<compile_context>
chip_gen: v7x
topology: tpu7x:2x2x1
jax: 0.10.0
libtpu: 0.0.40
codegen_flags: <defaults>
</compile_context>

<pallas_src>
import functools
import math

import numpy as np
import jax
import jax.numpy as jnp
from jax.experimental import pallas as pl
from jax.experimental.pallas import tpu as pltpu


# ------------------------------ small helpers -------------------------------

def _round_up(x, m):
    return ((x + m - 1) // m) * m


def _pick_tile(dim, pref, align):
    """Largest tile <= pref that divides dim and is a multiple of align (fallback: dim)."""
    if dim <= pref:
        return dim
    t = (pref // align) * align
    while t >= align:
        if dim % t == 0:
            return t
        t -= align
    return dim


# --------------------------- generic tiled matmul ----------------------------

def _mm_kernel(x_ref, w_ref, b_ref, o_ref, acc_ref):
    @pl.when(pl.program_id(2) == 0)
    def _init():
        acc_ref[...] = jnp.zeros_like(acc_ref)

    acc_ref[...] += jnp.dot(x_ref[...], w_ref[...],
                            preferred_element_type=jnp.float32)

    @pl.when(pl.program_id(2) == pl.num_programs(2) - 1)
    def _finalize():
        o_ref[...] = (acc_ref[...] + b_ref[...].astype(jnp.float32)).astype(o_ref.dtype)


def matmul_bias(x, w, b, out_dtype=jnp.float32):
    """x @ w + b on the MXU (bf16 inputs, f32 accumulate), tiled (M, N, K) grid."""
    M, K = x.shape
    N = w.shape[1]
    TM = _pick_tile(M, 256, 8)
    TN = _pick_tile(N, 256, 128)
    TK = _pick_tile(K, 512, 128)
    grid = (M // TM, N // TN, K // TK)
    return pl.pallas_call(
        _mm_kernel,
        out_shape=jax.ShapeDtypeStruct((M, N), out_dtype),
        grid=grid,
        in_specs=[pl.BlockSpec((TM, TK), lambda i, j, k: (i, k)),
                  pl.BlockSpec((TK, TN), lambda i, j, k: (k, j)),
                  pl.BlockSpec((1, TN), lambda i, j, k: (0, j))],
        out_specs=pl.BlockSpec((TM, TN), lambda i, j, k: (i, j)),
        scratch_shapes=[pltpu.VMEM((TM, TN), jnp.float32)],
        compiler_params=pltpu.CompilerParams(
            dimension_semantics=("parallel", "parallel", "arbitrary")),
    )(x.astype(jnp.bfloat16), w.astype(jnp.bfloat16),
      b.reshape(1, N).astype(jnp.float32))


# ----------------------- actnorm kernels (data-dep init) ---------------------

def _stats_kernel(x_ref, mean_ref, scale_ref):
    # one-pass sum / sum-of-squares; var clamped >= 0 before sqrt
    x = x_ref[...]
    n = x.shape[0]
    mean = jnp.sum(x, axis=0, keepdims=True) * (1.0 / n)
    ex2 = jnp.sum(x * x, axis=0, keepdims=True) * (1.0 / n)
    var = jnp.maximum(ex2 - mean * mean, 0.0)
    mean_ref[...] = mean
    scale_ref[...] = jnp.sqrt(var) + 1e-6


def channel_stats(x2d):
    """Per-channel mean / (std + 1e-6) like Actnorm's data-dependent first forward."""
    N, C = x2d.shape
    mean, scale = pl.pallas_call(
        _stats_kernel,
        out_shape=(jax.ShapeDtypeStruct((1, C), jnp.float32),
                   jax.ShapeDtypeStruct((1, C), jnp.float32)),
        grid=(1,),
        in_specs=[pl.BlockSpec((N, C), lambda i: (0, 0))],
        out_specs=(pl.BlockSpec((1, C), lambda i: (0, 0)),
                   pl.BlockSpec((1, C), lambda i: (0, 0))),
        compiler_params=pltpu.CompilerParams(dimension_semantics=("arbitrary",)),
    )(x2d.astype(jnp.float32))
    return mean, scale


def _actnorm_relu_kernel(x_ref, o_ref):
    # fused: stats + normalize + ReLU in a single HBM round trip (f32 math)
    x = x_ref[...].astype(jnp.float32)
    n = x.shape[0]
    mean = jnp.sum(x, axis=0, keepdims=True) * (1.0 / n)
    ex2 = jnp.sum(x * x, axis=0, keepdims=True) * (1.0 / n)
    var = jnp.maximum(ex2 - mean * mean, 0.0)
    scale = jnp.sqrt(var) + 1e-6
    z = (x - mean) / scale
    o_ref[...] = jnp.maximum(z, 0.0).astype(o_ref.dtype)


def actnorm_relu(x_nhwc):
    """Actnorm (data-dependent init) + ReLU, one fused kernel. Logdet is discarded
    for the coupling-internal actnorms (matches the PyTorch module)."""
    # TODO(synk): for very large activations this single-block kernel should become a
    # two-pass tiled grid (stats pass + normalize pass) instead of one resident block.
    B, H, W, C = x_nhwc.shape
    N = B * H * W
    y = pl.pallas_call(
        _actnorm_relu_kernel,
        out_shape=jax.ShapeDtypeStruct((N, C), x_nhwc.dtype),
        grid=(1,),
        in_specs=[pl.BlockSpec((N, C), lambda i: (0, 0))],
        out_specs=pl.BlockSpec((N, C), lambda i: (0, 0)),
        compiler_params=pltpu.CompilerParams(dimension_semantics=("arbitrary",)),
    )(x_nhwc.reshape(N, C))
    return y.reshape(B, H, W, C)


# --------------------- 3x3 conv kernels (no HBM im2col) ----------------------
#
# The padded activation is flattened per batch to (Hp*Wp + 8, Cin) and DMA'd once.
# Output rows cover all (h, w) with h in [0, Ho), w in [0, Wp); rows with w >= Wo are
# "wrap" garbage, sliced off in glue (and masked out of in-kernel logdet reductions).

def _conv_accumulate(x_ref, w_ref, *, cin, n_out, wp):
    cout = w_ref.shape[1]
    acc = jnp.zeros((n_out, cout), jnp.float32)
    for t in range(9):                       # unrolled 3x3 taps
        dy, dx = t // 3, t % 3
        off = dy * wp + dx
        slab = x_ref[0, off:off + n_out, :]              # (n_out, cin) bf16
        wt = w_ref[t * cin:(t + 1) * cin, :]             # (cin, cout)  bf16
        acc = acc + jnp.dot(slab, wt, preferred_element_type=jnp.float32)
    return acc


def _valid_row_mask(n_out, wp, wo):
    rows = jax.lax.broadcasted_iota(jnp.int32, (n_out, 1), 0)
    return ((rows % wp) < wo).astype(jnp.float32)


def _conv_plain_kernel(x_ref, w_ref, b_ref, o_ref, *, cin, n_out, wp):
    h = _conv_accumulate(x_ref, w_ref, cin=cin, n_out=n_out, wp=wp)
    h = h + b_ref[...].astype(jnp.float32)
    o_ref[0] = h.astype(o_ref.dtype)


def _conv_coupling_kernel(x_ref, w_ref, b_ref, lsf_ref, xa_ref, z_ref, ld_ref,
                          *, cin, n_out, wp, wo, half):
    h = _conv_accumulate(x_ref, w_ref, cin=cin, n_out=n_out, wp=wp)
    h = h + b_ref[...].astype(jnp.float32)
    lsf = lsf_ref[...].astype(jnp.float32)               # (1, 2*half), [t | s] halves
    t = h[:, :half] * jnp.exp(lsf[:, :half])
    u = h[:, half:] * jnp.exp(lsf[:, half:]) + 2.0
    s = jax.nn.sigmoid(u)
    z_ref[0] = (s * xa_ref[0] + t).astype(z_ref.dtype)
    # numerically-stable log(sigmoid(u)) = -softplus(-u)
    log_s = jnp.where(u > 0.0, -jnp.log1p(jnp.exp(-u)), u - jnp.log1p(jnp.exp(u)))
    mask = _valid_row_mask(n_out, wp, wo)
    ld_ref[...] = jnp.reshape(jnp.sum(log_s * mask), (1, 1, 1))


def _conv_gauss_kernel(x_ref, w_ref, b_ref, lsf_ref, x2_ref, z_ref, ld_ref,
                       *, cin, n_out, wp, wo, half):
    h = _conv_accumulate(x_ref, w_ref, cin=cin, n_out=n_out, wp=wp)
    h = h + b_ref[...].astype(jnp.float32)
    lsf = lsf_ref[...].astype(jnp.float32)               # (1, 2*half), [m | logs] halves
    m = h[:, :half] * jnp.exp(lsf[:, :half])
    logs = h[:, half:] * jnp.exp(lsf[:, half:])
    z_ref[0] = ((x2_ref[0] - m) * jnp.exp(-logs)).astype(z_ref.dtype)
    mask = _valid_row_mask(n_out, wp, wo)
    ld_ref[...] = jnp.reshape(-jnp.sum(logs * mask), (1, 1, 1))


def _conv_flat_input(x_nhwc, pad):
    B, H, W, Cin = x_nhwc.shape
    Hp, Wp = H + 2 * pad, W + 2 * pad
    Ho, Wo = Hp - 2, Wp - 2
    n_out = Ho * Wp
    R = Hp * Wp + 8
    xp = jnp.pad(x_nhwc, ((0, 0), (pad, pad), (pad, pad), (0, 0))) if pad else x_nhwc
    x_flat = jnp.pad(xp.reshape(B, Hp * Wp, Cin), ((0, 0), (0, R - Hp * Wp), (0, 0)))
    return x_flat.astype(jnp.bfloat16), (Hp, Wp, Ho, Wo, n_out, R)


def conv2d_3x3(x_nhwc, w_flat, bias, pad, out_dtype=jnp.bfloat16):
    """3x3 conv via in-kernel 9-tap accumulation. w_flat: (9*Cin, Cout), rows [dy,dx,cin]."""
    B, H, W, Cin = x_nhwc.shape
    Cout = w_flat.shape[1]
    assert w_flat.shape[0] == 9 * Cin
    x_flat, (Hp, Wp, Ho, Wo, n_out, R) = _conv_flat_input(x_nhwc, pad)
    kernel = functools.partial(_conv_plain_kernel, cin=Cin, n_out=n_out, wp=Wp)
    y = pl.pallas_call(
        kernel,
        out_shape=jax.ShapeDtypeStruct((B, n_out, Cout), out_dtype),
        grid=(B,),
        in_specs=[pl.BlockSpec((1, R, Cin), lambda b: (b, 0, 0)),
                  pl.BlockSpec((9 * Cin, Cout), lambda b: (0, 0)),
                  pl.BlockSpec((1, Cout), lambda b: (0, 0))],
        out_specs=pl.BlockSpec((1, n_out, Cout), lambda b: (b, 0, 0)),
        compiler_params=pltpu.CompilerParams(dimension_semantics=("parallel",)),
    )(x_flat, w_flat.astype(jnp.bfloat16), bias.reshape(1, Cout).astype(jnp.float32))
    return y.reshape(B, Ho, Wp, Cout)[:, :, :Wo, :]


def conv3x3_coupling(h_nhwc, w_flat, bias, lsf, x_a):
    """conv3 (kernel 3, pad 0) fused with the affine-coupling tail + per-batch logdet."""
    B, _, _, Cin = h_nhwc.shape
    C = w_flat.shape[1]
    half = C // 2
    assert w_flat.shape[0] == 9 * Cin
    x_flat, (Hp, Wp, Ho, Wo, n_out, R) = _conv_flat_input(h_nhwc, 0)
    xa_flat = jnp.pad(x_a, ((0, 0), (0, 0), (0, Wp - Wo), (0, 0))).reshape(B, n_out, half)
    kernel = functools.partial(_conv_coupling_kernel, cin=Cin, n_out=n_out,
                               wp=Wp, wo=Wo, half=half)
    z, ld = pl.pallas_call(
        kernel,
        out_shape=(jax.ShapeDtypeStruct((B, n_out, half), jnp.float32),
                   jax.ShapeDtypeStruct((B, 1, 1), jnp.float32)),
        grid=(B,),
        in_specs=[pl.BlockSpec((1, R, Cin), lambda b: (b, 0, 0)),
                  pl.BlockSpec((9 * Cin, C), lambda b: (0, 0)),
                  pl.BlockSpec((1, C), lambda b: (0, 0)),
                  pl.BlockSpec((1, C), lambda b: (0, 0)),
                  pl.BlockSpec((1, n_out, half), lambda b: (b, 0, 0))],
        out_specs=(pl.BlockSpec((1, n_out, half), lambda b: (b, 0, 0)),
                   pl.BlockSpec((1, 1, 1), lambda b: (b, 0, 0))),
        compiler_params=pltpu.CompilerParams(dimension_semantics=("parallel",)),
    )(x_flat, w_flat.astype(jnp.bfloat16), bias.reshape(1, C).astype(jnp.float32),
      lsf.reshape(1, C).astype(jnp.float32), xa_flat.astype(jnp.float32))
    z_a = z.reshape(B, Ho, Wp, half)[:, :, :Wo, :]
    return z_a, ld[:, 0, 0]


def conv3x3_gauss(x1_nhwc, w_flat, bias, lsf, x2):
    """Gaussianize conv (kernel 3, pad 1) fused with (x2 - m) * exp(-logs) + logdet."""
    B, _, _, Cin = x1_nhwc.shape
    C2 = w_flat.shape[1]
    half = C2 // 2
    assert w_flat.shape[0] == 9 * Cin
    x_flat, (Hp, Wp, Ho, Wo, n_out, R) = _conv_flat_input(x1_nhwc, 1)
    x2_flat = jnp.pad(x2, ((0, 0), (0, 0), (0, Wp - Wo), (0, 0))).reshape(B, n_out, half)
    kernel = functools.partial(_conv_gauss_kernel, cin=Cin, n_out=n_out,
                               wp=Wp, wo=Wo, half=half)
    z, ld = pl.pallas_call(
        kernel,
        out_shape=(jax.ShapeDtypeStruct((B, n_out, half), jnp.float32),
                   jax.ShapeDtypeStruct((B, 1, 1), jnp.float32)),
        grid=(B,),
        in_specs=[pl.BlockSpec((1, R, Cin), lambda b: (b, 0, 0)),
                  pl.BlockSpec((9 * Cin, C2), lambda b: (0, 0)),
                  pl.BlockSpec((1, C2), lambda b: (0, 0)),
                  pl.BlockSpec((1, C2), lambda b: (0, 0)),
                  pl.BlockSpec((1, n_out, half), lambda b: (b, 0, 0))],
        out_specs=(pl.BlockSpec((1, n_out, half), lambda b: (b, 0, 0)),
                   pl.BlockSpec((1, 1, 1), lambda b: (b, 0, 0))),
        compiler_params=pltpu.CompilerParams(dimension_semantics=("parallel",)),
    )(x_flat, w_flat.astype(jnp.bfloat16), bias.reshape(1, C2).astype(jnp.float32),
      lsf.reshape(1, C2).astype(jnp.float32), x2_flat.astype(jnp.float32))
    z2 = z.reshape(B, Ho, Wp, half)[:, :, :Wo, :]
    return z2, ld[:, 0, 0]


# --------------------------------- flow glue ---------------------------------

def squeeze_nhwc(x):
    B, H, W, C = x.shape
    x = x.reshape(B, H // 2, 2, W // 2, 2, C)
    x = jnp.transpose(x, (0, 1, 3, 5, 2, 4))   # channel order matches torch squeeze
    return x.reshape(B, H // 2, W // 2, 4 * C)


def affine_coupling_forward(x, p):
    B, H, W, C = x.shape
    half = C // 2
    x_a, x_b = x[..., :half], x[..., half:]
    wpad = p['w2'].shape[0]                    # hidden width zero-padded to 128-multiple
    zeros_w = jnp.zeros((wpad,), jnp.float32)
    # conv1 (3x3, pad 1, no bias) -> lane-dense padded hidden width
    h = conv2d_3x3(x_b, p['w1'], zeros_w, pad=1)
    h = actnorm_relu(h)                        # fused stats + normalize + ReLU
    # conv2 (1x1, no bias) as a tiled MXU matmul; PyTorch quirk: padding=1 on a 1x1
    # conv with no bias == pad the output spatially with zeros afterwards.
    h2 = matmul_bias(h.reshape(B * H * W, wpad), p['w2'], zeros_w,
                     out_dtype=jnp.bfloat16).reshape(B, H, W, wpad)
    h2 = jnp.pad(h2, ((0, 0), (1, 1), (1, 1), (0, 0)))
    h2 = actnorm_relu(h2)
    # conv3 (3x3, pad 0) fused with the coupling tail; t|s halves contiguous (permuted w3)
    z_a, logdet = conv3x3_coupling(h2, p['w3'], p['b3'], p['lsf'], x_a)
    z = jnp.concatenate([z_a, x_b], axis=-1)
    return z, logdet


def flowstep_forward(x, p):
    B, H, W, C = x.shape
    x2d = x.reshape(B * H * W, C)
    mean, scale = channel_stats(x2d)            # actnorm data-dependent init (every fwd)
    # Fold actnorm normalize into the invertible 1x1 conv:
    #   ((x - mean)/scale) @ W^T = x @ (W^T / scale[:, None]) - (mean/scale) @ W^T
    wt = jnp.transpose(p['w_inv'])
    w_fold = wt / scale.reshape(C, 1)
    b_fold = -(mean / scale) @ wt               # (1, C)
    y = matmul_bias(x2d, w_fold, b_fold, out_dtype=jnp.float32).reshape(B, H, W, C)
    ld_act = -jnp.sum(jnp.log(jnp.abs(scale))) * (H * W)
    ld_inv = p['logdet_w'] * (H * W)
    z, ld_coup = affine_coupling_forward(y, p['coupling'])
    return z, ld_act + ld_inv + ld_coup


def gaussianize_forward(x1, x2, p):
    return conv3x3_gauss(x1, p['w'], p['b'], p['lsf'], x2)


def glow_forward(x_nchw, params, n_levels, depth):
    x = jnp.transpose(x_nchw, (0, 2, 3, 1)).astype(jnp.float32)   # NCHW -> NHWC
    B, H, W, C = x.shape
    x = x - 0.5                                  # Preprocess (fuses into the transpose)
    sum_logdets = -math.log(256.0) * (C * H * W)
    zs = []
    for lvl in range(n_levels):
        x = squeeze_nhwc(x)
        for d in range(depth):
            x, ld = flowstep_forward(x, params['levels'][lvl]['steps'][d])
            sum_logdets = sum_logdets + ld
        Cc = x.shape[-1]
        x1, x2 = x[..., :Cc // 2], x[..., Cc // 2:]
        z2, ld = gaussianize_forward(x1, x2, params['levels'][lvl]['gauss'])
        sum_logdets = sum_logdets + ld
        zs.append(z2)
        x = x1
    x = squeeze_nhwc(x)
    for d in range(depth):
        x, ld = flowstep_forward(x, params['final_steps'][d])
        sum_logdets = sum_logdets + ld
    z2, ld = gaussianize_forward(jnp.zeros_like(x), x, params['final_gauss'])
    sum_logdets = sum_logdets + ld
    zs.append(z2)
    zs = [jnp.transpose(z, (0, 3, 1, 2)) for z in zs]   # back to NCHW like PyTorch
    return zs, sum_logdets


glow_forward_jit = jax.jit(glow_forward, static_argnums=(2, 3))


# ------------------------------ parameter setup -------------------------------

def _perm_even_odd(n):
    # columns reordered so h[:, 0::2] / h[:, 1::2] become contiguous halves
    return np.concatenate([np.arange(0, n, 2), np.arange(1, n, 2)])


def _conv3x3_weight_flat(w_oihw, cin_pad=None, cout_pad=None):
    """(Cout, Cin, 3, 3) -> (9*Cin_pad, Cout_pad), rows ordered [dy, dx, cin]."""
    Cout, Cin = w_oihw.shape[0], w_oihw.shape[1]
    w = jnp.transpose(w_oihw, (2, 3, 1, 0))          # (3, 3, Cin, Cout)
    if cin_pad is not None and cin_pad > Cin:
        w = jnp.pad(w, ((0, 0), (0, 0), (0, cin_pad - Cin), (0, 0)))
    if cout_pad is not None and cout_pad > Cout:
        w = jnp.pad(w, ((0, 0), (0, 0), (0, 0), (0, cout_pad - Cout)))
    ci, co = w.shape[2], w.shape[3]
    return w.reshape(9 * ci, co)


def _flowstep_params(key, C, width):
    ks = jax.random.split(key, 6)
    w = np.linalg.qr(np.asarray(jax.random.normal(ks[0], (C, C), jnp.float32),
                                dtype=np.float64))[0].astype(np.float32)
    logdet_w = float(np.linalg.slogdet(np.asarray(w, dtype=np.float64))[1])
    half = C // 2
    wpad = _round_up(max(width, 1), 128)             # lane-dense hidden width
    # NOTE: PyTorch __init__ zero-inits conv3 / log_scale_factor; small deterministic
    # random values are used here so the kernels compute non-trivial math.
    w1 = 0.05 * jax.random.normal(ks[1], (width, half, 3, 3), jnp.float32)
    w2 = 0.05 * jax.random.normal(ks[2], (width, width), jnp.float32)   # (out, in)
    w3 = 0.02 * jax.random.normal(ks[3], (C, width, 3, 3), jnp.float32)
    b3 = 0.01 * jax.random.normal(ks[4], (C,), jnp.float32)
    lsf = 0.01 * jax.random.normal(ks[5], (C,), jnp.float32)
    perm = _perm_even_odd(C)
    w2_mat = jnp.zeros((wpad, wpad), jnp.float32).at[:width, :width].set(jnp.transpose(w2))
    coupling = {
        'w1': _conv3x3_weight_flat(w1, cout_pad=wpad),        # (9*half, wpad)
        'w2': w2_mat,                                         # (wpad, wpad)
        'w3': _conv3x3_weight_flat(w3[perm], cin_pad=wpad),   # (9*wpad, C), [t|s]
        'b3': b3[perm],
        'lsf': lsf[perm],
    }
    return {'w_inv': jnp.asarray(w), 'logdet_w': logdet_w, 'coupling': coupling}


def _gauss_params(key, C):
    ks = jax.random.split(key, 3)
    w = 0.02 * jax.random.normal(ks[0], (2 * C, C, 3, 3), jnp.float32)
    b = 0.01 * jax.random.normal(ks[1], (2 * C,), jnp.float32)
    lsf = 0.01 * jax.random.normal(ks[2], (2 * C,), jnp.float32)
    perm = _perm_even_odd(2 * C)
    return {'w': _conv3x3_weight_flat(w[perm]),               # (9*C, 2C), [m|logs]
            'b': b[perm], 'lsf': lsf[perm]}


def init_glow_params(key, width, depth, n_levels, input_dims):
    in_channels, H, W = input_dims
    out_channels = int(in_channels * 4 ** (n_levels + 1) / 2 ** n_levels)
    keys = jax.random.split(key, n_levels + 2)
    levels = []
    for i in range(n_levels):
        c_sq = in_channels * (2 ** i) * 4
        kk = jax.random.split(keys[i], depth + 1)
        steps = [_flowstep_params(kk[d], c_sq, width) for d in range(depth)]
        gauss = _gauss_params(kk[depth], c_sq // 2)
        levels.append({'steps': steps, 'gauss': gauss})
    kk = jax.random.split(keys[n_levels], depth + 1)
    final_steps = [_flowstep_params(kk[d], out_channels, width) for d in range(depth)]
    final_gauss = _gauss_params(keys[n_levels + 1], out_channels)
    return {'levels': levels, 'final_steps': final_steps, 'final_gauss': final_gauss}


# ----------------------------------- main -------------------------------------

if __name__ == "__main__":
    key = jax.random.PRNGKey(0)
    width, depth, n_levels = 32, 1, 1
    input_dims = (4, 16, 16)            # (C, H, W), PyTorch NCHW convention
    batch = 2

    k_x, k_p = jax.random.split(key)
    x = jax.random.uniform(k_x, (batch,) + input_dims, jnp.float32)   # "image" in [0, 1)
    params = init_glow_params(k_p, width, depth, n_levels, input_dims)

    zs, sum_logdets = glow_forward_jit(x, params, n_levels, depth)
    for z in zs:
        jax.block_until_ready(z)
    sum_logdets = jax.block_until_ready(sum_logdets)

    # sanity: output shapes must match the PyTorch module (NCHW)
    assert zs[0].shape == (batch, 8, 8, 8)        # level-0 split z
    assert zs[1].shape == (batch, 32, 4, 4)       # final gaussianized z
    assert sum_logdets.shape == (batch,)
    assert all(bool(jnp.all(jnp.isfinite(z))) for z in zs)
    assert bool(jnp.all(jnp.isfinite(sum_logdets)))
    print("KERNEL_OK")
</pallas_src>

<mosaic_0001>
module attributes {stable_mosaic.version = 11 : i64} {
  func.func @_stats_kernel(%arg0: i32, %arg1: memref<128x16xf32, #tpu.memory_space<vmem>>, %arg2: memref<1x16xf32, #tpu.memory_space<vmem>>, %arg3: memref<1x16xf32, #tpu.memory_space<vmem>>) attributes {dimension_semantics = [#tpu.dimension_semantics<arbitrary>], iteration_bounds = array<i64: 1>, scalar_prefetch = 0 : i64, scratch_operands = 0 : i64, tpu.core_type = #tpu.core_type<tc>, window_params = [{pipeline_mode = #tpu.pipeline_mode<synchronous>, transform_indices = @transform_0, window_bounds = array<i64: 128, 16>}, {pipeline_mode = #tpu.pipeline_mode<synchronous>, transform_indices = @transform_1, window_bounds = array<i64: 1, 16>}, {pipeline_mode = #tpu.pipeline_mode<synchronous>, transform_indices = @transform_2, window_bounds = array<i64: 1, 16>}]} {
    %c0 = arith.constant 0 : index
    %c0_0 = arith.constant 0 : index
    %0 = vector.load %arg1[%c0, %c0_0] : memref<128x16xf32, #tpu.memory_space<vmem>>, vector<128x16xf32>
    %cst = arith.constant dense<0.000000e+00> : vector<16xf32>
    %1 = vector.multi_reduction <add>, %0, %cst [0] : vector<128x16xf32> to vector<16xf32>
    %2 = vector.shape_cast %1 : vector<16xf32> to vector<1x16xf32>
    %cst_1 = arith.constant 7.812500e-03 : f32
    %3 = vector.broadcast %cst_1 : f32 to vector<1x16xf32>
    %4 = arith.mulf %2, %3 : vector<1x16xf32>
    %5 = arith.mulf %0, %0 : vector<128x16xf32>
    %cst_2 = arith.constant dense<0.000000e+00> : vector<16xf32>
    %6 = vector.multi_reduction <add>, %5, %cst_2 [0] : vector<128x16xf32> to vector<16xf32>
    %7 = vector.shape_cast %6 : vector<16xf32> to vector<1x16xf32>
    %cst_3 = arith.constant 7.812500e-03 : f32
    %8 = vector.broadcast %cst_3 : f32 to vector<1x16xf32>
    %9 = arith.mulf %7, %8 : vector<1x16xf32>
    %10 = arith.mulf %4, %4 : vector<1x16xf32>
    %11 = arith.subf %9, %10 : vector<1x16xf32>
    %cst_4 = arith.constant 0.000000e+00 : f32
    %12 = vector.broadcast %cst_4 : f32 to vector<1x16xf32>
    %13 = arith.maximumf %11, %12 : vector<1x16xf32>
    %c0_5 = arith.constant 0 : index
    %c0_6 = arith.constant 0 : index
    %14 = vector.load %arg2[%c0_5, %c0_6] : memref<1x16xf32, #tpu.memory_space<vmem>>, vector<1x16xf32>
    tpu.vector_store %arg2[%c0_5, %c0_6], %4 {strides = array<i32>} : memref<1x16xf32, #tpu.memory_space<vmem>>, vector<1x16xf32>,
    %15 = math.sqrt %13 : vector<1x16xf32>
    %cst_7 = arith.constant 9.99999997E-7 : f32
    %16 = vector.broadcast %cst_7 : f32 to vector<1x16xf32>
    %17 = arith.addf %15, %16 : vector<1x16xf32>
    %c0_8 = arith.constant 0 : index
    %c0_9 = arith.constant 0 : index
    %18 = vector.load %arg3[%c0_8, %c0_9] : memref<1x16xf32, #tpu.memory_space<vmem>>, vector<1x16xf32>
    tpu.vector_store %arg3[%c0_8, %c0_9], %17 {strides = array<i32>} : memref<1x16xf32, #tpu.memory_space<vmem>>, vector<1x16xf32>,
    return
  }
  func.func @transform_0(%arg0: i32) -> (i32, i32) {
    %c0_i32 = arith.constant 0 : i32
    %c0_i32_0 = arith.constant 0 : i32
    %c0_i32_1 = arith.constant 0 : i32
    return %c0_i32, %c0_i32_0 : i32, i32
  }
  func.func @transform_1(%arg0: i32) -> (i32, i32) {
    %c0_i32 = arith.constant 0 : i32
    %c0_i32_0 = arith.constant 0 : i32
    %c0_i32_1 = arith.constant 0 : i32
    return %c0_i32, %c0_i32_0 : i32, i32
  }
  func.func @transform_2(%arg0: i32) -> (i32, i32) {
    %c0_i32 = arith.constant 0 : i32
    %c0_i32_0 = arith.constant 0 : i32
    %c0_i32_1 = arith.constant 0 : i32
    return %c0_i32, %c0_i32_0 : i32, i32
  }
}

module attributes {stable_mosaic.version = 11 : i64} {
  func.func @_mm_kernel(%arg0: i32, %arg1: i32, %arg2: i32, %arg3: memref<128x16xbf16, #tpu.memory_space<vmem>>, %arg4: memref<16x16xbf16, #tpu.memory_space<vmem>>, %arg5: memref<1x16xf32, #tpu.memory_space<vmem>>, %arg6: memref<128x16xf32, #tpu.memory_space<vmem>>, %arg7: memref<128x16xf32, #tpu.memory_space<vmem>>) attributes {dimension_semantics = [#tpu.dimension_semantics<parallel>, #tpu.dimension_semantics<parallel>, #tpu.dimension_semantics<arbitrary>], iteration_bounds = array<i64: 1, 1, 1>, scalar_prefetch = 0 : i64, scratch_operands = 1 : i64, tpu.core_type = #tpu.core_type<tc>, window_params = [{transform_indices = @transform_0, window_bounds = array<i64: 128, 16>}, {transform_indices = @transform_1, window_bounds = array<i64: 16, 16>}, {transform_indices = @transform_2, window_bounds = array<i64: 1, 16>}, {transform_indices = @transform_3, window_bounds = array<i64: 128, 16>}]} {
    %c0_i32 = arith.constant 0 : i32
    %0 = arith.cmpi eq, %arg2, %c0_i32 : i32
    %1 = arith.extui %0 : i1 to i32
    %c0_i32_0 = arith.constant 0 : i32
    %2 = arith.cmpi ne, %1, %c0_i32_0 : i32
    scf.if %2 {
      %cst_10 = arith.constant 0.000000e+00 : f32
      %12 = vector.broadcast %cst_10 : f32 to vector<128x16xf32>
      %c0_11 = arith.constant 0 : index
      %c0_12 = arith.constant 0 : index
      %13 = vector.load %arg7[%c0_11, %c0_12] : memref<128x16xf32, #tpu.memory_space<vmem>>, vector<128x16xf32>
      tpu.vector_store %arg7[%c0_11, %c0_12], %12 {strides = array<i32>} : memref<128x16xf32, #tpu.memory_space<vmem>>, vector<128x16xf32>,
    } else {
    }
    %c0 = arith.constant 0 : index
    %c0_1 = arith.constant 0 : index
    %3 = vector.load %arg7[%c0, %c0_1] : memref<128x16xf32, #tpu.memory_space<vmem>>, vector<128x16xf32>
    %c0_2 = arith.constant 0 : index
    %c0_3 = arith.constant 0 : index
    %4 = vector.load %arg3[%c0_2, %c0_3] : memref<128x16xbf16, #tpu.memory_space<vmem>>, vector<128x16xbf16>
    %c0_4 = arith.constant 0 : index
    %c0_5 = arith.constant 0 : index
    %5 = vector.load %arg4[%c0_4, %c0_5] : memref<16x16xbf16, #tpu.memory_space<vmem>>, vector<16x16xbf16>
    %cst = arith.constant dense<0.000000e+00> : vector<128x16xf32>
    %6 = tpu.matmul %4, %5, %cst {dimension_numbers = #tpu.dot_dimension_numbers<[1], [0], [0], [1], [0, 0, 1, 1], [], []>} : vector<128x16xbf16>, vector<16x16xbf16>, vector<128x16xf32> -> vector<128x16xf32>
    %7 = arith.addf %3, %6 : vector<128x16xf32>
    %c0_6 = arith.constant 0 : index
    %c0_7 = arith.constant 0 : index
    %8 = vector.load %arg7[%c0_6, %c0_7] : memref<128x16xf32, #tpu.memory_space<vmem>>, vector<128x16xf32>
    tpu.vector_store %arg7[%c0_6, %c0_7], %7 {strides = array<i32>} : memref<128x16xf32, #tpu.memory_space<vmem>>, vector<128x16xf32>,
    %c0_i32_8 = arith.constant 0 : i32
    %9 = arith.cmpi eq, %arg2, %c0_i32_8 : i32
    %10 = arith.extui %9 : i1 to i32
    %c0_i32_9 = arith.constant 0 : i32
    %11 = arith.cmpi ne, %10, %c0_i32_9 : i32
    scf.if %11 {
      %c0_10 = arith.constant 0 : index
      %c0_11 = arith.constant 0 : index
      %12 = vector.load %arg7[%c0_10, %c0_11] : memref<128x16xf32, #tpu.memory_space<vmem>>, vector<128x16xf32>
      %c0_12 = arith.constant 0 : index
      %c0_13 = arith.constant 0 : index
      %13 = vector.load %arg5[%c0_12, %c0_13] : memref<1x16xf32, #tpu.memory_space<vmem>>, vector<1x16xf32>
      %14 = vector.broadcast %13 : vector<1x16xf32> to vector<128x16xf32>
      %15 = arith.addf %12, %14 : vector<128x16xf32>
      %c0_14 = arith.constant 0 : index
      %c0_15 = arith.constant 0 : index
      %16 = vector.load %arg6[%c0_14, %c0_15] : memref<128x16xf32, #tpu.memory_space<vmem>>, vector<128x16xf32>
      tpu.vector_store %arg6[%c0_14, %c0_15], %15 {strides = array<i32>} : memref<128x16xf32, #tpu.memory_space<vmem>>, vector<128x16xf32>,
    } else {
    }
    return
  }
  func.func @transform_0(%arg0: i32, %arg1: i32, %arg2: i32) -> (i32, i32) {
    %c0_i32 = arith.constant 0 : i32
    return %arg0, %arg2 : i32, i32
  }
  func.func @transform_1(%arg0: i32, %arg1: i32, %arg2: i32) -> (i32, i32) {
    %c0_i32 = arith.constant 0 : i32
    return %arg2, %arg1 : i32, i32
  }
  func.func @transform_2(%arg0: i32, %arg1: i32, %arg2: i32) -> (i32, i32) {
    %c0_i32 = arith.constant 0 : i32
    %c0_i32_0 = arith.constant 0 : i32
    return %c0_i32, %arg1 : i32, i32
  }
  func.func @transform_3(%arg0: i32, %arg1: i32, %arg2: i32) -> (i32, i32) {
    %c0_i32 = arith.constant 0 : i32
    return %arg0, %arg1 : i32, i32
  }
}

module attributes {stable_mosaic.version = 11 : i64} {
  func.func @_conv_plain_kernel(%arg0: i32, %arg1: memref<1x108x8xbf16, #tpu.memory_space<vmem>>, %arg2: memref<72x128xbf16, #tpu.memory_space<vmem>>, %arg3: memref<1x128xf32, #tpu.memory_space<vmem>>, %arg4: memref<1x80x128xbf16, #tpu.memory_space<vmem>>) attributes {dimension_semantics = [#tpu.dimension_semantics<parallel>], iteration_bounds = array<i64: 2>, scalar_prefetch = 0 : i64, scratch_operands = 0 : i64, tpu.core_type = #tpu.core_type<tc>, window_params = [{transform_indices = @transform_0, window_bounds = array<i64: 1, 108, 8>}, {pipeline_mode = #tpu.pipeline_mode<synchronous>, transform_indices = @transform_1, window_bounds = array<i64: 72, 128>}, {pipeline_mode = #tpu.pipeline_mode<synchronous>, transform_indices = @transform_2, window_bounds = array<i64: 1, 128>}, {transform_indices = @transform_3, window_bounds = array<i64: 1, 80, 128>}]} {
    %cst = arith.constant 0.000000e+00 : f32
    %0 = vector.broadcast %cst : f32 to vector<80x128xf32>
    %c0 = arith.constant 0 : index
    %c0_0 = arith.constant 0 : index
    %c0_1 = arith.constant 0 : index
    %1 = vector.load %arg1[%c0, %c0_0, %c0_1] : memref<1x108x8xbf16, #tpu.memory_space<vmem>>, vector<1x80x8xbf16>
    %2 = vector.shape_cast %1 : vector<1x80x8xbf16> to vector<80x8xbf16>
    %c0_2 = arith.constant 0 : index
    %c0_3 = arith.constant 0 : index
    %3 = vector.load %arg2[%c0_2, %c0_3] : memref<72x128xbf16, #tpu.memory_space<vmem>>, vector<8x128xbf16>
    %cst_4 = arith.constant dense<0.000000e+00> : vector<80x128xf32>
    %4 = tpu.matmul %2, %3, %cst_4 {dimension_numbers = #tpu.dot_dimension_numbers<[1], [0], [0], [1], [0, 0, 1, 1], [], []>} : vector<80x8xbf16>, vector<8x128xbf16>, vector<80x128xf32> -> vector<80x128xf32>
    %5 = arith.addf %0, %4 : vector<80x128xf32>
    %c0_5 = arith.constant 0 : index
    %c1 = arith.constant 1 : index
    %c0_6 = arith.constant 0 : index
    %6 = vector.load %arg1[%c0_5, %c1, %c0_6] : memref<1x108x8xbf16, #tpu.memory_space<vmem>>, vector<1x80x8xbf16>
    %7 = vector.shape_cast %6 : vector<1x80x8xbf16> to vector<80x8xbf16>
    %c8 = arith.constant 8 : index
    %c0_7 = arith.constant 0 : index
    %8 = vector.load %arg2[%c8, %c0_7] : memref<72x128xbf16, #tpu.memory_space<vmem>>, vector<8x128xbf16>
    %cst_8 = arith.constant dense<0.000000e+00> : vector<80x128xf32>
    %9 = tpu.matmul %7, %8, %cst_8 {dimension_numbers = #tpu.dot_dimension_numbers<[1], [0], [0], [1], [0, 0, 1, 1], [], []>} : vector<80x8xbf16>, vector<8x128xbf16>, vector<80x128xf32> -> vector<80x128xf32>
    %10 = arith.addf %5, %9 : vector<80x128xf32>
    %c0_9 = arith.constant 0 : index
    %c2 = arith.constant 2 : index
    %c0_10 = arith.constant 0 : index
    %11 = vector.load %arg1[%c0_9, %c2, %c0_10] : memref<1x108x8xbf16, #tpu.memory_space<vmem>>, vector<1x80x8xbf16>
    %12 = vector.shape_cast %11 : vector<1x80x8xbf16> to vector<80x8xbf16>
    %c16 = arith.constant 16 : index
    %c0_11 = arith.constant 0 : index
    %13 = vector.load %arg2[%c16, %c0_11] : memref<72x128xbf16, #tpu.memory_space<vmem>>, vector<8x128xbf16>
    %cst_12 = arith.constant dense<0.000000e+00> : vector<80x128xf32>
    %14 = tpu.matmul %12, %13, %cst_12 {dimension_numbers = #tpu.dot_dimension_numbers<[1], [0], [0], [1], [0, 0, 1, 1], [], []>} : vector<80x8xbf16>, vector<8x128xbf16>, vector<80x128xf32> -> vector<80x128xf32>
    %15 = arith.addf %10, %14 : vector<80x128xf32>
    %c0_13 = arith.constant 0 : index
    %c10 = arith.constant 10 : index
    %c0_14 = arith.constant 0 : index
    %16 = vector.load %arg1[%c0_13, %c10, %c0_14] : memref<1x108x8xbf16, #tpu.memory_space<vmem>>, vector<1x80x8xbf16>
    %17 = vector.shape_cast %16 : vector<1x80x8xbf16> to vector<80x8xbf16>
    %c24 = arith.constant 24 : index
    %c0_15 = arith.constant 0 : index
    %18 = vector.load %arg2[%c24, %c0_15] : memref<72x128xbf16, #tpu.memory_space<vmem>>, vector<8x128xbf16>
    %cst_16 = arith.constant dense<0.000000e+00> : vector<80x128xf32>
    %19 = tpu.matmul %17, %18, %cst_16 {dimension_numbers = #tpu.dot_dimension_numbers<[1], [0], [0], [1], [0, 0, 1, 1], [], []>} : vector<80x8xbf16>, vector<8x128xbf16>, vector<80x128xf32> -> vector<80x128xf32>
    %20 = arith.addf %15, %19 : vector<80x128xf32>
    %c0_17 = arith.constant 0 : index
    %c11 = arith.constant 11 : index
    %c0_18 = arith.constant 0 : index
    %21 = vector.load %arg1[%c0_17, %c11, %c0_18] : memref<1x108x8xbf16, #tpu.memory_space<vmem>>, vector<1x80x8xbf16>
    %22 = vector.shape_cast %21 : vector<1x80x8xbf16> to vector<80x8xbf16>
    %c32 = arith.constant 32 : index
    %c0_19 = arith.constant 0 : index
    %23 = vector.load %arg2[%c32, %c0_19] : memref<72x128xbf16, #tpu.memory_space<vmem>>, vector<8x128xbf16>
    %cst_20 = arith.constant dense<0.000000e+00> : vector<80x128xf32>
    %24 = tpu.matmul %22, %23, %cst_20 {dimension_numbers = #tpu.dot_dimension_numbers<[1], [0], [0], [1], [0, 0, 1, 1], [], []>} : vector<80x8xbf16>, vector<8x128xbf16>, vector<80x128xf32> -> vector<80x128xf32>
    %25 = arith.addf %20, %24 : vector<80x128xf32>
    %c0_21 = arith.constant 0 : index
    %c12 = arith.constant 12 : index
    %c0_22 = arith.constant 0 : index
    %26 = vector.load %arg1[%c0_21, %c12, %c0_22] : memref<1x108x8xbf16, #tpu.memory_space<vmem>>, vector<1x80x8xbf16>
    %27 = vector.shape_cast %26 : vector<1x80x8xbf16> to vector<80x8xbf16>
    %c40 = arith.constant 40 : index
    %c0_23 = arith.constant 0 : index
    %28 = vector.load %arg2[%c40, %c0_23] : memref<72x128xbf16, #tpu.memory_space<vmem>>, vector<8x128xbf16>
    %cst_24 = arith.constant dense<0.000000e+00> : vector<80x128xf32>
    %29 = tpu.matmul %27, %28, %cst_24 {dimension_numbers = #tpu.dot_dimension_numbers<[1], [0], [0], [1], [0, 0, 1, 1], [], []>} : vector<80x8xbf16>, vector<8x128xbf16>, vector<80x128xf32> -> vector<80x128xf32>
    %30 = arith.addf %25, %29 : vector<80x128xf32>
    %c0_25 = arith.constant 0 : index
    %c20 = arith.constant 20 : index
    %c0_26 = arith.constant 0 : index
    %31 = vector.load %arg1[%c0_25, %c20, %c0_26] : memref<1x108x8xbf16, #tpu.memory_space<vmem>>, vector<1x80x8xbf16>
    %32 = vector.shape_cast %31 : vector<1x80x8xbf16> to vector<80x8xbf16>
    %c48 = arith.constant 48 : index
    %c0_27 = arith.constant 0 : index
    %33 = vector.load %arg2[%c48, %c0_27] : memref<72x128xbf16, #tpu.memory_space<vmem>>, vector<8x128xbf16>
    %cst_28 = arith.constant dense<0.000000e+00> : vector<80x128xf32>
    %34 = tpu.matmul %32, %33, %cst_28 {dimension_numbers = #tpu.dot_dimension_numbers<[1], [0], [0], [1], [0, 0, 1, 1], [], []>} : vector<80x8xbf16>, vector<8x128xbf16>, vector<80x128xf32> -> vector<80x128xf32>
    %35 = arith.addf %30, %34 : vector<80x128xf32>
    %c0_29 = arith.constant 0 : index
    %c21 = arith.constant 21 : index
    %c0_30 = arith.constant 0 : index
    %36 = vector.load %arg1[%c0_29, %c21, %c0_30] : memref<1x108x8xbf16, #tpu.memory_space<vmem>>, vector<1x80x8xbf16>
    %37 = vector.shape_cast %36 : vector<1x80x8xbf16> to vector<80x8xbf16>
    %c56 = arith.constant 56 : index
    %c0_31 = arith.constant 0 : index
    %38 = vector.load %arg2[%c56, %c0_31] : memref<72x128xbf16, #tpu.memory_space<vmem>>, vector<8x128xbf16>
    %cst_32 = arith.constant dense<0.000000e+00> : vector<80x128xf32>
    %39 = tpu.matmul %37, %38, %cst_32 {dimension_numbers = #tpu.dot_dimension_numbers<[1], [0], [0], [1], [0, 0, 1, 1], [], []>} : vector<80x8xbf16>, vector<8x128xbf16>, vector<80x128xf32> -> vector<80x128xf32>
    %40 = arith.addf %35, %39 : vector<80x128xf32>
    %c0_33 = arith.constant 0 : index
    %c22 = arith.constant 22 : index
    %c0_34 = arith.constant 0 : index
    %41 = vector.load %arg1[%c0_33, %c22, %c0_34] : memref<1x108x8xbf16, #tpu.memory_space<vmem>>, vector<1x80x8xbf16>
    %42 = vector.shape_cast %41 : vector<1x80x8xbf16> to vector<80x8xbf16>
    %c64 = arith.constant 64 : index
    %c0_35 = arith.constant 0 : index
    %43 = vector.load %arg2[%c64, %c0_35] : memref<72x128xbf16, #tpu.memory_space<vmem>>, vector<8x128xbf16>
    %cst_36 = arith.constant dense<0.000000e+00> : vector<80x128xf32>
    %44 = tpu.matmul %42, %43, %cst_36 {dimension_numbers = #tpu.dot_dimension_numbers<[1], [0], [0], [1], [0, 0, 1, 1], [], []>} : vector<80x8xbf16>, vector<8x128xbf16>, vector<80x128xf32> -> vector<80x128xf32>
    %45 = arith.addf %40, %44 : vector<80x128xf32>
    %c0_37 = arith.constant 0 : index
    %c0_38 = arith.constant 0 : index
    %46 = vector.load %arg3[%c0_37, %c0_38] : memref<1x128xf32, #tpu.memory_space<vmem>>, vector<1x128xf32>
    %47 = vector.broadcast %46 : vector<1x128xf32> to vector<80x128xf32>
    %48 = arith.addf %45, %47 : vector<80x128xf32>
    %49 = arith.truncf %48 : vector<80x128xf32> to vector<80x128xbf16>
    %c0_39 = arith.constant 0 : index
    %c0_40 = arith.constant 0 : index
    %c0_41 = arith.constant 0 : index
    %50 = vector.load %arg4[%c0_39, %c0_40, %c0_41] : memref<1x80x128xbf16, #tpu.memory_space<vmem>>, vector<1x80x128xbf16>
    %51 = vector.shape_cast %50 : vector<1x80x128xbf16> to vector<80x128xbf16>
    %52 = vector.shape_cast %49 : vector<80x128xbf16> to vector<1x80x128xbf16>
    tpu.vector_store %arg4[%c0_39, %c0_40, %c0_41], %52 {strides = array<i32>} : memref<1x80x128xbf16, #tpu.memory_space<vmem>>, vector<1x80x128xbf16>,
    return
  }
  func.func @transform_0(%arg0: i32) -> (i32, i32, i32) {
    %c0_i32 = arith.constant 0 : i32
    %c0_i32_0 = arith.constant 0 : i32
    %c0_i32_1 = arith.constant 0 : i32
    return %arg0, %c0_i32, %c0_i32_0 : i32, i32, i32
  }
  func.func @transform_1(%arg0: i32) -> (i32, i32) {
    %c0_i32 = arith.constant 0 : i32
    %c0_i32_0 = arith.constant 0 : i32
    %c0_i32_1 = arith.constant 0 : i32
    return %c0_i32, %c0_i32_0 : i32, i32
  }
  func.func @transform_2(%arg0: i32) -> (i32, i32) {
    %c0_i32 = arith.constant 0 : i32
    %c0_i32_0 = arith.constant 0 : i32
    %c0_i32_1 = arith.constant 0 : i32
    return %c0_i32, %c0_i32_0 : i32, i32
  }
  func.func @transform_3(%arg0: i32) -> (i32, i32, i32) {
    %c0_i32 = arith.constant 0 : i32
    %c0_i32_0 = arith.constant 0 : i32
    %c0_i32_1 = arith.constant 0 : i32
    return %arg0, %c0_i32, %c0_i32_0 : i32, i32, i32
  }
}

module attributes {stable_mosaic.version = 11 : i64} {
  func.func @_actnorm_relu_kernel(%arg0: i32, %arg1: memref<128x128xbf16, #tpu.memory_space<vmem>>, %arg2: memref<128x128xbf16, #tpu.memory_space<vmem>>) attributes {dimension_semantics = [#tpu.dimension_semantics<arbitrary>], iteration_bounds = array<i64: 1>, scalar_prefetch = 0 : i64, scratch_operands = 0 : i64, tpu.core_type = #tpu.core_type<tc>, window_params = [{pipeline_mode = #tpu.pipeline_mode<synchronous>, transform_indices = @transform_0, window_bounds = array<i64: 128, 128>}, {pipeline_mode = #tpu.pipeline_mode<synchronous>, transform_indices = @transform_1, window_bounds = array<i64: 128, 128>}]} {
    %c0 = arith.constant 0 : index
    %c0_0 = arith.constant 0 : index
    %0 = vector.load %arg1[%c0, %c0_0] : memref<128x128xbf16, #tpu.memory_space<vmem>>, vector<128x128xbf16>
    %1 = arith.extf %0 : vector<128x128xbf16> to vector<128x128xf32>
    %cst = arith.constant dense<0.000000e+00> : vector<128xf32>
    %2 = vector.multi_reduction <add>, %1, %cst [0] : vector<128x128xf32> to vector<128xf32>
    %3 = vector.shape_cast %2 : vector<128xf32> to vector<1x128xf32>
    %cst_1 = arith.constant 7.812500e-03 : f32
    %4 = vector.broadcast %cst_1 : f32 to vector<1x128xf32>
    %5 = arith.mulf %3, %4 : vector<1x128xf32>
    %6 = arith.mulf %1, %1 : vector<128x128xf32>
    %cst_2 = arith.constant dense<0.000000e+00> : vector<128xf32>
    %7 = vector.multi_reduction <add>, %6, %cst_2 [0] : vector<128x128xf32> to vector<128xf32>
    %8 = vector.shape_cast %7 : vector<128xf32> to vector<1x128xf32>
    %cst_3 = arith.constant 7.812500e-03 : f32
    %9 = vector.broadcast %cst_3 : f32 to vector<1x128xf32>
    %10 = arith.mulf %8, %9 : vector<1x128xf32>
    %11 = arith.mulf %5, %5 : vector<1x128xf32>
    %12 = arith.subf %10, %11 : vector<1x128xf32>
    %cst_4 = arith.constant 0.000000e+00 : f32
    %13 = vector.broadcast %cst_4 : f32 to vector<1x128xf32>
    %14 = arith.maximumf %12, %13 : vector<1x128xf32>
    %15 = math.sqrt %14 : vector<1x128xf32>
    %cst_5 = arith.constant 9.99999997E-7 : f32
    %16 = vector.broadcast %cst_5 : f32 to vector<1x128xf32>
    %17 = arith.addf %15, %16 : vector<1x128xf32>
    %18 = vector.broadcast %5 : vector<1x128xf32> to vector<128x128xf32>
    %19 = arith.subf %1, %18 : vector<128x128xf32>
    %20 = vector.broadcast %17 : vector<1x128xf32> to vector<128x128xf32>
    %21 = arith.divf %19, %20 : vector<128x128xf32>
    %cst_6 = arith.constant 0.000000e+00 : f32
    %22 = vector.broadcast %cst_6 : f32 to vector<128x128xf32>
    %23 = arith.maximumf %21, %22 : vector<128x128xf32>
    %24 = arith.truncf %23 : vector<128x128xf32> to vector<128x128xbf16>
    %c0_7 = arith.constant 0 : index
    %c0_8 = arith.constant 0 : index
    %25 = vector.load %arg2[%c0_7, %c0_8] : memref<128x128xbf16, #tpu.memory_space<vmem>>, vector<128x128xbf16>
    tpu.vector_store %arg2[%c0_7, %c0_8], %24 {strides = array<i32>} : memref<128x128xbf16, #tpu.memory_space<vmem>>, vector<128x128xbf16>,
    return
  }
  func.func @transform_0(%arg0: i32) -> (i32, i32) {
    %c0_i32 = arith.constant 0 : i32
    %c0_i32_0 = arith.constant 0 : i32
    %c0_i32_1 = arith.constant 0 : i32
    return %c0_i32, %c0_i32_0 : i32, i32
  }
  func.func @transform_1(%arg0: i32) -> (i32, i32) {
    %c0_i32 = arith.constant 0 : i32
    %c0_i32_0 = arith.constant 0 : i32
    %c0_i32_1 = arith.constant 0 : i32
    return %c0_i32, %c0_i32_0 : i32, i32
  }
}

module attributes {stable_mosaic.version = 11 : i64} {
  func.func @_mm_kernel(%arg0: i32, %arg1: i32, %arg2: i32, %arg3: memref<128x128xbf16, #tpu.memory_space<vmem>>, %arg4: memref<128x128xbf16, #tpu.memory_space<vmem>>, %arg5: memref<1x128xf32, #tpu.memory_space<vmem>>, %arg6: memref<128x128xbf16, #tpu.memory_space<vmem>>, %arg7: memref<128x128xf32, #tpu.memory_space<vmem>>) attributes {dimension_semantics = [#tpu.dimension_semantics<parallel>, #tpu.dimension_semantics<parallel>, #tpu.dimension_semantics<arbitrary>], iteration_bounds = array<i64: 1, 1, 1>, scalar_prefetch = 0 : i64, scratch_operands = 1 : i64, tpu.core_type = #tpu.core_type<tc>, window_params = [{transform_indices = @transform_0, window_bounds = array<i64: 128, 128>}, {transform_indices = @transform_1, window_bounds = array<i64: 128, 128>}, {transform_indices = @transform_2, window_bounds = array<i64: 1, 128>}, {transform_indices = @transform_3, window_bounds = array<i64: 128, 128>}]} {
    %c0_i32 = arith.constant 0 : i32
    %0 = arith.cmpi eq, %arg2, %c0_i32 : i32
    %1 = arith.extui %0 : i1 to i32
    %c0_i32_0 = arith.constant 0 : i32
    %2 = arith.cmpi ne, %1, %c0_i32_0 : i32
    scf.if %2 {
      %cst_10 = arith.constant 0.000000e+00 : f32
      %12 = vector.broadcast %cst_10 : f32 to vector<128x128xf32>
      %c0_11 = arith.constant 0 : index
      %c0_12 = arith.constant 0 : index
      %13 = vector.load %arg7[%c0_11, %c0_12] : memref<128x128xf32, #tpu.memory_space<vmem>>, vector<128x128xf32>
      tpu.vector_store %arg7[%c0_11, %c0_12], %12 {strides = array<i32>} : memref<128x128xf32, #tpu.memory_space<vmem>>, vector<128x128xf32>,
    } else {
    }
    %c0 = arith.constant 0 : index
    %c0_1 = arith.constant 0 : index
    %3 = vector.load %arg7[%c0, %c0_1] : memref<128x128xf32, #tpu.memory_space<vmem>>, vector<128x128xf32>
    %c0_2 = arith.constant 0 : index
    %c0_3 = arith.constant 0 : index
    %4 = vector.load %arg3[%c0_2, %c0_3] : memref<128x128xbf16, #tpu.memory_space<vmem>>, vector<128x128xbf16>
    %c0_4 = arith.constant 0 : index
    %c0_5 = arith.constant 0 : index
    %5 = vector.load %arg4[%c0_4, %c0_5] : memref<128x128xbf16, #tpu.memory_space<vmem>>, vector<128x128xbf16>
    %cst = arith.constant dense<0.000000e+00> : vector<128x128xf32>
    %6 = tpu.matmul %4, %5, %cst {dimension_numbers = #tpu.dot_dimension_numbers<[1], [0], [0], [1], [0, 0, 1, 1], [], []>} : vector<128x128xbf16>, vector<128x128xbf16>, vector<128x128xf32> -> vector<128x128xf32>
    %7 = arith.addf %3, %6 : vector<128x128xf32>
    %c0_6 = arith.constant 0 : index
    %c0_7 = arith.constant 0 : index
    %8 = vector.load %arg7[%c0_6, %c0_7] : memref<128x128xf32, #tpu.memory_space<vmem>>, vector<128x128xf32>
    tpu.vector_store %arg7[%c0_6, %c0_7], %7 {strides = array<i32>} : memref<128x128xf32, #tpu.memory_space<vmem>>, vector<128x128xf32>,
    %c0_i32_8 = arith.constant 0 : i32
    %9 = arith.cmpi eq, %arg2, %c0_i32_8 : i32
    %10 = arith.extui %9 : i1 to i32
    %c0_i32_9 = arith.constant 0 : i32
    %11 = arith.cmpi ne, %10, %c0_i32_9 : i32
    scf.if %11 {
      %c0_10 = arith.constant 0 : index
      %c0_11 = arith.constant 0 : index
      %12 = vector.load %arg7[%c0_10, %c0_11] : memref<128x128xf32, #tpu.memory_space<vmem>>, vector<128x128xf32>
      %c0_12 = arith.constant 0 : index
      %c0_13 = arith.constant 0 : index
      %13 = vector.load %arg5[%c0_12, %c0_13] : memref<1x128xf32, #tpu.memory_space<vmem>>, vector<1x128xf32>
      %14 = vector.broadcast %13 : vector<1x128xf32> to vector<128x128xf32>
      %15 = arith.addf %12, %14 : vector<128x128xf32>
      %16 = arith.truncf %15 : vector<128x128xf32> to vector<128x128xbf16>
      %c0_14 = arith.constant 0 : index
      %c0_15 = arith.constant 0 : index
      %17 = vector.load %arg6[%c0_14, %c0_15] : memref<128x128xbf16, #tpu.memory_space<vmem>>, vector<128x128xbf16>
      tpu.vector_store %arg6[%c0_14, %c0_15], %16 {strides = array<i32>} : memref<128x128xbf16, #tpu.memory_space<vmem>>, vector<128x128xbf16>,
    } else {
    }
    return
  }
  func.func @transform_0(%arg0: i32, %arg1: i32, %arg2: i32) -> (i32, i32) {
    %c0_i32 = arith.constant 0 : i32
    return %arg0, %arg2 : i32, i32
  }
  func.func @transform_1(%arg0: i32, %arg1: i32, %arg2: i32) -> (i32, i32) {
    %c0_i32 = arith.constant 0 : i32
    return %arg2, %arg1 : i32, i32
  }
  func.func @transform_2(%arg0: i32, %arg1: i32, %arg2: i32) -> (i32, i32) {
    %c0_i32 = arith.constant 0 : i32
    %c0_i32_0 = arith.constant 0 : i32
    return %c0_i32, %arg1 : i32, i32
  }
  func.func @transform_3(%arg0: i32, %arg1: i32, %arg2: i32) -> (i32, i32) {
    %c0_i32 = arith.constant 0 : i32
    return %arg0, %arg1 : i32, i32
  }
}

module attributes {stable_mosaic.version = 11 : i64} {
  func.func @_actnorm_relu_kernel(%arg0: i32, %arg1: memref<200x128xbf16, #tpu.memory_space<vmem>>, %arg2: memref<200x128xbf16, #tpu.memory_space<vmem>>) attributes {dimension_semantics = [#tpu.dimension_semantics<arbitrary>], iteration_bounds = array<i64: 1>, scalar_prefetch = 0 : i64, scratch_operands = 0 : i64, tpu.core_type = #tpu.core_type<tc>, window_params = [{pipeline_mode = #tpu.pipeline_mode<synchronous>, transform_indices = @transform_0, window_bounds = array<i64: 200, 128>}, {pipeline_mode = #tpu.pipeline_mode<synchronous>, transform_indices = @transform_1, window_bounds = array<i64: 200, 128>}]} {
    %c0 = arith.constant 0 : index
    %c0_0 = arith.constant 0 : index
    %0 = vector.load %arg1[%c0, %c0_0] : memref<200x128xbf16, #tpu.memory_space<vmem>>, vector<200x128xbf16>
    %1 = arith.extf %0 : vector<200x128xbf16> to vector<200x128xf32>
    %cst = arith.constant dense<0.000000e+00> : vector<128xf32>
    %2 = vector.multi_reduction <add>, %1, %cst [0] : vector<200x128xf32> to vector<128xf32>
    %3 = vector.shape_cast %2 : vector<128xf32> to vector<1x128xf32>
    %cst_1 = arith.constant 5.000000e-03 : f32
    %4 = vector.broadcast %cst_1 : f32 to vector<1x128xf32>
    %5 = arith.mulf %3, %4 : vector<1x128xf32>
    %6 = arith.mulf %1, %1 : vector<200x128xf32>
    %cst_2 = arith.constant dense<0.000000e+00> : vector<128xf32>
    %7 = vector.multi_reduction <add>, %6, %cst_2 [0] : vector<200x128xf32> to vector<128xf32>
    %8 = vector.shape_cast %7 : vector<128xf32> to vector<1x128xf32>
    %cst_3 = arith.constant 5.000000e-03 : f32
    %9 = vector.broadcast %cst_3 : f32 to vector<1x128xf32>
    %10 = arith.mulf %8, %9 : vector<1x128xf32>
    %11 = arith.mulf %5, %5 : vector<1x128xf32>
    %12 = arith.subf %10, %11 : vector<1x128xf32>
    %cst_4 = arith.constant 0.000000e+00 : f32
    %13 = vector.broadcast %cst_4 : f32 to vector<1x128xf32>
    %14 = arith.maximumf %12, %13 : vector<1x128xf32>
    %15 = math.sqrt %14 : vector<1x128xf32>
    %cst_5 = arith.constant 9.99999997E-7 : f32
    %16 = vector.broadcast %cst_5 : f32 to vector<1x128xf32>
    %17 = arith.addf %15, %16 : vector<1x128xf32>
    %18 = vector.broadcast %5 : vector<1x128xf32> to vector<200x128xf32>
    %19 = arith.subf %1, %18 : vector<200x128xf32>
    %20 = vector.broadcast %17 : vector<1x128xf32> to vector<200x128xf32>
    %21 = arith.divf %19, %20 : vector<200x128xf32>
    %cst_6 = arith.constant 0.000000e+00 : f32
    %22 = vector.broadcast %cst_6 : f32 to vector<200x128xf32>
    %23 = arith.maximumf %21, %22 : vector<200x128xf32>
    %24 = arith.truncf %23 : vector<200x128xf32> to vector<200x128xbf16>
    %c0_7 = arith.constant 0 : index
    %c0_8 = arith.constant 0 : index
    %25 = vector.load %arg2[%c0_7, %c0_8] : memref<200x128xbf16, #tpu.memory_space<vmem>>, vector<200x128xbf16>
    tpu.vector_store %arg2[%c0_7, %c0_8], %24 {strides = array<i32>} : memref<200x128xbf16, #tpu.memory_space<vmem>>, vector<200x128xbf16>,
    return
  }
  func.func @transform_0(%arg0: i32) -> (i32, i32) {
    %c0_i32 = arith.constant 0 : i32
    %c0_i32_0 = arith.constant 0 : i32
    %c0_i32_1 = arith.constant 0 : i32
    return %c0_i32, %c0_i32_0 : i32, i32
  }
  func.func @transform_1(%arg0: i32) -> (i32, i32) {
    %c0_i32 = arith.constant 0 : i32
    %c0_i32_0 = arith.constant 0 : i32
    %c0_i32_1 = arith.constant 0 : i32
    return %c0_i32, %c0_i32_0 : i32, i32
  }
}

module attributes {stable_mosaic.version = 11 : i64} {
  func.func @_conv_coupling_kernel(%arg0: i32, %arg1: memref<1x108x128xbf16, #tpu.memory_space<vmem>>, %arg2: memref<1152x16xbf16, #tpu.memory_space<vmem>>, %arg3: memref<1x16xf32, #tpu.memory_space<vmem>>, %arg4: memref<1x16xf32, #tpu.memory_space<vmem>>, %arg5: memref<1x80x8xf32, #tpu.memory_space<vmem>>, %arg6: memref<1x80x8xf32, #tpu.memory_space<vmem>>, %arg7: memref<1x1x1xf32, #tpu.memory_space<vmem>>) attributes {dimension_semantics = [#tpu.dimension_semantics<parallel>], iteration_bounds = array<i64: 2>, scalar_prefetch = 0 : i64, scratch_operands = 0 : i64, tpu.core_type = #tpu.core_type<tc>, window_params = [{transform_indices = @transform_0, window_bounds = array<i64: 1, 108, 128>}, {pipeline_mode = #tpu.pipeline_mode<synchronous>, transform_indices = @transform_1, window_bounds = array<i64: 1152, 16>}, {pipeline_mode = #tpu.pipeline_mode<synchronous>, transform_indices = @transform_2, window_bounds = array<i64: 1, 16>}, {pipeline_mode = #tpu.pipeline_mode<synchronous>, transform_indices = @transform_3, window_bounds = array<i64: 1, 16>}, {transform_indices = @transform_4, window_bounds = array<i64: 1, 80, 8>}, {transform_indices = @transform_5, window_bounds = array<i64: 1, 80, 8>}, {transform_indices = @transform_6, window_bounds = array<i64: 1, 1, 1>}]} {
    %cst = arith.constant 0.000000e+00 : f32
    %0 = vector.broadcast %cst : f32 to vector<80x16xf32>
    %c0 = arith.constant 0 : index
    %c0_0 = arith.constant 0 : index
    %c0_1 = arith.constant 0 : index
    %1 = vector.load %arg1[%c0, %c0_0, %c0_1] : memref<1x108x128xbf16, #tpu.memory_space<vmem>>, vector<1x80x128xbf16>
    %2 = vector.shape_cast %1 : vector<1x80x128xbf16> to vector<80x128xbf16>
    %c0_2 = arith.constant 0 : index
    %c0_3 = arith.constant 0 : index
    %3 = vector.load %arg2[%c0_2, %c0_3] : memref<1152x16xbf16, #tpu.memory_space<vmem>>, vector<128x16xbf16>
    %cst_4 = arith.constant dense<0.000000e+00> : vector<80x16xf32>
    %4 = tpu.matmul %2, %3, %cst_4 {dimension_numbers = #tpu.dot_dimension_numbers<[1], [0], [0], [1], [0, 0, 1, 1], [], []>} : vector<80x128xbf16>, vector<128x16xbf16>, vector<80x16xf32> -> vector<80x16xf32>
    %5 = arith.addf %0, %4 : vector<80x16xf32>
    %c0_5 = arith.constant 0 : index
    %c1 = arith.constant 1 : index
    %c0_6 = arith.constant 0 : index
    %6 = vector.load %arg1[%c0_5, %c1, %c0_6] : memref<1x108x128xbf16, #tpu.memory_space<vmem>>, vector<1x80x128xbf16>
    %7 = vector.shape_cast %6 : vector<1x80x128xbf16> to vector<80x128xbf16>
    %c128 = arith.constant 128 : index
    %c0_7 = arith.constant 0 : index
    %8 = vector.load %arg2[%c128, %c0_7] : memref<1152x16xbf16, #tpu.memory_space<vmem>>, vector<128x16xbf16>
    %cst_8 = arith.constant dense<0.000000e+00> : vector<80x16xf32>
    %9 = tpu.matmul %7, %8, %cst_8 {dimension_numbers = #tpu.dot_dimension_numbers<[1], [0], [0], [1], [0, 0, 1, 1], [], []>} : vector<80x128xbf16>, vector<128x16xbf16>, vector<80x16xf32> -> vector<80x16xf32>
    %10 = arith.addf %5, %9 : vector<80x16xf32>
    %c0_9 = arith.constant 0 : index
    %c2 = arith.constant 2 : index
    %c0_10 = arith.constant 0 : index
    %11 = vector.load %arg1[%c0_9, %c2, %c0_10] : memref<1x108x128xbf16, #tpu.memory_space<vmem>>, vector<1x80x128xbf16>
    %12 = vector.shape_cast %11 : vector<1x80x128xbf16> to vector<80x128xbf16>
    %c256 = arith.constant 256 : index
    %c0_11 = arith.constant 0 : index
    %13 = vector.load %arg2[%c256, %c0_11] : memref<1152x16xbf16, #tpu.memory_space<vmem>>, vector<128x16xbf16>
    %cst_12 = arith.constant dense<0.000000e+00> : vector<80x16xf32>
    %14 = tpu.matmul %12, %13, %cst_12 {dimension_numbers = #tpu.dot_dimension_numbers<[1], [0], [0], [1], [0, 0, 1, 1], [], []>} : vector<80x128xbf16>, vector<128x16xbf16>, vector<80x16xf32> -> vector<80x16xf32>
    %15 = arith.addf %10, %14 : vector<80x16xf32>
    %c0_13 = arith.constant 0 : index
    %c10 = arith.constant 10 : index
    %c0_14 = arith.constant 0 : index
    %16 = vector.load %arg1[%c0_13, %c10, %c0_14] : memref<1x108x128xbf16, #tpu.memory_space<vmem>>, vector<1x80x128xbf16>
    %17 = vector.shape_cast %16 : vector<1x80x128xbf16> to vector<80x128xbf16>
    %c384 = arith.constant 384 : index
    %c0_15 = arith.constant 0 : index
    %18 = vector.load %arg2[%c384, %c0_15] : memref<1152x16xbf16, #tpu.memory_space<vmem>>, vector<128x16xbf16>
    %cst_16 = arith.constant dense<0.000000e+00> : vector<80x16xf32>
    %19 = tpu.matmul %17, %18, %cst_16 {dimension_numbers = #tpu.dot_dimension_numbers<[1], [0], [0], [1], [0, 0, 1, 1], [], []>} : vector<80x128xbf16>, vector<128x16xbf16>, vector<80x16xf32> -> vector<80x16xf32>
    %20 = arith.addf %15, %19 : vector<80x16xf32>
    %c0_17 = arith.constant 0 : index
    %c11 = arith.constant 11 : index
    %c0_18 = arith.constant 0 : index
    %21 = vector.load %arg1[%c0_17, %c11, %c0_18] : memref<1x108x128xbf16, #tpu.memory_space<vmem>>, vector<1x80x128xbf16>
    %22 = vector.shape_cast %21 : vector<1x80x128xbf16> to vector<80x128xbf16>
    %c512 = arith.constant 512 : index
    %c0_19 = arith.constant 0 : index
    %23 = vector.load %arg2[%c512, %c0_19] : memref<1152x16xbf16, #tpu.memory_space<vmem>>, vector<128x16xbf16>
    %cst_20 = arith.constant dense<0.000000e+00> : vector<80x16xf32>
    %24 = tpu.matmul %22, %23, %cst_20 {dimension_numbers = #tpu.dot_dimension_numbers<[1], [0], [0], [1], [0, 0, 1, 1], [], []>} : vector<80x128xbf16>, vector<128x16xbf16>, vector<80x16xf32> -> vector<80x16xf32>
    %25 = arith.addf %20, %24 : vector<80x16xf32>
    %c0_21 = arith.constant 0 : index
    %c12 = arith.constant 12 : index
    %c0_22 = arith.constant 0 : index
    %26 = vector.load %arg1[%c0_21, %c12, %c0_22] : memref<1x108x128xbf16, #tpu.memory_space<vmem>>, vector<1x80x128xbf16>
    %27 = vector.shape_cast %26 : vector<1x80x128xbf16> to vector<80x128xbf16>
    %c640 = arith.constant 640 : index
    %c0_23 = arith.constant 0 : index
    %28 = vector.load %arg2[%c640, %c0_23] : memref<1152x16xbf16, #tpu.memory_space<vmem>>, vector<128x16xbf16>
    %cst_24 = arith.constant dense<0.000000e+00> : vector<80x16xf32>
    %29 = tpu.matmul %27, %28, %cst_24 {dimension_numbers = #tpu.dot_dimension_numbers<[1], [0], [0], [1], [0, 0, 1, 1], [], []>} : vector<80x128xbf16>, vector<128x16xbf16>, vector<80x16xf32> -> vector<80x16xf32>
    %30 = arith.addf %25, %29 : vector<80x16xf32>
    %c0_25 = arith.constant 0 : index
    %c20 = arith.constant 20 : index
    %c0_26 = arith.constant 0 : index
    %31 = vector.load %arg1[%c0_25, %c20, %c0_26] : memref<1x108x128xbf16, #tpu.memory_space<vmem>>, vector<1x80x128xbf16>
    %32 = vector.shape_cast %31 : vector<1x80x128xbf16> to vector<80x128xbf16>
    %c768 = arith.constant 768 : index
    %c0_27 = arith.constant 0 : index
    %33 = vector.load %arg2[%c768, %c0_27] : memref<1152x16xbf16, #tpu.memory_space<vmem>>, vector<128x16xbf16>
    %cst_28 = arith.constant dense<0.000000e+00> : vector<80x16xf32>
    %34 = tpu.matmul %32, %33, %cst_28 {dimension_numbers = #tpu.dot_dimension_numbers<[1], [0], [0], [1], [0, 0, 1, 1], [], []>} : vector<80x128xbf16>, vector<128x16xbf16>, vector<80x16xf32> -> vector<80x16xf32>
    %35 = arith.addf %30, %34 : vector<80x16xf32>
    %c0_29 = arith.constant 0 : index
    %c21 = arith.constant 21 : index
    %c0_30 = arith.constant 0 : index
    %36 = vector.load %arg1[%c0_29, %c21, %c0_30] : memref<1x108x128xbf16, #tpu.memory_space<vmem>>, vector<1x80x128xbf16>
    %37 = vector.shape_cast %36 : vector<1x80x128xbf16> to vector<80x128xbf16>
    %c896 = arith.constant 896 : index
    %c0_31 = arith.constant 0 : index
    %38 = vector.load %arg2[%c896, %c0_31] : memref<1152x16xbf16, #tpu.memory_space<vmem>>, vector<128x16xbf16>
    %cst_32 = arith.constant dense<0.000000e+00> : vector<80x16xf32>
    %39 = tpu.matmul %37, %38, %cst_32 {dimension_numbers = #tpu.dot_dimension_numbers<[1], [0], [0], [1], [0, 0, 1, 1], [], []>} : vector<80x128xbf16>, vector<128x16xbf16>, vector<80x16xf32> -> vector<80x16xf32>
    %40 = arith.addf %35, %39 : vector<80x16xf32>
    %c0_33 = arith.constant 0 : index
    %c22 = arith.constant 22 : index
    %c0_34 = arith.constant 0 : index
    %41 = vector.load %arg1[%c0_33, %c22, %c0_34] : memref<1x108x128xbf16, #tpu.memory_space<vmem>>, vector<1x80x128xbf16>
    %42 = vector.shape_cast %41 : vector<1x80x128xbf16> to vector<80x128xbf16>
    %c1024 = arith.constant 1024 : index
    %c0_35 = arith.constant 0 : index
    %43 = vector.load %arg2[%c1024, %c0_35] : memref<1152x16xbf16, #tpu.memory_space<vmem>>, vector<128x16xbf16>
    %cst_36 = arith.constant dense<0.000000e+00> : vector<80x16xf32>
    %44 = tpu.matmul %42, %43, %cst_36 {dimension_numbers = #tpu.dot_dimension_numbers<[1], [0], [0], [1], [0, 0, 1, 1], [], []>} : vector<80x128xbf16>, vector<128x16xbf16>, vector<80x16xf32> -> vector<80x16xf32>
    %45 = arith.addf %40, %44 : vector<80x16xf32>
    %c0_37 = arith.constant 0 : index
    %c0_38 = arith.constant 0 : index
    %46 = vector.load %arg3[%c0_37, %c0_38] : memref<1x16xf32, #tpu.memory_space<vmem>>, vector<1x16xf32>
    %47 = vector.broadcast %46 : vector<1x16xf32> to vector<80x16xf32>
    %48 = arith.addf %45, %47 : vector<80x16xf32>
    %c0_39 = arith.constant 0 : index
    %c0_40 = arith.constant 0 : index
    %49 = vector.load %arg4[%c0_39, %c0_40] : memref<1x16xf32, #tpu.memory_space<vmem>>, vector<1x16xf32>
    %50 = vector.extract_strided_slice %48 {offsets = [0, 0], sizes = [80, 8], strides = [1, 1]} : vector<80x16xf32> to vector<80x8xf32>
    %51 = vector.extract_strided_slice %49 {offsets = [0, 0], sizes = [1, 8], strides = [1, 1]} : vector<1x16xf32> to vector<1x8xf32>
    %52 = math.exp %51 : vector<1x8xf32>
    %53 = vector.broadcast %52 : vector<1x8xf32> to vector<80x8xf32>
    %54 = arith.mulf %50, %53 : vector<80x8xf32>
    %55 = vector.extract_strided_slice %48 {offsets = [0, 8], sizes = [80, 8], strides = [1, 1]} : vector<80x16xf32> to vector<80x8xf32>
    %56 = vector.extract_strided_slice %49 {offsets = [0, 8], sizes = [1, 8], strides = [1, 1]} : vector<1x16xf32> to vector<1x8xf32>
    %57 = math.exp %56 : vector<1x8xf32>
    %58 = vector.broadcast %57 : vector<1x8xf32> to vector<80x8xf32>
    %59 = arith.mulf %55, %58 : vector<80x8xf32>
    %cst_41 = arith.constant 2.000000e+00 : f32
    %60 = vector.broadcast %cst_41 : f32 to vector<80x8xf32>
    %61 = arith.addf %59, %60 : vector<80x8xf32>
    %62 = arith.negf %61 : vector<80x8xf32>
    %63 = math.exp %62 : vector<80x8xf32>
    %cst_42 = arith.constant 1.000000e+00 : f32
    %64 = vector.broadcast %cst_42 : f32 to vector<80x8xf32>
    %65 = arith.addf %64, %63 : vector<80x8xf32>
    %66 = arith.divf %64, %65 : vector<80x8xf32>
    %c0_43 = arith.constant 0 : index
    %c0_44 = arith.constant 0 : index
    %c0_45 = arith.constant 0 : index
    %67 = vector.load %arg5[%c0_43, %c0_44, %c0_45] : memref<1x80x8xf32, #tpu.memory_space<vmem>>, vector<1x80x8xf32>
    %68 = vector.shape_cast %67 : vector<1x80x8xf32> to vector<80x8xf32>
    %69 = arith.mulf %66, %68 : vector<80x8xf32>
    %70 = arith.addf %69, %54 : vector<80x8xf32>
    %c0_46 = arith.constant 0 : index
    %c0_47 = arith.constant 0 : index
    %c0_48 = arith.constant 0 : index
    %71 = vector.load %arg6[%c0_46, %c0_47, %c0_48] : memref<1x80x8xf32, #tpu.memory_space<vmem>>, vector<1x80x8xf32>
    %72 = vector.shape_cast %71 : vector<1x80x8xf32> to vector<80x8xf32>
    %73 = vector.shape_cast %70 : vector<80x8xf32> to vector<1x80x8xf32>
    tpu.vector_store %arg6[%c0_46, %c0_47, %c0_48], %73 {strides = array<i32>} : memref<1x80x8xf32, #tpu.memory_space<vmem>>, vector<1x80x8xf32>,
    %cst_49 = arith.constant 0.000000e+00 : f32
    %74 = vector.broadcast %cst_49 : f32 to vector<80x8xf32>
    %75 = arith.cmpf ogt, %61, %74 : vector<80x8xf32>
    %cst_50 = arith.constant 0.000000e+00 : f32
    %76 = vector.broadcast %cst_50 : f32 to vector<80x8xf32>
    %77 = arith.subf %76, %61 : vector<80x8xf32>
    %78 = math.exp %77 : vector<80x8xf32>
    %79 = math.log1p %78 : vector<80x8xf32>
    %cst_51 = arith.constant 0.000000e+00 : f32
    %80 = vector.broadcast %cst_51 : f32 to vector<80x8xf32>
    %81 = arith.subf %80, %79 : vector<80x8xf32>
    %82 = math.exp %61 : vector<80x8xf32>
    %83 = math.log1p %82 : vector<80x8xf32>
    %84 = arith.subf %61, %83 : vector<80x8xf32>
    %85 = arith.select %75, %81, %84 : vector<80x8xi1>, vector<80x8xf32>
    %86 = tpu.iota {dimensions = array<i32: 0>} : vector<80x1xi32>
    %c10_i32 = arith.constant 10 : i32
    %c0_i32 = arith.constant 0 : i32
    %87 = arith.cmpi eq, %c10_i32, %c0_i32 : i32
    %c1_i32 = arith.constant 1 : i32
    %88 = arith.select %87, %c1_i32, %c10_i32 : i32
    %89 = vector.broadcast %88 : i32 to vector<80x1xi32>
    %90 = arith.remsi %86, %89 : vector<80x1xi32>
    %c0_i32_52 = arith.constant 0 : i32
    %91 = vector.broadcast %c0_i32_52 : i32 to vector<80x1xi32>
    %92 = arith.cmpi ne, %90, %91 : vector<80x1xi32>
    %c0_i32_53 = arith.constant 0 : i32
    %93 = vector.broadcast %c0_i32_53 : i32 to vector<80x1xi32>
    %94 = arith.cmpi slt, %90, %93 : vector<80x1xi32>
    %c0_i32_54 = arith.constant 0 : i32
    %95 = arith.cmpi slt, %88, %c0_i32_54 : i32
    %96 = vector.broadcast %95 : i1 to vector<80x1xi1>
    %97 = vector.broadcast %96 : vector<80x1xi1> to vector<80x1xi1>
    %98 = arith.xori %94, %97 : vector<80x1xi1>
    %99 = arith.andi %98, %92 : vector<80x1xi1>
    %100 = vector.broadcast %88 : i32 to vector<80x1xi32>
    %101 = arith.addi %90, %100 : vector<80x1xi32>
    %102 = arith.select %99, %101, %90 : vector<80x1xi1>, vector<80x1xi32>
    %c8_i32 = arith.constant 8 : i32
    %103 = vector.broadcast %c8_i32 : i32 to vector<80x1xi32>
    %104 = arith.cmpi slt, %102, %103 : vector<80x1xi32>
    %105 = arith.extui %104 : vector<80x1xi1> to vector<80x1xi32>
    %106 = arith.sitofp %105 : vector<80x1xi32> to vector<80x1xf32>
    %107 = vector.broadcast %106 : vector<80x1xf32> to vector<80x8xf32>
    %108 = arith.mulf %85, %107 : vector<80x8xf32>
    %109 = vector.shape_cast %108 : vector<80x8xf32> to vector<1x80x8xf32>
    %cst_55 = arith.constant dense<0.000000e+00> : vector<1xf32>
    %110 = vector.multi_reduction <add>, %109, %cst_55 [1, 2] : vector<1x80x8xf32> to vector<1xf32>
    %111 = vector.shape_cast %110 : vector<1xf32> to vector<1x1x1xf32>
    %112 = vector.extract %111[0, 0, 0] : f32 from vector<1x1x1xf32>
    %113 = vector.broadcast %112 : f32 to vector<1x1x1xf32>
    %c0_56 = arith.constant 0 : index
    %c0_57 = arith.constant 0 : index
    %c0_58 = arith.constant 0 : index
    %114 = vector.load %arg7[%c0_56, %c0_57, %c0_58] : memref<1x1x1xf32, #tpu.memory_space<vmem>>, vector<1x1x1xf32>
    tpu.vector_store %arg7[%c0_56, %c0_57, %c0_58], %113 {strides = array<i32>} : memref<1x1x1xf32, #tpu.memory_space<vmem>>, vector<1x1x1xf32>,
    return
  }
  func.func @transform_0(%arg0: i32) -> (i32, i32, i32) {
    %c0_i32 = arith.constant 0 : i32
    %c0_i32_0 = arith.constant 0 : i32
    %c0_i32_1 = arith.constant 0 : i32
    return %arg0, %c0_i32, %c0_i32_0 : i32, i32, i32
  }
  func.func @transform_1(%arg0: i32) -> (i32, i32) {
    %c0_i32 = arith.constant 0 : i32
    %c0_i32_0 = arith.constant 0 : i32
    %c0_i32_1 = arith.constant 0 : i32
    return %c0_i32, %c0_i32_0 : i32, i32
  }
  func.func @transform_2(%arg0: i32) -> (i32, i32) {
    %c0_i32 = arith.constant 0 : i32
    %c0_i32_0 = arith.constant 0 : i32
    %c0_i32_1 = arith.constant 0 : i32
    return %c0_i32, %c0_i32_0 : i32, i32
  }
  func.func @transform_3(%arg0: i32) -> (i32, i32) {
    %c0_i32 = arith.constant 0 : i32
    %c0_i32_0 = arith.constant 0 : i32
    %c0_i32_1 = arith.constant 0 : i32
    return %c0_i32, %c0_i32_0 : i32, i32
  }
  func.func @transform_4(%arg0: i32) -> (i32, i32, i32) {
    %c0_i32 = arith.constant 0 : i32
    %c0_i32_0 = arith.constant 0 : i32
    %c0_i32_1 = arith.constant 0 : i32
    return %arg0, %c0_i32, %c0_i32_0 : i32, i32, i32
  }
  func.func @transform_5(%arg0: i32) -> (i32, i32, i32) {
    %c0_i32 = arith.constant 0 : i32
    %c0_i32_0 = arith.constant 0 : i32
    %c0_i32_1 = arith.constant 0 : i32
    return %arg0, %c0_i32, %c0_i32_0 : i32, i32, i32
  }
  func.func @transform_6(%arg0: i32) -> (i32, i32, i32) {
    %c0_i32 = arith.constant 0 : i32
    %c0_i32_0 = arith.constant 0 : i32
    %c0_i32_1 = arith.constant 0 : i32
    return %arg0, %c0_i32, %c0_i32_0 : i32, i32, i32
  }
}

module attributes {stable_mosaic.version = 11 : i64} {
  func.func @_stats_kernel(%arg0: i32, %arg1: memref<32x32xf32, #tpu.memory_space<vmem>>, %arg2: memref<1x32xf32, #tpu.memory_space<vmem>>, %arg3: memref<1x32xf32, #tpu.memory_space<vmem>>) attributes {dimension_semantics = [#tpu.dimension_semantics<arbitrary>], iteration_bounds = array<i64: 1>, scalar_prefetch = 0 : i64, scratch_operands = 0 : i64, tpu.core_type = #tpu.core_type<tc>, window_params = [{pipeline_mode = #tpu.pipeline_mode<synchronous>, transform_indices = @transform_0, window_bounds = array<i64: 32, 32>}, {pipeline_mode = #tpu.pipeline_mode<synchronous>, transform_indices = @transform_1, window_bounds = array<i64: 1, 32>}, {pipeline_mode = #tpu.pipeline_mode<synchronous>, transform_indices = @transform_2, window_bounds = array<i64: 1, 32>}]} {
    %c0 = arith.constant 0 : index
    %c0_0 = arith.constant 0 : index
    %0 = vector.load %arg1[%c0, %c0_0] : memref<32x32xf32, #tpu.memory_space<vmem>>, vector<32x32xf32>
    %cst = arith.constant dense<0.000000e+00> : vector<32xf32>
    %1 = vector.multi_reduction <add>, %0, %cst [0] : vector<32x32xf32> to vector<32xf32>
    %2 = vector.shape_cast %1 : vector<32xf32> to vector<1x32xf32>
    %cst_1 = arith.constant 3.125000e-02 : f32
    %3 = vector.broadcast %cst_1 : f32 to vector<1x32xf32>
    %4 = arith.mulf %2, %3 : vector<1x32xf32>
    %5 = arith.mulf %0, %0 : vector<32x32xf32>
    %cst_2 = arith.constant dense<0.000000e+00> : vector<32xf32>
    %6 = vector.multi_reduction <add>, %5, %cst_2 [0] : vector<32x32xf32> to vector<32xf32>
    %7 = vector.shape_cast %6 : vector<32xf32> to vector<1x32xf32>
    %cst_3 = arith.constant 3.125000e-02 : f32
    %8 = vector.broadcast %cst_3 : f32 to vector<1x32xf32>
    %9 = arith.mulf %7, %8 : vector<1x32xf32>
    %10 = arith.mulf %4, %4 : vector<1x32xf32>
    %11 = arith.subf %9, %10 : vector<1x32xf32>
    %cst_4 = arith.constant 0.000000e+00 : f32
    %12 = vector.broadcast %cst_4 : f32 to vector<1x32xf32>
    %13 = arith.maximumf %11, %12 : vector<1x32xf32>
    %c0_5 = arith.constant 0 : index
    %c0_6 = arith.constant 0 : index
    %14 = vector.load %arg2[%c0_5, %c0_6] : memref<1x32xf32, #tpu.memory_space<vmem>>, vector<1x32xf32>
    tpu.vector_store %arg2[%c0_5, %c0_6], %4 {strides = array<i32>} : memref<1x32xf32, #tpu.memory_space<vmem>>, vector<1x32xf32>,
    %15 = math.sqrt %13 : vector<1x32xf32>
    %cst_7 = arith.constant 9.99999997E-7 : f32
    %16 = vector.broadcast %cst_7 : f32 to vector<1x32xf32>
    %17 = arith.addf %15, %16 : vector<1x32xf32>
    %c0_8 = arith.constant 0 : index
    %c0_9 = arith.constant 0 : index
    %18 = vector.load %arg3[%c0_8, %c0_9] : memref<1x32xf32, #tpu.memory_space<vmem>>, vector<1x32xf32>
    tpu.vector_store %arg3[%c0_8, %c0_9], %17 {strides = array<i32>} : memref<1x32xf32, #tpu.memory_space<vmem>>, vector<1x32xf32>,
    return
  }
  func.func @transform_0(%arg0: i32) -> (i32, i32) {
    %c0_i32 = arith.constant 0 : i32
    %c0_i32_0 = arith.constant 0 : i32
    %c0_i32_1 = arith.constant 0 : i32
    return %c0_i32, %c0_i32_0 : i32, i32
  }
  func.func @transform_1(%arg0: i32) -> (i32, i32) {
    %c0_i32 = arith.constant 0 : i32
    %c0_i32_0 = arith.constant 0 : i32
    %c0_i32_1 = arith.constant 0 : i32
    return %c0_i32, %c0_i32_0 : i32, i32
  }
  func.func @transform_2(%arg0: i32) -> (i32, i32) {
    %c0_i32 = arith.constant 0 : i32
    %c0_i32_0 = arith.constant 0 : i32
    %c0_i32_1 = arith.constant 0 : i32
    return %c0_i32, %c0_i32_0 : i32, i32
  }
}

module attributes {stable_mosaic.version = 11 : i64} {
  func.func @_mm_kernel(%arg0: i32, %arg1: i32, %arg2: i32, %arg3: memref<32x32xbf16, #tpu.memory_space<vmem>>, %arg4: memref<32x32xbf16, #tpu.memory_space<vmem>>, %arg5: memref<1x32xf32, #tpu.memory_space<vmem>>, %arg6: memref<32x32xf32, #tpu.memory_space<vmem>>, %arg7: memref<32x32xf32, #tpu.memory_space<vmem>>) attributes {dimension_semantics = [#tpu.dimension_semantics<parallel>, #tpu.dimension_semantics<parallel>, #tpu.dimension_semantics<arbitrary>], iteration_bounds = array<i64: 1, 1, 1>, scalar_prefetch = 0 : i64, scratch_operands = 1 : i64, tpu.core_type = #tpu.core_type<tc>, window_params = [{transform_indices = @transform_0, window_bounds = array<i64: 32, 32>}, {transform_indices = @transform_1, window_bounds = array<i64: 32, 32>}, {transform_indices = @transform_2, window_bounds = array<i64: 1, 32>}, {transform_indices = @transform_3, window_bounds = array<i64: 32, 32>}]} {
    %c0_i32 = arith.constant 0 : i32
    %0 = arith.cmpi eq, %arg2, %c0_i32 : i32
    %1 = arith.extui %0 : i1 to i32
    %c0_i32_0 = arith.constant 0 : i32
    %2 = arith.cmpi ne, %1, %c0_i32_0 : i32
    scf.if %2 {
      %cst_10 = arith.constant 0.000000e+00 : f32
      %12 = vector.broadcast %cst_10 : f32 to vector<32x32xf32>
      %c0_11 = arith.constant 0 : index
      %c0_12 = arith.constant 0 : index
      %13 = vector.load %arg7[%c0_11, %c0_12] : memref<32x32xf32, #tpu.memory_space<vmem>>, vector<32x32xf32>
      tpu.vector_store %arg7[%c0_11, %c0_12], %12 {strides = array<i32>} : memref<32x32xf32, #tpu.memory_space<vmem>>, vector<32x32xf32>,
    } else {
    }
    %c0 = arith.constant 0 : index
    %c0_1 = arith.constant 0 : index
    %3 = vector.load %arg7[%c0, %c0_1] : memref<32x32xf32, #tpu.memory_space<vmem>>, vector<32x32xf32>
    %c0_2 = arith.constant 0 : index
    %c0_3 = arith.constant 0 : index
    %4 = vector.load %arg3[%c0_2, %c0_3] : memref<32x32xbf16, #tpu.memory_space<vmem>>, vector<32x32xbf16>
    %c0_4 = arith.constant 0 : index
    %c0_5 = arith.constant 0 : index
    %5 = vector.load %arg4[%c0_4, %c0_5] : memref<32x32xbf16, #tpu.memory_space<vmem>>, vector<32x32xbf16>
    %cst = arith.constant dense<0.000000e+00> : vector<32x32xf32>
    %6 = tpu.matmul %4, %5, %cst {dimension_numbers = #tpu.dot_dimension_numbers<[1], [0], [0], [1], [0, 0, 1, 1], [], []>} : vector<32x32xbf16>, vector<32x32xbf16>, vector<32x32xf32> -> vector<32x32xf32>
    %7 = arith.addf %3, %6 : vector<32x32xf32>
    %c0_6 = arith.constant 0 : index
    %c0_7 = arith.constant 0 : index
    %8 = vector.load %arg7[%c0_6, %c0_7] : memref<32x32xf32, #tpu.memory_space<vmem>>, vector<32x32xf32>
    tpu.vector_store %arg7[%c0_6, %c0_7], %7 {strides = array<i32>} : memref<32x32xf32, #tpu.memory_space<vmem>>, vector<32x32xf32>,
    %c0_i32_8 = arith.constant 0 : i32
    %9 = arith.cmpi eq, %arg2, %c0_i32_8 : i32
    %10 = arith.extui %9 : i1 to i32
    %c0_i32_9 = arith.constant 0 : i32
    %11 = arith.cmpi ne, %10, %c0_i32_9 : i32
    scf.if %11 {
      %c0_10 = arith.constant 0 : index
      %c0_11 = arith.constant 0 : index
      %12 = vector.load %arg7[%c0_10, %c0_11] : memref<32x32xf32, #tpu.memory_space<vmem>>, vector<32x32xf32>
      %c0_12 = arith.constant 0 : index
      %c0_13 = arith.constant 0 : index
      %13 = vector.load %arg5[%c0_12, %c0_13] : memref<1x32xf32, #tpu.memory_space<vmem>>, vector<1x32xf32>
      %14 = vector.broadcast %13 : vector<1x32xf32> to vector<32x32xf32>
      %15 = arith.addf %12, %14 : vector<32x32xf32>
      %c0_14 = arith.constant 0 : index
      %c0_15 = arith.constant 0 : index
      %16 = vector.load %arg6[%c0_14, %c0_15] : memref<32x32xf32, #tpu.memory_space<vmem>>, vector<32x32xf32>
      tpu.vector_store %arg6[%c0_14, %c0_15], %15 {strides = array<i32>} : memref<32x32xf32, #tpu.memory_space<vmem>>, vector<32x32xf32>,
    } else {
    }
    return
  }
  func.func @transform_0(%arg0: i32, %arg1: i32, %arg2: i32) -> (i32, i32) {
    %c0_i32 = arith.constant 0 : i32
    return %arg0, %arg2 : i32, i32
  }
  func.func @transform_1(%arg0: i32, %arg1: i32, %arg2: i32) -> (i32, i32) {
    %c0_i32 = arith.constant 0 : i32
    return %arg2, %arg1 : i32, i32
  }
  func.func @transform_2(%arg0: i32, %arg1: i32, %arg2: i32) -> (i32, i32) {
    %c0_i32 = arith.constant 0 : i32
    %c0_i32_0 = arith.constant 0 : i32
    return %c0_i32, %arg1 : i32, i32
  }
  func.func @transform_3(%arg0: i32, %arg1: i32, %arg2: i32) -> (i32, i32) {
    %c0_i32 = arith.constant 0 : i32
    return %arg0, %arg1 : i32, i32
  }
}

module attributes {stable_mosaic.version = 11 : i64} {
  func.func @_conv_plain_kernel(%arg0: i32, %arg1: memref<1x44x16xbf16, #tpu.memory_space<vmem>>, %arg2: memref<144x128xbf16, #tpu.memory_space<vmem>>, %arg3: memref<1x128xf32, #tpu.memory_space<vmem>>, %arg4: memref<1x24x128xbf16, #tpu.memory_space<vmem>>) attributes {dimension_semantics = [#tpu.dimension_semantics<parallel>], iteration_bounds = array<i64: 2>, scalar_prefetch = 0 : i64, scratch_operands = 0 : i64, tpu.core_type = #tpu.core_type<tc>, window_params = [{transform_indices = @transform_0, window_bounds = array<i64: 1, 44, 16>}, {pipeline_mode = #tpu.pipeline_mode<synchronous>, transform_indices = @transform_1, window_bounds = array<i64: 144, 128>}, {pipeline_mode = #tpu.pipeline_mode<synchronous>, transform_indices = @transform_2, window_bounds = array<i64: 1, 128>}, {transform_indices = @transform_3, window_bounds = array<i64: 1, 24, 128>}]} {
    %cst = arith.constant 0.000000e+00 : f32
    %0 = vector.broadcast %cst : f32 to vector<24x128xf32>
    %c0 = arith.constant 0 : index
    %c0_0 = arith.constant 0 : index
    %c0_1 = arith.constant 0 : index
    %1 = vector.load %arg1[%c0, %c0_0, %c0_1] : memref<1x44x16xbf16, #tpu.memory_space<vmem>>, vector<1x24x16xbf16>
    %2 = vector.shape_cast %1 : vector<1x24x16xbf16> to vector<24x16xbf16>
    %c0_2 = arith.constant 0 : index
    %c0_3 = arith.constant 0 : index
    %3 = vector.load %arg2[%c0_2, %c0_3] : memref<144x128xbf16, #tpu.memory_space<vmem>>, vector<16x128xbf16>
    %cst_4 = arith.constant dense<0.000000e+00> : vector<24x128xf32>
    %4 = tpu.matmul %2, %3, %cst_4 {dimension_numbers = #tpu.dot_dimension_numbers<[1], [0], [0], [1], [0, 0, 1, 1], [], []>} : vector<24x16xbf16>, vector<16x128xbf16>, vector<24x128xf32> -> vector<24x128xf32>
    %5 = arith.addf %0, %4 : vector<24x128xf32>
    %c0_5 = arith.constant 0 : index
    %c1 = arith.constant 1 : index
    %c0_6 = arith.constant 0 : index
    %6 = vector.load %arg1[%c0_5, %c1, %c0_6] : memref<1x44x16xbf16, #tpu.memory_space<vmem>>, vector<1x24x16xbf16>
    %7 = vector.shape_cast %6 : vector<1x24x16xbf16> to vector<24x16xbf16>
    %c16 = arith.constant 16 : index
    %c0_7 = arith.constant 0 : index
    %8 = vector.load %arg2[%c16, %c0_7] : memref<144x128xbf16, #tpu.memory_space<vmem>>, vector<16x128xbf16>
    %cst_8 = arith.constant dense<0.000000e+00> : vector<24x128xf32>
    %9 = tpu.matmul %7, %8, %cst_8 {dimension_numbers = #tpu.dot_dimension_numbers<[1], [0], [0], [1], [0, 0, 1, 1], [], []>} : vector<24x16xbf16>, vector<16x128xbf16>, vector<24x128xf32> -> vector<24x128xf32>
    %10 = arith.addf %5, %9 : vector<24x128xf32>
    %c0_9 = arith.constant 0 : index
    %c2 = arith.constant 2 : index
    %c0_10 = arith.constant 0 : index
    %11 = vector.load %arg1[%c0_9, %c2, %c0_10] : memref<1x44x16xbf16, #tpu.memory_space<vmem>>, vector<1x24x16xbf16>
    %12 = vector.shape_cast %11 : vector<1x24x16xbf16> to vector<24x16xbf16>
    %c32 = arith.constant 32 : index
    %c0_11 = arith.constant 0 : index
    %13 = vector.load %arg2[%c32, %c0_11] : memref<144x128xbf16, #tpu.memory_space<vmem>>, vector<16x128xbf16>
    %cst_12 = arith.constant dense<0.000000e+00> : vector<24x128xf32>
    %14 = tpu.matmul %12, %13, %cst_12 {dimension_numbers = #tpu.dot_dimension_numbers<[1], [0], [0], [1], [0, 0, 1, 1], [], []>} : vector<24x16xbf16>, vector<16x128xbf16>, vector<24x128xf32> -> vector<24x128xf32>
    %15 = arith.addf %10, %14 : vector<24x128xf32>
    %c0_13 = arith.constant 0 : index
    %c6 = arith.constant 6 : index
    %c0_14 = arith.constant 0 : index
    %16 = vector.load %arg1[%c0_13, %c6, %c0_14] : memref<1x44x16xbf16, #tpu.memory_space<vmem>>, vector<1x24x16xbf16>
    %17 = vector.shape_cast %16 : vector<1x24x16xbf16> to vector<24x16xbf16>
    %c48 = arith.constant 48 : index
    %c0_15 = arith.constant 0 : index
    %18 = vector.load %arg2[%c48, %c0_15] : memref<144x128xbf16, #tpu.memory_space<vmem>>, vector<16x128xbf16>
    %cst_16 = arith.constant dense<0.000000e+00> : vector<24x128xf32>
    %19 = tpu.matmul %17, %18, %cst_16 {dimension_numbers = #tpu.dot_dimension_numbers<[1], [0], [0], [1], [0, 0, 1, 1], [], []>} : vector<24x16xbf16>, vector<16x128xbf16>, vector<24x128xf32> -> vector<24x128xf32>
    %20 = arith.addf %15, %19 : vector<24x128xf32>
    %c0_17 = arith.constant 0 : index
    %c7 = arith.constant 7 : index
    %c0_18 = arith.constant 0 : index
    %21 = vector.load %arg1[%c0_17, %c7, %c0_18] : memref<1x44x16xbf16, #tpu.memory_space<vmem>>, vector<1x24x16xbf16>
    %22 = vector.shape_cast %21 : vector<1x24x16xbf16> to vector<24x16xbf16>
    %c64 = arith.constant 64 : index
    %c0_19 = arith.constant 0 : index
    %23 = vector.load %arg2[%c64, %c0_19] : memref<144x128xbf16, #tpu.memory_space<vmem>>, vector<16x128xbf16>
    %cst_20 = arith.constant dense<0.000000e+00> : vector<24x128xf32>
    %24 = tpu.matmul %22, %23, %cst_20 {dimension_numbers = #tpu.dot_dimension_numbers<[1], [0], [0], [1], [0, 0, 1, 1], [], []>} : vector<24x16xbf16>, vector<16x128xbf16>, vector<24x128xf32> -> vector<24x128xf32>
    %25 = arith.addf %20, %24 : vector<24x128xf32>
    %c0_21 = arith.constant 0 : index
    %c8 = arith.constant 8 : index
    %c0_22 = arith.constant 0 : index
    %26 = vector.load %arg1[%c0_21, %c8, %c0_22] : memref<1x44x16xbf16, #tpu.memory_space<vmem>>, vector<1x24x16xbf16>
    %27 = vector.shape_cast %26 : vector<1x24x16xbf16> to vector<24x16xbf16>
    %c80 = arith.constant 80 : index
    %c0_23 = arith.constant 0 : index
    %28 = vector.load %arg2[%c80, %c0_23] : memref<144x128xbf16, #tpu.memory_space<vmem>>, vector<16x128xbf16>
    %cst_24 = arith.constant dense<0.000000e+00> : vector<24x128xf32>
    %29 = tpu.matmul %27, %28, %cst_24 {dimension_numbers = #tpu.dot_dimension_numbers<[1], [0], [0], [1], [0, 0, 1, 1], [], []>} : vector<24x16xbf16>, vector<16x128xbf16>, vector<24x128xf32> -> vector<24x128xf32>
    %30 = arith.addf %25, %29 : vector<24x128xf32>
    %c0_25 = arith.constant 0 : index
    %c12 = arith.constant 12 : index
    %c0_26 = arith.constant 0 : index
    %31 = vector.load %arg1[%c0_25, %c12, %c0_26] : memref<1x44x16xbf16, #tpu.memory_space<vmem>>, vector<1x24x16xbf16>
    %32 = vector.shape_cast %31 : vector<1x24x16xbf16> to vector<24x16xbf16>
    %c96 = arith.constant 96 : index
    %c0_27 = arith.constant 0 : index
    %33 = vector.load %arg2[%c96, %c0_27] : memref<144x128xbf16, #tpu.memory_space<vmem>>, vector<16x128xbf16>
    %cst_28 = arith.constant dense<0.000000e+00> : vector<24x128xf32>
    %34 = tpu.matmul %32, %33, %cst_28 {dimension_numbers = #tpu.dot_dimension_numbers<[1], [0], [0], [1], [0, 0, 1, 1], [], []>} : vector<24x16xbf16>, vector<16x128xbf16>, vector<24x128xf32> -> vector<24x128xf32>
    %35 = arith.addf %30, %34 : vector<24x128xf32>
    %c0_29 = arith.constant 0 : index
    %c13 = arith.constant 13 : index
    %c0_30 = arith.constant 0 : index
    %36 = vector.load %arg1[%c0_29, %c13, %c0_30] : memref<1x44x16xbf16, #tpu.memory_space<vmem>>, vector<1x24x16xbf16>
    %37 = vector.shape_cast %36 : vector<1x24x16xbf16> to vector<24x16xbf16>
    %c112 = arith.constant 112 : index
    %c0_31 = arith.constant 0 : index
    %38 = vector.load %arg2[%c112, %c0_31] : memref<144x128xbf16, #tpu.memory_space<vmem>>, vector<16x128xbf16>
    %cst_32 = arith.constant dense<0.000000e+00> : vector<24x128xf32>
    %39 = tpu.matmul %37, %38, %cst_32 {dimension_numbers = #tpu.dot_dimension_numbers<[1], [0], [0], [1], [0, 0, 1, 1], [], []>} : vector<24x16xbf16>, vector<16x128xbf16>, vector<24x128xf32> -> vector<24x128xf32>
    %40 = arith.addf %35, %39 : vector<24x128xf32>
    %c0_33 = arith.constant 0 : index
    %c14 = arith.constant 14 : index
    %c0_34 = arith.constant 0 : index
    %41 = vector.load %arg1[%c0_33, %c14, %c0_34] : memref<1x44x16xbf16, #tpu.memory_space<vmem>>, vector<1x24x16xbf16>
    %42 = vector.shape_cast %41 : vector<1x24x16xbf16> to vector<24x16xbf16>
    %c128 = arith.constant 128 : index
    %c0_35 = arith.constant 0 : index
    %43 = vector.load %arg2[%c128, %c0_35] : memref<144x128xbf16, #tpu.memory_space<vmem>>, vector<16x128xbf16>
    %cst_36 = arith.constant dense<0.000000e+00> : vector<24x128xf32>
    %44 = tpu.matmul %42, %43, %cst_36 {dimension_numbers = #tpu.dot_dimension_numbers<[1], [0], [0], [1], [0, 0, 1, 1], [], []>} : vector<24x16xbf16>, vector<16x128xbf16>, vector<24x128xf32> -> vector<24x128xf32>
    %45 = arith.addf %40, %44 : vector<24x128xf32>
    %c0_37 = arith.constant 0 : index
    %c0_38 = arith.constant 0 : index
    %46 = vector.load %arg3[%c0_37, %c0_38] : memref<1x128xf32, #tpu.memory_space<vmem>>, vector<1x128xf32>
    %47 = vector.broadcast %46 : vector<1x128xf32> to vector<24x128xf32>
    %48 = arith.addf %45, %47 : vector<24x128xf32>
    %49 = arith.truncf %48 : vector<24x128xf32> to vector<24x128xbf16>
    %c0_39 = arith.constant 0 : index
    %c0_40 = arith.constant 0 : index
    %c0_41 = arith.constant 0 : index
    %50 = vector.load %arg4[%c0_39, %c0_40, %c0_41] : memref<1x24x128xbf16, #tpu.memory_space<vmem>>, vector<1x24x128xbf16>
    %51 = vector.shape_cast %50 : vector<1x24x128xbf16> to vector<24x128xbf16>
    %52 = vector.shape_cast %49 : vector<24x128xbf16> to vector<1x24x128xbf16>
    tpu.vector_store %arg4[%c0_39, %c0_40, %c0_41], %52 {strides = array<i32>} : memref<1x24x128xbf16, #tpu.memory_space<vmem>>, vector<1x24x128xbf16>,
    return
  }
  func.func @transform_0(%arg0: i32) -> (i32, i32, i32) {
    %c0_i32 = arith.constant 0 : i32
    %c0_i32_0 = arith.constant 0 : i32
    %c0_i32_1 = arith.constant 0 : i32
    return %arg0, %c0_i32, %c0_i32_0 : i32, i32, i32
  }
  func.func @transform_1(%arg0: i32) -> (i32, i32) {
    %c0_i32 = arith.constant 0 : i32
    %c0_i32_0 = arith.constant 0 : i32
    %c0_i32_1 = arith.constant 0 : i32
    return %c0_i32, %c0_i32_0 : i32, i32
  }
  func.func @transform_2(%arg0: i32) -> (i32, i32) {
    %c0_i32 = arith.constant 0 : i32
    %c0_i32_0 = arith.constant 0 : i32
    %c0_i32_1 = arith.constant 0 : i32
    return %c0_i32, %c0_i32_0 : i32, i32
  }
  func.func @transform_3(%arg0: i32) -> (i32, i32, i32) {
    %c0_i32 = arith.constant 0 : i32
    %c0_i32_0 = arith.constant 0 : i32
    %c0_i32_1 = arith.constant 0 : i32
    return %arg0, %c0_i32, %c0_i32_0 : i32, i32, i32
  }
}

module attributes {stable_mosaic.version = 11 : i64} {
  func.func @_actnorm_relu_kernel(%arg0: i32, %arg1: memref<32x128xbf16, #tpu.memory_space<vmem>>, %arg2: memref<32x128xbf16, #tpu.memory_space<vmem>>) attributes {dimension_semantics = [#tpu.dimension_semantics<arbitrary>], iteration_bounds = array<i64: 1>, scalar_prefetch = 0 : i64, scratch_operands = 0 : i64, tpu.core_type = #tpu.core_type<tc>, window_params = [{pipeline_mode = #tpu.pipeline_mode<synchronous>, transform_indices = @transform_0, window_bounds = array<i64: 32, 128>}, {pipeline_mode = #tpu.pipeline_mode<synchronous>, transform_indices = @transform_1, window_bounds = array<i64: 32, 128>}]} {
    %c0 = arith.constant 0 : index
    %c0_0 = arith.constant 0 : index
    %0 = vector.load %arg1[%c0, %c0_0] : memref<32x128xbf16, #tpu.memory_space<vmem>>, vector<32x128xbf16>
    %1 = arith.extf %0 : vector<32x128xbf16> to vector<32x128xf32>
    %cst = arith.constant dense<0.000000e+00> : vector<128xf32>
    %2 = vector.multi_reduction <add>, %1, %cst [0] : vector<32x128xf32> to vector<128xf32>
    %3 = vector.shape_cast %2 : vector<128xf32> to vector<1x128xf32>
    %cst_1 = arith.constant 3.125000e-02 : f32
    %4 = vector.broadcast %cst_1 : f32 to vector<1x128xf32>
    %5 = arith.mulf %3, %4 : vector<1x128xf32>
    %6 = arith.mulf %1, %1 : vector<32x128xf32>
    %cst_2 = arith.constant dense<0.000000e+00> : vector<128xf32>
    %7 = vector.multi_reduction <add>, %6, %cst_2 [0] : vector<32x128xf32> to vector<128xf32>
    %8 = vector.shape_cast %7 : vector<128xf32> to vector<1x128xf32>
    %cst_3 = arith.constant 3.125000e-02 : f32
    %9 = vector.broadcast %cst_3 : f32 to vector<1x128xf32>
    %10 = arith.mulf %8, %9 : vector<1x128xf32>
    %11 = arith.mulf %5, %5 : vector<1x128xf32>
    %12 = arith.subf %10, %11 : vector<1x128xf32>
    %cst_4 = arith.constant 0.000000e+00 : f32
    %13 = vector.broadcast %cst_4 : f32 to vector<1x128xf32>
    %14 = arith.maximumf %12, %13 : vector<1x128xf32>
    %15 = math.sqrt %14 : vector<1x128xf32>
    %cst_5 = arith.constant 9.99999997E-7 : f32
    %16 = vector.broadcast %cst_5 : f32 to vector<1x128xf32>
    %17 = arith.addf %15, %16 : vector<1x128xf32>
    %18 = vector.broadcast %5 : vector<1x128xf32> to vector<32x128xf32>
    %19 = arith.subf %1, %18 : vector<32x128xf32>
    %20 = vector.broadcast %17 : vector<1x128xf32> to vector<32x128xf32>
    %21 = arith.divf %19, %20 : vector<32x128xf32>
    %cst_6 = arith.constant 0.000000e+00 : f32
    %22 = vector.broadcast %cst_6 : f32 to vector<32x128xf32>
    %23 = arith.maximumf %21, %22 : vector<32x128xf32>
    %24 = arith.truncf %23 : vector<32x128xf32> to vector<32x128xbf16>
    %c0_7 = arith.constant 0 : index
    %c0_8 = arith.constant 0 : index
    %25 = vector.load %arg2[%c0_7, %c0_8] : memref<32x128xbf16, #tpu.memory_space<vmem>>, vector<32x128xbf16>
    tpu.vector_store %arg2[%c0_7, %c0_8], %24 {strides = array<i32>} : memref<32x128xbf16, #tpu.memory_space<vmem>>, vector<32x128xbf16>,
    return
  }
  func.func @transform_0(%arg0: i32) -> (i32, i32) {
    %c0_i32 = arith.constant 0 : i32
    %c0_i32_0 = arith.constant 0 : i32
    %c0_i32_1 = arith.constant 0 : i32
    return %c0_i32, %c0_i32_0 : i32, i32
  }
  func.func @transform_1(%arg0: i32) -> (i32, i32) {
    %c0_i32 = arith.constant 0 : i32
    %c0_i32_0 = arith.constant 0 : i32
    %c0_i32_1 = arith.constant 0 : i32
    return %c0_i32, %c0_i32_0 : i32, i32
  }
}

module attributes {stable_mosaic.version = 11 : i64} {
  func.func @_mm_kernel(%arg0: i32, %arg1: i32, %arg2: i32, %arg3: memref<32x128xbf16, #tpu.memory_space<vmem>>, %arg4: memref<128x128xbf16, #tpu.memory_space<vmem>>, %arg5: memref<1x128xf32, #tpu.memory_space<vmem>>, %arg6: memref<32x128xbf16, #tpu.memory_space<vmem>>, %arg7: memref<32x128xf32, #tpu.memory_space<vmem>>) attributes {dimension_semantics = [#tpu.dimension_semantics<parallel>, #tpu.dimension_semantics<parallel>, #tpu.dimension_semantics<arbitrary>], iteration_bounds = array<i64: 1, 1, 1>, scalar_prefetch = 0 : i64, scratch_operands = 1 : i64, tpu.core_type = #tpu.core_type<tc>, window_params = [{transform_indices = @transform_0, window_bounds = array<i64: 32, 128>}, {transform_indices = @transform_1, window_bounds = array<i64: 128, 128>}, {transform_indices = @transform_2, window_bounds = array<i64: 1, 128>}, {transform_indices = @transform_3, window_bounds = array<i64: 32, 128>}]} {
    %c0_i32 = arith.constant 0 : i32
    %0 = arith.cmpi eq, %arg2, %c0_i32 : i32
    %1 = arith.extui %0 : i1 to i32
    %c0_i32_0 = arith.constant 0 : i32
    %2 = arith.cmpi ne, %1, %c0_i32_0 : i32
    scf.if %2 {
      %cst_10 = arith.constant 0.000000e+00 : f32
      %12 = vector.broadcast %cst_10 : f32 to vector<32x128xf32>
      %c0_11 = arith.constant 0 : index
      %c0_12 = arith.constant 0 : index
      %13 = vector.load %arg7[%c0_11, %c0_12] : memref<32x128xf32, #tpu.memory_space<vmem>>, vector<32x128xf32>
      tpu.vector_store %arg7[%c0_11, %c0_12], %12 {strides = array<i32>} : memref<32x128xf32, #tpu.memory_space<vmem>>, vector<32x128xf32>,
    } else {
    }
    %c0 = arith.constant 0 : index
    %c0_1 = arith.constant 0 : index
    %3 = vector.load %arg7[%c0, %c0_1] : memref<32x128xf32, #tpu.memory_space<vmem>>, vector<32x128xf32>
    %c0_2 = arith.constant 0 : index
    %c0_3 = arith.constant 0 : index
    %4 = vector.load %arg3[%c0_2, %c0_3] : memref<32x128xbf16, #tpu.memory_space<vmem>>, vector<32x128xbf16>
    %c0_4 = arith.constant 0 : index
    %c0_5 = arith.constant 0 : index
    %5 = vector.load %arg4[%c0_4, %c0_5] : memref<128x128xbf16, #tpu.memory_space<vmem>>, vector<128x128xbf16>
    %cst = arith.constant dense<0.000000e+00> : vector<32x128xf32>
    %6 = tpu.matmul %4, %5, %cst {dimension_numbers = #tpu.dot_dimension_numbers<[1], [0], [0], [1], [0, 0, 1, 1], [], []>} : vector<32x128xbf16>, vector<128x128xbf16>, vector<32x128xf32> -> vector<32x128xf32>
    %7 = arith.addf %3, %6 : vector<32x128xf32>
    %c0_6 = arith.constant 0 : index
    %c0_7 = arith.constant 0 : index
    %8 = vector.load %arg7[%c0_6, %c0_7] : memref<32x128xf32, #tpu.memory_space<vmem>>, vector<32x128xf32>
    tpu.vector_store %arg7[%c0_6, %c0_7], %7 {strides = array<i32>} : memref<32x128xf32, #tpu.memory_space<vmem>>, vector<32x128xf32>,
    %c0_i32_8 = arith.constant 0 : i32
    %9 = arith.cmpi eq, %arg2, %c0_i32_8 : i32
    %10 = arith.extui %9 : i1 to i32
    %c0_i32_9 = arith.constant 0 : i32
    %11 = arith.cmpi ne, %10, %c0_i32_9 : i32
    scf.if %11 {
      %c0_10 = arith.constant 0 : index
      %c0_11 = arith.constant 0 : index
      %12 = vector.load %arg7[%c0_10, %c0_11] : memref<32x128xf32, #tpu.memory_space<vmem>>, vector<32x128xf32>
      %c0_12 = arith.constant 0 : index
      %c0_13 = arith.constant 0 : index
      %13 = vector.load %arg5[%c0_12, %c0_13] : memref<1x128xf32, #tpu.memory_space<vmem>>, vector<1x128xf32>
      %14 = vector.broadcast %13 : vector<1x128xf32> to vector<32x128xf32>
      %15 = arith.addf %12, %14 : vector<32x128xf32>
      %16 = arith.truncf %15 : vector<32x128xf32> to vector<32x128xbf16>
      %c0_14 = arith.constant 0 : index
      %c0_15 = arith.constant 0 : index
      %17 = vector.load %arg6[%c0_14, %c0_15] : memref<32x128xbf16, #tpu.memory_space<vmem>>, vector<32x128xbf16>
      tpu.vector_store %arg6[%c0_14, %c0_15], %16 {strides = array<i32>} : memref<32x128xbf16, #tpu.memory_space<vmem>>, vector<32x128xbf16>,
    } else {
    }
    return
  }
  func.func @transform_0(%arg0: i32, %arg1: i32, %arg2: i32) -> (i32, i32) {
    %c0_i32 = arith.constant 0 : i32
    return %arg0, %arg2 : i32, i32
  }
  func.func @transform_1(%arg0: i32, %arg1: i32, %arg2: i32) -> (i32, i32) {
    %c0_i32 = arith.constant 0 : i32
    return %arg2, %arg1 : i32, i32
  }
  func.func @transform_2(%arg0: i32, %arg1: i32, %arg2: i32) -> (i32, i32) {
    %c0_i32 = arith.constant 0 : i32
    %c0_i32_0 = arith.constant 0 : i32
    return %c0_i32, %arg1 : i32, i32
  }
  func.func @transform_3(%arg0: i32, %arg1: i32, %arg2: i32) -> (i32, i32) {
    %c0_i32 = arith.constant 0 : i32
    return %arg0, %arg1 : i32, i32
  }
}

module attributes {stable_mosaic.version = 11 : i64} {
  func.func @_actnorm_relu_kernel(%arg0: i32, %arg1: memref<72x128xbf16, #tpu.memory_space<vmem>>, %arg2: memref<72x128xbf16, #tpu.memory_space<vmem>>) attributes {dimension_semantics = [#tpu.dimension_semantics<arbitrary>], iteration_bounds = array<i64: 1>, scalar_prefetch = 0 : i64, scratch_operands = 0 : i64, tpu.core_type = #tpu.core_type<tc>, window_params = [{pipeline_mode = #tpu.pipeline_mode<synchronous>, transform_indices = @transform_0, window_bounds = array<i64: 72, 128>}, {pipeline_mode = #tpu.pipeline_mode<synchronous>, transform_indices = @transform_1, window_bounds = array<i64: 72, 128>}]} {
    %c0 = arith.constant 0 : index
    %c0_0 = arith.constant 0 : index
    %0 = vector.load %arg1[%c0, %c0_0] : memref<72x128xbf16, #tpu.memory_space<vmem>>, vector<72x128xbf16>
    %1 = arith.extf %0 : vector<72x128xbf16> to vector<72x128xf32>
    %cst = arith.constant dense<0.000000e+00> : vector<128xf32>
    %2 = vector.multi_reduction <add>, %1, %cst [0] : vector<72x128xf32> to vector<128xf32>
    %3 = vector.shape_cast %2 : vector<128xf32> to vector<1x128xf32>
    %cst_1 = arith.constant 0.013888889 : f32
    %4 = vector.broadcast %cst_1 : f32 to vector<1x128xf32>
    %5 = arith.mulf %3, %4 : vector<1x128xf32>
    %6 = arith.mulf %1, %1 : vector<72x128xf32>
    %cst_2 = arith.constant dense<0.000000e+00> : vector<128xf32>
    %7 = vector.multi_reduction <add>, %6, %cst_2 [0] : vector<72x128xf32> to vector<128xf32>
    %8 = vector.shape_cast %7 : vector<128xf32> to vector<1x128xf32>
    %cst_3 = arith.constant 0.013888889 : f32
    %9 = vector.broadcast %cst_3 : f32 to vector<1x128xf32>
    %10 = arith.mulf %8, %9 : vector<1x128xf32>
    %11 = arith.mulf %5, %5 : vector<1x128xf32>
    %12 = arith.subf %10, %11 : vector<1x128xf32>
    %cst_4 = arith.constant 0.000000e+00 : f32
    %13 = vector.broadcast %cst_4 : f32 to vector<1x128xf32>
    %14 = arith.maximumf %12, %13 : vector<1x128xf32>
    %15 = math.sqrt %14 : vector<1x128xf32>
    %cst_5 = arith.constant 9.99999997E-7 : f32
    %16 = vector.broadcast %cst_5 : f32 to vector<1x128xf32>
    %17 = arith.addf %15, %16 : vector<1x128xf32>
    %18 = vector.broadcast %5 : vector<1x128xf32> to vector<72x128xf32>
    %19 = arith.subf %1, %18 : vector<72x128xf32>
    %20 = vector.broadcast %17 : vector<1x128xf32> to vector<72x128xf32>
    %21 = arith.divf %19, %20 : vector<72x128xf32>
    %cst_6 = arith.constant 0.000000e+00 : f32
    %22 = vector.broadcast %cst_6 : f32 to vector<72x128xf32>
    %23 = arith.maximumf %21, %22 : vector<72x128xf32>
    %24 = arith.truncf %23 : vector<72x128xf32> to vector<72x128xbf16>
    %c0_7 = arith.constant 0 : index
    %c0_8 = arith.constant 0 : index
    %25 = vector.load %arg2[%c0_7, %c0_8] : memref<72x128xbf16, #tpu.memory_space<vmem>>, vector<72x128xbf16>
    tpu.vector_store %arg2[%c0_7, %c0_8], %24 {strides = array<i32>} : memref<72x128xbf16, #tpu.memory_space<vmem>>, vector<72x128xbf16>,
    return
  }
  func.func @transform_0(%arg0: i32) -> (i32, i32) {
    %c0_i32 = arith.constant 0 : i32
    %c0_i32_0 = arith.constant 0 : i32
    %c0_i32_1 = arith.constant 0 : i32
    return %c0_i32, %c0_i32_0 : i32, i32
  }
  func.func @transform_1(%arg0: i32) -> (i32, i32) {
    %c0_i32 = arith.constant 0 : i32
    %c0_i32_0 = arith.constant 0 : i32
    %c0_i32_1 = arith.constant 0 : i32
    return %c0_i32, %c0_i32_0 : i32, i32
  }
}

module attributes {stable_mosaic.version = 11 : i64} {
  func.func @_conv_coupling_kernel(%arg0: i32, %arg1: memref<1x44x128xbf16, #tpu.memory_space<vmem>>, %arg2: memref<1152x32xbf16, #tpu.memory_space<vmem>>, %arg3: memref<1x32xf32, #tpu.memory_space<vmem>>, %arg4: memref<1x32xf32, #tpu.memory_space<vmem>>, %arg5: memref<1x24x16xf32, #tpu.memory_space<vmem>>, %arg6: memref<1x24x16xf32, #tpu.memory_space<vmem>>, %arg7: memref<1x1x1xf32, #tpu.memory_space<vmem>>) attributes {dimension_semantics = [#tpu.dimension_semantics<parallel>], iteration_bounds = array<i64: 2>, scalar_prefetch = 0 : i64, scratch_operands = 0 : i64, tpu.core_type = #tpu.core_type<tc>, window_params = [{transform_indices = @transform_0, window_bounds = array<i64: 1, 44, 128>}, {pipeline_mode = #tpu.pipeline_mode<synchronous>, transform_indices = @transform_1, window_bounds = array<i64: 1152, 32>}, {pipeline_mode = #tpu.pipeline_mode<synchronous>, transform_indices = @transform_2, window_bounds = array<i64: 1, 32>}, {pipeline_mode = #tpu.pipeline_mode<synchronous>, transform_indices = @transform_3, window_bounds = array<i64: 1, 32>}, {transform_indices = @transform_4, window_bounds = array<i64: 1, 24, 16>}, {transform_indices = @transform_5, window_bounds = array<i64: 1, 24, 16>}, {transform_indices = @transform_6, window_bounds = array<i64: 1, 1, 1>}]} {
    %cst = arith.constant 0.000000e+00 : f32
    %0 = vector.broadcast %cst : f32 to vector<24x32xf32>
    %c0 = arith.constant 0 : index
    %c0_0 = arith.constant 0 : index
    %c0_1 = arith.constant 0 : index
    %1 = vector.load %arg1[%c0, %c0_0, %c0_1] : memref<1x44x128xbf16, #tpu.memory_space<vmem>>, vector<1x24x128xbf16>
    %2 = vector.shape_cast %1 : vector<1x24x128xbf16> to vector<24x128xbf16>
    %c0_2 = arith.constant 0 : index
    %c0_3 = arith.constant 0 : index
    %3 = vector.load %arg2[%c0_2, %c0_3] : memref<1152x32xbf16, #tpu.memory_space<vmem>>, vector<128x32xbf16>
    %cst_4 = arith.constant dense<0.000000e+00> : vector<24x32xf32>
    %4 = tpu.matmul %2, %3, %cst_4 {dimension_numbers = #tpu.dot_dimension_numbers<[1], [0], [0], [1], [0, 0, 1, 1], [], []>} : vector<24x128xbf16>, vector<128x32xbf16>, vector<24x32xf32> -> vector<24x32xf32>
    %5 = arith.addf %0, %4 : vector<24x32xf32>
    %c0_5 = arith.constant 0 : index
    %c1 = arith.constant 1 : index
    %c0_6 = arith.constant 0 : index
    %6 = vector.load %arg1[%c0_5, %c1, %c0_6] : memref<1x44x128xbf16, #tpu.memory_space<vmem>>, vector<1x24x128xbf16>
    %7 = vector.shape_cast %6 : vector<1x24x128xbf16> to vector<24x128xbf16>
    %c128 = arith.constant 128 : index
    %c0_7 = arith.constant 0 : index
    %8 = vector.load %arg2[%c128, %c0_7] : memref<1152x32xbf16, #tpu.memory_space<vmem>>, vector<128x32xbf16>
    %cst_8 = arith.constant dense<0.000000e+00> : vector<24x32xf32>
    %9 = tpu.matmul %7, %8, %cst_8 {dimension_numbers = #tpu.dot_dimension_numbers<[1], [0], [0], [1], [0, 0, 1, 1], [], []>} : vector<24x128xbf16>, vector<128x32xbf16>, vector<24x32xf32> -> vector<24x32xf32>
    %10 = arith.addf %5, %9 : vector<24x32xf32>
    %c0_9 = arith.constant 0 : index
    %c2 = arith.constant 2 : index
    %c0_10 = arith.constant 0 : index
    %11 = vector.load %arg1[%c0_9, %c2, %c0_10] : memref<1x44x128xbf16, #tpu.memory_space<vmem>>, vector<1x24x128xbf16>
    %12 = vector.shape_cast %11 : vector<1x24x128xbf16> to vector<24x128xbf16>
    %c256 = arith.constant 256 : index
    %c0_11 = arith.constant 0 : index
    %13 = vector.load %arg2[%c256, %c0_11] : memref<1152x32xbf16, #tpu.memory_space<vmem>>, vector<128x32xbf16>
    %cst_12 = arith.constant dense<0.000000e+00> : vector<24x32xf32>
    %14 = tpu.matmul %12, %13, %cst_12 {dimension_numbers = #tpu.dot_dimension_numbers<[1], [0], [0], [1], [0, 0, 1, 1], [], []>} : vector<24x128xbf16>, vector<128x32xbf16>, vector<24x32xf32> -> vector<24x32xf32>
    %15 = arith.addf %10, %14 : vector<24x32xf32>
    %c0_13 = arith.constant 0 : index
    %c6 = arith.constant 6 : index
    %c0_14 = arith.constant 0 : index
    %16 = vector.load %arg1[%c0_13, %c6, %c0_14] : memref<1x44x128xbf16, #tpu.memory_space<vmem>>, vector<1x24x128xbf16>
    %17 = vector.shape_cast %16 : vector<1x24x128xbf16> to vector<24x128xbf16>
    %c384 = arith.constant 384 : index
    %c0_15 = arith.constant 0 : index
    %18 = vector.load %arg2[%c384, %c0_15] : memref<1152x32xbf16, #tpu.memory_space<vmem>>, vector<128x32xbf16>
    %cst_16 = arith.constant dense<0.000000e+00> : vector<24x32xf32>
    %19 = tpu.matmul %17, %18, %cst_16 {dimension_numbers = #tpu.dot_dimension_numbers<[1], [0], [0], [1], [0, 0, 1, 1], [], []>} : vector<24x128xbf16>, vector<128x32xbf16>, vector<24x32xf32> -> vector<24x32xf32>
    %20 = arith.addf %15, %19 : vector<24x32xf32>
    %c0_17 = arith.constant 0 : index
    %c7 = arith.constant 7 : index
    %c0_18 = arith.constant 0 : index
    %21 = vector.load %arg1[%c0_17, %c7, %c0_18] : memref<1x44x128xbf16, #tpu.memory_space<vmem>>, vector<1x24x128xbf16>
    %22 = vector.shape_cast %21 : vector<1x24x128xbf16> to vector<24x128xbf16>
    %c512 = arith.constant 512 : index
    %c0_19 = arith.constant 0 : index
    %23 = vector.load %arg2[%c512, %c0_19] : memref<1152x32xbf16, #tpu.memory_space<vmem>>, vector<128x32xbf16>
    %cst_20 = arith.constant dense<0.000000e+00> : vector<24x32xf32>
    %24 = tpu.matmul %22, %23, %cst_20 {dimension_numbers = #tpu.dot_dimension_numbers<[1], [0], [0], [1], [0, 0, 1, 1], [], []>} : vector<24x128xbf16>, vector<128x32xbf16>, vector<24x32xf32> -> vector<24x32xf32>
    %25 = arith.addf %20, %24 : vector<24x32xf32>
    %c0_21 = arith.constant 0 : index
    %c8 = arith.constant 8 : index
    %c0_22 = arith.constant 0 : index
    %26 = vector.load %arg1[%c0_21, %c8, %c0_22] : memref<1x44x128xbf16, #tpu.memory_space<vmem>>, vector<1x24x128xbf16>
    %27 = vector.shape_cast %26 : vector<1x24x128xbf16> to vector<24x128xbf16>
    %c640 = arith.constant 640 : index
    %c0_23 = arith.constant 0 : index
    %28 = vector.load %arg2[%c640, %c0_23] : memref<1152x32xbf16, #tpu.memory_space<vmem>>, vector<128x32xbf16>
    %cst_24 = arith.constant dense<0.000000e+00> : vector<24x32xf32>
    %29 = tpu.matmul %27, %28, %cst_24 {dimension_numbers = #tpu.dot_dimension_numbers<[1], [0], [0], [1], [0, 0, 1, 1], [], []>} : vector<24x128xbf16>, vector<128x32xbf16>, vector<24x32xf32> -> vector<24x32xf32>
    %30 = arith.addf %25, %29 : vector<24x32xf32>
    %c0_25 = arith.constant 0 : index
    %c12 = arith.constant 12 : index
    %c0_26 = arith.constant 0 : index
    %31 = vector.load %arg1[%c0_25, %c12, %c0_26] : memref<1x44x128xbf16, #tpu.memory_space<vmem>>, vector<1x24x128xbf16>
    %32 = vector.shape_cast %31 : vector<1x24x128xbf16> to vector<24x128xbf16>
    %c768 = arith.constant 768 : index
    %c0_27 = arith.constant 0 : index
    %33 = vector.load %arg2[%c768, %c0_27] : memref<1152x32xbf16, #tpu.memory_space<vmem>>, vector<128x32xbf16>
    %cst_28 = arith.constant dense<0.000000e+00> : vector<24x32xf32>
    %34 = tpu.matmul %32, %33, %cst_28 {dimension_numbers = #tpu.dot_dimension_numbers<[1], [0], [0], [1], [0, 0, 1, 1], [], []>} : vector<24x128xbf16>, vector<128x32xbf16>, vector<24x32xf32> -> vector<24x32xf32>
    %35 = arith.addf %30, %34 : vector<24x32xf32>
    %c0_29 = arith.constant 0 : index
    %c13 = arith.constant 13 : index
    %c0_30 = arith.constant 0 : index
    %36 = vector.load %arg1[%c0_29, %c13, %c0_30] : memref<1x44x128xbf16, #tpu.memory_space<vmem>>, vector<1x24x128xbf16>
    %37 = vector.shape_cast %36 : vector<1x24x128xbf16> to vector<24x128xbf16>
    %c896 = arith.constant 896 : index
    %c0_31 = arith.constant 0 : index
    %38 = vector.load %arg2[%c896, %c0_31] : memref<1152x32xbf16, #tpu.memory_space<vmem>>, vector<128x32xbf16>
    %cst_32 = arith.constant dense<0.000000e+00> : vector<24x32xf32>
    %39 = tpu.matmul %37, %38, %cst_32 {dimension_numbers = #tpu.dot_dimension_numbers<[1], [0], [0], [1], [0, 0, 1, 1], [], []>} : vector<24x128xbf16>, vector<128x32xbf16>, vector<24x32xf32> -> vector<24x32xf32>
    %40 = arith.addf %35, %39 : vector<24x32xf32>
    %c0_33 = arith.constant 0 : index
    %c14 = arith.constant 14 : index
    %c0_34 = arith.constant 0 : index
    %41 = vector.load %arg1[%c0_33, %c14, %c0_34] : memref<1x44x128xbf16, #tpu.memory_space<vmem>>, vector<1x24x128xbf16>
    %42 = vector.shape_cast %41 : vector<1x24x128xbf16> to vector<24x128xbf16>
    %c1024 = arith.constant 1024 : index
    %c0_35 = arith.constant 0 : index
    %43 = vector.load %arg2[%c1024, %c0_35] : memref<1152x32xbf16, #tpu.memory_space<vmem>>, vector<128x32xbf16>
    %cst_36 = arith.constant dense<0.000000e+00> : vector<24x32xf32>
    %44 = tpu.matmul %42, %43, %cst_36 {dimension_numbers = #tpu.dot_dimension_numbers<[1], [0], [0], [1], [0, 0, 1, 1], [], []>} : vector<24x128xbf16>, vector<128x32xbf16>, vector<24x32xf32> -> vector<24x32xf32>
    %45 = arith.addf %40, %44 : vector<24x32xf32>
    %c0_37 = arith.constant 0 : index
    %c0_38 = arith.constant 0 : index
    %46 = vector.load %arg3[%c0_37, %c0_38] : memref<1x32xf32, #tpu.memory_space<vmem>>, vector<1x32xf32>
    %47 = vector.broadcast %46 : vector<1x32xf32> to vector<24x32xf32>
    %48 = arith.addf %45, %47 : vector<24x32xf32>
    %c0_39 = arith.constant 0 : index
    %c0_40 = arith.constant 0 : index
    %49 = vector.load %arg4[%c0_39, %c0_40] : memref<1x32xf32, #tpu.memory_space<vmem>>, vector<1x32xf32>
    %50 = vector.extract_strided_slice %48 {offsets = [0, 0], sizes = [24, 16], strides = [1, 1]} : vector<24x32xf32> to vector<24x16xf32>
    %51 = vector.extract_strided_slice %49 {offsets = [0, 0], sizes = [1, 16], strides = [1, 1]} : vector<1x32xf32> to vector<1x16xf32>
    %52 = math.exp %51 : vector<1x16xf32>
    %53 = vector.broadcast %52 : vector<1x16xf32> to vector<24x16xf32>
    %54 = arith.mulf %50, %53 : vector<24x16xf32>
    %55 = vector.extract_strided_slice %48 {offsets = [0, 16], sizes = [24, 16], strides = [1, 1]} : vector<24x32xf32> to vector<24x16xf32>
    %56 = vector.extract_strided_slice %49 {offsets = [0, 16], sizes = [1, 16], strides = [1, 1]} : vector<1x32xf32> to vector<1x16xf32>
    %57 = math.exp %56 : vector<1x16xf32>
    %58 = vector.broadcast %57 : vector<1x16xf32> to vector<24x16xf32>
    %59 = arith.mulf %55, %58 : vector<24x16xf32>
    %cst_41 = arith.constant 2.000000e+00 : f32
    %60 = vector.broadcast %cst_41 : f32 to vector<24x16xf32>
    %61 = arith.addf %59, %60 : vector<24x16xf32>
    %62 = arith.negf %61 : vector<24x16xf32>
    %63 = math.exp %62 : vector<24x16xf32>
    %cst_42 = arith.constant 1.000000e+00 : f32
    %64 = vector.broadcast %cst_42 : f32 to vector<24x16xf32>
    %65 = arith.addf %64, %63 : vector<24x16xf32>
    %66 = arith.divf %64, %65 : vector<24x16xf32>
    %c0_43 = arith.constant 0 : index
    %c0_44 = arith.constant 0 : index
    %c0_45 = arith.constant 0 : index
    %67 = vector.load %arg5[%c0_43, %c0_44, %c0_45] : memref<1x24x16xf32, #tpu.memory_space<vmem>>, vector<1x24x16xf32>
    %68 = vector.shape_cast %67 : vector<1x24x16xf32> to vector<24x16xf32>
    %69 = arith.mulf %66, %68 : vector<24x16xf32>
    %70 = arith.addf %69, %54 : vector<24x16xf32>
    %c0_46 = arith.constant 0 : index
    %c0_47 = arith.constant 0 : index
    %c0_48 = arith.constant 0 : index
    %71 = vector.load %arg6[%c0_46, %c0_47, %c0_48] : memref<1x24x16xf32, #tpu.memory_space<vmem>>, vector<1x24x16xf32>
    %72 = vector.shape_cast %71 : vector<1x24x16xf32> to vector<24x16xf32>
    %73 = vector.shape_cast %70 : vector<24x16xf32> to vector<1x24x16xf32>
    tpu.vector_store %arg6[%c0_46, %c0_47, %c0_48], %73 {strides = array<i32>} : memref<1x24x16xf32, #tpu.memory_space<vmem>>, vector<1x24x16xf32>,
    %cst_49 = arith.constant 0.000000e+00 : f32
    %74 = vector.broadcast %cst_49 : f32 to vector<24x16xf32>
    %75 = arith.cmpf ogt, %61, %74 : vector<24x16xf32>
    %cst_50 = arith.constant 0.000000e+00 : f32
    %76 = vector.broadcast %cst_50 : f32 to vector<24x16xf32>
    %77 = arith.subf %76, %61 : vector<24x16xf32>
    %78 = math.exp %77 : vector<24x16xf32>
    %79 = math.log1p %78 : vector<24x16xf32>
    %cst_51 = arith.constant 0.000000e+00 : f32
    %80 = vector.broadcast %cst_51 : f32 to vector<24x16xf32>
    %81 = arith.subf %80, %79 : vector<24x16xf32>
    %82 = math.exp %61 : vector<24x16xf32>
    %83 = math.log1p %82 : vector<24x16xf32>
    %84 = arith.subf %61, %83 : vector<24x16xf32>
    %85 = arith.select %75, %81, %84 : vector<24x16xi1>, vector<24x16xf32>
    %86 = tpu.iota {dimensions = array<i32: 0>} : vector<24x1xi32>
    %c6_i32 = arith.constant 6 : i32
    %c0_i32 = arith.constant 0 : i32
    %87 = arith.cmpi eq, %c6_i32, %c0_i32 : i32
    %c1_i32 = arith.constant 1 : i32
    %88 = arith.select %87, %c1_i32, %c6_i32 : i32
    %89 = vector.broadcast %88 : i32 to vector<24x1xi32>
    %90 = arith.remsi %86, %89 : vector<24x1xi32>
    %c0_i32_52 = arith.constant 0 : i32
    %91 = vector.broadcast %c0_i32_52 : i32 to vector<24x1xi32>
    %92 = arith.cmpi ne, %90, %91 : vector<24x1xi32>
    %c0_i32_53 = arith.constant 0 : i32
    %93 = vector.broadcast %c0_i32_53 : i32 to vector<24x1xi32>
    %94 = arith.cmpi slt, %90, %93 : vector<24x1xi32>
    %c0_i32_54 = arith.constant 0 : i32
    %95 = arith.cmpi slt, %88, %c0_i32_54 : i32
    %96 = vector.broadcast %95 : i1 to vector<24x1xi1>
    %97 = vector.broadcast %96 : vector<24x1xi1> to vector<24x1xi1>
    %98 = arith.xori %94, %97 : vector<24x1xi1>
    %99 = arith.andi %98, %92 : vector<24x1xi1>
    %100 = vector.broadcast %88 : i32 to vector<24x1xi32>
    %101 = arith.addi %90, %100 : vector<24x1xi32>
    %102 = arith.select %99, %101, %90 : vector<24x1xi1>, vector<24x1xi32>
    %c4_i32 = arith.constant 4 : i32
    %103 = vector.broadcast %c4_i32 : i32 to vector<24x1xi32>
    %104 = arith.cmpi slt, %102, %103 : vector<24x1xi32>
    %105 = arith.extui %104 : vector<24x1xi1> to vector<24x1xi32>
    %106 = arith.sitofp %105 : vector<24x1xi32> to vector<24x1xf32>
    %107 = vector.broadcast %106 : vector<24x1xf32> to vector<24x16xf32>
    %108 = arith.mulf %85, %107 : vector<24x16xf32>
    %109 = vector.shape_cast %108 : vector<24x16xf32> to vector<1x24x16xf32>
    %cst_55 = arith.constant dense<0.000000e+00> : vector<1xf32>
    %110 = vector.multi_reduction <add>, %109, %cst_55 [1, 2] : vector<1x24x16xf32> to vector<1xf32>
    %111 = vector.shape_cast %110 : vector<1xf32> to vector<1x1x1xf32>
    %112 = vector.extract %111[0, 0, 0] : f32 from vector<1x1x1xf32>
    %113 = vector.broadcast %112 : f32 to vector<1x1x1xf32>
    %c0_56 = arith.constant 0 : index
    %c0_57 = arith.constant 0 : index
    %c0_58 = arith.constant 0 : index
    %114 = vector.load %arg7[%c0_56, %c0_57, %c0_58] : memref<1x1x1xf32, #tpu.memory_space<vmem>>, vector<1x1x1xf32>
    tpu.vector_store %arg7[%c0_56, %c0_57, %c0_58], %113 {strides = array<i32>} : memref<1x1x1xf32, #tpu.memory_space<vmem>>, vector<1x1x1xf32>,
    return
  }
  func.func @transform_0(%arg0: i32) -> (i32, i32, i32) {
    %c0_i32 = arith.constant 0 : i32
    %c0_i32_0 = arith.constant 0 : i32
    %c0_i32_1 = arith.constant 0 : i32
    return %arg0, %c0_i32, %c0_i32_0 : i32, i32, i32
  }
  func.func @transform_1(%arg0: i32) -> (i32, i32) {
    %c0_i32 = arith.constant 0 : i32
    %c0_i32_0 = arith.constant 0 : i32
    %c0_i32_1 = arith.constant 0 : i32
    return %c0_i32, %c0_i32_0 : i32, i32
  }
  func.func @transform_2(%arg0: i32) -> (i32, i32) {
    %c0_i32 = arith.constant 0 : i32
    %c0_i32_0 = arith.constant 0 : i32
    %c0_i32_1 = arith.constant 0 : i32
    return %c0_i32, %c0_i32_0 : i32, i32
  }
  func.func @transform_3(%arg0: i32) -> (i32, i32) {
    %c0_i32 = arith.constant 0 : i32
    %c0_i32_0 = arith.constant 0 : i32
    %c0_i32_1 = arith.constant 0 : i32
    return %c0_i32, %c0_i32_0 : i32, i32
  }
  func.func @transform_4(%arg0: i32) -> (i32, i32, i32) {
    %c0_i32 = arith.constant 0 : i32
    %c0_i32_0 = arith.constant 0 : i32
    %c0_i32_1 = arith.constant 0 : i32
    return %arg0, %c0_i32, %c0_i32_0 : i32, i32, i32
  }
  func.func @transform_5(%arg0: i32) -> (i32, i32, i32) {
    %c0_i32 = arith.constant 0 : i32
    %c0_i32_0 = arith.constant 0 : i32
    %c0_i32_1 = arith.constant 0 : i32
    return %arg0, %c0_i32, %c0_i32_0 : i32, i32, i32
  }
  func.func @transform_6(%arg0: i32) -> (i32, i32, i32) {
    %c0_i32 = arith.constant 0 : i32
    %c0_i32_0 = arith.constant 0 : i32
    %c0_i32_1 = arith.constant 0 : i32
    return %arg0, %c0_i32, %c0_i32_0 : i32, i32, i32
  }
}

module attributes {stable_mosaic.version = 11 : i64} {
  func.func @_conv_gauss_kernel(%arg0: i32, %arg1: memref<1x44x32xbf16, #tpu.memory_space<vmem>>, %arg2: memref<288x64xbf16, #tpu.memory_space<vmem>>, %arg3: memref<1x64xf32, #tpu.memory_space<vmem>>, %arg4: memref<1x64xf32, #tpu.memory_space<vmem>>, %arg5: memref<1x24x32xf32, #tpu.memory_space<vmem>>, %arg6: memref<1x24x32xf32, #tpu.memory_space<vmem>>, %arg7: memref<1x1x1xf32, #tpu.memory_space<vmem>>) attributes {dimension_semantics = [#tpu.dimension_semantics<parallel>], iteration_bounds = array<i64: 2>, scalar_prefetch = 0 : i64, scratch_operands = 0 : i64, tpu.core_type = #tpu.core_type<tc>, window_params = [{transform_indices = @transform_0, window_bounds = array<i64: 1, 44, 32>}, {pipeline_mode = #tpu.pipeline_mode<synchronous>, transform_indices = @transform_1, window_bounds = array<i64: 288, 64>}, {pipeline_mode = #tpu.pipeline_mode<synchronous>, transform_indices = @transform_2, window_bounds = array<i64: 1, 64>}, {pipeline_mode = #tpu.pipeline_mode<synchronous>, transform_indices = @transform_3, window_bounds = array<i64: 1, 64>}, {transform_indices = @transform_4, window_bounds = array<i64: 1, 24, 32>}, {transform_indices = @transform_5, window_bounds = array<i64: 1, 24, 32>}, {transform_indices = @transform_6, window_bounds = array<i64: 1, 1, 1>}]} {
    %cst = arith.constant 0.000000e+00 : f32
    %0 = vector.broadcast %cst : f32 to vector<24x64xf32>
    %c0 = arith.constant 0 : index
    %c0_0 = arith.constant 0 : index
    %c0_1 = arith.constant 0 : index
    %1 = vector.load %arg1[%c0, %c0_0, %c0_1] : memref<1x44x32xbf16, #tpu.memory_space<vmem>>, vector<1x24x32xbf16>
    %2 = vector.shape_cast %1 : vector<1x24x32xbf16> to vector<24x32xbf16>
    %c0_2 = arith.constant 0 : index
    %c0_3 = arith.constant 0 : index
    %3 = vector.load %arg2[%c0_2, %c0_3] : memref<288x64xbf16, #tpu.memory_space<vmem>>, vector<32x64xbf16>
    %cst_4 = arith.constant dense<0.000000e+00> : vector<24x64xf32>
    %4 = tpu.matmul %2, %3, %cst_4 {dimension_numbers = #tpu.dot_dimension_numbers<[1], [0], [0], [1], [0, 0, 1, 1], [], []>} : vector<24x32xbf16>, vector<32x64xbf16>, vector<24x64xf32> -> vector<24x64xf32>
    %5 = arith.addf %0, %4 : vector<24x64xf32>
    %c0_5 = arith.constant 0 : index
    %c1 = arith.constant 1 : index
    %c0_6 = arith.constant 0 : index
    %6 = vector.load %arg1[%c0_5, %c1, %c0_6] : memref<1x44x32xbf16, #tpu.memory_space<vmem>>, vector<1x24x32xbf16>
    %7 = vector.shape_cast %6 : vector<1x24x32xbf16> to vector<24x32xbf16>
    %c32 = arith.constant 32 : index
    %c0_7 = arith.constant 0 : index
    %8 = vector.load %arg2[%c32, %c0_7] : memref<288x64xbf16, #tpu.memory_space<vmem>>, vector<32x64xbf16>
    %cst_8 = arith.constant dense<0.000000e+00> : vector<24x64xf32>
    %9 = tpu.matmul %7, %8, %cst_8 {dimension_numbers = #tpu.dot_dimension_numbers<[1], [0], [0], [1], [0, 0, 1, 1], [], []>} : vector<24x32xbf16>, vector<32x64xbf16>, vector<24x64xf32> -> vector<24x64xf32>
    %10 = arith.addf %5, %9 : vector<24x64xf32>
    %c0_9 = arith.constant 0 : index
    %c2 = arith.constant 2 : index
    %c0_10 = arith.constant 0 : index
    %11 = vector.load %arg1[%c0_9, %c2, %c0_10] : memref<1x44x32xbf16, #tpu.memory_space<vmem>>, vector<1x24x32xbf16>
    %12 = vector.shape_cast %11 : vector<1x24x32xbf16> to vector<24x32xbf16>
    %c64 = arith.constant 64 : index
    %c0_11 = arith.constant 0 : index
    %13 = vector.load %arg2[%c64, %c0_11] : memref<288x64xbf16, #tpu.memory_space<vmem>>, vector<32x64xbf16>
    %cst_12 = arith.constant dense<0.000000e+00> : vector<24x64xf32>
    %14 = tpu.matmul %12, %13, %cst_12 {dimension_numbers = #tpu.dot_dimension_numbers<[1], [0], [0], [1], [0, 0, 1, 1], [], []>} : vector<24x32xbf16>, vector<32x64xbf16>, vector<24x64xf32> -> vector<24x64xf32>
    %15 = arith.addf %10, %14 : vector<24x64xf32>
    %c0_13 = arith.constant 0 : index
    %c6 = arith.constant 6 : index
    %c0_14 = arith.constant 0 : index
    %16 = vector.load %arg1[%c0_13, %c6, %c0_14] : memref<1x44x32xbf16, #tpu.memory_space<vmem>>, vector<1x24x32xbf16>
    %17 = vector.shape_cast %16 : vector<1x24x32xbf16> to vector<24x32xbf16>
    %c96 = arith.constant 96 : index
    %c0_15 = arith.constant 0 : index
    %18 = vector.load %arg2[%c96, %c0_15] : memref<288x64xbf16, #tpu.memory_space<vmem>>, vector<32x64xbf16>
    %cst_16 = arith.constant dense<0.000000e+00> : vector<24x64xf32>
    %19 = tpu.matmul %17, %18, %cst_16 {dimension_numbers = #tpu.dot_dimension_numbers<[1], [0], [0], [1], [0, 0, 1, 1], [], []>} : vector<24x32xbf16>, vector<32x64xbf16>, vector<24x64xf32> -> vector<24x64xf32>
    %20 = arith.addf %15, %19 : vector<24x64xf32>
    %c0_17 = arith.constant 0 : index
    %c7 = arith.constant 7 : index
    %c0_18 = arith.constant 0 : index
    %21 = vector.load %arg1[%c0_17, %c7, %c0_18] : memref<1x44x32xbf16, #tpu.memory_space<vmem>>, vector<1x24x32xbf16>
    %22 = vector.shape_cast %21 : vector<1x24x32xbf16> to vector<24x32xbf16>
    %c128 = arith.constant 128 : index
    %c0_19 = arith.constant 0 : index
    %23 = vector.load %arg2[%c128, %c0_19] : memref<288x64xbf16, #tpu.memory_space<vmem>>, vector<32x64xbf16>
    %cst_20 = arith.constant dense<0.000000e+00> : vector<24x64xf32>
    %24 = tpu.matmul %22, %23, %cst_20 {dimension_numbers = #tpu.dot_dimension_numbers<[1], [0], [0], [1], [0, 0, 1, 1], [], []>} : vector<24x32xbf16>, vector<32x64xbf16>, vector<24x64xf32> -> vector<24x64xf32>
    %25 = arith.addf %20, %24 : vector<24x64xf32>
    %c0_21 = arith.constant 0 : index
    %c8 = arith.constant 8 : index
    %c0_22 = arith.constant 0 : index
    %26 = vector.load %arg1[%c0_21, %c8, %c0_22] : memref<1x44x32xbf16, #tpu.memory_space<vmem>>, vector<1x24x32xbf16>
    %27 = vector.shape_cast %26 : vector<1x24x32xbf16> to vector<24x32xbf16>
    %c160 = arith.constant 160 : index
    %c0_23 = arith.constant 0 : index
    %28 = vector.load %arg2[%c160, %c0_23] : memref<288x64xbf16, #tpu.memory_space<vmem>>, vector<32x64xbf16>
    %cst_24 = arith.constant dense<0.000000e+00> : vector<24x64xf32>
    %29 = tpu.matmul %27, %28, %cst_24 {dimension_numbers = #tpu.dot_dimension_numbers<[1], [0], [0], [1], [0, 0, 1, 1], [], []>} : vector<24x32xbf16>, vector<32x64xbf16>, vector<24x64xf32> -> vector<24x64xf32>
    %30 = arith.addf %25, %29 : vector<24x64xf32>
    %c0_25 = arith.constant 0 : index
    %c12 = arith.constant 12 : index
    %c0_26 = arith.constant 0 : index
    %31 = vector.load %arg1[%c0_25, %c12, %c0_26] : memref<1x44x32xbf16, #tpu.memory_space<vmem>>, vector<1x24x32xbf16>
    %32 = vector.shape_cast %31 : vector<1x24x32xbf16> to vector<24x32xbf16>
    %c192 = arith.constant 192 : index
    %c0_27 = arith.constant 0 : index
    %33 = vector.load %arg2[%c192, %c0_27] : memref<288x64xbf16, #tpu.memory_space<vmem>>, vector<32x64xbf16>
    %cst_28 = arith.constant dense<0.000000e+00> : vector<24x64xf32>
    %34 = tpu.matmul %32, %33, %cst_28 {dimension_numbers = #tpu.dot_dimension_numbers<[1], [0], [0], [1], [0, 0, 1, 1], [], []>} : vector<24x32xbf16>, vector<32x64xbf16>, vector<24x64xf32> -> vector<24x64xf32>
    %35 = arith.addf %30, %34 : vector<24x64xf32>
    %c0_29 = arith.constant 0 : index
    %c13 = arith.constant 13 : index
    %c0_30 = arith.constant 0 : index
    %36 = vector.load %arg1[%c0_29, %c13, %c0_30] : memref<1x44x32xbf16, #tpu.memory_space<vmem>>, vector<1x24x32xbf16>
    %37 = vector.shape_cast %36 : vector<1x24x32xbf16> to vector<24x32xbf16>
    %c224 = arith.constant 224 : index
    %c0_31 = arith.constant 0 : index
    %38 = vector.load %arg2[%c224, %c0_31] : memref<288x64xbf16, #tpu.memory_space<vmem>>, vector<32x64xbf16>
    %cst_32 = arith.constant dense<0.000000e+00> : vector<24x64xf32>
    %39 = tpu.matmul %37, %38, %cst_32 {dimension_numbers = #tpu.dot_dimension_numbers<[1], [0], [0], [1], [0, 0, 1, 1], [], []>} : vector<24x32xbf16>, vector<32x64xbf16>, vector<24x64xf32> -> vector<24x64xf32>
    %40 = arith.addf %35, %39 : vector<24x64xf32>
    %c0_33 = arith.constant 0 : index
    %c14 = arith.constant 14 : index
    %c0_34 = arith.constant 0 : index
    %41 = vector.load %arg1[%c0_33, %c14, %c0_34] : memref<1x44x32xbf16, #tpu.memory_space<vmem>>, vector<1x24x32xbf16>
    %42 = vector.shape_cast %41 : vector<1x24x32xbf16> to vector<24x32xbf16>
    %c256 = arith.constant 256 : index
    %c0_35 = arith.constant 0 : index
    %43 = vector.load %arg2[%c256, %c0_35] : memref<288x64xbf16, #tpu.memory_space<vmem>>, vector<32x64xbf16>
    %cst_36 = arith.constant dense<0.000000e+00> : vector<24x64xf32>
    %44 = tpu.matmul %42, %43, %cst_36 {dimension_numbers = #tpu.dot_dimension_numbers<[1], [0], [0], [1], [0, 0, 1, 1], [], []>} : vector<24x32xbf16>, vector<32x64xbf16>, vector<24x64xf32> -> vector<24x64xf32>
    %45 = arith.addf %40, %44 : vector<24x64xf32>
    %c0_37 = arith.constant 0 : index
    %c0_38 = arith.constant 0 : index
    %46 = vector.load %arg3[%c0_37, %c0_38] : memref<1x64xf32, #tpu.memory_space<vmem>>, vector<1x64xf32>
    %47 = vector.broadcast %46 : vector<1x64xf32> to vector<24x64xf32>
    %48 = arith.addf %45, %47 : vector<24x64xf32>
    %c0_39 = arith.constant 0 : index
    %c0_40 = arith.constant 0 : index
    %49 = vector.load %arg4[%c0_39, %c0_40] : memref<1x64xf32, #tpu.memory_space<vmem>>, vector<1x64xf32>
    %50 = vector.extract_strided_slice %48 {offsets = [0, 0], sizes = [24, 32], strides = [1, 1]} : vector<24x64xf32> to vector<24x32xf32>
    %51 = vector.extract_strided_slice %49 {offsets = [0, 0], sizes = [1, 32], strides = [1, 1]} : vector<1x64xf32> to vector<1x32xf32>
    %52 = math.exp %51 : vector<1x32xf32>
    %53 = vector.broadcast %52 : vector<1x32xf32> to vector<24x32xf32>
    %54 = arith.mulf %50, %53 : vector<24x32xf32>
    %55 = vector.extract_strided_slice %48 {offsets = [0, 32], sizes = [24, 32], strides = [1, 1]} : vector<24x64xf32> to vector<24x32xf32>
    %56 = vector.extract_strided_slice %49 {offsets = [0, 32], sizes = [1, 32], strides = [1, 1]} : vector<1x64xf32> to vector<1x32xf32>
    %57 = math.exp %56 : vector<1x32xf32>
    %58 = vector.broadcast %57 : vector<1x32xf32> to vector<24x32xf32>
    %59 = arith.mulf %55, %58 : vector<24x32xf32>
    %c0_41 = arith.constant 0 : index
    %c0_42 = arith.constant 0 : index
    %c0_43 = arith.constant 0 : index
    %60 = vector.load %arg5[%c0_41, %c0_42, %c0_43] : memref<1x24x32xf32, #tpu.memory_space<vmem>>, vector<1x24x32xf32>
    %61 = vector.shape_cast %60 : vector<1x24x32xf32> to vector<24x32xf32>
    %62 = arith.subf %61, %54 : vector<24x32xf32>
    %cst_44 = arith.constant 0.000000e+00 : f32
    %63 = vector.broadcast %cst_44 : f32 to vector<24x32xf32>
    %64 = arith.subf %63, %59 : vector<24x32xf32>
    %65 = math.exp %64 : vector<24x32xf32>
    %66 = arith.mulf %62, %65 : vector<24x32xf32>
    %c0_45 = arith.constant 0 : index
    %c0_46 = arith.constant 0 : index
    %c0_47 = arith.constant 0 : index
    %67 = vector.load %arg6[%c0_45, %c0_46, %c0_47] : memref<1x24x32xf32, #tpu.memory_space<vmem>>, vector<1x24x32xf32>
    %68 = vector.shape_cast %67 : vector<1x24x32xf32> to vector<24x32xf32>
    %69 = vector.shape_cast %66 : vector<24x32xf32> to vector<1x24x32xf32>
    tpu.vector_store %arg6[%c0_45, %c0_46, %c0_47], %69 {strides = array<i32>} : memref<1x24x32xf32, #tpu.memory_space<vmem>>, vector<1x24x32xf32>,
    %70 = tpu.iota {dimensions = array<i32: 0>} : vector<24x1xi32>
    %c6_i32 = arith.constant 6 : i32
    %c0_i32 = arith.constant 0 : i32
    %71 = arith.cmpi eq, %c6_i32, %c0_i32 : i32
    %c1_i32 = arith.constant 1 : i32
    %72 = arith.select %71, %c1_i32, %c6_i32 : i32
    %73 = vector.broadcast %72 : i32 to vector<24x1xi32>
    %74 = arith.remsi %70, %73 : vector<24x1xi32>
    %c0_i32_48 = arith.constant 0 : i32
    %75 = vector.broadcast %c0_i32_48 : i32 to vector<24x1xi32>
    %76 = arith.cmpi ne, %74, %75 : vector<24x1xi32>
    %c0_i32_49 = arith.constant 0 : i32
    %77 = vector.broadcast %c0_i32_49 : i32 to vector<24x1xi32>
    %78 = arith.cmpi slt, %74, %77 : vector<24x1xi32>
    %c0_i32_50 = arith.constant 0 : i32
    %79 = arith.cmpi slt, %72, %c0_i32_50 : i32
    %80 = vector.broadcast %79 : i1 to vector<24x1xi1>
    %81 = vector.broadcast %80 : vector<24x1xi1> to vector<24x1xi1>
    %82 = arith.xori %78, %81 : vector<24x1xi1>
    %83 = arith.andi %82, %76 : vector<24x1xi1>
    %84 = vector.broadcast %72 : i32 to vector<24x1xi32>
    %85 = arith.addi %74, %84 : vector<24x1xi32>
    %86 = arith.select %83, %85, %74 : vector<24x1xi1>, vector<24x1xi32>
    %c4_i32 = arith.constant 4 : i32
    %87 = vector.broadcast %c4_i32 : i32 to vector<24x1xi32>
    %88 = arith.cmpi slt, %86, %87 : vector<24x1xi32>
    %89 = arith.extui %88 : vector<24x1xi1> to vector<24x1xi32>
    %90 = arith.sitofp %89 : vector<24x1xi32> to vector<24x1xf32>
    %91 = vector.broadcast %90 : vector<24x1xf32> to vector<24x32xf32>
    %92 = arith.mulf %59, %91 : vector<24x32xf32>
    %93 = vector.shape_cast %92 : vector<24x32xf32> to vector<1x24x32xf32>
    %cst_51 = arith.constant dense<0.000000e+00> : vector<1xf32>
    %94 = vector.multi_reduction <add>, %93, %cst_51 [1, 2] : vector<1x24x32xf32> to vector<1xf32>
    %95 = vector.shape_cast %94 : vector<1xf32> to vector<1x1x1xf32>
    %96 = vector.extract %95[0, 0, 0] : f32 from vector<1x1x1xf32>
    %cst_52 = arith.constant 0.000000e+00 : f32
    %97 = arith.subf %cst_52, %96 : f32
    %98 = vector.broadcast %97 : f32 to vector<1x1x1xf32>
    %c0_53 = arith.constant 0 : index
    %c0_54 = arith.constant 0 : index
    %c0_55 = arith.constant 0 : index
    %99 = vector.load %arg7[%c0_53, %c0_54, %c0_55] : memref<1x1x1xf32, #tpu.memory_space<vmem>>, vector<1x1x1xf32>
    tpu.vector_store %arg7[%c0_53, %c0_54, %c0_55], %98 {strides = array<i32>} : memref<1x1x1xf32, #tpu.memory_space<vmem>>, vector<1x1x1xf32>,
    return
  }
  func.func @transform_0(%arg0: i32) -> (i32, i32, i32) {
    %c0_i32 = arith.constant 0 : i32
    %c0_i32_0 = arith.constant 0 : i32
    %c0_i32_1 = arith.constant 0 : i32
    return %arg0, %c0_i32, %c0_i32_0 : i32, i32, i32
  }
  func.func @transform_1(%arg0: i32) -> (i32, i32) {
    %c0_i32 = arith.constant 0 : i32
    %c0_i32_0 = arith.constant 0 : i32
    %c0_i32_1 = arith.constant 0 : i32
    return %c0_i32, %c0_i32_0 : i32, i32
  }
  func.func @transform_2(%arg0: i32) -> (i32, i32) {
    %c0_i32 = arith.constant 0 : i32
    %c0_i32_0 = arith.constant 0 : i32
    %c0_i32_1 = arith.constant 0 : i32
    return %c0_i32, %c0_i32_0 : i32, i32
  }
  func.func @transform_3(%arg0: i32) -> (i32, i32) {
    %c0_i32 = arith.constant 0 : i32
    %c0_i32_0 = arith.constant 0 : i32
    %c0_i32_1 = arith.constant 0 : i32
    return %c0_i32, %c0_i32_0 : i32, i32
  }
  func.func @transform_4(%arg0: i32) -> (i32, i32, i32) {
    %c0_i32 = arith.constant 0 : i32
    %c0_i32_0 = arith.constant 0 : i32
    %c0_i32_1 = arith.constant 0 : i32
    return %arg0, %c0_i32, %c0_i32_0 : i32, i32, i32
  }
  func.func @transform_5(%arg0: i32) -> (i32, i32, i32) {
    %c0_i32 = arith.constant 0 : i32
    %c0_i32_0 = arith.constant 0 : i32
    %c0_i32_1 = arith.constant 0 : i32
    return %arg0, %c0_i32, %c0_i32_0 : i32, i32, i32
  }
  func.func @transform_6(%arg0: i32) -> (i32, i32, i32) {
    %c0_i32 = arith.constant 0 : i32
    %c0_i32_0 = arith.constant 0 : i32
    %c0_i32_1 = arith.constant 0 : i32
    return %arg0, %c0_i32, %c0_i32_0 : i32, i32, i32
  }
}

module attributes {stable_mosaic.version = 11 : i64} {
  func.func @_conv_gauss_kernel(%arg0: i32, %arg1: memref<1x108x8xbf16, #tpu.memory_space<vmem>>, %arg2: memref<72x16xbf16, #tpu.memory_space<vmem>>, %arg3: memref<1x16xf32, #tpu.memory_space<vmem>>, %arg4: memref<1x16xf32, #tpu.memory_space<vmem>>, %arg5: memref<1x80x8xf32, #tpu.memory_space<vmem>>, %arg6: memref<1x80x8xf32, #tpu.memory_space<vmem>>, %arg7: memref<1x1x1xf32, #tpu.memory_space<vmem>>) attributes {dimension_semantics = [#tpu.dimension_semantics<parallel>], iteration_bounds = array<i64: 2>, scalar_prefetch = 0 : i64, scratch_operands = 0 : i64, tpu.core_type = #tpu.core_type<tc>, window_params = [{transform_indices = @transform_0, window_bounds = array<i64: 1, 108, 8>}, {pipeline_mode = #tpu.pipeline_mode<synchronous>, transform_indices = @transform_1, window_bounds = array<i64: 72, 16>}, {pipeline_mode = #tpu.pipeline_mode<synchronous>, transform_indices = @transform_2, window_bounds = array<i64: 1, 16>}, {pipeline_mode = #tpu.pipeline_mode<synchronous>, transform_indices = @transform_3, window_bounds = array<i64: 1, 16>}, {transform_indices = @transform_4, window_bounds = array<i64: 1, 80, 8>}, {transform_indices = @transform_5, window_bounds = array<i64: 1, 80, 8>}, {transform_indices = @transform_6, window_bounds = array<i64: 1, 1, 1>}]} {
    %cst = arith.constant 0.000000e+00 : f32
    %0 = vector.broadcast %cst : f32 to vector<80x16xf32>
    %c0 = arith.constant 0 : index
    %c0_0 = arith.constant 0 : index
    %c0_1 = arith.constant 0 : index
    %1 = vector.load %arg1[%c0, %c0_0, %c0_1] : memref<1x108x8xbf16, #tpu.memory_space<vmem>>, vector<1x80x8xbf16>
    %2 = vector.shape_cast %1 : vector<1x80x8xbf16> to vector<80x8xbf16>
    %c0_2 = arith.constant 0 : index
    %c0_3 = arith.constant 0 : index
    %3 = vector.load %arg2[%c0_2, %c0_3] : memref<72x16xbf16, #tpu.memory_space<vmem>>, vector<8x16xbf16>
    %cst_4 = arith.constant dense<0.000000e+00> : vector<80x16xf32>
    %4 = tpu.matmul %2, %3, %cst_4 {dimension_numbers = #tpu.dot_dimension_numbers<[1], [0], [0], [1], [0, 0, 1, 1], [], []>} : vector<80x8xbf16>, vector<8x16xbf16>, vector<80x16xf32> -> vector<80x16xf32>
    %5 = arith.addf %0, %4 : vector<80x16xf32>
    %c0_5 = arith.constant 0 : index
    %c1 = arith.constant 1 : index
    %c0_6 = arith.constant 0 : index
    %6 = vector.load %arg1[%c0_5, %c1, %c0_6] : memref<1x108x8xbf16, #tpu.memory_space<vmem>>, vector<1x80x8xbf16>
    %7 = vector.shape_cast %6 : vector<1x80x8xbf16> to vector<80x8xbf16>
    %c8 = arith.constant 8 : index
    %c0_7 = arith.constant 0 : index
    %8 = vector.load %arg2[%c8, %c0_7] : memref<72x16xbf16, #tpu.memory_space<vmem>>, vector<8x16xbf16>
    %cst_8 = arith.constant dense<0.000000e+00> : vector<80x16xf32>
    %9 = tpu.matmul %7, %8, %cst_8 {dimension_numbers = #tpu.dot_dimension_numbers<[1], [0], [0], [1], [0, 0, 1, 1], [], []>} : vector<80x8xbf16>, vector<8x16xbf16>, vector<80x16xf32> -> vector<80x16xf32>
    %10 = arith.addf %5, %9 : vector<80x16xf32>
    %c0_9 = arith.constant 0 : index
    %c2 = arith.constant 2 : index
    %c0_10 = arith.constant 0 : index
    %11 = vector.load %arg1[%c0_9, %c2, %c0_10] : memref<1x108x8xbf16, #tpu.memory_space<vmem>>, vector<1x80x8xbf16>
    %12 = vector.shape_cast %11 : vector<1x80x8xbf16> to vector<80x8xbf16>
    %c16 = arith.constant 16 : index
    %c0_11 = arith.constant 0 : index
    %13 = vector.load %arg2[%c16, %c0_11] : memref<72x16xbf16, #tpu.memory_space<vmem>>, vector<8x16xbf16>
    %cst_12 = arith.constant dense<0.000000e+00> : vector<80x16xf32>
    %14 = tpu.matmul %12, %13, %cst_12 {dimension_numbers = #tpu.dot_dimension_numbers<[1], [0], [0], [1], [0, 0, 1, 1], [], []>} : vector<80x8xbf16>, vector<8x16xbf16>, vector<80x16xf32> -> vector<80x16xf32>
    %15 = arith.addf %10, %14 : vector<80x16xf32>
    %c0_13 = arith.constant 0 : index
    %c10 = arith.constant 10 : index
    %c0_14 = arith.constant 0 : index
    %16 = vector.load %arg1[%c0_13, %c10, %c0_14] : memref<1x108x8xbf16, #tpu.memory_space<vmem>>, vector<1x80x8xbf16>
    %17 = vector.shape_cast %16 : vector<1x80x8xbf16> to vector<80x8xbf16>
    %c24 = arith.constant 24 : index
    %c0_15 = arith.constant 0 : index
    %18 = vector.load %arg2[%c24, %c0_15] : memref<72x16xbf16, #tpu.memory_space<vmem>>, vector<8x16xbf16>
    %cst_16 = arith.constant dense<0.000000e+00> : vector<80x16xf32>
    %19 = tpu.matmul %17, %18, %cst_16 {dimension_numbers = #tpu.dot_dimension_numbers<[1], [0], [0], [1], [0, 0, 1, 1], [], []>} : vector<80x8xbf16>, vector<8x16xbf16>, vector<80x16xf32> -> vector<80x16xf32>
    %20 = arith.addf %15, %19 : vector<80x16xf32>
    %c0_17 = arith.constant 0 : index
    %c11 = arith.constant 11 : index
    %c0_18 = arith.constant 0 : index
    %21 = vector.load %arg1[%c0_17, %c11, %c0_18] : memref<1x108x8xbf16, #tpu.memory_space<vmem>>, vector<1x80x8xbf16>
    %22 = vector.shape_cast %21 : vector<1x80x8xbf16> to vector<80x8xbf16>
    %c32 = arith.constant 32 : index
    %c0_19 = arith.constant 0 : index
    %23 = vector.load %arg2[%c32, %c0_19] : memref<72x16xbf16, #tpu.memory_space<vmem>>, vector<8x16xbf16>
    %cst_20 = arith.constant dense<0.000000e+00> : vector<80x16xf32>
    %24 = tpu.matmul %22, %23, %cst_20 {dimension_numbers = #tpu.dot_dimension_numbers<[1], [0], [0], [1], [0, 0, 1, 1], [], []>} : vector<80x8xbf16>, vector<8x16xbf16>, vector<80x16xf32> -> vector<80x16xf32>
    %25 = arith.addf %20, %24 : vector<80x16xf32>
    %c0_21 = arith.constant 0 : index
    %c12 = arith.constant 12 : index
    %c0_22 = arith.constant 0 : index
    %26 = vector.load %arg1[%c0_21, %c12, %c0_22] : memref<1x108x8xbf16, #tpu.memory_space<vmem>>, vector<1x80x8xbf16>
    %27 = vector.shape_cast %26 : vector<1x80x8xbf16> to vector<80x8xbf16>
    %c40 = arith.constant 40 : index
    %c0_23 = arith.constant 0 : index
    %28 = vector.load %arg2[%c40, %c0_23] : memref<72x16xbf16, #tpu.memory_space<vmem>>, vector<8x16xbf16>
    %cst_24 = arith.constant dense<0.000000e+00> : vector<80x16xf32>
    %29 = tpu.matmul %27, %28, %cst_24 {dimension_numbers = #tpu.dot_dimension_numbers<[1], [0], [0], [1], [0, 0, 1, 1], [], []>} : vector<80x8xbf16>, vector<8x16xbf16>, vector<80x16xf32> -> vector<80x16xf32>
    %30 = arith.addf %25, %29 : vector<80x16xf32>
    %c0_25 = arith.constant 0 : index
    %c20 = arith.constant 20 : index
    %c0_26 = arith.constant 0 : index
    %31 = vector.load %arg1[%c0_25, %c20, %c0_26] : memref<1x108x8xbf16, #tpu.memory_space<vmem>>, vector<1x80x8xbf16>
    %32 = vector.shape_cast %31 : vector<1x80x8xbf16> to vector<80x8xbf16>
    %c48 = arith.constant 48 : index
    %c0_27 = arith.constant 0 : index
    %33 = vector.load %arg2[%c48, %c0_27] : memref<72x16xbf16, #tpu.memory_space<vmem>>, vector<8x16xbf16>
    %cst_28 = arith.constant dense<0.000000e+00> : vector<80x16xf32>
    %34 = tpu.matmul %32, %33, %cst_28 {dimension_numbers = #tpu.dot_dimension_numbers<[1], [0], [0], [1], [0, 0, 1, 1], [], []>} : vector<80x8xbf16>, vector<8x16xbf16>, vector<80x16xf32> -> vector<80x16xf32>
    %35 = arith.addf %30, %34 : vector<80x16xf32>
    %c0_29 = arith.constant 0 : index
    %c21 = arith.constant 21 : index
    %c0_30 = arith.constant 0 : index
    %36 = vector.load %arg1[%c0_29, %c21, %c0_30] : memref<1x108x8xbf16, #tpu.memory_space<vmem>>, vector<1x80x8xbf16>
    %37 = vector.shape_cast %36 : vector<1x80x8xbf16> to vector<80x8xbf16>
    %c56 = arith.constant 56 : index
    %c0_31 = arith.constant 0 : index
    %38 = vector.load %arg2[%c56, %c0_31] : memref<72x16xbf16, #tpu.memory_space<vmem>>, vector<8x16xbf16>
    %cst_32 = arith.constant dense<0.000000e+00> : vector<80x16xf32>
    %39 = tpu.matmul %37, %38, %cst_32 {dimension_numbers = #tpu.dot_dimension_numbers<[1], [0], [0], [1], [0, 0, 1, 1], [], []>} : vector<80x8xbf16>, vector<8x16xbf16>, vector<80x16xf32> -> vector<80x16xf32>
    %40 = arith.addf %35, %39 : vector<80x16xf32>
    %c0_33 = arith.constant 0 : index
    %c22 = arith.constant 22 : index
    %c0_34 = arith.constant 0 : index
    %41 = vector.load %arg1[%c0_33, %c22, %c0_34] : memref<1x108x8xbf16, #tpu.memory_space<vmem>>, vector<1x80x8xbf16>
    %42 = vector.shape_cast %41 : vector<1x80x8xbf16> to vector<80x8xbf16>
    %c64 = arith.constant 64 : index
    %c0_35 = arith.constant 0 : index
    %43 = vector.load %arg2[%c64, %c0_35] : memref<72x16xbf16, #tpu.memory_space<vmem>>, vector<8x16xbf16>
    %cst_36 = arith.constant dense<0.000000e+00> : vector<80x16xf32>
    %44 = tpu.matmul %42, %43, %cst_36 {dimension_numbers = #tpu.dot_dimension_numbers<[1], [0], [0], [1], [0, 0, 1, 1], [], []>} : vector<80x8xbf16>, vector<8x16xbf16>, vector<80x16xf32> -> vector<80x16xf32>
    %45 = arith.addf %40, %44 : vector<80x16xf32>
    %c0_37 = arith.constant 0 : index
    %c0_38 = arith.constant 0 : index
    %46 = vector.load %arg3[%c0_37, %c0_38] : memref<1x16xf32, #tpu.memory_space<vmem>>, vector<1x16xf32>
    %47 = vector.broadcast %46 : vector<1x16xf32> to vector<80x16xf32>
    %48 = arith.addf %45, %47 : vector<80x16xf32>
    %c0_39 = arith.constant 0 : index
    %c0_40 = arith.constant 0 : index
    %49 = vector.load %arg4[%c0_39, %c0_40] : memref<1x16xf32, #tpu.memory_space<vmem>>, vector<1x16xf32>
    %50 = vector.extract_strided_slice %48 {offsets = [0, 0], sizes = [80, 8], strides = [1, 1]} : vector<80x16xf32> to vector<80x8xf32>
    %51 = vector.extract_strided_slice %49 {offsets = [0, 0], sizes = [1, 8], strides = [1, 1]} : vector<1x16xf32> to vector<1x8xf32>
    %52 = math.exp %51 : vector<1x8xf32>
    %53 = vector.broadcast %52 : vector<1x8xf32> to vector<80x8xf32>
    %54 = arith.mulf %50, %53 : vector<80x8xf32>
    %55 = vector.extract_strided_slice %48 {offsets = [0, 8], sizes = [80, 8], strides = [1, 1]} : vector<80x16xf32> to vector<80x8xf32>
    %56 = vector.extract_strided_slice %49 {offsets = [0, 8], sizes = [1, 8], strides = [1, 1]} : vector<1x16xf32> to vector<1x8xf32>
    %57 = math.exp %56 : vector<1x8xf32>
    %58 = vector.broadcast %57 : vector<1x8xf32> to vector<80x8xf32>
    %59 = arith.mulf %55, %58 : vector<80x8xf32>
    %c0_41 = arith.constant 0 : index
    %c0_42 = arith.constant 0 : index
    %c0_43 = arith.constant 0 : index
    %60 = vector.load %arg5[%c0_41, %c0_42, %c0_43] : memref<1x80x8xf32, #tpu.memory_space<vmem>>, vector<1x80x8xf32>
    %61 = vector.shape_cast %60 : vector<1x80x8xf32> to vector<80x8xf32>
    %62 = arith.subf %61, %54 : vector<80x8xf32>
    %cst_44 = arith.constant 0.000000e+00 : f32
    %63 = vector.broadcast %cst_44 : f32 to vector<80x8xf32>
    %64 = arith.subf %63, %59 : vector<80x8xf32>
    %65 = math.exp %64 : vector<80x8xf32>
    %66 = arith.mulf %62, %65 : vector<80x8xf32>
    %c0_45 = arith.constant 0 : index
    %c0_46 = arith.constant 0 : index
    %c0_47 = arith.constant 0 : index
    %67 = vector.load %arg6[%c0_45, %c0_46, %c0_47] : memref<1x80x8xf32, #tpu.memory_space<vmem>>, vector<1x80x8xf32>
    %68 = vector.shape_cast %67 : vector<1x80x8xf32> to vector<80x8xf32>
    %69 = vector.shape_cast %66 : vector<80x8xf32> to vector<1x80x8xf32>
    tpu.vector_store %arg6[%c0_45, %c0_46, %c0_47], %69 {strides = array<i32>} : memref<1x80x8xf32, #tpu.memory_space<vmem>>, vector<1x80x8xf32>,
    %70 = tpu.iota {dimensions = array<i32: 0>} : vector<80x1xi32>
    %c10_i32 = arith.constant 10 : i32
    %c0_i32 = arith.constant 0 : i32
    %71 = arith.cmpi eq, %c10_i32, %c0_i32 : i32
    %c1_i32 = arith.constant 1 : i32
    %72 = arith.select %71, %c1_i32, %c10_i32 : i32
    %73 = vector.broadcast %72 : i32 to vector<80x1xi32>
    %74 = arith.remsi %70, %73 : vector<80x1xi32>
    %c0_i32_48 = arith.constant 0 : i32
    %75 = vector.broadcast %c0_i32_48 : i32 to vector<80x1xi32>
    %76 = arith.cmpi ne, %74, %75 : vector<80x1xi32>
    %c0_i32_49 = arith.constant 0 : i32
    %77 = vector.broadcast %c0_i32_49 : i32 to vector<80x1xi32>
    %78 = arith.cmpi slt, %74, %77 : vector<80x1xi32>
    %c0_i32_50 = arith.constant 0 : i32
    %79 = arith.cmpi slt, %72, %c0_i32_50 : i32
    %80 = vector.broadcast %79 : i1 to vector<80x1xi1>
    %81 = vector.broadcast %80 : vector<80x1xi1> to vector<80x1xi1>
    %82 = arith.xori %78, %81 : vector<80x1xi1>
    %83 = arith.andi %82, %76 : vector<80x1xi1>
    %84 = vector.broadcast %72 : i32 to vector<80x1xi32>
    %85 = arith.addi %74, %84 : vector<80x1xi32>
    %86 = arith.select %83, %85, %74 : vector<80x1xi1>, vector<80x1xi32>
    %c8_i32 = arith.constant 8 : i32
    %87 = vector.broadcast %c8_i32 : i32 to vector<80x1xi32>
    %88 = arith.cmpi slt, %86, %87 : vector<80x1xi32>
    %89 = arith.extui %88 : vector<80x1xi1> to vector<80x1xi32>
    %90 = arith.sitofp %89 : vector<80x1xi32> to vector<80x1xf32>
    %91 = vector.broadcast %90 : vector<80x1xf32> to vector<80x8xf32>
    %92 = arith.mulf %59, %91 : vector<80x8xf32>
    %93 = vector.shape_cast %92 : vector<80x8xf32> to vector<1x80x8xf32>
    %cst_51 = arith.constant dense<0.000000e+00> : vector<1xf32>
    %94 = vector.multi_reduction <add>, %93, %cst_51 [1, 2] : vector<1x80x8xf32> to vector<1xf32>
    %95 = vector.shape_cast %94 : vector<1xf32> to vector<1x1x1xf32>
    %96 = vector.extract %95[0, 0, 0] : f32 from vector<1x1x1xf32>
    %cst_52 = arith.constant 0.000000e+00 : f32
    %97 = arith.subf %cst_52, %96 : f32
    %98 = vector.broadcast %97 : f32 to vector<1x1x1xf32>
    %c0_53 = arith.constant 0 : index
    %c0_54 = arith.constant 0 : index
    %c0_55 = arith.constant 0 : index
    %99 = vector.load %arg7[%c0_53, %c0_54, %c0_55] : memref<1x1x1xf32, #tpu.memory_space<vmem>>, vector<1x1x1xf32>
    tpu.vector_store %arg7[%c0_53, %c0_54, %c0_55], %98 {strides = array<i32>} : memref<1x1x1xf32, #tpu.memory_space<vmem>>, vector<1x1x1xf32>,
    return
  }
  func.func @transform_0(%arg0: i32) -> (i32, i32, i32) {
    %c0_i32 = arith.constant 0 : i32
    %c0_i32_0 = arith.constant 0 : i32
    %c0_i32_1 = arith.constant 0 : i32
    return %arg0, %c0_i32, %c0_i32_0 : i32, i32, i32
  }
  func.func @transform_1(%arg0: i32) -> (i32, i32) {
    %c0_i32 = arith.constant 0 : i32
    %c0_i32_0 = arith.constant 0 : i32
    %c0_i32_1 = arith.constant 0 : i32
    return %c0_i32, %c0_i32_0 : i32, i32
  }
  func.func @transform_2(%arg0: i32) -> (i32, i32) {
    %c0_i32 = arith.constant 0 : i32
    %c0_i32_0 = arith.constant 0 : i32
    %c0_i32_1 = arith.constant 0 : i32
    return %c0_i32, %c0_i32_0 : i32, i32
  }
  func.func @transform_3(%arg0: i32) -> (i32, i32) {
    %c0_i32 = arith.constant 0 : i32
    %c0_i32_0 = arith.constant 0 : i32
    %c0_i32_1 = arith.constant 0 : i32
    return %c0_i32, %c0_i32_0 : i32, i32
  }
  func.func @transform_4(%arg0: i32) -> (i32, i32, i32) {
    %c0_i32 = arith.constant 0 : i32
    %c0_i32_0 = arith.constant 0 : i32
    %c0_i32_1 = arith.constant 0 : i32
    return %arg0, %c0_i32, %c0_i32_0 : i32, i32, i32
  }
  func.func @transform_5(%arg0: i32) -> (i32, i32, i32) {
    %c0_i32 = arith.constant 0 : i32
    %c0_i32_0 = arith.constant 0 : i32
    %c0_i32_1 = arith.constant 0 : i32
    return %arg0, %c0_i32, %c0_i32_0 : i32, i32, i32
  }
  func.func @transform_6(%arg0: i32) -> (i32, i32, i32) {
    %c0_i32 = arith.constant 0 : i32
    %c0_i32_0 = arith.constant 0 : i32
    %c0_i32_1 = arith.constant 0 : i32
    return %arg0, %c0_i32, %c0_i32_0 : i32, i32, i32
  }
}

</mosaic_0001>

<bundles_post_ra>
// kernel: glow_forward.16
= control target key start
LH: loop header
LB: loop body
LE: loop exit
PB: predicated region body
PF: predicated region fallthrough
CT: control target
= control target key end

     0   :  { %vm26_vm0 = vcmask 130048   ;;  %vm122_vm1 = vcmask 122880   ;;  %s246_s0 = inlined_call_operand.vmem [shape: f32[128,16], index: 0, kind: input, shape index: {}]   ;;  %s247_s1 = inlined_call_operand.vmem [shape: f32[1,16], index: 1, kind: output, shape index: {0}]   ;;  %s248_s2 = inlined_call_operand.vmem [shape: f32[1,16], index: 2, kind: output, shape index: {1}]  }
   0x1   :  { %v10_v0 = vld [vmem:[%s246_s0] sm:$0xff]  ;;  %v11_v1 = vld [vmem:[%s246_s0 + $0x8] sm:$0xff]  ;;  %v12_v2 = vld [vmem:[%s246_s0 + $0x10] sm:$0xff] }
   0x2   :  { %v13_v3 = vld [vmem:[%s246_s0 + $0x18] sm:$0xff]  ;;  %v27_v4 = vsel %vm26_vm0, %v10_v0, 0.0  ;;  %v28_v5 = vsel %vm26_vm0, %v11_v1, 0.0  ;;  %v30_v6 = vsel %vm26_vm0, %v12_v2, 0.0  ;;  %v14_v7 = vld [vmem:[%s246_s0 + $0x20] sm:$0xff]  ;;  %v15_v10 = vld [vmem:[%s246_s0 + $0x28] sm:$0xff]  ;;  %v65_v15 = vmul.f32 %v10_v0, %v10_v0 }
   0x3   :  { %v29_v8 = vadd.f32 %v28_v5, %v27_v4  ;;  %v32_v9 = vsel %vm26_vm0, %v13_v3, 0.0  ;;  %v34_v12 = vsel %vm26_vm0, %v14_v7, 0.0  ;;  %v16_v13 = vld [vmem:[%s246_s0 + $0x30] sm:$0xff]  ;;  %v66_v16 = vmul.f32 %v11_v1, %v11_v1  ;;  %v17_v19 = vld [vmem:[%s246_s0 + $0x38] sm:$0xff]  ;;  %v18_v24 = vld [vmem:[%s246_s0 + $0x40] sm:$0xff] }
   0x4   :  { %v67_v17 = vmul.f32 %v12_v2, %v12_v2  ;;  %v36_v18 = vsel %vm26_vm0, %v15_v10, 0.0  ;;  %v68_v21 = vmul.f32 %v13_v3, %v13_v3  ;;  %v38_v22 = vsel %vm26_vm0, %v16_v13, 0.0  ;;  %v19_v31 = vld [vmem:[%s246_s0 + $0x48] sm:$0xff]  ;;  %v20_v37 = vld [vmem:[%s246_s0 + $0x50] sm:$0xff]  ;;  %v21_v43 = vld [vmem:[%s246_s0 + $0x58] sm:$0xff] }
   0x5   :  { %v31_v11 = vadd.f32 %v30_v6, %v29_v8  ;;  %v69_v23 = vmul.f32 %v14_v7, %v14_v7  ;;  %v81_v26 = vsel %vm26_vm0, %v65_v15, 0.0  ;;  %v82_v27 = vsel %vm26_vm0, %v66_v16, 0.0  ;;  %v22_v49 = vld [vmem:[%s246_s0 + $0x60] sm:$0xff]  ;;  %v23_v55 = vld [vmem:[%s246_s0 + $0x68] sm:$0xff]  ;;  %v24_v61 = vld [vmem:[%s246_s0 + $0x70] sm:$0xff] }
   0x6   :  { %v84_v28 = vsel %vm26_vm0, %v67_v17, 0.0  ;;  %v40_v29 = vsel %vm26_vm0, %v17_v19, 0.0  ;;  %v83_v30 = vadd.f32 %v82_v27, %v81_v26  ;;  %v70_v33 = vmul.f32 %v15_v10, %v15_v10  ;;  %v25_v3 = vld [vmem:[%s246_s0 + $0x78] sm:$0xff] }
   0x7   :  { %v33_v14 = vadd.f32 %v32_v9, %v31_v11  ;;  %v86_v34 = vsel %vm26_vm0, %v68_v21, 0.0  ;;  %v42_v35 = vsel %vm26_vm0, %v18_v24, 0.0  ;;  %v71_v39 = vmul.f32 %v16_v13, %v16_v13 }
   0x8   :  { %v85_v36 = vadd.f32 %v84_v28, %v83_v30  ;;  %v88_v40 = vsel %vm26_vm0, %v69_v23, 0.0  ;;  %v44_v41 = vsel %vm26_vm0, %v19_v31, 0.0  ;;  %v72_v45 = vmul.f32 %v17_v19, %v17_v19 }
   0x9   :  { %v35_v20 = vadd.f32 %v34_v12, %v33_v14  ;;  %v90_v46 = vsel %vm26_vm0, %v70_v33, 0.0  ;;  %v46_v47 = vsel %vm26_vm0, %v20_v37, 0.0  ;;  %v73_v51 = vmul.f32 %v18_v24, %v18_v24 }
   0xa   :  { %v87_v42 = vadd.f32 %v86_v34, %v85_v36  ;;  %v92_v52 = vsel %vm26_vm0, %v71_v39, 0.0  ;;  %v48_v53 = vsel %vm26_vm0, %v21_v43, 0.0  ;;  %v74_v57 = vmul.f32 %v19_v31, %v19_v31 }
   0xb   :  { %v37_v25 = vadd.f32 %v36_v18, %v35_v20  ;;  %v94_v58 = vsel %vm26_vm0, %v72_v45, 0.0  ;;  %v50_v59 = vsel %vm26_vm0, %v22_v49, 0.0  ;;  %v75_v63 = vmul.f32 %v20_v37, %v20_v37 }
   0xc   :  { %v89_v48 = vadd.f32 %v88_v40, %v87_v42  ;;  %v96_v0 = vsel %vm26_vm0, %v73_v51, 0.0  ;;  %v52_v1 = vsel %vm26_vm0, %v23_v55, 0.0  ;;  %v76_v5 = vmul.f32 %v21_v43, %v21_v43 }
   0xd   :  { %v39_v32 = vadd.f32 %v38_v22, %v37_v25  ;;  %v98_v6 = vsel %vm26_vm0, %v74_v57, 0.0  ;;  %v54_v7 = vsel %vm26_vm0, %v24_v61, 0.0  ;;  %v77_v10 = vmul.f32 %v22_v49, %v22_v49 }
   0xe   :  { %v91_v54 = vadd.f32 %v90_v46, %v89_v48  ;;  %v100_v11 = vsel %vm26_vm0, %v75_v63, 0.0  ;;  %v56_v12 = vsel %vm26_vm0, %v25_v3, 0.0  ;;  %v78_v15 = vmul.f32 %v23_v55, %v23_v55 }
   0xf   :  { %v41_v38 = vadd.f32 %v40_v29, %v39_v32  ;;  %v102_v16 = vsel %vm26_vm0, %v76_v5, 0.0  ;;  %v79_v19 = vmul.f32 %v24_v61, %v24_v61  ;;  %v104_v20 = vsel %vm26_vm0, %v77_v10, 0.0 }
  0x10   :  { %v93_v60 = vadd.f32 %v92_v52, %v91_v54  ;;  %v80_v23 = vmul.f32 %v25_v3, %v25_v3  ;;  %v106_v24 = vsel %vm26_vm0, %v78_v15, 0.0 }
  0x11   :  { %v43_v44 = vadd.f32 %v42_v35, %v41_v38  ;;  %v108_v27 = vsel %vm26_vm0, %v79_v19, 0.0 }
  0x12   :  { %v95_v2 = vadd.f32 %v94_v58, %v93_v60  ;;  %v110_v30 = vsel %vm26_vm0, %v80_v23, 0.0 }
  0x13   :  { %v45_v50 = vadd.f32 %v44_v41, %v43_v44 }
  0x14   :  { %v97_v8 = vadd.f32 %v96_v0, %v95_v2 }
  0x15   :  { %v47_v56 = vadd.f32 %v46_v47, %v45_v50 }
  0x16   :  { %v99_v13 = vadd.f32 %v98_v6, %v97_v8 }
  0x17   :  { %v49_v62 = vadd.f32 %v48_v53, %v47_v56 }
  0x18   :  { %v101_v17 = vadd.f32 %v100_v11, %v99_v13 }
  0x19   :  { %v51_v4 = vadd.f32 %v50_v59, %v49_v62 }
  0x1a   :  { %v103_v21 = vadd.f32 %v102_v16, %v101_v17 }
  0x1b   :  { %v53_v9 = vadd.f32 %v52_v1, %v51_v4 }
  0x1c   :  { %v105_v25 = vadd.f32 %v104_v20, %v103_v21 }
  0x1d   :  { %v55_v14 = vadd.f32 %v54_v7, %v53_v9 }
  0x1e   :  { %v107_v28 = vadd.f32 %v106_v24, %v105_v25 }
  0x1f   :  { %v57_v18 = vadd.f32 %v56_v12, %v55_v14 }
  0x20   :  { %v109_v31 = vadd.f32 %v108_v27, %v107_v28 }
  0x21   :  { %v58_v22 = vrot.slane %v57_v18, 4 }
  0x22   :  { %v111_v33 = vadd.f32 %v110_v30, %v109_v31 }
  0x23   :  { %v59_v26 = vadd.f32 %v58_v22, %v57_v18 }
  0x24   :  { %v112_v35 = vrot.slane %v111_v33, 4 }
  0x25   :  { %v60_v29 = vrot.slane %v59_v26, 2 }
  0x26   :  { %v113_v37 = vadd.f32 %v112_v35, %v111_v33 }
  0x27   :  { %v61_v32 = vadd.f32 %v60_v29, %v59_v26 }
  0x28   :  { %v114_v39 = vrot.slane %v113_v37, 2 }
  0x29   :  { %v62_v34 = vrot.slane %v61_v32, 1 }
  0x2a   :  { %v115_v40 = vadd.f32 %v114_v39, %v113_v37 }
  0x2b   :  { %v63_v36 = vadd.f32 %v62_v34, %v61_v32 }
  0x2c   :  { %v116_v41 = vrot.slane %v115_v40, 1 }
  0x2d   :  { %v64_v38 = vmul.f32 0.0078125, %v63_v36 }
  0x2e   :  { %v117_v42 = vadd.f32 %v116_v41, %v115_v40 }
  0x2f   :  { %123 = vst.msk [vmem:[%s247_s1] sm:$0x1] %vm122_vm1, %v64_v38  ;;  %v119_v43 = vmul.f32 %v64_v38, %v64_v38 }
  0x30   :  { %v118_v44 = vmul.f32 0.0078125, %v117_v42 }
  0x32   :  { %v120_v45 = vsub.f32 %v118_v44, %v119_v43 }
  0x34   :  { %v121_v46 = vmax.f32 %v120_v45, 0.0 }
  0x36   :  { %141 = vrsqrt.f32 %v121_v46  ;;  %vm126_vm2 = vcmp.eq.f32.partialorder %v121_v46, inf  ;;  %v129_v48 = vand.u32 2147483648, %v121_v46  ;;  %vm128_vm3 = vcmp.eq.f32.partialorder %v121_v46, 0.0 }
  0x40   :  { %v142_v47 = vpop.eup %141 }
  0x41   :  { %v125_v49 = vmul.f32 %v142_v47, %v121_v46 }
  0x43   :  { %v127_v50 = vsel %vm126_vm2, %v121_v46, %v125_v49 }
  0x44   :  { %v130_v51 = vsel %vm128_vm3, %v129_v48, %v127_v50 }
  0x45   :  { %v131_v52 = vadd.f32 1e-06, %v130_v51 }
  0x47   :  { %132 = vst.msk [vmem:[%s248_s2] sm:$0x1] %vm122_vm1, %v131_v52 }

// kernel: glow_forward.17
= control target key start
LH: loop header
LB: loop body
LE: loop exit
PB: predicated region body
PF: predicated region fallthrough
CT: control target
= control target key end

     0   :  { %vm19_vm0 = vcmask 130048   ;;  %v389_v1 = vmov 0.0   ;;  %s562_s1 = inlined_call_operand.vmem [shape: bf16[16,16], index: 1, kind: input, shape index: {}]   ;;  %s563_s0 = inlined_call_operand.vmem [shape: bf16[128,16], index: 0, kind: input, shape index: {}]   ;;  %s564_s2 = inlined_call_operand.vmem [shape: f32[1,16], index: 2, kind: input, shape index: {}]   ;;  %s565_s3 = inlined_call_operand.vmem [shape: f32[128,16], index: 3, kind: output, shape index: {}]  }
   0x1   :  { %v380_v0 = vld [vmem:[%s562_s1] sm:$0xff]   ;;  %22 = vst.msk [vmem:[#allocation2 + $0x10] sm:$0xff] %vm19_vm0, %v389_v1  ;;  %20 = vst.msk [vmem:[#allocation2] sm:$0xff] %vm19_vm0, %v389_v1  ;;  %v383_v4 = vld [vmem:[%s563_s0 + $0x8] sm:$0xff]  }
   0x2   :  { %21 = vst.msk [vmem:[#allocation2 + $0x8] sm:$0xff] %vm19_vm0, %v389_v1  ;;  %23 = vst.msk [vmem:[#allocation2 + $0x18] sm:$0xff] %vm19_vm0, %v389_v1  ;;  %v381_v2 = vld [vmem:[%s563_s0] sm:$0xff]   ;;  %359 = vmatprep.subr.bf16.mxu0 %v380_v0  ;;  %377 = vmatprep.subr.bf16.mxu1 %v380_v0  ;;  %v384_v5 = vld [vmem:[%s563_s0 + $0x28] sm:$0xff]  }
   0x3   :  { %24 = vst.msk [vmem:[#allocation2 + $0x20] sm:$0xff] %vm19_vm0, %v389_v1  ;;  %25 = vst.msk [vmem:[#allocation2 + $0x28] sm:$0xff] %vm19_vm0, %v389_v1  ;;  %v382_v3 = vld [vmem:[%s563_s0 + $0x20] sm:$0xff]   ;;  %360 = vmatpush3.bf16.msra.mxu0 %v380_v0  ;;  %378 = vmatpush3.bf16.msra.mxu1 %v380_v0  ;;  %v385_v6 = vld [vmem:[%s563_s0 + $0x10] sm:$0xff]  }
   0x4   :  { %26 = vst.msk [vmem:[#allocation2 + $0x30] sm:$0xff] %vm19_vm0, %v389_v1  ;;  %27 = vst.msk [vmem:[#allocation2 + $0x38] sm:$0xff] %vm19_vm0, %v389_v1  ;;  %361 = vmatprep.mubr.msk.bf16.mxu0 %vm19_vm0, %v381_v2  ;;  %369 = vmatprep.mubr.msk.bf16.mxu1 %vm19_vm0, %v382_v3  ;;  %v386_v7 = vld [vmem:[%s563_s0 + $0x30] sm:$0xff]   ;;  %v387_v8 = vld [vmem:[%s563_s0 + $0x18] sm:$0xff]  }
   0x5   :  { %28 = vst.msk [vmem:[#allocation2 + $0x40] sm:$0xff] %vm19_vm0, %v389_v1  ;;  %29 = vst.msk [vmem:[#allocation2 + $0x48] sm:$0xff] %vm19_vm0, %v389_v1  ;;  %v388_v9 = vld [vmem:[%s563_s0 + $0x38] sm:$0xff]   ;;  %v472_v38 = vld [vmem:[%s564_s2] ss:$0 sm:$0xff] }
   0x6   :  { %30 = vst.msk [vmem:[#allocation2 + $0x50] sm:$0xff] %vm19_vm0, %v389_v1  ;;  %31 = vst.msk [vmem:[#allocation2 + $0x58] sm:$0xff] %vm19_vm0, %v389_v1  ;;  %362 = vmatmul.mubr.msk.bf16.vlgmr.msra.gmra.mrb[0].mxu0 %vm19_vm0, %v383_v4  ;;  %370 = vmatmul.mubr.msk.bf16.vlgmr.msra.gmra.mrb[0].mxu1 %vm19_vm0, %v384_v5 }
   0x7   :  { %32 = vst.msk [vmem:[#allocation2 + $0x60] sm:$0xff] %vm19_vm0, %v389_v1  ;;  %33 = vst.msk [vmem:[#allocation2 + $0x68] sm:$0xff] %vm19_vm0, %v389_v1  ;;  %365 = vmatprep.mubr.msk.bf16.mxu0 %vm19_vm0, %v385_v6  ;;  %373 = vmatprep.mubr.msk.bf16.mxu1 %vm19_vm0, %v386_v7 }
   0x8   :  { %34 = vst.msk [vmem:[#allocation2 + $0x70] sm:$0xff] %vm19_vm0, %v389_v1  ;;  %35 = vst.msk [vmem:[#allocation2 + $0x78] sm:$0xff] %vm19_vm0, %v389_v1  ;;  %v38_v10 = vld [vmem:[#allocation2 + $0x10] sm:$0xff]  ;;  %v36_v12 = vld [vmem:[#allocation2] sm:$0xff] }
   0x9   :  { %v39_v16 = vld [vmem:[#allocation2 + $0x18] sm:$0xff]  ;;  %v37_v22 = vld [vmem:[#allocation2 + $0x8] sm:$0xff] }
   0xa   :  { %v40_v36 = vld [vmem:[#allocation2 + $0x20] sm:$0xff]  ;;  %v41_v47 = vld [vmem:[#allocation2 + $0x28] sm:$0xff] }
   0xb   :  { %v42_v34 = vld [vmem:[#allocation2 + $0x30] sm:$0xff]  ;;  %v43_v41 = vld [vmem:[#allocation2 + $0x38] sm:$0xff] }
   0xc   :  { %v44_v13 = vld [vmem:[#allocation2 + $0x40] sm:$0xff]  ;;  %v45_v23 = vld [vmem:[#allocation2 + $0x48] sm:$0xff] }
   0xd   :  { %v46_v11 = vld [vmem:[#allocation2 + $0x50] sm:$0xff]  ;;  %v47_v17 = vld [vmem:[#allocation2 + $0x58] sm:$0xff] }
   0xe   :  { %366 = vmatmul.mubr.msk.bf16.gmra.mrb[4].mxu0 %vm19_vm0, %v387_v8  ;;  %374 = vmatmul.mubr.msk.bf16.gmra.mrb[4].mxu1 %vm19_vm0, %v388_v9  ;;  %v48_v37 = vld [vmem:[#allocation2 + $0x60] sm:$0xff]  ;;  %v49_v48 = vld [vmem:[#allocation2 + $0x68] sm:$0xff] }
   0xf   :  { %v50_v35 = vld [vmem:[#allocation2 + $0x70] sm:$0xff]  ;;  %v51_v42 = vld [vmem:[#allocation2 + $0x78] sm:$0xff] }
  0xd9   :  { %v363_v14 = vpop.f32.mrb[0].mxu0  ;;  %v371_v15 = vpop.f32.mrb[0].mxu1 }
  0xda   :  { %v240_v18 = vadd.f32 %v363_v14, %v38_v10  ;;  %v248_v19 = vadd.f32 %v371_v15, %v46_v11  ;;  %v175_v20 = vpop.f32.mrb[1].mxu0  ;;  %v207_v21 = vpop.f32.mrb[1].mxu1 }
  0xdb   :  { %v238_v24 = vadd.f32 %v175_v20, %v36_v12  ;;  %v246_v25 = vadd.f32 %v207_v21, %v44_v13  ;;  %v364_v26 = vpop.f32.mrb[2].mxu0  ;;  %v372_v27 = vpop.f32.mrb[2].mxu1 }
  0xdc   :  { %256 = vst.msk [vmem:[#allocation2 + $0x10] sm:$0xff] %vm19_vm0, %v240_v18  ;;  %264 = vst.msk [vmem:[#allocation2 + $0x50] sm:$0xff] %vm19_vm0, %v248_v19  ;;  %v241_v28 = vadd.f32 %v364_v26, %v39_v16  ;;  %v249_v29 = vadd.f32 %v372_v27, %v47_v17  ;;  %v178_v30 = vpop.f32.mrb[3].mxu0  ;;  %v210_v31 = vpop.f32.mrb[3].mxu1 }
  0xdd   :  { %254 = vst.msk [vmem:[#allocation2] sm:$0xff] %vm19_vm0, %v238_v24  ;;  %262 = vst.msk [vmem:[#allocation2 + $0x40] sm:$0xff] %vm19_vm0, %v246_v25  ;;  %v239_v32 = vadd.f32 %v178_v30, %v37_v22  ;;  %v247_v33 = vadd.f32 %v210_v31, %v45_v23 }
  0xde   :  { %257 = vst.msk [vmem:[#allocation2 + $0x18] sm:$0xff] %vm19_vm0, %v241_v28  ;;  %265 = vst.msk [vmem:[#allocation2 + $0x58] sm:$0xff] %vm19_vm0, %v249_v29 }
  0xdf   :  { %255 = vst.msk [vmem:[#allocation2 + $0x8] sm:$0xff] %vm19_vm0, %v239_v32  ;;  %263 = vst.msk [vmem:[#allocation2 + $0x48] sm:$0xff] %vm19_vm0, %v247_v33 }
  0xe1   :  { %v367_v39 = vpop.f32.mrb[4].mxu0  ;;  %v375_v40 = vpop.f32.mrb[4].mxu1 }
  0xe2   :  { %v244_v43 = vadd.f32 %v367_v39, %v42_v34  ;;  %v252_v44 = vadd.f32 %v375_v40, %v50_v35  ;;  %v191_v45 = vpop.f32.mrb[5].mxu0  ;;  %v223_v46 = vpop.f32.mrb[5].mxu1 }
  0xe3   :  { %v275_v49 = vld [vmem:[#allocation2 + $0x10] sm:$0xff]  ;;  %v242_v51 = vadd.f32 %v191_v45, %v40_v36  ;;  %v250_v52 = vadd.f32 %v223_v46, %v48_v37  ;;  %v368_v53 = vpop.f32.mrb[6].mxu0  ;;  %v376_v54 = vpop.f32.mrb[6].mxu1 }
  0xe4   :  { %v283_v50 = vld [vmem:[#allocation2 + $0x50] sm:$0xff]  ;;  %v298_v55 = vadd.f32 %v472_v38, %v275_v49  ;;  %v273_v57 = vld [vmem:[#allocation2] sm:$0xff]  ;;  %260 = vst.msk [vmem:[#allocation2 + $0x30] sm:$0xff] %vm19_vm0, %v244_v43  ;;  %268 = vst.msk [vmem:[#allocation2 + $0x70] sm:$0xff] %vm19_vm0, %v252_v44  ;;  %v245_v59 = vadd.f32 %v368_v53, %v43_v41  ;;  %v253_v60 = vadd.f32 %v376_v54, %v51_v42  ;;  %v194_v61 = vpop.f32.mrb[7].mxu0  ;;  %v226_v62 = vpop.f32.mrb[7].mxu1 }
  0xe5   :  { %v306_v56 = vadd.f32 %v472_v38, %v283_v50  ;;  %v281_v58 = vld [vmem:[#allocation2 + $0x40] sm:$0xff]  ;;  %v296_v63 = vadd.f32 %v472_v38, %v273_v57  ;;  %v276_v1 = vld [vmem:[#allocation2 + $0x18] sm:$0xff]  ;;  %258 = vst.msk [vmem:[#allocation2 + $0x20] sm:$0xff] %vm19_vm0, %v242_v51  ;;  %266 = vst.msk [vmem:[#allocation2 + $0x60] sm:$0xff] %vm19_vm0, %v250_v52  ;;  %v243_v3 = vadd.f32 %v194_v61, %v41_v47 }
  0xe6   :  { %v304_v0 = vadd.f32 %v472_v38, %v281_v58  ;;  %v284_v2 = vld [vmem:[#allocation2 + $0x58] sm:$0xff]  ;;  %v251_v4 = vadd.f32 %v226_v62, %v49_v48  ;;  %314 = vst.msk [vmem:[%s565_s3 + $0x10] sm:$0xff] %vm19_vm0, %v298_v55  ;;  %v299_v5 = vadd.f32 %v472_v38, %v276_v1  ;;  %v274_v7 = vld [vmem:[#allocation2 + $0x8] sm:$0xff]  ;;  %261 = vst.msk [vmem:[#allocation2 + $0x38] sm:$0xff] %vm19_vm0, %v245_v59 }
  0xe7   :  { %322 = vst.msk [vmem:[%s565_s3 + $0x50] sm:$0xff] %vm19_vm0, %v306_v56  ;;  %v307_v6 = vadd.f32 %v472_v38, %v284_v2  ;;  %v282_v8 = vld [vmem:[#allocation2 + $0x48] sm:$0xff]  ;;  %269 = vst.msk [vmem:[#allocation2 + $0x78] sm:$0xff] %vm19_vm0, %v253_v60  ;;  %v297_v9 = vadd.f32 %v472_v38, %v274_v7 }
  0xe8   :  { %312 = vst.msk [vmem:[%s565_s3] sm:$0xff] %vm19_vm0, %v296_v63  ;;  %320 = vst.msk [vmem:[%s565_s3 + $0x40] sm:$0xff] %vm19_vm0, %v304_v0  ;;  %v305_v10 = vadd.f32 %v472_v38, %v282_v8 }
  0xe9   :  { %259 = vst.msk [vmem:[#allocation2 + $0x28] sm:$0xff] %vm19_vm0, %v243_v3  ;;  %267 = vst.msk [vmem:[#allocation2 + $0x68] sm:$0xff] %vm19_vm0, %v251_v4 }
  0xea   :  { %315 = vst.msk [vmem:[%s565_s3 + $0x18] sm:$0xff] %vm19_vm0, %v299_v5  ;;  %323 = vst.msk [vmem:[%s565_s3 + $0x58] sm:$0xff] %vm19_vm0, %v307_v6 }
  0xeb   :  { %313 = vst.msk [vmem:[%s565_s3 + $0x8] sm:$0xff] %vm19_vm0, %v297_v9  ;;  %321 = vst.msk [vmem:[%s565_s3 + $0x48] sm:$0xff] %vm19_vm0, %v305_v10  ;;  %v279_v11 = vld [vmem:[#allocation2 + $0x30] sm:$0xff] }
  0xec   :  { %v287_v12 = vld [vmem:[#allocation2 + $0x70] sm:$0xff]  ;;  %v302_v13 = vadd.f32 %v472_v38, %v279_v11  ;;  %v277_v15 = vld [vmem:[#allocation2 + $0x20] sm:$0xff] }
  0xed   :  { %v310_v14 = vadd.f32 %v472_v38, %v287_v12  ;;  %v285_v16 = vld [vmem:[#allocation2 + $0x60] sm:$0xff]  ;;  %v300_v17 = vadd.f32 %v472_v38, %v277_v15  ;;  %v280_v19 = vld [vmem:[#allocation2 + $0x38] sm:$0xff] }
  0xee   :  { %v308_v18 = vadd.f32 %v472_v38, %v285_v16  ;;  %v288_v20 = vld [vmem:[#allocation2 + $0x78] sm:$0xff]  ;;  %318 = vst.msk [vmem:[%s565_s3 + $0x30] sm:$0xff] %vm19_vm0, %v302_v13  ;;  %v303_v21 = vadd.f32 %v472_v38, %v280_v19 }
  0xef   :  { %326 = vst.msk [vmem:[%s565_s3 + $0x70] sm:$0xff] %vm19_vm0, %v310_v14  ;;  %v311_v22 = vadd.f32 %v472_v38, %v288_v20  ;;  %316 = vst.msk [vmem:[%s565_s3 + $0x20] sm:$0xff] %vm19_vm0, %v300_v17 }
  0xf0   :  { %v278_v23 = vld [vmem:[#allocation2 + $0x28] sm:$0xff]  ;;  %324 = vst.msk [vmem:[%s565_s3 + $0x60] sm:$0xff] %vm19_vm0, %v308_v18  ;;  %319 = vst.msk [vmem:[%s565_s3 + $0x38] sm:$0xff] %vm19_vm0, %v303_v21 }
  0xf1   :  { %v286_v24 = vld [vmem:[#allocation2 + $0x68] sm:$0xff]  ;;  %v301_v25 = vadd.f32 %v472_v38, %v278_v23  ;;  %327 = vst.msk [vmem:[%s565_s3 + $0x78] sm:$0xff] %vm19_vm0, %v311_v22 }
  0xf2   :  { %v309_v26 = vadd.f32 %v472_v38, %v286_v24 }
  0xf3   :  { %317 = vst.msk [vmem:[%s565_s3 + $0x28] sm:$0xff] %vm19_vm0, %v301_v25 }
  0xf4   :  { %325 = vst.msk [vmem:[%s565_s3 + $0x68] sm:$0xff] %vm19_vm0, %v309_v26 }

// kernel: glow_forward.19
= control target key start
LH: loop header
LB: loop body
LE: loop exit
PB: predicated region body
PF: predicated region fallthrough
CT: control target
= control target key end

     0   :  { %s540_s0 = inlined_call_operand.vmem [shape: bf16[128,128], index: 0, kind: input, shape index: {}]   ;;  %s541_s1 = inlined_call_operand.vmem [shape: bf16[128,128], index: 1, kind: output, shape index: {}]  }
   0x1   :  { %v277_v0 = vld [vmem:[%s540_s0] sm:$0xff]   ;;  %v348_v1 = vld [vmem:[%s540_s0 + $0x8] sm:$0xff]   ;;  %v349_v5 = vld [vmem:[%s540_s0 + $0x10] sm:$0xff]  }
   0x2   :  { %v382_v2 = vunpack.c.l.bf16 %v277_v0  ;;  %v384_v3 = vunpack.c.h.bf16 %v277_v0  ;;  %v386_v4 = vunpack.c.l.bf16 %v348_v1  ;;  %v391_v6 = vunpack.c.h.bf16 %v348_v1  ;;  %v350_v13 = vld [vmem:[%s540_s0 + $0x18] sm:$0xff]   ;;  %v351_v22 = vld [vmem:[%s540_s0 + $0x20] sm:$0xff]   ;;  %v352_v31 = vld [vmem:[%s540_s0 + $0x28] sm:$0xff]  }
   0x3   :  { %v399_v10 = vunpack.c.l.bf16 %v349_v5  ;;  %v407_v14 = vunpack.c.h.bf16 %v349_v5  ;;  %v412_v18 = vunpack.c.l.bf16 %v350_v13  ;;  %v420_v23 = vunpack.c.h.bf16 %v350_v13  ;;  %v353_v40 = vld [vmem:[%s540_s0 + $0x30] sm:$0xff]   ;;  %v354_v49 = vld [vmem:[%s540_s0 + $0x38] sm:$0xff]  }
   0x4   :  { %v40_v7 = vadd.f32 %v384_v3, %v382_v2  ;;  %v62_v8 = vmul.f32 %v382_v2, %v382_v2  ;;  %v63_v9 = vmul.f32 %v384_v3, %v384_v3  ;;  %v64_v12 = vmul.f32 %v386_v4, %v386_v4 }
   0x5   :  { %v65_v16 = vmul.f32 %v391_v6, %v391_v6  ;;  %v66_v20 = vmul.f32 %v399_v10, %v399_v10  ;;  %v67_v25 = vmul.f32 %v407_v14, %v407_v14  ;;  %v425_v27 = vunpack.c.l.bf16 %v351_v22 }
   0x6   :  { %v41_v11 = vadd.f32 %v386_v4, %v40_v7  ;;  %v78_v17 = vadd.f32 %v63_v9, %v62_v8  ;;  %v68_v29 = vmul.f32 %v412_v18, %v412_v18  ;;  %v433_v32 = vunpack.c.h.bf16 %v351_v22 }
   0x7   :  { %v69_v34 = vmul.f32 %v420_v23, %v420_v23  ;;  %v438_v36 = vunpack.c.l.bf16 %v352_v31  ;;  %v70_v38 = vmul.f32 %v425_v27, %v425_v27  ;;  %v446_v41 = vunpack.c.h.bf16 %v352_v31 }
   0x8   :  { %v42_v15 = vadd.f32 %v391_v6, %v41_v11  ;;  %v79_v21 = vadd.f32 %v78_v17, %v64_v12  ;;  %v71_v43 = vmul.f32 %v433_v32, %v433_v32  ;;  %v451_v45 = vunpack.c.l.bf16 %v353_v40 }
   0x9   :  { %v72_v47 = vmul.f32 %v438_v36, %v438_v36  ;;  %v459_v50 = vunpack.c.h.bf16 %v353_v40  ;;  %v73_v52 = vmul.f32 %v446_v41, %v446_v41  ;;  %v464_v54 = vunpack.c.l.bf16 %v354_v49 }
   0xa   :  { %v43_v19 = vadd.f32 %v399_v10, %v42_v15  ;;  %v80_v26 = vadd.f32 %v79_v21, %v65_v16  ;;  %v74_v56 = vmul.f32 %v451_v45, %v451_v45  ;;  %v469_v58 = vunpack.c.h.bf16 %v354_v49 }
   0xb   :  { %v75_v60 = vmul.f32 %v459_v50, %v459_v50  ;;  %v76_v63 = vmul.f32 %v464_v54, %v464_v54 }
   0xc   :  { %v44_v24 = vadd.f32 %v407_v14, %v43_v19  ;;  %v81_v30 = vadd.f32 %v80_v26, %v66_v20  ;;  %v77_v5 = vmul.f32 %v469_v58, %v469_v58 }
   0xe   :  { %v45_v28 = vadd.f32 %v412_v18, %v44_v24  ;;  %v82_v35 = vadd.f32 %v81_v30, %v67_v25 }
  0x10   :  { %v46_v33 = vadd.f32 %v420_v23, %v45_v28  ;;  %v83_v39 = vadd.f32 %v82_v35, %v68_v29 }
  0x12   :  { %v47_v37 = vadd.f32 %v425_v27, %v46_v33  ;;  %v84_v44 = vadd.f32 %v83_v39, %v69_v34 }
  0x14   :  { %v48_v42 = vadd.f32 %v433_v32, %v47_v37  ;;  %v85_v48 = vadd.f32 %v84_v44, %v70_v38 }
  0x16   :  { %v49_v46 = vadd.f32 %v438_v36, %v48_v42  ;;  %v86_v53 = vadd.f32 %v85_v48, %v71_v43 }
  0x18   :  { %v50_v51 = vadd.f32 %v446_v41, %v49_v46  ;;  %v87_v57 = vadd.f32 %v86_v53, %v72_v47 }
  0x1a   :  { %v51_v55 = vadd.f32 %v451_v45, %v50_v51  ;;  %v88_v61 = vadd.f32 %v87_v57, %v73_v52 }
  0x1c   :  { %v52_v59 = vadd.f32 %v459_v50, %v51_v55  ;;  %v89_v0 = vadd.f32 %v88_v61, %v74_v56 }
  0x1e   :  { %v53_v62 = vadd.f32 %v464_v54, %v52_v59  ;;  %v90_v7 = vadd.f32 %v89_v0, %v75_v60 }
  0x20   :  { %v54_v1 = vadd.f32 %v469_v58, %v53_v62  ;;  %v91_v9 = vadd.f32 %v90_v7, %v76_v63 }
  0x22   :  { %v55_v8 = vrot.slane %v54_v1, 4  ;;  %v92_v12 = vadd.f32 %v91_v9, %v77_v5 }
  0x24   :  { %v56_v11 = vadd.f32 %v55_v8, %v54_v1  ;;  %v93_v15 = vrot.slane %v92_v12, 4 }
  0x26   :  { %v57_v13 = vrot.slane %v56_v11, 2  ;;  %v94_v17 = vadd.f32 %v93_v15, %v92_v12 }
  0x28   :  { %v58_v16 = vadd.f32 %v57_v13, %v56_v11  ;;  %v95_v20 = vrot.slane %v94_v17, 2 }
  0x2a   :  { %v59_v19 = vrot.slane %v58_v16, 1  ;;  %v96_v22 = vadd.f32 %v95_v20, %v94_v17 }
  0x2c   :  { %v60_v21 = vadd.f32 %v59_v19, %v58_v16  ;;  %v97_v25 = vrot.slane %v96_v22, 1 }
  0x2e   :  { %v480_v24 = vmul.f32 0.0078125, %v60_v21  ;;  %v98_v26 = vadd.f32 %v97_v25, %v96_v22 }
  0x30   :  { %v100_v28 = vmul.f32 %v480_v24, %v480_v24  ;;  %v99_v29 = vmul.f32 0.0078125, %v98_v26  ;;  %v111_v40 = vsub.f32 %v382_v2, %v480_v24  ;;  %v112_v42 = vsub.f32 %v384_v3, %v480_v24 }
  0x31   :  { %v113_v43 = vsub.f32 %v386_v4, %v480_v24  ;;  %v114_v44 = vsub.f32 %v391_v6, %v480_v24  ;;  %v115_v46 = vsub.f32 %v399_v10, %v480_v24  ;;  %v116_v47 = vsub.f32 %v407_v14, %v480_v24 }
  0x32   :  { %v101_v30 = vsub.f32 %v99_v29, %v100_v28  ;;  %v117_v48 = vsub.f32 %v412_v18, %v480_v24  ;;  %v118_v2 = vsub.f32 %v420_v23, %v480_v24  ;;  %v119_v3 = vsub.f32 %v425_v27, %v480_v24 }
  0x33   :  { %v120_v4 = vsub.f32 %v433_v32, %v480_v24  ;;  %v121_v6 = vsub.f32 %v438_v36, %v480_v24  ;;  %v122_v10 = vsub.f32 %v446_v41, %v480_v24  ;;  %v123_v14 = vsub.f32 %v451_v45, %v480_v24 }
  0x34   :  { %v102_v31 = vmax.f32 %v101_v30, 0.0  ;;  %v124_v18 = vsub.f32 %v459_v50, %v480_v24  ;;  %v125_v23 = vsub.f32 %v464_v54, %v480_v24  ;;  %v126_v27 = vsub.f32 %v469_v58, %v480_v24 }
  0x36   :  { %362 = vrsqrt.f32 %v102_v31  ;;  %vm105_vm0 = vcmp.eq.f32.partialorder %v102_v31, inf  ;;  %v108_v34 = vand.u32 2147483648, %v102_v31  ;;  %vm107_vm1 = vcmp.eq.f32.partialorder %v102_v31, 0.0 }
  0x40   :  { %v363_v33 = vpop.eup %362 }
  0x41   :  { %v104_v35 = vmul.f32 %v363_v33, %v102_v31 }
  0x43   :  { %v106_v37 = vsel %vm105_vm0, %v102_v31, %v104_v35 }
  0x44   :  { %v109_v38 = vsel %vm107_vm1, %v108_v34, %v106_v37 }
  0x45   :  { %v110_v39 = vadd.f32 1e-06, %v109_v38 }
  0x47   :  { %364 = vrcp.f32 %v110_v39 }
  0x51   :  { %v365_v49 = vpop.eup %364 }
  0x52   :  { %v128_v32 = vmul.f32 %v365_v49, %v111_v40  ;;  %v129_v51 = vmul.f32 %v365_v49, %v112_v42  ;;  %v130_v52 = vmul.f32 %v365_v49, %v113_v43  ;;  %v131_v36 = vmul.f32 %v365_v49, %v114_v44 }
  0x53   :  { %v132_v53 = vmul.f32 %v365_v49, %v115_v46  ;;  %v133_v55 = vmul.f32 %v365_v49, %v116_v47  ;;  %v134_v41 = vmul.f32 %v365_v49, %v117_v48  ;;  %v135_v56 = vmul.f32 %v365_v49, %v118_v2 }
  0x54   :  { %v144_v57 = vmax.f32 %v128_v32, 0.0  ;;  %v145_v59 = vmax.f32 %v129_v51, 0.0  ;;  %v146_v45 = vmax.f32 %v130_v52, 0.0  ;;  %v147_v60 = vmax.f32 %v131_v36, 0.0 }
  0x55   :  { %v148_v61 = vmax.f32 %v132_v53, 0.0  ;;  %v149_v50 = vmax.f32 %v133_v55, 0.0  ;;  %v150_v62 = vmax.f32 %v134_v41, 0.0  ;;  %v151_v63 = vmax.f32 %v135_v56, 0.0 }
  0x56   :  { %v311_v54 = vpack.c.bf16 %v145_v59, %v144_v57  ;;  %v316_v0 = vpack.c.bf16 %v147_v60, %v146_v45  ;;  %v136_v1 = vmul.f32 %v365_v49, %v119_v3  ;;  %v137_v58 = vmul.f32 %v365_v49, %v120_v4 }
  0x57   :  { %v321_v5 = vpack.c.bf16 %v149_v50, %v148_v61  ;;  %v326_v7 = vpack.c.bf16 %v151_v63, %v150_v62  ;;  %v138_v8 = vmul.f32 %v365_v49, %v121_v6  ;;  %v139_v9 = vmul.f32 %v365_v49, %v122_v10 }
  0x58   :  { %312 = vst [vmem:[%s541_s1] sm:$0xff] %v311_v54   ;;  %355 = vst [vmem:[%s541_s1 + $0x8] sm:$0xff] %v316_v0   ;;  %v152_v11 = vmax.f32 %v136_v1, 0.0  ;;  %v153_v12 = vmax.f32 %v137_v58, 0.0  ;;  %v140_v13 = vmul.f32 %v365_v49, %v123_v14  ;;  %v141_v15 = vmul.f32 %v365_v49, %v124_v18 }
  0x59   :  { %356 = vst [vmem:[%s541_s1 + $0x10] sm:$0xff] %v321_v5   ;;  %357 = vst [vmem:[%s541_s1 + $0x18] sm:$0xff] %v326_v7   ;;  %v154_v16 = vmax.f32 %v138_v8, 0.0  ;;  %v155_v17 = vmax.f32 %v139_v9, 0.0  ;;  %v142_v19 = vmul.f32 %v365_v49, %v125_v23  ;;  %v143_v20 = vmul.f32 %v365_v49, %v126_v27 }
  0x5a   :  { %v331_v21 = vpack.c.bf16 %v153_v12, %v152_v11  ;;  %v156_v22 = vmax.f32 %v140_v13, 0.0  ;;  %v157_v24 = vmax.f32 %v141_v15, 0.0 }
  0x5b   :  { %v336_v25 = vpack.c.bf16 %v155_v17, %v154_v16  ;;  %v158_v26 = vmax.f32 %v142_v19, 0.0  ;;  %v159_v28 = vmax.f32 %v143_v20, 0.0 }
  0x5c   :  { %358 = vst [vmem:[%s541_s1 + $0x20] sm:$0xff] %v331_v21   ;;  %v341_v29 = vpack.c.bf16 %v157_v24, %v156_v22 }
  0x5d   :  { %359 = vst [vmem:[%s541_s1 + $0x28] sm:$0xff] %v336_v25   ;;  %v346_v30 = vpack.c.bf16 %v159_v28, %v158_v26 }
  0x5e   :  { %360 = vst [vmem:[%s541_s1 + $0x30] sm:$0xff] %v341_v29  }
  0x5f   :  { %361 = vst [vmem:[%s541_s1 + $0x38] sm:$0xff] %v346_v30  }

// kernel: glow_forward.20
= control target key start
LH: loop header
LB: loop body
LE: loop exit
PB: predicated region body
PF: predicated region fallthrough
CT: control target
= control target key end

     0   :  { %s705_s1 = inlined_call_operand.vmem [shape: bf16[128,128], index: 1, kind: input, shape index: {}]   ;;  %s706_s0 = inlined_call_operand.vmem [shape: bf16[128,128], index: 0, kind: input, shape index: {}]   ;;  %s707_s2 = inlined_call_operand.vmem [shape: f32[1,128], index: 2, kind: input, shape index: {}]   ;;  %s708_s3 = inlined_call_operand.vmem [shape: bf16[128,128], index: 3, kind: output, shape index: {}]  }
   0x1   :  { %v594_v0 = vld [vmem:[%s705_s1] sm:$0xff]   ;;  %v595_v1 = vld [vmem:[%s705_s1 + $0x8] sm:$0xff]   ;;  %v596_v2 = vld [vmem:[%s705_s1 + $0x10] sm:$0xff]  }
   0x2   :  { %546 = vmatprep.subr.bf16.mxu0 %v594_v0  ;;  %578 = vmatprep.subr.bf16.mxu1 %v594_v0  ;;  %v597_v3 = vld [vmem:[%s705_s1 + $0x18] sm:$0xff]   ;;  %v602_v4 = vld [vmem:[%s706_s0] sm:$0xff]   ;;  %v599_v7 = vld [vmem:[%s705_s1 + $0x28] sm:$0xff]  }
   0x3   :  { %547 = vmatpush3.bf16.msra.mxu0 %v594_v0  ;;  %586 = vmatpush3.bf16.msra.mxu1 %v594_v0  ;;  %v603_v5 = vld [vmem:[%s706_s0 + $0x20] sm:$0xff]   ;;  %v600_v8 = vld [vmem:[%s705_s1 + $0x30] sm:$0xff]   ;;  %v601_v9 = vld [vmem:[%s705_s1 + $0x38] sm:$0xff]  }
   0x4   :  { %548 = vmatprep.subr.bf16.mxu0 %v595_v1  ;;  %579 = vmatprep.subr.bf16.mxu1 %v595_v1  ;;  %v598_v6 = vld [vmem:[%s705_s1 + $0x20] sm:$0xff]   ;;  %v604_v10 = vld [vmem:[%s706_s0 + $0x8] sm:$0xff]   ;;  %v606_v12 = vld [vmem:[%s706_s0 + $0x10] sm:$0xff]  }
   0x5   :  { %562 = vmatprep.mubr.bf16.mxu0 %v602_v4  ;;  %570 = vmatprep.mubr.bf16.mxu1 %v603_v5  ;;  %v605_v11 = vld [vmem:[%s706_s0 + $0x28] sm:$0xff]   ;;  %v607_v13 = vld [vmem:[%s706_s0 + $0x30] sm:$0xff]   ;;  %v608_v14 = vld [vmem:[%s706_s0 + $0x18] sm:$0xff]  }
   0x6   :  { %v609_v15 = vld [vmem:[%s706_s0 + $0x38] sm:$0xff]   ;;  %v450_v17 = vld [vmem:[%s707_s2] ss:$0 sm:$0xff] }
   0x7   :  { %549 = vmatpush3.bf16.msra.mxu0 %v595_v1  ;;  %587 = vmatpush3.bf16.msra.mxu1 %v595_v1 }
   0x8   :  { %550 = vmatprep.subr.bf16.mxu0 %v596_v2  ;;  %580 = vmatprep.subr.bf16.mxu1 %v596_v2 }
   0xb   :  { %551 = vmatpush3.bf16.msra.mxu0 %v596_v2  ;;  %588 = vmatpush3.bf16.msra.mxu1 %v596_v2 }
   0xc   :  { %552 = vmatprep.subr.bf16.mxu0 %v597_v3  ;;  %581 = vmatprep.subr.bf16.mxu1 %v597_v3 }
   0xf   :  { %553 = vmatpush3.bf16.msra.mxu0 %v597_v3  ;;  %589 = vmatpush3.bf16.msra.mxu1 %v597_v3 }
  0x10   :  { %554 = vmatprep.subr.bf16.mxu0 %v598_v6  ;;  %582 = vmatprep.subr.bf16.mxu1 %v598_v6 }
  0x13   :  { %555 = vmatpush3.bf16.msra.mxu0 %v598_v6  ;;  %590 = vmatpush3.bf16.msra.mxu1 %v598_v6 }
  0x14   :  { %556 = vmatprep.subr.bf16.mxu0 %v599_v7  ;;  %583 = vmatprep.subr.bf16.mxu1 %v599_v7 }
  0x17   :  { %557 = vmatpush3.bf16.msra.mxu0 %v599_v7  ;;  %591 = vmatpush3.bf16.msra.mxu1 %v599_v7 }
  0x18   :  { %558 = vmatprep.subr.bf16.mxu0 %v600_v8  ;;  %584 = vmatprep.subr.bf16.mxu1 %v600_v8 }
  0x1b   :  { %559 = vmatpush3.bf16.msra.mxu0 %v600_v8  ;;  %592 = vmatpush3.bf16.msra.mxu1 %v600_v8 }
  0x1c   :  { %560 = vmatprep.subr.bf16.mxu0 %v601_v9  ;;  %585 = vmatprep.subr.bf16.mxu1 %v601_v9 }
  0x1f   :  { %561 = vmatpush3.bf16.msra.mxu0 %v601_v9  ;;  %593 = vmatpush3.bf16.msra.mxu1 %v601_v9 }
  0x22   :  { %563 = vmatmul.mubr.bf16.vlgmr.msra.gmra.mrb[0].mxu0 %v604_v10  ;;  %571 = vmatmul.mubr.bf16.vlgmr.msra.gmra.mrb[0].mxu1 %v605_v11 }
  0x23   :  { %566 = vmatprep.mubr.bf16.mxu0 %v606_v12  ;;  %574 = vmatprep.mubr.bf16.mxu1 %v607_v13 }
  0x2a   :  { %567 = vmatmul.mubr.bf16.gmra.mrb[4].mxu0 %v608_v14  ;;  %575 = vmatmul.mubr.bf16.gmra.mrb[4].mxu1 %v609_v15 }
  0xf5   :  { %v564_v16 = vpop.f32.mrb[0].mxu0  ;;  %v572_v18 = vpop.f32.mrb[0].mxu1 }
  0xf6   :  { %v213_v19 = vpop.f32.mrb[1].mxu0  ;;  %v245_v20 = vpop.f32.mrb[1].mxu1  ;;  %v336_v23 = vadd.f32 %v564_v16, %v450_v17  ;;  %v344_v24 = vadd.f32 %v572_v18, %v450_v17 }
  0xf7   :  { %v565_v21 = vpop.f32.mrb[2].mxu0  ;;  %v573_v22 = vpop.f32.mrb[2].mxu1  ;;  %v334_v29 = vadd.f32 %v450_v17, %v213_v19  ;;  %v342_v30 = vadd.f32 %v450_v17, %v245_v20 }
  0xf8   :  { %v337_v25 = vadd.f32 %v565_v21, %v450_v17  ;;  %v345_v26 = vadd.f32 %v573_v22, %v450_v17  ;;  %v216_v27 = vpop.f32.mrb[3].mxu0  ;;  %v248_v28 = vpop.f32.mrb[3].mxu1 }
  0xf9   :  { %v335_v31 = vadd.f32 %v450_v17, %v216_v27  ;;  %v343_v32 = vadd.f32 %v450_v17, %v248_v28 }
  0xfa   :  { %v491_v33 = vpack.c.bf16 %v337_v25, %v336_v23  ;;  %v511_v34 = vpack.c.bf16 %v345_v26, %v344_v24 }
  0xfb   :  { %v486_v35 = vpack.c.bf16 %v335_v31, %v334_v29  ;;  %v506_v36 = vpack.c.bf16 %v343_v32, %v342_v30 }
  0xfc   :  { %523 = vst [vmem:[%s708_s3 + $0x8] sm:$0xff] %v491_v33   ;;  %527 = vst [vmem:[%s708_s3 + $0x28] sm:$0xff] %v511_v34  }
  0xfd   :  { %487 = vst [vmem:[%s708_s3] sm:$0xff] %v486_v35   ;;  %526 = vst [vmem:[%s708_s3 + $0x20] sm:$0xff] %v506_v36   ;;  %v568_v37 = vpop.f32.mrb[4].mxu0  ;;  %v576_v38 = vpop.f32.mrb[4].mxu1 }
  0xfe   :  { %v229_v39 = vpop.f32.mrb[5].mxu0  ;;  %v261_v40 = vpop.f32.mrb[5].mxu1  ;;  %v340_v43 = vadd.f32 %v568_v37, %v450_v17  ;;  %v348_v44 = vadd.f32 %v576_v38, %v450_v17 }
  0xff   :  { %v569_v41 = vpop.f32.mrb[6].mxu0  ;;  %v577_v42 = vpop.f32.mrb[6].mxu1  ;;  %v338_v49 = vadd.f32 %v450_v17, %v229_v39  ;;  %v346_v50 = vadd.f32 %v450_v17, %v261_v40 }
 0x100   :  { %v341_v45 = vadd.f32 %v569_v41, %v450_v17  ;;  %v349_v46 = vadd.f32 %v577_v42, %v450_v17  ;;  %v232_v47 = vpop.f32.mrb[7].mxu0  ;;  %v264_v48 = vpop.f32.mrb[7].mxu1 }
 0x101   :  { %v339_v51 = vadd.f32 %v450_v17, %v232_v47  ;;  %v347_v52 = vadd.f32 %v450_v17, %v264_v48 }
 0x102   :  { %v501_v53 = vpack.c.bf16 %v341_v45, %v340_v43  ;;  %v521_v54 = vpack.c.bf16 %v349_v46, %v348_v44 }
 0x103   :  { %v496_v55 = vpack.c.bf16 %v339_v51, %v338_v49  ;;  %v516_v56 = vpack.c.bf16 %v347_v52, %v346_v50 }
 0x104   :  { %525 = vst [vmem:[%s708_s3 + $0x18] sm:$0xff] %v501_v53   ;;  %529 = vst [vmem:[%s708_s3 + $0x38] sm:$0xff] %v521_v54  }
 0x105   :  { %524 = vst [vmem:[%s708_s3 + $0x10] sm:$0xff] %v496_v55   ;;  %528 = vst [vmem:[%s708_s3 + $0x30] sm:$0xff] %v516_v56  }

// kernel: glow_forward.21
= control target key start
LH: loop header
LB: loop body
LE: loop exit
PB: predicated region body
PF: predicated region fallthrough
CT: control target
= control target key end

     0   :  { %s843_s0 = inlined_call_operand.vmem [shape: bf16[200,128], index: 0, kind: input, shape index: {}]   ;;  %s844_s1 = inlined_call_operand.vmem [shape: bf16[200,128], index: 1, kind: output, shape index: {}]  }
   0x1   :  { %v413_v0 = vld [vmem:[%s843_s0] sm:$0xff]   ;;  %v520_v1 = vld [vmem:[%s843_s0 + $0x8] sm:$0xff]   ;;  %v521_v5 = vld [vmem:[%s843_s0 + $0x10] sm:$0xff]  }
   0x2   :  { %v562_v2 = vunpack.c.l.bf16 %v413_v0  ;;  %v564_v3 = vunpack.c.h.bf16 %v413_v0  ;;  %v566_v4 = vunpack.c.l.bf16 %v520_v1  ;;  %v571_v6 = vunpack.c.h.bf16 %v520_v1  ;;  %v522_v10 = vld [vmem:[%s843_s0 + $0x18] sm:$0xff]   ;;  %v523_v18 = vld [vmem:[%s843_s0 + $0x20] sm:$0xff]   ;;  %v524_v27 = vld [vmem:[%s843_s0 + $0x28] sm:$0xff]  }
   0x3   :  { %v575_v8 = vunpack.c.l.bf16 %v521_v5  ;;  %v585_v13 = vunpack.c.h.bf16 %v521_v5  ;;  %v590_v16 = vunpack.c.l.bf16 %v522_v10  ;;  %v598_v21 = vunpack.c.h.bf16 %v522_v10  ;;  %v525_v36 = vld [vmem:[%s843_s0 + $0x30] sm:$0xff]   ;;  %v526_v45 = vld [vmem:[%s843_s0 + $0x38] sm:$0xff]   ;;  %v527_v54 = vld [vmem:[%s843_s0 + $0x40] sm:$0xff]  }
   0x4   :  { %v58_v7 = vadd.f32 %v564_v3, %v562_v2  ;;  %v89_v11 = vmul.f32 %v562_v2, %v562_v2  ;;  %v90_v12 = vmul.f32 %v564_v3, %v564_v3  ;;  %v91_v15 = vmul.f32 %v566_v4, %v566_v4  ;;  %v528_v63 = vld [vmem:[%s843_s0 + $0x48] sm:$0xff]  }
   0x5   :  { %v92_v19 = vmul.f32 %v571_v6, %v571_v6  ;;  %v93_v23 = vmul.f32 %v575_v8, %v575_v8  ;;  %v603_v25 = vunpack.c.l.bf16 %v523_v18  ;;  %v94_v28 = vmul.f32 %v585_v13, %v585_v13 }
   0x6   :  { %v59_v9 = vadd.f32 %v566_v4, %v58_v7  ;;  %v114_v20 = vadd.f32 %v90_v12, %v89_v11  ;;  %v611_v30 = vunpack.c.h.bf16 %v523_v18  ;;  %v95_v32 = vmul.f32 %v590_v16, %v590_v16 }
   0x7   :  { %v616_v34 = vunpack.c.l.bf16 %v524_v27  ;;  %v96_v37 = vmul.f32 %v598_v21, %v598_v21  ;;  %v624_v39 = vunpack.c.h.bf16 %v524_v27  ;;  %v97_v41 = vmul.f32 %v603_v25, %v603_v25 }
   0x8   :  { %v60_v14 = vadd.f32 %v571_v6, %v59_v9  ;;  %v115_v24 = vadd.f32 %v114_v20, %v91_v15  ;;  %v629_v43 = vunpack.c.l.bf16 %v525_v36  ;;  %v98_v46 = vmul.f32 %v611_v30, %v611_v30 }
   0x9   :  { %v637_v48 = vunpack.c.h.bf16 %v525_v36  ;;  %v99_v50 = vmul.f32 %v616_v34, %v616_v34  ;;  %v642_v52 = vunpack.c.l.bf16 %v526_v45  ;;  %v100_v55 = vmul.f32 %v624_v39, %v624_v39 }
   0xa   :  { %v61_v17 = vadd.f32 %v575_v8, %v60_v14  ;;  %v116_v29 = vadd.f32 %v115_v24, %v92_v19  ;;  %v650_v57 = vunpack.c.h.bf16 %v526_v45  ;;  %v101_v59 = vmul.f32 %v629_v43, %v629_v43  ;;  %v529_v14 = vld [vmem:[%s843_s0 + $0x50] sm:$0xff]  }
   0xb   :  { %v655_v61 = vunpack.c.l.bf16 %v527_v54  ;;  %v102_v0 = vmul.f32 %v637_v48, %v637_v48  ;;  %v663_v5 = vunpack.c.h.bf16 %v527_v54  ;;  %v103_v9 = vmul.f32 %v642_v52, %v642_v52 }
   0xc   :  { %v62_v22 = vadd.f32 %v585_v13, %v61_v17  ;;  %v117_v33 = vadd.f32 %v116_v29, %v93_v23  ;;  %v668_v11 = vunpack.c.l.bf16 %v528_v63  ;;  %v104_v15 = vmul.f32 %v650_v57, %v650_v57 }
   0xd   :  { %v676_v18 = vunpack.c.h.bf16 %v528_v63  ;;  %v105_v20 = vmul.f32 %v655_v61, %v655_v61  ;;  %v681_v23 = vunpack.c.l.bf16 %v529_v14  ;;  %v106_v27 = vmul.f32 %v663_v5, %v663_v5 }
   0xe   :  { %v63_v26 = vadd.f32 %v590_v16, %v62_v22  ;;  %v118_v38 = vadd.f32 %v117_v33, %v94_v28  ;;  %v689_v29 = vunpack.c.h.bf16 %v529_v14 }
  0x10   :  { %v64_v31 = vadd.f32 %v598_v21, %v63_v26  ;;  %v119_v42 = vadd.f32 %v118_v38, %v95_v32  ;;  %v530_v26 = vld [vmem:[%s843_s0 + $0x58] sm:$0xff]   ;;  %v107_v32 = vmul.f32 %v668_v11, %v668_v11  ;;  %v108_v38 = vmul.f32 %v676_v18, %v676_v18 }
  0x12   :  { %v65_v35 = vadd.f32 %v603_v25, %v64_v31  ;;  %v120_v47 = vadd.f32 %v119_v42, %v96_v37  ;;  %v32_v37 = vld [vmem:[%s843_s0 + $0x60] sm:$0xf] }
  0x14   :  { %v66_v40 = vadd.f32 %v611_v30, %v65_v35  ;;  %v121_v51 = vadd.f32 %v120_v47, %v97_v41  ;;  %v694_v35 = vunpack.c.l.bf16 %v530_v26  ;;  %v702_v41 = vunpack.c.h.bf16 %v530_v26 }
  0x16   :  { %v67_v44 = vadd.f32 %v616_v34, %v66_v40  ;;  %v122_v56 = vadd.f32 %v121_v51, %v98_v46  ;;  %v707_v46 = vunpack.c.l.bf16 %v32_v37 }
  0x18   :  { %v68_v49 = vadd.f32 %v624_v39, %v67_v44  ;;  %v123_v60 = vadd.f32 %v122_v56, %v99_v50  ;;  %v109_v44 = vmul.f32 %v681_v23, %v681_v23  ;;  %v112_v56 = vmul.f32 %v702_v41, %v702_v41 }
  0x1a   :  { %v69_v53 = vadd.f32 %v629_v43, %v68_v49  ;;  %v124_v1 = vadd.f32 %v123_v60, %v100_v55  ;;  %v110_v49 = vmul.f32 %v689_v29, %v689_v29  ;;  %v113_v60 = vmul.f32 %v707_v46, %v707_v46 }
  0x1c   :  { %v70_v58 = vadd.f32 %v637_v48, %v69_v53  ;;  %v125_v10 = vadd.f32 %v124_v1, %v101_v59  ;;  %v111_v53 = vmul.f32 %v694_v35, %v694_v35 }
  0x1e   :  { %v71_v62 = vadd.f32 %v642_v52, %v70_v58  ;;  %v126_v17 = vadd.f32 %v125_v10, %v102_v0 }
  0x20   :  { %v72_v7 = vadd.f32 %v650_v57, %v71_v62  ;;  %v127_v22 = vadd.f32 %v126_v17, %v103_v9 }
  0x22   :  { %v73_v12 = vadd.f32 %v655_v61, %v72_v7  ;;  %v128_v28 = vadd.f32 %v127_v22, %v104_v15 }
  0x24   :  { %v74_v19 = vadd.f32 %v663_v5, %v73_v12  ;;  %v129_v33 = vadd.f32 %v128_v28, %v105_v20 }
  0x26   :  { %v75_v24 = vadd.f32 %v668_v11, %v74_v19  ;;  %v130_v40 = vadd.f32 %v129_v33, %v106_v27 }
  0x28   :  { %v76_v31 = vadd.f32 %v676_v18, %v75_v24  ;;  %v131_v45 = vadd.f32 %v130_v40, %v107_v32 }
  0x2a   :  { %v77_v36 = vadd.f32 %v681_v23, %v76_v31  ;;  %v132_v50 = vadd.f32 %v131_v45, %v108_v38 }
  0x2c   :  { %v78_v42 = vadd.f32 %v689_v29, %v77_v36  ;;  %v133_v54 = vadd.f32 %v132_v50, %v109_v44 }
  0x2e   :  { %v79_v47 = vadd.f32 %v694_v35, %v78_v42  ;;  %v134_v58 = vadd.f32 %v133_v54, %v110_v49 }
  0x30   :  { %v80_v51 = vadd.f32 %v702_v41, %v79_v47  ;;  %v135_v62 = vadd.f32 %v134_v58, %v111_v53 }
  0x32   :  { %v81_v55 = vadd.f32 %v80_v51, %v707_v46  ;;  %v136_v0 = vadd.f32 %v135_v62, %v112_v56 }
  0x34   :  { %v82_v59 = vrot.slane %v81_v55, 4  ;;  %v137_v7 = vadd.f32 %v136_v0, %v113_v60 }
  0x36   :  { %v83_v63 = vadd.f32 %v82_v59, %v81_v55  ;;  %v138_v10 = vrot.slane %v137_v7, 4 }
  0x38   :  { %v84_v1 = vrot.slane %v83_v63, 2  ;;  %v139_v14 = vadd.f32 %v138_v10, %v137_v7 }
  0x3a   :  { %v85_v9 = vadd.f32 %v84_v1, %v83_v63  ;;  %v140_v17 = vrot.slane %v139_v14, 2 }
  0x3c   :  { %v86_v12 = vrot.slane %v85_v9, 1  ;;  %v141_v20 = vadd.f32 %v140_v17, %v139_v14 }
  0x3e   :  { %v87_v15 = vadd.f32 %v86_v12, %v85_v9  ;;  %v142_v22 = vrot.slane %v141_v20, 1 }
  0x40   :  { %v720_v19 = vmul.f32 0.005, %v87_v15  ;;  %v143_v24 = vadd.f32 %v142_v22, %v141_v20 }
  0x42   :  { %v145_v26 = vmul.f32 %v720_v19, %v720_v19  ;;  %v144_v27 = vmul.f32 0.005, %v143_v24  ;;  %v156_v42 = vsub.f32 %v562_v2, %v720_v19  ;;  %v157_v44 = vsub.f32 %v564_v3, %v720_v19 }
  0x43   :  { %v158_v45 = vsub.f32 %v566_v4, %v720_v19  ;;  %v159_v47 = vsub.f32 %v571_v6, %v720_v19  ;;  %v160_v49 = vsub.f32 %v575_v8, %v720_v19  ;;  %v161_v50 = vsub.f32 %v585_v13, %v720_v19 }
  0x44   :  { %v146_v28 = vsub.f32 %v144_v27, %v145_v26  ;;  %v162_v51 = vsub.f32 %v590_v16, %v720_v19  ;;  %v163_v2 = vsub.f32 %v598_v21, %v720_v19  ;;  %v164_v3 = vsub.f32 %v603_v25, %v720_v19 }
  0x45   :  { %v165_v4 = vsub.f32 %v611_v30, %v720_v19  ;;  %v166_v6 = vsub.f32 %v616_v34, %v720_v19  ;;  %v167_v8 = vsub.f32 %v624_v39, %v720_v19  ;;  %v168_v13 = vsub.f32 %v629_v43, %v720_v19 }
  0x46   :  { %v147_v31 = vmax.f32 %v146_v28, 0.0  ;;  %v169_v16 = vsub.f32 %v637_v48, %v720_v19  ;;  %v170_v21 = vsub.f32 %v642_v52, %v720_v19  ;;  %v171_v25 = vsub.f32 %v650_v57, %v720_v19 }
  0x47   :  { %v172_v30 = vsub.f32 %v655_v61, %v720_v19  ;;  %v173_v34 = vsub.f32 %v663_v5, %v720_v19  ;;  %v174_v39 = vsub.f32 %v668_v11, %v720_v19  ;;  %v175_v43 = vsub.f32 %v676_v18, %v720_v19 }
  0x48   :  { %542 = vrsqrt.f32 %v147_v31  ;;  %vm150_vm0 = vcmp.eq.f32.partialorder %v147_v31, inf  ;;  %v153_v33 = vand.u32 2147483648, %v147_v31  ;;  %vm152_vm1 = vcmp.eq.f32.partialorder %v147_v31, 0.0 }
  0x49   :  { %v176_v48 = vsub.f32 %v681_v23, %v720_v19  ;;  %v177_v52 = vsub.f32 %v689_v29, %v720_v19  ;;  %v178_v57 = vsub.f32 %v694_v35, %v720_v19  ;;  %v179_v61 = vsub.f32 %v702_v41, %v720_v19 }
  0x4a   :  { %v180_v5 = vsub.f32 %v707_v46, %v720_v19 }
  0x52   :  { %v543_v32 = vpop.eup %542 }
  0x53   :  { %v149_v36 = vmul.f32 %v543_v32, %v147_v31 }
  0x55   :  { %v151_v37 = vsel %vm150_vm0, %v147_v31, %v149_v36 }
  0x56   :  { %v154_v38 = vsel %vm152_vm1, %v153_v33, %v151_v37 }
  0x57   :  { %v155_v40 = vadd.f32 1e-06, %v154_v38 }
  0x59   :  { %544 = vrcp.f32 %v155_v40 }
  0x63   :  { %v766_v53 = vpop.eup %544 }
  0x64   :  { %v182_v11 = vmul.f32 %v766_v53, %v156_v42  ;;  %v183_v18 = vmul.f32 %v766_v53, %v157_v44  ;;  %v184_v23 = vmul.f32 %v766_v53, %v158_v45  ;;  %v185_v54 = vmul.f32 %v766_v53, %v159_v47 }
  0x65   :  { %v186_v55 = vmul.f32 %v766_v53, %v160_v49  ;;  %v187_v29 = vmul.f32 %v766_v53, %v161_v50  ;;  %v188_v35 = vmul.f32 %v766_v53, %v162_v51  ;;  %v189_v56 = vmul.f32 %v766_v53, %v163_v2 }
  0x66   :  { %v207_v41 = vmax.f32 %v182_v11, 0.0  ;;  %v208_v58 = vmax.f32 %v183_v18, 0.0  ;;  %v209_v59 = vmax.f32 %v184_v23, 0.0  ;;  %v210_v60 = vmax.f32 %v185_v54, 0.0 }
  0x67   :  { %v211_v62 = vmax.f32 %v186_v55, 0.0  ;;  %v212_v63 = vmax.f32 %v187_v29, 0.0  ;;  %v213_v0 = vmax.f32 %v188_v35, 0.0  ;;  %v214_v1 = vmax.f32 %v189_v56, 0.0 }
  0x68   :  { %v463_v7 = vpack.c.bf16 %v208_v58, %v207_v41  ;;  %v468_v9 = vpack.c.bf16 %v210_v60, %v209_v59  ;;  %v190_v10 = vmul.f32 %v766_v53, %v164_v3  ;;  %v191_v12 = vmul.f32 %v766_v53, %v165_v4 }
  0x69   :  { %v473_v14 = vpack.c.bf16 %v212_v63, %v211_v62  ;;  %v478_v15 = vpack.c.bf16 %v214_v1, %v213_v0  ;;  %v192_v17 = vmul.f32 %v766_v53, %v166_v6  ;;  %v193_v20 = vmul.f32 %v766_v53, %v167_v8 }
  0x6a   :  { %464 = vst [vmem:[%s844_s1] sm:$0xff] %v463_v7   ;;  %531 = vst [vmem:[%s844_s1 + $0x8] sm:$0xff] %v468_v9   ;;  %v215_v22 = vmax.f32 %v190_v10, 0.0  ;;  %v216_v24 = vmax.f32 %v191_v12, 0.0  ;;  %v194_v26 = vmul.f32 %v766_v53, %v168_v13  ;;  %v195_v27 = vmul.f32 %v766_v53, %v169_v16 }
  0x6b   :  { %532 = vst [vmem:[%s844_s1 + $0x10] sm:$0xff] %v473_v14   ;;  %533 = vst [vmem:[%s844_s1 + $0x18] sm:$0xff] %v478_v15   ;;  %v217_v28 = vmax.f32 %v192_v17, 0.0  ;;  %v218_v31 = vmax.f32 %v193_v20, 0.0  ;;  %v196_v32 = vmul.f32 %v766_v53, %v170_v21  ;;  %v197_v33 = vmul.f32 %v766_v53, %v171_v25 }
  0x6c   :  { %v483_v36 = vpack.c.bf16 %v216_v24, %v215_v22  ;;  %v219_v37 = vmax.f32 %v194_v26, 0.0  ;;  %v220_v38 = vmax.f32 %v195_v27, 0.0  ;;  %v198_v40 = vmul.f32 %v766_v53, %v172_v30 }
  0x6d   :  { %v488_v42 = vpack.c.bf16 %v218_v31, %v217_v28  ;;  %v221_v44 = vmax.f32 %v196_v32, 0.0  ;;  %v222_v45 = vmax.f32 %v197_v33, 0.0  ;;  %v199_v47 = vmul.f32 %v766_v53, %v173_v34 }
  0x6e   :  { %534 = vst [vmem:[%s844_s1 + $0x20] sm:$0xff] %v483_v36   ;;  %v493_v49 = vpack.c.bf16 %v220_v38, %v219_v37  ;;  %v223_v50 = vmax.f32 %v198_v40, 0.0  ;;  %v200_v51 = vmul.f32 %v766_v53, %v174_v39  ;;  %v201_v2 = vmul.f32 %v766_v53, %v175_v43 }
  0x6f   :  { %535 = vst [vmem:[%s844_s1 + $0x28] sm:$0xff] %v488_v42   ;;  %v498_v3 = vpack.c.bf16 %v222_v45, %v221_v44  ;;  %v224_v4 = vmax.f32 %v199_v47, 0.0  ;;  %v202_v6 = vmul.f32 %v766_v53, %v176_v48  ;;  %v203_v8 = vmul.f32 %v766_v53, %v177_v52 }
  0x70   :  { %536 = vst [vmem:[%s844_s1 + $0x30] sm:$0xff] %v493_v49   ;;  %v225_v13 = vmax.f32 %v200_v51, 0.0  ;;  %v226_v16 = vmax.f32 %v201_v2, 0.0  ;;  %v204_v21 = vmul.f32 %v766_v53, %v178_v57  ;;  %v205_v25 = vmul.f32 %v766_v53, %v179_v61 }
  0x71   :  { %537 = vst [vmem:[%s844_s1 + $0x38] sm:$0xff] %v498_v3   ;;  %v503_v30 = vpack.c.bf16 %v224_v4, %v223_v50  ;;  %v227_v34 = vmax.f32 %v202_v6, 0.0  ;;  %v228_v39 = vmax.f32 %v203_v8, 0.0  ;;  %v206_v43 = vmul.f32 %v766_v53, %v180_v5 }
  0x72   :  { %v508_v48 = vpack.c.bf16 %v226_v16, %v225_v13  ;;  %v229_v52 = vmax.f32 %v204_v21, 0.0  ;;  %v230_v11 = vmax.f32 %v205_v25, 0.0 }
  0x73   :  { %538 = vst [vmem:[%s844_s1 + $0x40] sm:$0xff] %v503_v30   ;;  %v513_v57 = vpack.c.bf16 %v228_v39, %v227_v34  ;;  %v231_v61 = vmax.f32 %v206_v43, 0.0 }
  0x74   :  { %539 = vst [vmem:[%s844_s1 + $0x48] sm:$0xff] %v508_v48   ;;  %v518_v18 = vpack.c.bf16 %v230_v11, %v229_v52 }
  0x75   :  { %540 = vst [vmem:[%s844_s1 + $0x50] sm:$0xff] %v513_v57   ;;  %v411_v46 = vpack.c.bf16 %v231_v61, %v231_v61 }
  0x76   :  { %541 = vst [vmem:[%s844_s1 + $0x58] sm:$0xff] %v518_v18  }
  0x77   :  { %357 = vst [vmem:[%s844_s1 + $0x60] sm:$0xf] %v411_v46 }

// kernel: glow_forward.18
= control target key start
LH: loop header
LB: loop body
LE: loop exit
PB: predicated region body
PF: predicated region fallthrough
CT: control target
= control target key end

     0   :  { %s1983_s12 = smov 0   ;;  %s2392_s0 = inlined_call_operand.vmem [shape: bf16[2,108,8], index: 0, kind: input, shape index: {}]   ;;  %s2393_s1 = inlined_call_operand.vmem [shape: bf16[72,128], index: 1, kind: input, shape index: {}]   ;;  %s2394_s2 = inlined_call_operand.vmem [shape: f32[1,128], index: 2, kind: input, shape index: {}]   ;;  %s2395_s3 = inlined_call_operand.vmem [shape: bf16[2,80,128], index: 3, kind: output, shape index: {}]  }
   0x1 LB: > { %s1537_s13 = sadd.s32 4294967295, %s1959_s12   ;;  %p1541_p0 = scmp.ge.s32.totalorder %s1959_s12, 1  ;;  %s1959_s12 = sphi %s1983_s12, %s13_s12  }
   0x2   : > { %p137_p1 = scmp.lt.s32.totalorder %s1959_s12, 3 }
   0x4   : > { %p138_p2 = pnand %p1541_p0, %p137_p1 }
   0x5   : > { %v184_v0 = vld [vmem:[%s2393_s1 + $0x4] sm:$0xf] (!%p138_p2)  ;;  %vm274_vm0 = vcmask (!%p138_p2), 1043456   ;;  %p161_p3 = scmp.lt.s32.totalorder (!%p138_p2), %s1537_s13, 1  ;;  %v1961_v1 = vmov (!%p138_p2), 0.0   ;;  %vm1962_vm1 = vmmov (!%p138_p2), 0  }
   0x6   : > { %141 = sbr.rel (%p138_p2) target bundleno = 424 (0x1a8), region = 32  ;;  %1718 = vmatprep.subr.bf16.mxu0 (!%p138_p2), %v1961_v1  ;;  %1916 = vmatprep.subr.bf16.mxu1 (!%p138_p2), %v1961_v1  ;;  %v276_v2 = vsel (!%p138_p2), %vm274_vm0, %v184_v0, 0  ;;  %vm213_vm2 = vsmask.f32 (!%p138_p2), 7424  ;;  %v438_v13 = vld [vmem:[%s2393_s1 + $0x8] sm:$0xf] (!%p138_p2) }
   0x7   : > { %1719 = vmatpush3.bf16.msra.mxu0 (!%p138_p2), %v276_v2  ;;  %1917 = vmatpush3.bf16.msra.mxu1 (!%p138_p2), %v276_v2  ;;  %vm258_vm3 = vcmask (!%p138_p2), 64512   ;;  %v182_v22 = vld [vmem:[%s2393_s1] sm:$0xf] (!%p138_p2)  ;;  %v470_v26 = vsel (!%p138_p2), %vm274_vm0, %v438_v13, 0  ;;  %vm442_vm4 = vcmask (!%p138_p2), 1046528   ;;  %vm872_vm6 = vcmask (!%p138_p2), 1045504  }
   0x8   : > { %1720 = vmatprep.mubr.msk.bf16.mxu0 (!%p138_p2), %vm1962_vm1, %v1961_v1  ;;  %1732 = vmatprep.mubr.msk.bf16.mxu1 (!%p138_p2), %vm1962_vm1, %v1961_v1  ;;  %v362_v31 = vsel (!%p138_p2), %vm274_vm0, %v182_v22, 0  ;;  %v566_v48 = vld [vmem:[%s2393_s1 + $0xc] sm:$0xf] (!%p138_p2)  ;;  %v708_v53 = vld [vmem:[%s2393_s1 + $0x10] sm:$0xf] (!%p138_p2)  ;;  %vm1302_vm8 = vcmask (!%p138_p2), 1044480  }
   0x9   : > { %1762 = vmatprep.subr.bf16.mxu0 (!%p138_p2), %v1961_v1  ;;  %1740 = vmatprep.subr.bf16.mxu1 (!%p138_p2), %v1961_v1  ;;  %v622_v50 = vsel (!%p138_p2), %vm274_vm0, %v566_v48, 0  ;;  %v782_v55 = vsel (!%p138_p2), %vm274_vm0, %v708_v53, 0  ;;  %vm712_vm5 = vsmask.f32 (!%p138_p2), 6400  ;;  %vm1142_vm7 = vsmask.f32 (!%p138_p2), 5376 }
   0xd   : > { %s2397_s13 = smov (!%p161_p3, %s1537_s13), 1 }
   0xe   : > { %s1918_s16 = smul.u32 56, %s2397_s13 }
   0xf   : > { %s1919_s11 = smul.u32 40, %s2397_s13 }
  0x10   : > { %s2009_s19 = scalar_lea.vmem %s2392_s0, %s1918_s16 }
  0x11   : > { %v172_v3 = vld [vmem:[%s2009_s19] sm:$0xf]  ;;  %v2013_v4 = vld [vmem:[%s2009_s19 + $0x4] sm:$0xf]  ;;  %v2019_v6 = vld [vmem:[%s2009_s19 + $0x8] sm:$0xff]   ;;  %s2370_s16 = scalar_lea.vmem %s2395_s3, %s1919_s11 }
  0x12   : > { %v2016_v5 = vcombine.low %v172_v3, %v2013_v4  ;;  %v222_v9 = vshll.u32 %v2019_v6, 16  ;;  %v2025_v10 = vld [vmem:[%s2009_s19 + $0x18] sm:$0xff]   ;;  %v2028_v11 = vld [vmem:[%s2009_s19 + $0x20] sm:$0xff]   ;;  %v2031_v12 = vld [vmem:[%s2009_s19 + $0x10] sm:$0xff]   ;;  %v226_v23 = vshrl.u32 %v2019_v6, 16  ;;  %v444_v52 = vrot.slane %v2019_v6, 1 }
  0x13   : > { %v238_v16 = vshll.u32 %v2025_v10, 16  ;;  %v242_v17 = vshrl.u32 %v2025_v10, 16  ;;  %v246_v18 = vshll.u32 %v2028_v11, 16  ;;  %v2040_v19 = vld [vmem:[%s2009_s19 + $0x28] ss:$0 sps:$4 sm:$0x11]  }
  0x14   : > { %v215_v7 = vshrl.u32 %v2016_v5, 16  ;;  %v217_v8 = vshll.u32 %v2016_v5, 16  ;;  %v224_v15 = vrot.slane %v222_v9, 1  ;;  %v230_v24 = vshll.u32 %v2031_v12, 16  ;;  %v2064_v39 = vld [vmem:[%s2009_s19 + $0x24] sm:$0xff]   ;;  %v2135_v2 = vld [vmem:[%s2009_s19 + $0xc] sm:$0xff]  }
  0x15   : > { %v240_v21 = vrot.slane %v238_v16, 1  ;;  %v248_v25 = vrot.slane %v246_v18, 1  ;;  %v250_v29 = vshrl.u32 %v2028_v11, 16  ;;  %v254_v30 = vshll.u32 %v2040_v19, 16  ;;  %v437_v43 = vld [vmem:[%s2009_s19] sm:$0xe] }
  0x16   : > { %v219_v14 = vrot.slane %v217_v8, 1  ;;  %v228_v33 = vor.u32 %v226_v23, %v224_v15  ;;  %v232_v34 = vrot.slane %v230_v24, 1  ;;  %v234_v38 = vshrl.u32 %v2031_v12, 16  ;;  %v1942_v40 = vld [vmem:[%s2009_s19 + $0x2c] ss:$0 sps:$4 sm:$0x11]  }
  0x17   : > { %v244_v28 = vor.u32 %v242_v17, %v240_v21  ;;  %v252_v35 = vor.u32 %v250_v29, %v248_v25  ;;  %v256_v36 = vrot.slane %v254_v30, 1  ;;  %v602_v44 = vrot.slane %v2064_v39, 1  ;;  %v555_v61 = vld [vmem:[%s2009_s19 + $0x4] sm:$0xe]  ;;  %v2130_v62 = vld [vmem:[%s2009_s19 + $0x8] sm:$0xf] }
  0x18   : > { %v220_v20 = vor.u32 %v219_v14, %v215_v7  ;;  %v233_v37 = vsel %vm213_vm2, %v228_v33, %v232_v34  ;;  %v236_v42 = vor.u32 %v234_v38, %v232_v34  ;;  %v604_v45 = vrot.slane %v1942_v40, 1  ;;  %v2154_v18 = vld [vmem:[%s2009_s19 + $0x14] sm:$0xff]   ;;  %v2174_v30 = vld [vmem:[%s2009_s19 + $0x1c] sm:$0xff]   ;;  %v2198_v48 = vld [vmem:[%s2009_s19 + $0x2c] ss:$0 sps:$4 sm:$0x33]  }
  0x19   : > { %v249_v32 = vsel %vm213_vm2, %v244_v28, %v248_v25  ;;  %v257_v41 = vsel %vm213_vm2, %v252_v35, %v256_v36  ;;  %v1560_v49 = vcombine.low %v437_v43, %v2013_v4  ;;  %v446_v56 = vrot.slane %v2031_v12, 1  ;;  %v996_v24 = vld [vmem:[%s2393_s1 + $0x18] sm:$0xf]  ;;  %v867_v53 = vld [vmem:[%s2009_s19 + $0x4] sm:$0xc] }
  0x1a   : > { %v225_v27 = vsel %vm213_vm2, %v220_v20, %v224_v15  ;;  %1733 = vmatmul.mubr.msk.bf16.vlgmr.msra.gmra.mrb[0].mxu1 %vm258_vm3, %v249_v32  ;;  %v2079_v46 = vsel %vm442_vm4, %v602_v44, %v604_v45  ;;  %v241_v47 = vsel %vm213_vm2, %v236_v42, %v240_v21  ;;  %v448_v58 = vrot.slane %v2025_v10, 1 }
  0x1b   : > { %1721 = vmatmul.mubr.msk.bf16.vlgmr.msra.gmra.mrb[0].mxu0 %vm258_vm3, %v225_v27  ;;  %1741 = vmatpush3.bf16.msra.mxu1 %v362_v31  ;;  %v443_v51 = vrot.slane %v1560_v49, 1  ;;  %v447_v57 = vsel %vm442_vm4, %v444_v52, %v446_v56  ;;  %v450_v60 = vrot.slane %v2028_v11, 1  ;;  %v1566_v0 = vcombine.low %v555_v61, %v2130_v62 }
  0x1c   : > { %1763 = vmatpush3.bf16.msra.mxu0 %v470_v26  ;;  %1724 = vmatprep.mubr.msk.bf16.mxu0 %vm1962_vm1, %v1961_v1  ;;  %v449_v59 = vsel %vm442_vm4, %v446_v56, %v448_v58  ;;  %v452_v3 = vrot.slane %v2040_v19, 1  ;;  %v725_v7 = vshll.u32 %v2135_v2, 16  ;;  %v596_v9 = vrot.slane %v2135_v2, 1 }
  0x1d   : > { %1806 = vmatprep.subr.bf16.mxu0 %v1961_v1  ;;  %1736 = vmatprep.mubr.msk.bf16.mxu1 %vm1962_vm1, %v1961_v1  ;;  %v445_v54 = vsel %vm442_vm4, %v443_v51, %v444_v52  ;;  %v451_v63 = vsel %vm442_vm4, %v448_v58, %v450_v60  ;;  %v714_v4 = vshrl.u32 %v1566_v0, 16  ;;  %v595_v8 = vrot.slane %v1566_v0, 1  ;;  %v985_v58 = vld [vmem:[%s2009_s19 + $0x8] sm:$0xc] }
  0x1e   : > { %1784 = vmatprep.subr.bf16.mxu1 %v1961_v1  ;;  %v727_v16 = vrot.slane %v725_v7, 2  ;;  %v731_v21 = vshrl.u32 %v2154_v18, 16  ;;  %v734_v22 = vshll.u32 %v2154_v18, 16  ;;  %v598_v23 = vrot.slane %v2154_v18, 1  ;;  %v1298_v7 = vld [vmem:[%s2393_s1 + $0x20] sm:$0xf] }
  0x1f   : > { %v716_v13 = vrot.slane %v714_v4, 1  ;;  %v597_v17 = vsel %vm442_vm4, %v595_v8, %v596_v9  ;;  %v1052_v28 = vsel %vm274_vm0, %v996_v24, 0  ;;  %v740_v32 = vshrl.u32 %v2174_v30, 16 }
  0x20   : > { %v733_v26 = vrot.slane %v731_v21, 1  ;;  %v736_v27 = vrot.slane %v734_v22, 2  ;;  %v599_v29 = vsel %vm442_vm4, %v596_v9, %v598_v23  ;;  %v743_v33 = vshll.u32 %v2174_v30, 16  ;;  %v2249_v9 = vld [vmem:[%s2009_s19 + $0x18] sm:$0xff]  }
  0x21   : > { %v600_v34 = vrot.slane %v2174_v30, 1  ;;  %v742_v36 = vrot.slane %v740_v32, 1  ;;  %v752_v42 = vshll.u32 %v2064_v39, 16  ;;  %v758_v51 = vshrl.u32 %v2198_v48, 16 }
  0x22   : > { %1737 = vmatmul.mubr.msk.bf16.gmra.mrb[4].mxu1 %vm258_vm3, %v257_v41  ;;  %v737_v31 = vor.u32 %v736_v27, %v733_v26  ;;  %v749_v41 = vshrl.u32 %v2064_v39, 16  ;;  %v761_v52 = vshll.u32 %v2198_v48, 16  ;;  %v1583_v56 = vcombine.low %v867_v53, %v2130_v62 }
  0x23   : > { %1725 = vmatmul.mubr.msk.bf16.gmra.mrb[4].mxu0 %vm258_vm3, %v233_v37  ;;  %1742 = vmatprep.mubr.msk.bf16.mxu1 %vm1962_vm1, %v1961_v1  ;;  %v745_v37 = vrot.slane %v743_v33, 2  ;;  %v601_v38 = vsel %vm442_vm4, %v598_v23, %v600_v34  ;;  %v603_v49 = vsel %vm442_vm4, %v600_v34, %v602_v44  ;;  %v874_v61 = vrot.slane %v2135_v2, 2 }
  0x24   : > { %1728 = vmatprep.mubr.msk.bf16.mxu0 %vm1962_vm1, %v1961_v1  ;;  %v751_v45 = vrot.slane %v749_v41, 1  ;;  %v882_v23 = vrot.slane %v2198_v48, 2 }
  0x25   : > { %v746_v40 = vor.u32 %v745_v37, %v742_v36 }
  0x27   : > { %v747_v43 = vsel %vm712_vm5, %v737_v31, %v746_v40 }
  0x2a   : > { %1743 = vmatmul.mubr.msk.bf16.vlgmr.msra.gmra.mrb[8].mxu1 %vm258_vm3, %v2016_v5  ;;  %v717_v5 = vshll.u32 %v1566_v0, 16 }
  0x2b   : > { %1729 = vmatmul.mubr.msk.bf16.gmra.mrb[8].mxu0 %vm258_vm3, %v241_v47  ;;  %1785 = vmatpush3.bf16.msra.mxu1 %v622_v50  ;;  %v754_v47 = vrot.slane %v752_v42, 2 }
  0x2c   : > { %1764 = vmatprep.mubr.msk.bf16.mxu0 %vm1962_vm1, %v1961_v1  ;;  %1746 = vmatprep.mubr.msk.bf16.mxu1 %vm1962_vm1, %v1961_v1  ;;  %v719_v14 = vrot.slane %v717_v5, 2 }
  0x2d   : > { %1828 = vmatprep.subr.bf16.mxu1 %v1961_v1  ;;  %v755_v50 = vor.u32 %v754_v47, %v751_v45 }
  0x2e   : > { %v720_v19 = vor.u32 %v719_v14, %v716_v13  ;;  %v1028_v13 = vrot.slane %v2249_v9, 2  ;;  %v878_v14 = vrot.slane %v2174_v30, 2 }
  0x2f   : > { %v756_v44 = vsel %vm712_vm5, %v746_v40, %v755_v50  ;;  %v1164_v40 = vshll.u32 %v2249_v9, 16 }
  0x31   : > { %v1166_v47 = vrot.slane %v1164_v40, 3 }
  0x32   : > { %1747 = vmatmul.mubr.msk.bf16.gmra.mrb[12].mxu1 %vm258_vm3, %v2019_v6  ;;  %v722_v6 = vshrl.u32 %v2135_v2, 16 }
  0x33   : > { %1765 = vmatmul.mubr.msk.bf16.vlgmr.msra.gmra.mrb[12].mxu0 %vm258_vm3, %v445_v54  ;;  %1750 = vmatprep.mubr.msk.bf16.mxu1 %vm1962_vm1, %v1961_v1  ;;  %v760_v54 = vrot.slane %v758_v51, 1 }
  0x34   : > { %1807 = vmatpush3.bf16.msra.mxu0 %v782_v55  ;;  %1768 = vmatprep.mubr.msk.bf16.mxu0 %vm1962_vm1, %v1961_v1  ;;  %v724_v15 = vrot.slane %v722_v6, 1  ;;  %v763_v55 = vrot.slane %v761_v52, 2  ;;  %v876_v6 = vrot.slane %v2154_v18, 2 }
  0x35   : > { %1850 = vmatprep.subr.bf16.mxu0 %v1961_v1 }
  0x36   : > { %v728_v20 = vor.u32 %v727_v16, %v724_v15  ;;  %v2263_v16 = vld [vmem:[%s2009_s19 + $0x20] sm:$0xff]  }
  0x37   : > { %v1030_v18 = vrot.slane %v2263_v16, 2  ;;  %v1170_v51 = vshrl.u32 %v2263_v16, 16  ;;  %v1173_v52 = vshll.u32 %v2263_v16, 16 }
  0x38   : > { %v729_v25 = vsel %vm712_vm5, %v720_v19, %v728_v20  ;;  %v738_v35 = vsel %vm712_vm5, %v728_v20, %v737_v31  ;;  %v2276_v20 = vld [vmem:[%s2009_s19 + $0x28] sm:$0xff]  }
  0x39   : > { %v1031_v19 = vsel %vm872_vm6, %v1028_v13, %v1030_v18  ;;  %v1032_v22 = vrot.slane %v2276_v20, 2 }
  0x3a   : > { %1751 = vmatmul.mubr.msk.bf16.gmra.mrb[16].mxu1 %vm258_vm3, %v2031_v12  ;;  %v868_v12 = vld [vmem:[%s2393_s1 + $0x14] sm:$0xf] }
  0x3b   : > { %1769 = vmatmul.mubr.msk.bf16.gmra.mrb[16].mxu0 %vm258_vm3, %v447_v57  ;;  %1754 = vmatprep.mubr.msk.bf16.mxu1 %vm1962_vm1, %v1961_v1  ;;  %v764_v57 = vor.u32 %v763_v55, %v760_v54  ;;  %v1033_v27 = vsel %vm872_vm6, %v1030_v18, %v1032_v22  ;;  %v1172_v54 = vrot.slane %v1170_v51, 2  ;;  %v1175_v55 = vrot.slane %v1173_v52, 3 }
  0x3c   : > { %1772 = vmatprep.mubr.msk.bf16.mxu0 %vm1962_vm1, %v1961_v1 }
  0x3d   : > { %v765_v62 = vsel %vm712_vm5, %v755_v50, %v764_v57  ;;  %v1176_v57 = vor.u32 %v1175_v55, %v1172_v54 }
  0x42   : > { %1755 = vmatmul.mubr.msk.bf16.gmra.mrb[20].mxu1 %vm258_vm3, %v2025_v10  ;;  %v453_v10 = vsel %vm442_vm4, %v450_v60, %v452_v3  ;;  %v873_v60 = vrot.slane %v1583_v56, 2  ;;  %v1306_v56 = vrot.slane %v2249_v9, 3 }
  0x43   : > { %1773 = vmatmul.mubr.msk.bf16.gmra.mrb[20].mxu0 %vm258_vm3, %v449_v59  ;;  %1758 = vmatprep.mubr.msk.bf16.mxu1 %vm1962_vm1, %v1961_v1  ;;  %v2221_v59 = vld [vmem:[%s2009_s19 + $0xc] sm:$0xf] }
  0x44   : > { %1776 = vmatprep.mubr.msk.bf16.mxu0 %vm1962_vm1, %v1961_v1  ;;  %v1589_v0 = vcombine.low %v985_v58, %v2221_v59  ;;  %v875_v3 = vsel %vm872_vm6, %v873_v60, %v874_v61  ;;  %v1179_v58 = vshrl.u32 %v2276_v20, 16 }
  0x46   : > { %v1025_v2 = vrot.slane %v1589_v0, 2  ;;  %v1147_v24 = vshll.u32 %v1589_v0, 16 }
  0x48   : > { %v1149_v31 = vrot.slane %v1147_v24, 3 }
  0x4a   : > { %1759 = vmatmul.mubr.msk.bf16.gmra.mrb[24].mxu1 %vm258_vm3, %v2028_v11  ;;  %v900_v11 = vsel %vm274_vm0, %v868_v12, 0  ;;  %v877_v12 = vsel %vm872_vm6, %v874_v61, %v876_v6 }
  0x4b   : > { %1777 = vmatmul.mubr.msk.bf16.gmra.mrb[24].mxu0 %vm258_vm3, %v451_v63  ;;  %1786 = vmatprep.mubr.msk.bf16.mxu1 %vm1962_vm1, %v1961_v1  ;;  %v1138_v63 = vld [vmem:[%s2393_s1 + $0x1c] sm:$0xf] }
  0x4c   : > { %1780 = vmatprep.mubr.msk.bf16.mxu0 %vm1962_vm1, %v1961_v1  ;;  %v1212_v4 = vsel %vm274_vm0, %v1138_v63, 0 }
  0x52   : > { %1787 = vmatmul.mubr.msk.bf16.vlgmr.msra.gmra.mrb[28].mxu1 %vm258_vm3, %v597_v17  ;;  %v879_v17 = vsel %vm872_vm6, %v876_v6, %v878_v14 }
  0x53   : > { %1781 = vmatmul.mubr.msk.bf16.gmra.mrb[28].mxu0 %vm258_vm3, %v453_v10  ;;  %1829 = vmatpush3.bf16.msra.mxu1 %v900_v11  ;;  %v1330_v10 = vsel %vm274_vm0, %v1298_v7, 0  ;;  %v880_v11 = vrot.slane %v2064_v39, 2  ;;  %v1144_v39 = vshrl.u32 %v1589_v0, 16  ;;  %v1952_v0 = vld [vmem:[%s2009_s19 + $0x30] ss:$0 sps:$4 sm:$0x77]  }
  0x54   : > { %1808 = vmatprep.mubr.msk.bf16.mxu0 %vm1962_vm1, %v1961_v1  ;;  %1790 = vmatprep.mubr.msk.bf16.mxu1 %vm1962_vm1, %v1961_v1 }
  0x55   : > { %1872 = vmatprep.subr.bf16.mxu1 %v1961_v1  ;;  %v881_v21 = vsel %vm872_vm6, %v878_v14, %v880_v11  ;;  %v1146_v30 = vrot.slane %v1144_v39, 2  ;;  %v1312_v14 = vrot.slane %v1952_v0, 3 }
  0x57   : > { %v1150_v36 = vor.u32 %v1149_v31, %v1146_v30 }
  0x5a   : > { %1791 = vmatmul.mubr.msk.bf16.gmra.mrb[32].mxu1 %vm258_vm3, %v599_v29  ;;  %v883_v29 = vsel %vm872_vm6, %v880_v11, %v882_v23 }
  0x5b   : > { %1809 = vmatmul.mubr.msk.bf16.vlgmr.msra.gmra.mrb[32].mxu0 %vm258_vm3, %v729_v25  ;;  %1794 = vmatprep.mubr.msk.bf16.mxu1 %vm1962_vm1, %v1961_v1 }
  0x5c   : > { %1851 = vmatpush3.bf16.msra.mxu0 %v1052_v28  ;;  %1812 = vmatprep.mubr.msk.bf16.mxu0 %vm1962_vm1, %v1961_v1  ;;  %v1950_v28 = vld [vmem:[%s2009_s19 + $0x30] ss:$0 sps:$4 sm:$0x33]  }
  0x5d   : > { %1894 = vmatprep.subr.bf16.mxu0 %v1961_v1  ;;  %v1034_v34 = vrot.slane %v1950_v28, 2 }
  0x5f   : > { %v1035_v41 = vsel %vm872_vm6, %v1032_v22, %v1034_v34 }
  0x62   : > { %1795 = vmatmul.mubr.msk.bf16.gmra.mrb[36].mxu1 %vm258_vm3, %v601_v38  ;;  %v1161_v38 = vshrl.u32 %v2249_v9, 16  ;;  %v1310_v9 = vrot.slane %v2276_v20, 3 }
  0x63   : > { %1813 = vmatmul.mubr.msk.bf16.gmra.mrb[36].mxu0 %vm258_vm3, %v738_v35  ;;  %1798 = vmatprep.mubr.msk.bf16.mxu1 %vm1962_vm1, %v1961_v1  ;;  %v1297_v35 = vld [vmem:[%s2009_s19 + $0x8] sm:$0x8] }
  0x64   : > { %1816 = vmatprep.mubr.msk.bf16.mxu0 %vm1962_vm1, %v1961_v1  ;;  %v1606_v42 = vcombine.low %v1297_v35, %v2221_v59  ;;  %v1163_v45 = vrot.slane %v1161_v38, 2  ;;  %v1182_v59 = vshll.u32 %v2276_v20, 16 }
  0x66   : > { %v1303_v48 = vrot.slane %v1606_v42, 3  ;;  %v1167_v50 = vor.u32 %v1166_v47, %v1163_v45  ;;  %v1184_v63 = vrot.slane %v1182_v59, 3 }
  0x68   : > { %v1177_v61 = vsel %vm1142_vm7, %v1167_v50, %v1176_v57 }
  0x6a   : > { %1799 = vmatmul.mubr.msk.bf16.gmra.mrb[40].mxu1 %vm258_vm3, %v603_v49 }
  0x6b   : > { %1817 = vmatmul.mubr.msk.bf16.gmra.mrb[40].mxu0 %vm258_vm3, %v747_v43  ;;  %1802 = vmatprep.mubr.msk.bf16.mxu1 %vm1962_vm1, %v1961_v1 }
  0x6c   : > { %1820 = vmatprep.mubr.msk.bf16.mxu0 %vm1962_vm1, %v1961_v1 }
  0x72   : > { %1803 = vmatmul.mubr.msk.bf16.gmra.mrb[44].mxu1 %vm258_vm3, %v2079_v46  ;;  %v2232_v46 = vld [vmem:[%s2009_s19 + $0x10] sm:$0xff]  }
  0x73   : > { %1821 = vmatmul.mubr.msk.bf16.gmra.mrb[44].mxu0 %vm258_vm3, %v756_v44  ;;  %1830 = vmatprep.mubr.msk.bf16.mxu1 %vm1962_vm1, %v1961_v1  ;;  %v1026_v5 = vrot.slane %v2232_v46, 2  ;;  %v1152_v25 = vshrl.u32 %v2232_v46, 16  ;;  %v1155_v26 = vshll.u32 %v2232_v46, 16  ;;  %v1304_v49 = vrot.slane %v2232_v46, 3 }
  0x74   : > { %1824 = vmatprep.mubr.msk.bf16.mxu0 %vm1962_vm1, %v1961_v1  ;;  %v1308_v46 = vrot.slane %v2263_v16, 3 }
  0x75   : > { %v1027_v8 = vsel %vm872_vm6, %v1025_v2, %v1026_v5  ;;  %v1029_v15 = vsel %vm872_vm6, %v1026_v5, %v1028_v13  ;;  %v1154_v32 = vrot.slane %v1152_v25, 2  ;;  %v1157_v33 = vrot.slane %v1155_v26, 3 }
  0x76   : > { %v1305_v53 = vsel %vm1302_vm8, %v1303_v48, %v1304_v49  ;;  %v1307_v60 = vsel %vm1302_vm8, %v1304_v49, %v1306_v56  ;;  %v1191_v2 = vshll.u32 %v1952_v0, 16  ;;  %v1309_v5 = vsel %vm1302_vm8, %v1306_v56, %v1308_v46 }
  0x77   : > { %v1158_v37 = vor.u32 %v1157_v33, %v1154_v32 }
  0x79   : > { %v1159_v43 = vsel %vm1142_vm7, %v1150_v36, %v1158_v37  ;;  %v1168_v44 = vsel %vm1142_vm7, %v1158_v37, %v1167_v50 }
  0x7a   : > { %1831 = vmatmul.mubr.msk.bf16.vlgmr.msra.gmra.mrb[48].mxu1 %vm258_vm3, %v875_v3 }
  0x7b   : > { %1825 = vmatmul.mubr.msk.bf16.gmra.mrb[48].mxu0 %vm258_vm3, %v765_v62  ;;  %1873 = vmatpush3.bf16.msra.mxu1 %v1212_v4  ;;  %v1181_v62 = vrot.slane %v1179_v58, 2  ;;  %v1188_v4 = vshrl.u32 %v1952_v0, 16 }
  0x7c   : > { %1852 = vmatprep.mubr.msk.bf16.mxu0 %vm1962_vm1, %v1961_v1  ;;  %1834 = vmatprep.mubr.msk.bf16.mxu1 %vm1962_vm1, %v1961_v1 }
  0x7d   : > { %v1185_v3 = vor.u32 %v1184_v63, %v1181_v62  ;;  %v1190_v7 = vrot.slane %v1188_v4, 2 }
  0x7f   : > { %v1186_v6 = vsel %vm1142_vm7, %v1176_v57, %v1185_v3 }
  0x82   : > { %1835 = vmatmul.mubr.msk.bf16.gmra.mrb[52].mxu1 %vm258_vm3, %v877_v12  ;;  %v1311_v12 = vsel %vm1302_vm8, %v1308_v46, %v1310_v9 }
  0x83   : > { %1853 = vmatmul.mubr.msk.bf16.vlgmr.msra.gmra.mrb[52].mxu0 %vm258_vm3, %v1027_v8  ;;  %1838 = vmatprep.mubr.msk.bf16.mxu1 %vm1962_vm1, %v1961_v1  ;;  %v1193_v8 = vrot.slane %v1191_v2, 3 }
  0x84   : > { %1895 = vmatpush3.bf16.msra.mxu0 %v1330_v10  ;;  %1856 = vmatprep.mubr.msk.bf16.mxu0 %vm1962_vm1, %v1961_v1 }
  0x85   : > { %v1194_v10 = vor.u32 %v1193_v8, %v1190_v7 }
  0x87   : > { %v1195_v13 = vsel %vm1142_vm7, %v1185_v3, %v1194_v10 }
  0x8a   : > { %1839 = vmatmul.mubr.msk.bf16.gmra.mrb[56].mxu1 %vm258_vm3, %v879_v17 }
  0x8b   : > { %1857 = vmatmul.mubr.msk.bf16.gmra.mrb[56].mxu0 %vm258_vm3, %v1029_v15  ;;  %1842 = vmatprep.mubr.msk.bf16.mxu1 %vm1962_vm1, %v1961_v1  ;;  %v1313_v15 = vsel %vm1302_vm8, %v1310_v9, %v1312_v14 }
  0x8c   : > { %1860 = vmatprep.mubr.msk.bf16.mxu0 %vm1962_vm1, %v1961_v1 }
  0x92   : > { %1843 = vmatmul.mubr.msk.bf16.gmra.mrb[60].mxu1 %vm258_vm3, %v881_v21 }
  0x93   : > { %1861 = vmatmul.mubr.msk.bf16.gmra.mrb[60].mxu0 %vm258_vm3, %v1031_v19  ;;  %1846 = vmatprep.mubr.msk.bf16.mxu1 %vm1962_vm1, %v1961_v1 }
  0x94   : > { %1864 = vmatprep.mubr.msk.bf16.mxu0 %vm1962_vm1, %v1961_v1 }
  0x9a   : > { %1847 = vmatmul.mubr.msk.bf16.gmra.mrb[64].mxu1 %vm258_vm3, %v883_v29 }
  0x9b   : > { %1865 = vmatmul.mubr.msk.bf16.gmra.mrb[64].mxu0 %vm258_vm3, %v1033_v27  ;;  %1874 = vmatprep.mubr.msk.bf16.mxu1 %vm1962_vm1, %v1961_v1 }
  0x9c   : > { %1868 = vmatprep.mubr.msk.bf16.mxu0 %vm1962_vm1, %v1961_v1 }
  0xa2   : > { %1875 = vmatmul.mubr.msk.bf16.vlgmr.msra.gmra.mrb[68].mxu1 %vm258_vm3, %v1159_v43 }
  0xa3   : > { %1869 = vmatmul.mubr.msk.bf16.gmra.mrb[68].mxu0 %vm258_vm3, %v1035_v41  ;;  %1878 = vmatprep.mubr.msk.bf16.mxu1 %vm1962_vm1, %v1961_v1 }
  0xa4   : > { %1896 = vmatprep.mubr.msk.bf16.mxu0 %vm1962_vm1, %v1961_v1 }
  0xaa   : > { %1879 = vmatmul.mubr.msk.bf16.gmra.mrb[72].mxu1 %vm258_vm3, %v1168_v44 }
  0xab   : > { %1897 = vmatmul.mubr.msk.bf16.vlgmr.msra.gmra.mrb[72].mxu0 %vm258_vm3, %v1305_v53  ;;  %1882 = vmatprep.mubr.msk.bf16.mxu1 %vm1962_vm1, %v1961_v1 }
  0xac   : > { %1900 = vmatprep.mubr.msk.bf16.mxu0 %vm1962_vm1, %v1961_v1 }
  0xb2   : > { %1883 = vmatmul.mubr.msk.bf16.gmra.mrb[76].mxu1 %vm258_vm3, %v1177_v61 }
  0xb3   : > { %1901 = vmatmul.mubr.msk.bf16.gmra.mrb[76].mxu0 %vm258_vm3, %v1307_v60  ;;  %1886 = vmatprep.mubr.msk.bf16.mxu1 %vm1962_vm1, %v1961_v1 }
  0xb4   : > { %1904 = vmatprep.mubr.msk.bf16.mxu0 %vm1962_vm1, %v1961_v1 }
  0xba   : > { %1887 = vmatmul.mubr.msk.bf16.gmra.mrb[80].mxu1 %vm258_vm3, %v1186_v6 }
  0xbb   : > { %1905 = vmatmul.mubr.msk.bf16.gmra.mrb[80].mxu0 %vm258_vm3, %v1309_v5  ;;  %1890 = vmatprep.mubr.msk.bf16.mxu1 %vm1962_vm1, %v1961_v1 }
  0xbc   : > { %1908 = vmatprep.mubr.msk.bf16.mxu0 %vm1962_vm1, %v1961_v1 }
  0xc2   : > { %1891 = vmatmul.mubr.msk.bf16.gmra.mrb[84].mxu1 %vm258_vm3, %v1195_v13 }
  0xc3   : > { %1909 = vmatmul.mubr.msk.bf16.gmra.mrb[84].mxu0 %vm258_vm3, %v1311_v12 }
  0xc4   : > { %1912 = vmatprep.mubr.msk.bf16.mxu0 %vm1962_vm1, %v1961_v1 }
  0xcb   : > { %1913 = vmatmul.mubr.msk.bf16.gmra.mrb[88].mxu0 %vm258_vm3, %v1313_v15 }
  0xed   : > { %v336_v11 = vpop.f32.mrb[0].mxu1 }
  0xee   : > { %v312_v16 = vpop.f32.mrb[0].mxu0  ;;  %v1734_v20 = vpop.f32.mrb[1].mxu1 }
  0xef   : > { %v1722_v17 = vpop.f32.mrb[1].mxu0  ;;  %v339_v21 = vpop.f32.mrb[2].mxu1 }
  0xf0   : > { %v315_v18 = vpop.f32.mrb[2].mxu0  ;;  %v1735_v22 = vpop.f32.mrb[3].mxu1 }
  0xf1   : > { %v1723_v19 = vpop.f32.mrb[3].mxu0 }
  0xf5   : > { %v344_v25 = vpop.f32.mrb[4].mxu1 }
  0xf6   : > { %v320_v23 = vpop.f32.mrb[4].mxu0  ;;  %v1738_v26 = vpop.f32.mrb[5].mxu1 }
  0xf7   : > { %v1726_v39 = vpop.f32.mrb[5].mxu0  ;;  %v347_v27 = vpop.f32.mrb[6].mxu1 }
  0xf8   : > { %v323_v24 = vpop.f32.mrb[6].mxu0  ;;  %v1739_v28 = vpop.f32.mrb[7].mxu1 }
  0xf9   : > { %v1727_v1 = vpop.f32.mrb[7].mxu0 }
  0xfd   : > { %v398_v31 = vpop.f32.mrb[8].mxu1 }
  0xfe   : > { %v328_v29 = vpop.f32.mrb[8].mxu0  ;;  %v399_v33 = vadd.f32 %v398_v31, %v312_v16  ;;  %v1744_v34 = vpop.f32.mrb[9].mxu1 }
  0xff   : > { %v1730_v30 = vpop.f32.mrb[9].mxu0  ;;  %v401_v36 = vpop.f32.mrb[10].mxu1 }
 0x100   : > { %v331_v32 = vpop.f32.mrb[10].mxu0  ;;  %v402_v37 = vadd.f32 %v401_v36, %v315_v18  ;;  %v1745_v38 = vpop.f32.mrb[11].mxu1 }
 0x101   : > { %v1731_v35 = vpop.f32.mrb[11].mxu0 }
 0x105   : > { %v406_v43 = vpop.f32.mrb[12].mxu1 }
 0x106   : > { %v506_v40 = vpop.f32.mrb[12].mxu0  ;;  %v407_v47 = vadd.f32 %v406_v43, %v320_v23  ;;  %v1748_v48 = vpop.f32.mrb[13].mxu1 }
 0x107   : > { %v545_v41 = vadd.f32 %v506_v40, %v399_v33  ;;  %v1766_v42 = vpop.f32.mrb[13].mxu0  ;;  %v409_v51 = vpop.f32.mrb[14].mxu1 }
 0x108   : > { %v509_v45 = vpop.f32.mrb[14].mxu0  ;;  %v410_v52 = vadd.f32 %v409_v51, %v323_v24  ;;  %v1749_v53 = vpop.f32.mrb[15].mxu1 }
 0x109   : > { %v546_v49 = vadd.f32 %v509_v45, %v402_v37  ;;  %v1767_v50 = vpop.f32.mrb[15].mxu0 }
 0x10d   : > { %v414_v56 = vpop.f32.mrb[16].mxu1 }
 0x10e   : > { %v514_v44 = vpop.f32.mrb[16].mxu0  ;;  %v415_v58 = vadd.f32 %v414_v56, %v328_v29  ;;  %v1752_v59 = vpop.f32.mrb[17].mxu1 }
 0x10f   : > { %v547_v54 = vadd.f32 %v514_v44, %v407_v47  ;;  %v1770_v55 = vpop.f32.mrb[17].mxu0  ;;  %v417_v62 = vpop.f32.mrb[18].mxu1 }
 0x110   : > { %v517_v57 = vpop.f32.mrb[18].mxu0  ;;  %v418_v63 = vadd.f32 %v417_v62, %v331_v32  ;;  %v1753_v0 = vpop.f32.mrb[19].mxu1 }
 0x111   : > { %v548_v60 = vadd.f32 %v517_v57, %v410_v52  ;;  %v1771_v61 = vpop.f32.mrb[19].mxu0 }
 0x115   : > { %v422_v2 = vpop.f32.mrb[20].mxu1 }
 0x116   : > { %v522_v46 = vpop.f32.mrb[20].mxu0  ;;  %v423_v6 = vadd.f32 %v422_v2, %v336_v11  ;;  %v1756_v7 = vpop.f32.mrb[21].mxu1 }
 0x117   : > { %v549_v3 = vadd.f32 %v522_v46, %v415_v58  ;;  %v1774_v4 = vpop.f32.mrb[21].mxu0  ;;  %v425_v10 = vpop.f32.mrb[22].mxu1 }
 0x118   : > { %v525_v5 = vpop.f32.mrb[22].mxu0  ;;  %v426_v12 = vadd.f32 %v425_v10, %v339_v21  ;;  %v1757_v13 = vpop.f32.mrb[23].mxu1 }
 0x119   : > { %v550_v8 = vadd.f32 %v525_v5, %v418_v63  ;;  %v1775_v9 = vpop.f32.mrb[23].mxu0 }
 0x11d   : > { %v430_v17 = vpop.f32.mrb[24].mxu1 }
 0x11e   : > { %v530_v14 = vpop.f32.mrb[24].mxu0  ;;  %v431_v19 = vadd.f32 %v430_v17, %v344_v25  ;;  %v1760_v20 = vpop.f32.mrb[25].mxu1 }
 0x11f   : > { %v551_v15 = vadd.f32 %v530_v14, %v423_v6  ;;  %v1778_v16 = vpop.f32.mrb[25].mxu0  ;;  %v433_v39 = vpop.f32.mrb[26].mxu1 }
 0x120   : > { %v533_v18 = vpop.f32.mrb[26].mxu0  ;;  %v434_v24 = vadd.f32 %v433_v39, %v347_v27  ;;  %v1761_v1 = vpop.f32.mrb[27].mxu1 }
 0x121   : > { %v552_v22 = vadd.f32 %v533_v18, %v426_v12  ;;  %v1779_v23 = vpop.f32.mrb[27].mxu0 }
 0x125   : > { %v658_v29 = vpop.f32.mrb[28].mxu1 }
 0x126   : > { %v538_v26 = vpop.f32.mrb[28].mxu0  ;;  %v697_v31 = vadd.f32 %v658_v29, %v545_v41  ;;  %v1788_v21 = vpop.f32.mrb[29].mxu1 }
 0x127   : > { %v553_v11 = vadd.f32 %v538_v26, %v431_v19  ;;  %v1782_v28 = vpop.f32.mrb[29].mxu0  ;;  %v661_v34 = vpop.f32.mrb[30].mxu1 }
 0x128   : > { %v541_v30 = vpop.f32.mrb[30].mxu0  ;;  %v698_v35 = vadd.f32 %v661_v34, %v546_v49  ;;  %v1789_v36 = vpop.f32.mrb[31].mxu1 }
 0x129   : > { %v554_v32 = vadd.f32 %v541_v30, %v434_v24  ;;  %v1783_v33 = vpop.f32.mrb[31].mxu0 }
 0x12d   : > { %v666_v40 = vpop.f32.mrb[32].mxu1 }
 0x12e   : > { %v818_v37 = vpop.f32.mrb[32].mxu0  ;;  %v699_v43 = vadd.f32 %v666_v40, %v547_v54  ;;  %v1792_v27 = vpop.f32.mrb[33].mxu1 }
 0x12f   : > { %v857_v25 = vadd.f32 %v818_v37, %v697_v31  ;;  %v1810_v38 = vpop.f32.mrb[33].mxu0  ;;  %v669_v48 = vpop.f32.mrb[34].mxu1 }
 0x130   : > { %v821_v42 = vpop.f32.mrb[34].mxu0  ;;  %v700_v50 = vadd.f32 %v669_v48, %v548_v60  ;;  %v1793_v51 = vpop.f32.mrb[35].mxu1 }
 0x131   : > { %v858_v45 = vadd.f32 %v821_v42, %v698_v35  ;;  %v1811_v47 = vpop.f32.mrb[35].mxu0 }
 0x135   : > { %v674_v44 = vpop.f32.mrb[36].mxu1 }
 0x136   : > { %v826_v52 = vpop.f32.mrb[36].mxu0  ;;  %v701_v56 = vadd.f32 %v674_v44, %v549_v3  ;;  %v1796_v49 = vpop.f32.mrb[37].mxu1 }
 0x137   : > { %v859_v41 = vadd.f32 %v826_v52, %v699_v43  ;;  %v1814_v53 = vpop.f32.mrb[37].mxu0  ;;  %v677_v59 = vpop.f32.mrb[38].mxu1 }
 0x138   : > { %v829_v55 = vpop.f32.mrb[38].mxu0  ;;  %v702_v61 = vadd.f32 %v677_v59, %v550_v8  ;;  %v1797_v62 = vpop.f32.mrb[39].mxu1 }
 0x139   : > { %v860_v57 = vadd.f32 %v829_v55, %v700_v50  ;;  %v1815_v58 = vpop.f32.mrb[39].mxu0 }
 0x13d   : > { %v682_v46 = vpop.f32.mrb[40].mxu1 }
 0x13e   : > { %v834_v63 = vpop.f32.mrb[40].mxu0  ;;  %v703_v2 = vadd.f32 %v682_v46, %v551_v15  ;;  %v1800_v60 = vpop.f32.mrb[41].mxu1 }
 0x13f   : > { %v861_v54 = vadd.f32 %v834_v63, %v701_v56  ;;  %v1818_v0 = vpop.f32.mrb[41].mxu0  ;;  %v685_v7 = vpop.f32.mrb[42].mxu1 }
 0x140   : > { %v837_v4 = vpop.f32.mrb[42].mxu0  ;;  %v704_v9 = vadd.f32 %v685_v7, %v552_v22  ;;  %v1801_v10 = vpop.f32.mrb[43].mxu1 }
 0x141   : > { %v862_v5 = vadd.f32 %v837_v4, %v702_v61  ;;  %v1819_v6 = vpop.f32.mrb[43].mxu0 }
 0x145   : > { %v690_v14 = vpop.f32.mrb[44].mxu1 }
 0x146   : > { %v842_v12 = vpop.f32.mrb[44].mxu0  ;;  %v705_v17 = vadd.f32 %v690_v14, %v553_v11  ;;  %v1804_v8 = vpop.f32.mrb[45].mxu1 }
 0x147   : > { %v863_v3 = vadd.f32 %v842_v12, %v703_v2  ;;  %v1822_v13 = vpop.f32.mrb[45].mxu0  ;;  %v693_v20 = vpop.f32.mrb[46].mxu1 }
 0x148   : > { %v845_v16 = vpop.f32.mrb[46].mxu0  ;;  %v706_v23 = vadd.f32 %v693_v20, %v554_v32  ;;  %v1805_v39 = vpop.f32.mrb[47].mxu1 }
 0x149   : > { %v864_v18 = vadd.f32 %v845_v16, %v704_v9  ;;  %v1823_v19 = vpop.f32.mrb[47].mxu0 }
 0x14d   : > { %v936_v26 = vpop.f32.mrb[48].mxu1 }
 0x14e   : > { %v850_v24 = vpop.f32.mrb[48].mxu0  ;;  %v975_v29 = vadd.f32 %v936_v26, %v857_v25  ;;  %v1832_v22 = vpop.f32.mrb[49].mxu1 }
 0x14f   : > { %v865_v15 = vadd.f32 %v850_v24, %v705_v17  ;;  %v1826_v1 = vpop.f32.mrb[49].mxu0  ;;  %v939_v21 = vpop.f32.mrb[50].mxu1 }
 0x150   : > { %v853_v28 = vpop.f32.mrb[50].mxu0  ;;  %v976_v33 = vadd.f32 %v939_v21, %v858_v45  ;;  %v1833_v34 = vpop.f32.mrb[51].mxu1 }
 0x151   : > { %v866_v30 = vadd.f32 %v853_v28, %v706_v23  ;;  %v1827_v31 = vpop.f32.mrb[51].mxu0 }
 0x155   : > { %v944_v37 = vpop.f32.mrb[52].mxu1 }
 0x156   : > { %v1088_v35 = vpop.f32.mrb[52].mxu0  ;;  %v977_v40 = vadd.f32 %v944_v37, %v859_v41  ;;  %v1836_v32 = vpop.f32.mrb[53].mxu1 }
 0x157   : > { %v1127_v11 = vadd.f32 %v1088_v35, %v975_v29  ;;  %v1854_v36 = vpop.f32.mrb[53].mxu0  ;;  %v947_v27 = vpop.f32.mrb[54].mxu1  ;;  %v2362_v35 = vld [vmem:[%s2394_s2] ss:$0 sm:$0xff] }
 0x158   : > { %v1091_v38 = vpop.f32.mrb[54].mxu0  ;;  %v978_v47 = vadd.f32 %v947_v27, %v860_v57  ;;  %v1837_v48 = vpop.f32.mrb[55].mxu1 }
 0x159   : > { %v1128_v42 = vadd.f32 %v1091_v38, %v976_v33  ;;  %v1855_v43 = vpop.f32.mrb[55].mxu0 }
 0x15d   : > { %v952_v52 = vpop.f32.mrb[56].mxu1 }
 0x15e   : > { %v1096_v50 = vpop.f32.mrb[56].mxu0  ;;  %v979_v44 = vadd.f32 %v952_v52, %v861_v54  ;;  %v1840_v45 = vpop.f32.mrb[57].mxu1 }
 0x15f   : > { %v1129_v25 = vadd.f32 %v1096_v50, %v977_v40  ;;  %v1858_v51 = vpop.f32.mrb[57].mxu0  ;;  %v955_v49 = vpop.f32.mrb[58].mxu1 }
 0x160   : > { %v1099_v53 = vpop.f32.mrb[58].mxu0  ;;  %v980_v58 = vadd.f32 %v955_v49, %v862_v5  ;;  %v1841_v59 = vpop.f32.mrb[59].mxu1 }
 0x161   : > { %v1130_v55 = vadd.f32 %v1099_v53, %v978_v47  ;;  %v1859_v56 = vpop.f32.mrb[59].mxu0 }
 0x165   : > { %v960_v63 = vpop.f32.mrb[60].mxu1 }
 0x166   : > { %v1104_v61 = vpop.f32.mrb[60].mxu0  ;;  %v981_v46 = vadd.f32 %v960_v63, %v863_v3  ;;  %v1844_v57 = vpop.f32.mrb[61].mxu1 }
 0x167   : > { %v1131_v41 = vadd.f32 %v1104_v61, %v979_v44  ;;  %v1862_v62 = vpop.f32.mrb[61].mxu0  ;;  %v963_v60 = vpop.f32.mrb[62].mxu1 }
 0x168   : > { %v1107_v0 = vpop.f32.mrb[62].mxu0  ;;  %v982_v6 = vadd.f32 %v963_v60, %v864_v18  ;;  %v1845_v7 = vpop.f32.mrb[63].mxu1 }
 0x169   : > { %v1132_v4 = vadd.f32 %v1107_v0, %v980_v58  ;;  %v1863_v2 = vpop.f32.mrb[63].mxu0 }
 0x16d   : > { %v968_v12 = vpop.f32.mrb[64].mxu1 }
 0x16e   : > { %v1112_v9 = vpop.f32.mrb[64].mxu0  ;;  %v983_v5 = vadd.f32 %v968_v12, %v865_v15  ;;  %v1848_v14 = vpop.f32.mrb[65].mxu1 }
 0x16f   : > { %v2351_v54 = vadd.f32 %v1112_v9, %v981_v46  ;;  %v1866_v10 = vpop.f32.mrb[65].mxu0  ;;  %v971_v8 = vpop.f32.mrb[66].mxu1 }
 0x170   : > { %v1115_v13 = vpop.f32.mrb[66].mxu0  ;;  %v984_v19 = vadd.f32 %v971_v8, %v866_v30  ;;  %v1849_v3 = vpop.f32.mrb[67].mxu1 }
 0x171   : > { %v2353_v16 = vadd.f32 %v1115_v13, %v982_v6  ;;  %v1867_v17 = vpop.f32.mrb[67].mxu0 }
 0x175   : > { %v1248_v39 = vpop.f32.mrb[68].mxu1 }
 0x176   : > { %v1120_v20 = vpop.f32.mrb[68].mxu0  ;;  %v1287_v1 = vadd.f32 %v1248_v39, %v1127_v11  ;;  %v1876_v26 = vpop.f32.mrb[69].mxu1 }
 0x177   : > { %v2355_v23 = vadd.f32 %v1120_v20, %v983_v5  ;;  %v1870_v18 = vpop.f32.mrb[69].mxu0  ;;  %v1251_v15 = vpop.f32.mrb[70].mxu1 }
 0x178   : > { %v1123_v24 = vpop.f32.mrb[70].mxu0  ;;  %v1288_v22 = vadd.f32 %v1251_v15, %v1128_v42  ;;  %v1877_v31 = vpop.f32.mrb[71].mxu1 }
 0x179   : > { %v2357_v28 = vadd.f32 %v1123_v24, %v984_v19  ;;  %v1871_v29 = vpop.f32.mrb[71].mxu0 }
 0x17d   : > { %v1256_v30 = vpop.f32.mrb[72].mxu1 }
 0x17e   : > { %v1366_v21 = vpop.f32.mrb[72].mxu0  ;;  %v1289_v37 = vadd.f32 %v1256_v30, %v1129_v25  ;;  %v1880_v11 = vpop.f32.mrb[73].mxu1 }
 0x17f   : > { %v1405_v33 = vadd.f32 %v1366_v21, %v1287_v1  ;;  %v1898_v34 = vpop.f32.mrb[73].mxu0  ;;  %v1259_v32 = vpop.f32.mrb[74].mxu1 }
 0x180   : > { %v1369_v36 = vpop.f32.mrb[74].mxu0  ;;  %v1290_v42 = vadd.f32 %v1259_v32, %v1130_v55  ;;  %v1881_v47 = vpop.f32.mrb[75].mxu1 }
 0x181   : > { %v1406_v38 = vadd.f32 %v1369_v36, %v1288_v22  ;;  %v1899_v40 = vpop.f32.mrb[75].mxu0  ;;  %v1422_v43 = vadd.f32 %v2362_v35, %v1405_v33 }
 0x183   : > { %v1423_v27 = vadd.f32 %v2362_v35, %v1406_v38 }
 0x185   : > { %v1638_v48 = vpack.c.bf16 %v1423_v27, %v1422_v43  ;;  %v1264_v52 = vpop.f32.mrb[76].mxu1 }
 0x186   : > { %v1374_v50 = vpop.f32.mrb[76].mxu0  ;;  %v1291_v44 = vadd.f32 %v1264_v52, %v1131_v41  ;;  %v1884_v45 = vpop.f32.mrb[77].mxu1 }
 0x187   : > { %1639 = vst [vmem:[%s2370_s16] sm:$0xff] %v1638_v48   ;;  %v1407_v25 = vadd.f32 %v1374_v50, %v1289_v37  ;;  %v1902_v51 = vpop.f32.mrb[77].mxu0  ;;  %v1267_v49 = vpop.f32.mrb[78].mxu1 }
 0x188   : > { %v1377_v53 = vpop.f32.mrb[78].mxu0  ;;  %v1292_v59 = vadd.f32 %v1267_v49, %v1132_v4  ;;  %v1885_v62 = vpop.f32.mrb[79].mxu1 }
 0x189   : > { %v1408_v55 = vadd.f32 %v1377_v53, %v1290_v42  ;;  %v1903_v56 = vpop.f32.mrb[79].mxu0  ;;  %v1424_v58 = vadd.f32 %v2362_v35, %v1407_v25 }
 0x18b   : > { %v1425_v61 = vadd.f32 %v2362_v35, %v1408_v55 }
 0x18d   : > { %v1643_v63 = vpack.c.bf16 %v1425_v61, %v1424_v58  ;;  %v1272_v2 = vpop.f32.mrb[80].mxu1 }
 0x18e   : > { %v1382_v0 = vpop.f32.mrb[80].mxu0  ;;  %v1293_v41 = vadd.f32 %v1272_v2, %v2351_v54  ;;  %v1888_v6 = vpop.f32.mrb[81].mxu1 }
 0x18f   : > { %1660 = vst [vmem:[%s2370_s16 + $0x8] sm:$0xff] %v1643_v63   ;;  %v1409_v46 = vadd.f32 %v1382_v0, %v1291_v44  ;;  %v1906_v57 = vpop.f32.mrb[81].mxu0  ;;  %v1275_v10 = vpop.f32.mrb[82].mxu1 }
 0x190   : > { %v1385_v60 = vpop.f32.mrb[82].mxu0  ;;  %v1294_v4 = vadd.f32 %v1275_v10, %v2353_v16  ;;  %v1889_v5 = vpop.f32.mrb[83].mxu1 }
 0x191   : > { %v1410_v7 = vadd.f32 %v1385_v60, %v1292_v59  ;;  %v1907_v9 = vpop.f32.mrb[83].mxu0  ;;  %v1426_v12 = vadd.f32 %v2362_v35, %v1409_v46 }
 0x193   : > { %v1427_v13 = vadd.f32 %v2362_v35, %v1410_v7 }
 0x195   : > { %v1648_v14 = vpack.c.bf16 %v1427_v13, %v1426_v12  ;;  %v1280_v3 = vpop.f32.mrb[84].mxu1 }
 0x196   : > { %v1390_v17 = vpop.f32.mrb[84].mxu0  ;;  %v1295_v54 = vadd.f32 %v1280_v3, %v2355_v23  ;;  %v1892_v18 = vpop.f32.mrb[85].mxu1 }
 0x197   : > { %1661 = vst [vmem:[%s2370_s16 + $0x10] sm:$0xff] %v1648_v14   ;;  %v1411_v8 = vadd.f32 %v1390_v17, %v1293_v41  ;;  %v1910_v19 = vpop.f32.mrb[85].mxu0  ;;  %v1283_v1 = vpop.f32.mrb[86].mxu1 }
 0x198   : > { %v1393_v20 = vpop.f32.mrb[86].mxu0  ;;  %v1296_v26 = vadd.f32 %v1283_v1, %v2357_v28  ;;  %v1893_v15 = vpop.f32.mrb[87].mxu1 }
 0x199   : > { %v1412_v39 = vadd.f32 %v1393_v20, %v1294_v4  ;;  %v1911_v24 = vpop.f32.mrb[87].mxu0  ;;  %v1428_v16 = vadd.f32 %v2362_v35, %v1411_v8 }
 0x19b   : > { %v1429_v29 = vadd.f32 %v2362_v35, %v1412_v39 }
 0x19d   : > { %v1653_v22 = vpack.c.bf16 %v1429_v29, %v1428_v16 }
 0x19e   : > { %v1398_v31 = vpop.f32.mrb[88].mxu0 }
 0x19f   : > { %1662 = vst [vmem:[%s2370_s16 + $0x18] sm:$0xff] %v1653_v22   ;;  %v1413_v21 = vadd.f32 %v1398_v31, %v1295_v54  ;;  %v1914_v33 = vpop.f32.mrb[89].mxu0 }
 0x1a0   : > { %v1401_v34 = vpop.f32.mrb[90].mxu0 }
 0x1a1   : > { %v1414_v30 = vadd.f32 %v1401_v34, %v1296_v26  ;;  %v1915_v23 = vpop.f32.mrb[91].mxu0  ;;  %v1430_v36 = vadd.f32 %v2362_v35, %v1413_v21 }
 0x1a3   : > { %v1431_v37 = vadd.f32 %v2362_v35, %v1414_v30 }
 0x1a5   : > { %v1658_v11 = vpack.c.bf16 %v1431_v37, %v1430_v36 }
 0x1a7   : > { %1663 = vst [vmem:[%s2370_s16 + $0x20] sm:$0xff] %v1658_v11  }
 0x1a8 PF: > { %s13_s12 = sadd.s32 1, %s1959_s12  }
 0x1a9   : > { %p10_p4 = scmp.ge.s32.totalorder %s13_s12, 4  }
 0x1ab   :  { %12 = sbr.rel (!%p10_p4) target bundleno = 1 (0x1), region = 62 }

// kernel: glow_forward.24
= control target key start
LH: loop header
LB: loop body
LE: loop exit
PB: predicated region body
PF: predicated region fallthrough
CT: control target
= control target key end

     0   :  { %vm14_vm0 = vcmask 261120   ;;  %vm50_vm1 = vcmask 253952   ;;  %s114_s0 = inlined_call_operand.vmem [shape: f32[32,32], index: 0, kind: input, shape index: {}]   ;;  %s115_s1 = inlined_call_operand.vmem [shape: f32[1,32], index: 1, kind: output, shape index: {0}]   ;;  %s116_s2 = inlined_call_operand.vmem [shape: f32[1,32], index: 2, kind: output, shape index: {1}]  }
   0x1   :  { %v10_v0 = vld [vmem:[%s114_s0] sm:$0xff]  ;;  %v11_v1 = vld [vmem:[%s114_s0 + $0x8] sm:$0xff]  ;;  %v12_v2 = vld [vmem:[%s114_s0 + $0x10] sm:$0xff] }
   0x2   :  { %v13_v3 = vld [vmem:[%s114_s0 + $0x18] sm:$0xff]  ;;  %v15_v4 = vsel %vm14_vm0, %v10_v0, 0.0  ;;  %v16_v5 = vsel %vm14_vm0, %v11_v1, 0.0  ;;  %v18_v6 = vsel %vm14_vm0, %v12_v2, 0.0  ;;  %v29_v7 = vmul.f32 %v10_v0, %v10_v0 }
   0x3   :  { %v17_v8 = vadd.f32 %v16_v5, %v15_v4  ;;  %v30_v9 = vmul.f32 %v11_v1, %v11_v1  ;;  %v31_v10 = vmul.f32 %v12_v2, %v12_v2  ;;  %v20_v11 = vsel %vm14_vm0, %v13_v3, 0.0 }
   0x4   :  { %v32_v12 = vmul.f32 %v13_v3, %v13_v3  ;;  %v33_v13 = vsel %vm14_vm0, %v29_v7, 0.0 }
   0x5   :  { %v19_v14 = vadd.f32 %v18_v6, %v17_v8  ;;  %v34_v15 = vsel %vm14_vm0, %v30_v9, 0.0  ;;  %v36_v16 = vsel %vm14_vm0, %v31_v10, 0.0 }
   0x6   :  { %v35_v17 = vadd.f32 %v34_v15, %v33_v13  ;;  %v38_v19 = vsel %vm14_vm0, %v32_v12, 0.0 }
   0x7   :  { %v21_v18 = vadd.f32 %v20_v11, %v19_v14 }
   0x8   :  { %v37_v20 = vadd.f32 %v36_v16, %v35_v17 }
   0x9   :  { %v22_v21 = vrot.slane %v21_v18, 4 }
   0xa   :  { %v39_v22 = vadd.f32 %v38_v19, %v37_v20 }
   0xb   :  { %v23_v23 = vadd.f32 %v22_v21, %v21_v18 }
   0xc   :  { %v40_v24 = vrot.slane %v39_v22, 4 }
   0xd   :  { %v24_v25 = vrot.slane %v23_v23, 2 }
   0xe   :  { %v41_v26 = vadd.f32 %v40_v24, %v39_v22 }
   0xf   :  { %v25_v27 = vadd.f32 %v24_v25, %v23_v23 }
  0x10   :  { %v42_v28 = vrot.slane %v41_v26, 2 }
  0x11   :  { %v26_v29 = vrot.slane %v25_v27, 1 }
  0x12   :  { %v43_v30 = vadd.f32 %v42_v28, %v41_v26 }
  0x13   :  { %v27_v31 = vadd.f32 %v26_v29, %v25_v27 }
  0x14   :  { %v44_v32 = vrot.slane %v43_v30, 1 }
  0x15   :  { %v28_v33 = vmul.f32 0.03125, %v27_v31 }
  0x16   :  { %v45_v34 = vadd.f32 %v44_v32, %v43_v30 }
  0x17   :  { %v47_v35 = vmul.f32 %v28_v33, %v28_v33  ;;  %51 = vst.msk [vmem:[%s115_s1] sm:$0x1] %vm50_vm1, %v28_v33 }
  0x18   :  { %v46_v36 = vmul.f32 0.03125, %v45_v34 }
  0x1a   :  { %v48_v37 = vsub.f32 %v46_v36, %v47_v35 }
  0x1c   :  { %v49_v38 = vmax.f32 %v48_v37, 0.0 }
  0x1e   :  { %69 = vrsqrt.f32 %v49_v38  ;;  %vm54_vm2 = vcmp.eq.f32.partialorder %v49_v38, inf  ;;  %v57_v40 = vand.u32 2147483648, %v49_v38  ;;  %vm56_vm3 = vcmp.eq.f32.partialorder %v49_v38, 0.0 }
  0x28   :  { %v70_v39 = vpop.eup %69 }
  0x29   :  { %v53_v41 = vmul.f32 %v70_v39, %v49_v38 }
  0x2b   :  { %v55_v42 = vsel %vm54_vm2, %v49_v38, %v53_v41 }
  0x2c   :  { %v58_v43 = vsel %vm56_vm3, %v57_v40, %v55_v42 }
  0x2d   :  { %v59_v44 = vadd.f32 1e-06, %v58_v43 }
  0x2f   :  { %60 = vst.msk [vmem:[%s116_s2] sm:$0x1] %vm50_vm1, %v59_v44 }

// kernel: glow_forward.25
= control target key start
LH: loop header
LB: loop body
LE: loop exit
PB: predicated region body
PF: predicated region fallthrough
CT: control target
= control target key end

     0   :  { %vm19_vm0 = vcmask 261120   ;;  %v172_v1 = vmov 0.0   ;;  %s234_s1 = inlined_call_operand.vmem [shape: bf16[32,32], index: 1, kind: input, shape index: {}]   ;;  %s235_s0 = inlined_call_operand.vmem [shape: bf16[32,32], index: 0, kind: input, shape index: {}]   ;;  %s236_s2 = inlined_call_operand.vmem [shape: f32[1,32], index: 2, kind: input, shape index: {}]   ;;  %s237_s3 = inlined_call_operand.vmem [shape: f32[32,32], index: 3, kind: output, shape index: {}]  }
   0x1   :  { %v168_v0 = vld [vmem:[%s234_s1] sm:$0xff]   ;;  %22 = vst.msk [vmem:[#allocation2 + $0x10] sm:$0xff] %vm19_vm0, %v172_v1  ;;  %20 = vst.msk [vmem:[#allocation2] sm:$0xff] %vm19_vm0, %v172_v1  ;;  %v169_v2 = vld [vmem:[%s234_s1 + $0x8] sm:$0xff]  }
   0x2   :  { %21 = vst.msk [vmem:[#allocation2 + $0x8] sm:$0xff] %vm19_vm0, %v172_v1  ;;  %23 = vst.msk [vmem:[#allocation2 + $0x18] sm:$0xff] %vm19_vm0, %v172_v1  ;;  %159 = vmatprep.subr.bf16.mxu0 %v168_v0  ;;  %v170_v3 = vld [vmem:[%s235_s0] sm:$0xff]   ;;  %v171_v4 = vld [vmem:[%s235_s0 + $0x8] sm:$0xff]  }
   0x3   :  { %160 = vmatpush3.bf16.msra.mxu0 %v168_v0  ;;  %163 = vmatprep.mubr.msk.bf16.mxu0 %vm19_vm0, %v170_v3  ;;  %v154_v17 = vld [vmem:[%s236_s2] ss:$0 sm:$0xff] }
   0x4   :  { %161 = vmatprep.subr.bf16.mxu0 %v169_v2 }
   0x7   :  { %162 = vmatpush3.bf16.msra.mxu0 %v169_v2 }
   0x8   :  { %v26_v5 = vld [vmem:[#allocation2 + $0x10] sm:$0xff]  ;;  %v24_v6 = vld [vmem:[#allocation2] sm:$0xff] }
   0x9   :  { %v27_v8 = vld [vmem:[#allocation2 + $0x18] sm:$0xff]  ;;  %v25_v11 = vld [vmem:[#allocation2 + $0x8] sm:$0xff] }
   0xa   :  { %164 = vmatmul.mubr.msk.bf16.vlgmr.msra.gmra.mrb[0].mxu0 %vm19_vm0, %v171_v4 }
  0xdd   :  { %v165_v7 = vpop.f32.mrb[0].mxu0 }
  0xde   :  { %v116_v9 = vadd.f32 %v165_v7, %v26_v5  ;;  %v99_v10 = vpop.f32.mrb[1].mxu0 }
  0xdf   :  { %v114_v12 = vadd.f32 %v99_v10, %v24_v6  ;;  %v166_v13 = vpop.f32.mrb[2].mxu0 }
  0xe0   :  { %120 = vst.msk [vmem:[#allocation2 + $0x10] sm:$0xff] %vm19_vm0, %v116_v9  ;;  %v117_v14 = vadd.f32 %v166_v13, %v27_v8  ;;  %v102_v15 = vpop.f32.mrb[3].mxu0 }
  0xe1   :  { %118 = vst.msk [vmem:[#allocation2] sm:$0xff] %vm19_vm0, %v114_v12  ;;  %v115_v16 = vadd.f32 %v102_v15, %v25_v11 }
  0xe2   :  { %121 = vst.msk [vmem:[#allocation2 + $0x18] sm:$0xff] %vm19_vm0, %v117_v14 }
  0xe3   :  { %119 = vst.msk [vmem:[#allocation2 + $0x8] sm:$0xff] %vm19_vm0, %v115_v16 }
  0xe7   :  { %v127_v18 = vld [vmem:[#allocation2 + $0x10] sm:$0xff] }
  0xe8   :  { %v138_v19 = vadd.f32 %v154_v17, %v127_v18  ;;  %v125_v20 = vld [vmem:[#allocation2] sm:$0xff] }
  0xe9   :  { %v136_v21 = vadd.f32 %v154_v17, %v125_v20  ;;  %v128_v22 = vld [vmem:[#allocation2 + $0x18] sm:$0xff] }
  0xea   :  { %142 = vst.msk [vmem:[%s237_s3 + $0x10] sm:$0xff] %vm19_vm0, %v138_v19  ;;  %v139_v23 = vadd.f32 %v154_v17, %v128_v22  ;;  %v126_v24 = vld [vmem:[#allocation2 + $0x8] sm:$0xff] }
  0xeb   :  { %140 = vst.msk [vmem:[%s237_s3] sm:$0xff] %vm19_vm0, %v136_v21  ;;  %v137_v25 = vadd.f32 %v154_v17, %v126_v24 }
  0xec   :  { %143 = vst.msk [vmem:[%s237_s3 + $0x18] sm:$0xff] %vm19_vm0, %v139_v23 }
  0xed   :  { %141 = vst.msk [vmem:[%s237_s3 + $0x8] sm:$0xff] %vm19_vm0, %v137_v25 }

// kernel: glow_forward.22
= control target key start
LH: loop header
LB: loop body
LE: loop exit
PB: predicated region body
PF: predicated region fallthrough
CT: control target
= control target key end

     0   :  { %s3772_s21 = smov 0   ;;  %s5111_s0 = inlined_call_operand.vmem [shape: bf16[2,108,128], index: 0, kind: input, shape index: {}]   ;;  %s5112_s1 = inlined_call_operand.vmem [shape: bf16[1152,16], index: 1, kind: input, shape index: {}]   ;;  %s5113_s2 = inlined_call_operand.vmem [shape: f32[1,16], index: 2, kind: input, shape index: {}]   ;;  %s5114_s3 = inlined_call_operand.vmem [shape: f32[1,16], index: 3, kind: input, shape index: {}]   ;;  %s5115_s4 = inlined_call_operand.vmem [shape: f32[2,80,8], index: 4, kind: input, shape index: {}]   ;;  %s5116_s5 = inlined_call_operand.vmem [shape: f32[2,80,8], index: 5, kind: output, shape index: {0}]   ;;  %s5117_s6 = inlined_call_operand.vmem [shape: f32[2,1,1], index: 6, kind: output, shape index: {1}]  }
   0x1 LB: > { %s2889_s22 = sadd.s32 4294967295, %s3731_s21   ;;  %p2893_p0 = scmp.ge.s32.totalorder %s3731_s21, 1  ;;  %s3731_s21 = sphi %s3772_s21, %s17_s21  }
   0x2   : > { %p225_p1 = scmp.lt.s32.totalorder %s3731_s21, 3 }
   0x4   : > { %p226_p2 = pnand %p2893_p0, %p225_p1 }
   0x6   : > { %229 = sbr.rel (%p226_p2) target bundleno = 898 (0x382), region = 40 }
   0xd   : > { %v3508_v0 = vld [vmem:[%s5112_s1 + $0x40] sm:$0xff]   ;;  %v5118_v1 = vmov 0.0   ;;  %v3510_v3 = vld [vmem:[%s5112_s1 + $0x48] sm:$0xff]   ;;  %vm3734_vm0 = vmmov 0   ;;  %p263_p3 = scmp.lt.s32.totalorder %s2889_s22, 1  ;;  %v3512_v5 = vld [vmem:[%s5112_s1 + $0x50] sm:$0xff]  }
   0xe   : > { %3132 = vmatprep.subr.bf16.mxu0 %v5118_v1  ;;  %3168 = vmatprep.subr.bf16.mxu1 %v5118_v1  ;;  %v3509_v2 = vld [vmem:[%s5112_s1] sm:$0xff]   ;;  %v3511_v4 = vld [vmem:[%s5112_s1 + $0x8] sm:$0xff]   ;;  %v3513_v6 = vld [vmem:[%s5112_s1 + $0x10] sm:$0xff]   ;;  %vm353_vm1 = vsmask.f32 7424  ;;  %vm670_vm2 = vcmask 1046528  }
   0xf   : > { %3133 = vmatpush3.bf16.msra.mxu0 %v3508_v0  ;;  %3148 = vmatprep.mubr.msk.bf16.mxu0 %vm3734_vm0, %v5118_v1  ;;  %s5219_s22 = smov (!%p263_p3, %s2889_s22), 1  ;;  %v3514_v7 = vld [vmem:[%s5112_s1 + $0x58] sm:$0xff]   ;;  %v3516_v9 = vld [vmem:[%s5112_s1 + $0x60] sm:$0xff]   ;;  %v3518_v13 = vld [vmem:[%s5112_s1 + $0x68] sm:$0xff]   ;;  %vm1040_vm3 = vsmask.f32 6400 }
  0x10   : > { %3169 = vmatpush3.bf16.msra.mxu1 %v3509_v2  ;;  %3134 = vmatprep.subr.bf16.mxu0 %v5118_v1  ;;  %s3472_s11 = smul.u32 56, %s5219_s22  ;;  %v3515_v8 = vld [vmem:[%s5112_s1 + $0x18] sm:$0xff]   ;;  %v3517_v10 = vld [vmem:[%s5112_s1 + $0x20] sm:$0xff]   ;;  %v3519_v16 = vld [vmem:[%s5112_s1 + $0x28] sm:$0xff]   ;;  %vm1250_vm4 = vcmask 1045504   ;;  %vm1830_vm6 = vcmask 1044480   ;;  %s280_s13 = scalar_lea.vmem %s5117_s6, %s5219_s22 }
  0x11   : > { %3170 = vmatprep.subr.bf16.mxu1 %v5118_v1  ;;  %3184 = vmatprep.mubr.msk.bf16.mxu1 %vm3734_vm0, %v5118_v1  ;;  %v3520_v18 = vld [vmem:[%s5112_s1 + $0x70] sm:$0xff]   ;;  %v3522_v23 = vld [vmem:[%s5112_s1 + $0x78] sm:$0xff]   ;;  %v3526_v28 = vld [vmem:[%s5112_s1 + $0x80] sm:$0xff]   ;;  %vm1620_vm5 = vsmask.f32 5376  ;;  %s3735_s26 = smov 120  }
  0x12   : > { %s3822_s18 = scalar_lea.vmem %s5111_s0, %s3472_s11  ;;  %v3521_v22 = vld [vmem:[%s5112_s1 + $0x30] sm:$0xff]   ;;  %v3523_v24 = vld [vmem:[%s5112_s1 + $0x38] sm:$0xff]   ;;  %v3529_v32 = vld [vmem:[%s5112_s1 + $0xc0] sm:$0xff]   ;;  %s3473_s27 = smul.u32 80, %s5219_s22 }
  0x13   : > { %3135 = vmatpush3.bf16.msra.mxu0 %v3510_v3  ;;  %v282_v11 = vld [vmem:[%s3822_s18] sm:$0xf]  ;;  %v3834_v12 = vld [vmem:[%s3822_s18 + $0x4] sm:$0xf]  ;;  %v3841_v15 = vld [vmem:[%s3822_s18 + $0x8] sm:$0xff]   ;;  %s3736_s7 = smov 8  }
  0x14   : > { %3171 = vmatpush3.bf16.msra.mxu1 %v3511_v4  ;;  %3136 = vmatprep.subr.bf16.mxu0 %v5118_v1  ;;  %v2897_v14 = vcombine.low %v282_v11, %v3834_v12  ;;  %v362_v21 = vshll.u32 %v3841_v15, 16  ;;  %v3864_v27 = vld [vmem:[%s3822_s18 + $0x10] sm:$0xff]   ;;  %v366_v30 = vshrl.u32 %v3841_v15, 16  ;;  %v3880_v33 = vld [vmem:[%s3822_s18 + $0x18] sm:$0xff]   ;;  %v3527_v34 = vld [vmem:[%s5112_s1 + $0x88] sm:$0xff]   ;;  %s5006_s30 = scalar_lea.vmem %s5115_s4, %s3473_s27  ;;  %s277_s10 = scalar_lea.vmem %s5116_s5, %s3473_s27 }
  0x15   : > { %3172 = vmatprep.subr.bf16.mxu1 %v5118_v1  ;;  %v370_v31 = vshll.u32 %v3864_v27, 16  ;;  %v3531_v37 = vld [vmem:[%s5112_s1 + $0xc8] sm:$0xff]   ;;  %v378_v38 = vshll.u32 %v3880_v33, 16  ;;  %v3530_v40 = vld [vmem:[%s5112_s1 + $0x90] sm:$0xff]   ;;  %v374_v41 = vshrl.u32 %v3864_v27, 16  ;;  %v3533_v44 = vld [vmem:[%s5112_s1 + $0x98] sm:$0xff]  }
  0x16   : > { %v357_v17 = vshll.u32 %v2897_v14, 16  ;;  %v355_v19 = vshrl.u32 %v2897_v14, 16  ;;  %v364_v26 = vrot.slane %v362_v21, 1  ;;  %v3534_v42 = vld [vmem:[%s5112_s1 + $0xd0] sm:$0xff]   ;;  %v3909_v45 = vld [vmem:[%s3822_s18 + $0x20] sm:$0xff]   ;;  %v3536_v47 = vld [vmem:[%s5112_s1 + $0xd8] sm:$0xff]  }
  0x17   : > { %3137 = vmatpush3.bf16.msra.mxu0 %v3512_v5  ;;  %v372_v36 = vrot.slane %v370_v31, 1  ;;  %v380_v43 = vrot.slane %v378_v38, 1  ;;  %v3535_v48 = vld [vmem:[%s5112_s1 + $0xa0] sm:$0xff]   ;;  %v382_v50 = vshrl.u32 %v3880_v33, 16  ;;  %v386_v51 = vshll.u32 %v3909_v45, 16  ;;  %v3539_v56 = vld [vmem:[%s5112_s1 + $0xa8] sm:$0xff]  }
  0x18   : > { %3173 = vmatpush3.bf16.msra.mxu1 %v3513_v6  ;;  %3138 = vmatprep.subr.bf16.mxu0 %v5118_v1  ;;  %v359_v20 = vrot.slane %v357_v17, 1  ;;  %v368_v35 = vor.u32 %v366_v30, %v364_v26  ;;  %v3538_v52 = vld [vmem:[%s5112_s1 + $0xe0] sm:$0xff]   ;;  %v3932_v53 = vld [vmem:[%s3822_s18 + $0x28] ss:$0 sps:$4 sm:$0x11]   ;;  %v390_v59 = vshrl.u32 %v3909_v45, 16 }
  0x19   : > { %3174 = vmatprep.subr.bf16.mxu1 %v5118_v1  ;;  %v376_v46 = vor.u32 %v374_v41, %v372_v36  ;;  %v384_v54 = vor.u32 %v382_v50, %v380_v43  ;;  %v388_v55 = vrot.slane %v386_v51, 1  ;;  %v3540_v57 = vld [vmem:[%s5112_s1 + $0xe8] sm:$0xff]   ;;  %v394_v60 = vshll.u32 %v3932_v53, 16  ;;  %v3541_v61 = vld [vmem:[%s5112_s1 + $0xb0] sm:$0xff]   ;;  %v3544_v63 = vld [vmem:[%s5112_s1 + $0xb8] sm:$0xff]  }
  0x1a   : > { %v360_v25 = vor.u32 %v359_v20, %v355_v19  ;;  %v373_v39 = vsel %vm353_vm1, %v368_v35, %v372_v36  ;;  %v3543_v62 = vld [vmem:[%s5112_s1 + $0xf0] sm:$0xff]   ;;  %v3545_v3 = vld [vmem:[%s5112_s1 + $0xf8] sm:$0xff]   ;;  %v650_v4 = vld [vmem:[%s3822_s18] sm:$0xe]  ;;  %v674_v21 = vrot.slane %v3864_v27, 1  ;;  %v678_v38 = vrot.slane %v3909_v45, 1 }
  0x1b   : > { %3139 = vmatpush3.bf16.msra.mxu0 %v3514_v7  ;;  %v381_v49 = vsel %vm353_vm1, %v376_v46, %v380_v43  ;;  %v389_v58 = vsel %vm353_vm1, %v384_v54, %v388_v55  ;;  %v392_v0 = vor.u32 %v390_v59, %v388_v55  ;;  %v396_v2 = vrot.slane %v394_v60, 1  ;;  %v818_v5 = vld [vmem:[%s3822_s18 + $0x4] sm:$0xe]  ;;  %v3974_v6 = vld [vmem:[%s3822_s18 + $0x8] sm:$0xf]  ;;  %v4001_v19 = vld [vmem:[%s3822_s18 + $0x14] sm:$0xff]  }
  0x1c   : > { %3175 = vmatpush3.bf16.msra.mxu1 %v3515_v8  ;;  %3140 = vmatprep.subr.bf16.mxu0 %v5118_v1  ;;  %v365_v29 = vsel %vm353_vm1, %v360_v25, %v364_v26  ;;  %v2919_v8 = vcombine.low %v650_v4, %v3834_v12  ;;  %v672_v12 = vrot.slane %v3841_v15, 1  ;;  %v3549_v17 = vld [vmem:[%s5112_s1 + $0x100] sm:$0xff]   ;;  %v3550_v20 = vld [vmem:[%s5112_s1 + $0x108] sm:$0xff]   ;;  %v3553_v25 = vld [vmem:[%s5112_s1 + $0x110] sm:$0xff]  }
  0x1d   : > { %3176 = vmatprep.subr.bf16.mxu1 %v5118_v1  ;;  %v397_v7 = vsel %vm353_vm1, %v392_v0, %v396_v2  ;;  %v3556_v30 = vld [vmem:[%s5112_s1 + $0x118] sm:$0xff]   ;;  %v4054_v36 = vld [vmem:[%s3822_s18 + $0x24] sm:$0xff]   ;;  %v3565_v43 = vld [vmem:[%s3822_s18 + $0x2c] ss:$0 sps:$4 sm:$0x11]   ;;  %v1059_v2 = vshrl.u32 %v4001_v19, 16 }
  0x1e   : > { %v671_v11 = vrot.slane %v2919_v8, 1  ;;  %v3563_v41 = vld [vmem:[%s5112_s1 + $0x168] sm:$0xff]   ;;  %v3566_v46 = vld [vmem:[%s5112_s1 + $0x170] sm:$0xff]   ;;  %v3568_v54 = vld [vmem:[%s5112_s1 + $0x178] sm:$0xff]  }
  0x1f   : > { %3141 = vmatpush3.bf16.msra.mxu0 %v3516_v9  ;;  %v3980_v9 = vcombine.low %v818_v5, %v3974_v6  ;;  %v1230_v55 = vld [vmem:[%s3822_s18 + $0x4] sm:$0xc]  ;;  %v1061_v8 = vrot.slane %v1059_v2, 1 }
  0x20   : > { %3177 = vmatpush3.bf16.msra.mxu1 %v3517_v10  ;;  %3142 = vmatprep.subr.bf16.mxu0 %v5118_v1  ;;  %v3983_v10 = vld [vmem:[%s3822_s18 + $0xc] sm:$0xff]  }
  0x21   : > { %3178 = vmatprep.subr.bf16.mxu1 %v5118_v1  ;;  %v1050_v50 = vshrl.u32 %v3983_v10, 16  ;;  %v1053_v51 = vshll.u32 %v3983_v10, 16  ;;  %v1252_v5 = vrot.slane %v3983_v10, 2 }
  0x23   : > { %3143 = vmatpush3.bf16.msra.mxu0 %v3518_v13  ;;  %v873_v13 = vrot.slane %v3980_v9, 1  ;;  %v1052_v59 = vrot.slane %v1050_v50, 1  ;;  %v1055_v60 = vrot.slane %v1053_v51, 2  ;;  %v4199_v51 = vld [vmem:[%s3822_s18 + $0x10] sm:$0xff]  }
  0x24   : > { %3179 = vmatpush3.bf16.msra.mxu1 %v3519_v16  ;;  %3144 = vmatprep.subr.bf16.mxu0 %v5118_v1  ;;  %v673_v16 = vsel %vm670_vm2, %v671_v11, %v672_v12 }
  0x25   : > { %3180 = vmatprep.subr.bf16.mxu1 %v5118_v1  ;;  %v1056_v0 = vor.u32 %v1055_v60, %v1052_v59  ;;  %v1633_v59 = vshll.u32 %v4199_v51, 16  ;;  %v3586_v60 = vld [vmem:[%s5112_s1 + $0x1f8] sm:$0xff]  }
  0x27   : > { %3145 = vmatpush3.bf16.msra.mxu0 %v3520_v18 }
  0x28   : > { %3181 = vmatpush3.bf16.msra.mxu1 %v3521_v22  ;;  %3146 = vmatprep.subr.bf16.mxu0 %v5118_v1  ;;  %v876_v22 = vrot.slane %v4001_v19, 1 }
  0x29   : > { %3182 = vmatprep.subr.bf16.mxu1 %v5118_v1 }
  0x2b   : > { %3147 = vmatpush3.bf16.msra.mxu0 %v3522_v23  ;;  %v3554_v23 = vld [vmem:[%s5112_s1 + $0x148] sm:$0xff]  }
  0x2c   : > { %3183 = vmatpush3.bf16.msra.mxu1 %v3523_v24  ;;  %3204 = vmatprep.subr.bf16.mxu0 %v5118_v1  ;;  %v675_v24 = vsel %vm670_vm2, %v672_v12, %v674_v21  ;;  %v3572_v12 = vld [vmem:[%s5112_s1 + $0x1c0] sm:$0xff]  }
  0x2d   : > { %3240 = vmatprep.subr.bf16.mxu1 %v5118_v1 }
  0x2e   : > { %3149 = vmatmul.mubr.bf16.vlgmr.msra.gmra.mrb[0].mxu0 %v365_v29  ;;  %v676_v29 = vrot.slane %v3880_v33, 1 }
  0x2f   : > { %3185 = vmatmul.mubr.bf16.vlgmr.msra.gmra.mrb[0].mxu1 %v2897_v14  ;;  %3205 = vmatpush3.bf16.msra.mxu0 %v3526_v28  ;;  %v874_v14 = vrot.slane %v3983_v10, 1  ;;  %v3557_v28 = vld [vmem:[%s5112_s1 + $0x150] sm:$0xff]   ;;  %v3571_v10 = vld [vmem:[%s5112_s1 + $0x188] sm:$0xff]  }
  0x30   : > { %3206 = vmatprep.subr.bf16.mxu0 %v5118_v1  ;;  %3152 = vmatprep.mubr.msk.bf16.mxu0 %vm3734_vm0, %v5118_v1 }
  0x31   : > { %3188 = vmatprep.mubr.msk.bf16.mxu1 %vm3734_vm0, %v5118_v1  ;;  %3241 = vmatpush3.bf16.msra.mxu1 %v3529_v32  ;;  %v875_v18 = vsel %vm670_vm2, %v873_v13, %v874_v14  ;;  %v877_v26 = vsel %vm670_vm2, %v874_v14, %v876_v22  ;;  %v3559_v32 = vld [vmem:[%s5112_s1 + $0x158] sm:$0xff]  }
  0x32   : > { %3242 = vmatprep.subr.bf16.mxu1 %v5118_v1 }
  0x33   : > { %3207 = vmatpush3.bf16.msra.mxu0 %v3527_v34  ;;  %v3558_v34 = vld [vmem:[%s5112_s1 + $0x120] sm:$0xff]  }
  0x34   : > { %3208 = vmatprep.subr.bf16.mxu0 %v5118_v1 }
  0x35   : > { %3243 = vmatpush3.bf16.msra.mxu1 %v3531_v37  ;;  %v3561_v37 = vld [vmem:[%s5112_s1 + $0x160] sm:$0xff]  }
  0x36   : > { %3153 = vmatmul.mubr.bf16.gmra.mrb[4].mxu0 %v373_v39  ;;  %3244 = vmatprep.subr.bf16.mxu1 %v5118_v1  ;;  %v3562_v39 = vld [vmem:[%s5112_s1 + $0x128] sm:$0xff]  }
  0x37   : > { %3189 = vmatmul.mubr.bf16.gmra.mrb[4].mxu1 %v3841_v15  ;;  %3209 = vmatpush3.bf16.msra.mxu0 %v3530_v40  ;;  %v3552_v15 = vld [vmem:[%s5112_s1 + $0x140] sm:$0xff]   ;;  %v880_v40 = vrot.slane %v4054_v36, 1 }
  0x38   : > { %3156 = vmatprep.mubr.msk.bf16.mxu0 %vm3734_vm0, %v5118_v1  ;;  %3192 = vmatprep.mubr.msk.bf16.mxu1 %vm3734_vm0, %v5118_v1 }
  0x39   : > { %3210 = vmatprep.subr.bf16.mxu0 %v5118_v1  ;;  %3245 = vmatpush3.bf16.msra.mxu1 %v3534_v42  ;;  %v679_v42 = vsel %vm670_vm2, %v676_v29, %v678_v38 }
  0x3a   : > { %3246 = vmatprep.subr.bf16.mxu1 %v5118_v1 }
  0x3b   : > { %3211 = vmatpush3.bf16.msra.mxu0 %v3533_v44 }
  0x3c   : > { %3212 = vmatprep.subr.bf16.mxu0 %v5118_v1 }
  0x3d   : > { %3247 = vmatpush3.bf16.msra.mxu1 %v3536_v47  ;;  %v680_v47 = vrot.slane %v3932_v53, 1  ;;  %v3567_v53 = vld [vmem:[%s5112_s1 + $0x138] sm:$0xff]  }
  0x3e   : > { %3157 = vmatmul.mubr.bf16.gmra.mrb[8].mxu0 %v381_v49  ;;  %3248 = vmatprep.subr.bf16.mxu1 %v5118_v1  ;;  %v1045_v49 = vshll.u32 %v3980_v9, 16 }
  0x3f   : > { %3193 = vmatmul.mubr.bf16.gmra.mrb[8].mxu1 %v3864_v27  ;;  %3213 = vmatpush3.bf16.msra.mxu0 %v3535_v48  ;;  %v4027_v27 = vld [vmem:[%s3822_s18 + $0x1c] sm:$0xff]   ;;  %v1042_v48 = vshrl.u32 %v3980_v9, 16 }
  0x40   : > { %3160 = vmatprep.mubr.msk.bf16.mxu0 %vm3734_vm0, %v5118_v1  ;;  %3196 = vmatprep.mubr.msk.bf16.mxu1 %vm3734_vm0, %v5118_v1  ;;  %v878_v31 = vrot.slane %v4027_v27, 1  ;;  %v1068_v14 = vshrl.u32 %v4027_v27, 16 }
  0x41   : > { %3214 = vmatprep.subr.bf16.mxu0 %v5118_v1  ;;  %3249 = vmatpush3.bf16.msra.mxu1 %v3538_v52  ;;  %v882_v52 = vrot.slane %v3565_v43, 1  ;;  %v3581_v43 = vld [vmem:[%s5112_s1 + $0x1e8] sm:$0xff]  }
  0x42   : > { %3250 = vmatprep.subr.bf16.mxu1 %v5118_v1  ;;  %v879_v35 = vsel %vm670_vm2, %v876_v22, %v878_v31  ;;  %v881_v44 = vsel %vm670_vm2, %v878_v31, %v880_v40 }
  0x43   : > { %3215 = vmatpush3.bf16.msra.mxu0 %v3539_v56  ;;  %v681_v56 = vsel %vm670_vm2, %v678_v38, %v680_v47 }
  0x44   : > { %3216 = vmatprep.subr.bf16.mxu0 %v5118_v1 }
  0x45   : > { %3251 = vmatpush3.bf16.msra.mxu1 %v3540_v57  ;;  %v1044_v57 = vrot.slane %v1042_v48, 1 }
  0x46   : > { %3161 = vmatmul.mubr.bf16.gmra.mrb[12].mxu0 %v389_v58  ;;  %3252 = vmatprep.subr.bf16.mxu1 %v5118_v1  ;;  %v1047_v58 = vrot.slane %v1045_v49, 2 }
  0x47   : > { %3197 = vmatmul.mubr.bf16.gmra.mrb[12].mxu1 %v3880_v33  ;;  %3164 = vmatprep.mubr.msk.bf16.mxu0 %vm3734_vm0, %v5118_v1  ;;  %v677_v33 = vsel %vm670_vm2, %v674_v21, %v676_v29  ;;  %v1070_v21 = vrot.slane %v1068_v14, 1  ;;  %v1256_v29 = vrot.slane %v4027_v27, 2 }
  0x48   : > { %3200 = vmatprep.mubr.msk.bf16.mxu1 %vm3734_vm0, %v5118_v1  ;;  %3217 = vmatpush3.bf16.msra.mxu0 %v3541_v61  ;;  %v883_v61 = vsel %vm670_vm2, %v880_v40, %v882_v52  ;;  %v3584_v52 = vld [vmem:[%s5112_s1 + $0x1f0] sm:$0xff]  }
  0x49   : > { %3253 = vmatpush3.bf16.msra.mxu1 %v3543_v62  ;;  %3218 = vmatprep.subr.bf16.mxu0 %v5118_v1  ;;  %v2951_v62 = vcombine.low %v1230_v55, %v3974_v6  ;;  %v3585_v55 = vld [vmem:[%s5112_s1 + $0x1b8] sm:$0xff]  }
  0x4a   : > { %3254 = vmatprep.subr.bf16.mxu1 %v5118_v1 }
  0x4b   : > { %v1251_v4 = vrot.slane %v2951_v62, 2 }
  0x4c   : > { %3219 = vmatpush3.bf16.msra.mxu0 %v3544_v63  ;;  %v1048_v63 = vor.u32 %v1047_v58, %v1044_v57  ;;  %v1630_v58 = vshrl.u32 %v4199_v51, 16 }
  0x4d   : > { %3255 = vmatpush3.bf16.msra.mxu1 %v3545_v3  ;;  %3276 = vmatprep.subr.bf16.mxu0 %v5118_v1  ;;  %v1062_v3 = vshll.u32 %v4001_v19, 16  ;;  %v1253_v11 = vsel %vm1250_vm4, %v1251_v4, %v1252_v5  ;;  %v4222_v4 = vld [vmem:[%s3822_s18 + $0x18] sm:$0xff]  }
  0x4e   : > { %3165 = vmatmul.mubr.bf16.gmra.mrb[16].mxu0 %v397_v7  ;;  %3312 = vmatprep.subr.bf16.mxu1 %v5118_v1  ;;  %v1057_v6 = vsel %vm1040_vm3, %v1048_v63, %v1056_v0  ;;  %v3570_v7 = vld [vmem:[%s5112_s1 + $0x180] sm:$0xff]   ;;  %v1632_v2 = vrot.slane %v1630_v58, 2 }
  0x4f   : > { %3201 = vmatmul.mubr.bf16.gmra.mrb[16].mxu1 %v3909_v45  ;;  %3220 = vmatprep.mubr.msk.bf16.mxu0 %vm3734_vm0, %v5118_v1  ;;  %v3564_v45 = vld [vmem:[%s5112_s1 + $0x130] sm:$0xff]   ;;  %v1064_v9 = vrot.slane %v1062_v3, 2  ;;  %v1635_v3 = vrot.slane %v1633_v59, 3 }
  0x50   : > { %3256 = vmatprep.mubr.msk.bf16.mxu1 %vm3734_vm0, %v5118_v1 }
  0x51   : > { %v1065_v13 = vor.u32 %v1064_v9, %v1061_v8  ;;  %v1636_v8 = vor.u32 %v1635_v3, %v1632_v2  ;;  %v1639_v9 = vshrl.u32 %v4222_v4, 16 }
  0x53   : > { %v1641_v14 = vrot.slane %v1639_v9, 2 }
  0x56   : > { %3221 = vmatmul.mubr.bf16.vlgmr.msra.gmra.mrb[20].mxu0 %v673_v16  ;;  %v1071_v16 = vshll.u32 %v4027_v27, 16 }
  0x57   : > { %3257 = vmatmul.mubr.bf16.vlgmr.msra.gmra.mrb[20].mxu1 %v875_v18  ;;  %3277 = vmatpush3.bf16.msra.mxu0 %v3549_v17  ;;  %v1254_v17 = vrot.slane %v4001_v19, 2  ;;  %v3574_v18 = vld [vmem:[%s5112_s1 + $0x1c8] sm:$0xff]  }
  0x58   : > { %3278 = vmatprep.subr.bf16.mxu0 %v5118_v1  ;;  %3224 = vmatprep.mubr.msk.bf16.mxu0 %vm3734_vm0, %v5118_v1  ;;  %v1073_v22 = vrot.slane %v1071_v16, 2 }
  0x59   : > { %3260 = vmatprep.mubr.msk.bf16.mxu1 %vm3734_vm0, %v5118_v1  ;;  %3313 = vmatpush3.bf16.msra.mxu1 %v3552_v15  ;;  %v1066_v15 = vsel %vm1040_vm3, %v1056_v0, %v1065_v13  ;;  %v1255_v19 = vsel %vm1250_vm4, %v1252_v5, %v1254_v17  ;;  %v1257_v27 = vsel %vm1250_vm4, %v1254_v17, %v1256_v29  ;;  %v4239_v17 = vld [vmem:[%s3822_s18 + $0x20] sm:$0xff]  }
  0x5a   : > { %3314 = vmatprep.subr.bf16.mxu1 %v5118_v1 }
  0x5b   : > { %3279 = vmatpush3.bf16.msra.mxu0 %v3550_v20  ;;  %v3573_v20 = vld [vmem:[%s5112_s1 + $0x190] sm:$0xff]  }
  0x5c   : > { %3280 = vmatprep.subr.bf16.mxu0 %v5118_v1 }
  0x5d   : > { %3315 = vmatpush3.bf16.msra.mxu1 %v3554_v23  ;;  %v3576_v23 = vld [vmem:[%s5112_s1 + $0x1d0] sm:$0xff]  }
  0x5e   : > { %3225 = vmatmul.mubr.bf16.gmra.mrb[24].mxu0 %v675_v24  ;;  %3316 = vmatprep.subr.bf16.mxu1 %v5118_v1  ;;  %v1074_v24 = vor.u32 %v1073_v22, %v1070_v21  ;;  %v1648_v21 = vshrl.u32 %v4239_v17, 16  ;;  %v1651_v22 = vshll.u32 %v4239_v17, 16 }
  0x5f   : > { %3261 = vmatmul.mubr.bf16.gmra.mrb[24].mxu1 %v877_v26  ;;  %3281 = vmatpush3.bf16.msra.mxu0 %v3553_v25  ;;  %v3575_v25 = vld [vmem:[%s5112_s1 + $0x198] sm:$0xff]   ;;  %v1077_v26 = vshrl.u32 %v4054_v36, 16 }
  0x60   : > { %3228 = vmatprep.mubr.msk.bf16.mxu0 %vm3734_vm0, %v5118_v1  ;;  %3264 = vmatprep.mubr.msk.bf16.mxu1 %vm3734_vm0, %v5118_v1  ;;  %v1075_v31 = vsel %vm1040_vm3, %v1065_v13, %v1074_v24 }
  0x61   : > { %3282 = vmatprep.subr.bf16.mxu0 %v5118_v1  ;;  %3317 = vmatpush3.bf16.msra.mxu1 %v3557_v28  ;;  %v1080_v28 = vshll.u32 %v4054_v36, 16 }
  0x62   : > { %3318 = vmatprep.subr.bf16.mxu1 %v5118_v1 }
  0x63   : > { %3283 = vmatpush3.bf16.msra.mxu0 %v3556_v30  ;;  %v3578_v30 = vld [vmem:[%s5112_s1 + $0x1d8] sm:$0xff]  }
  0x64   : > { %3284 = vmatprep.subr.bf16.mxu0 %v5118_v1 }
  0x65   : > { %3319 = vmatpush3.bf16.msra.mxu1 %v3559_v32  ;;  %v3577_v32 = vld [vmem:[%s5112_s1 + $0x1a0] sm:$0xff]  }
  0x66   : > { %3229 = vmatmul.mubr.bf16.gmra.mrb[28].mxu0 %v677_v33  ;;  %3320 = vmatprep.subr.bf16.mxu1 %v5118_v1  ;;  %v1079_v33 = vrot.slane %v1077_v26, 1  ;;  %v1653_v26 = vrot.slane %v1651_v22, 3 }
  0x67   : > { %3265 = vmatmul.mubr.bf16.gmra.mrb[28].mxu1 %v879_v35  ;;  %3285 = vmatpush3.bf16.msra.mxu0 %v3558_v34  ;;  %v1082_v34 = vrot.slane %v1080_v28, 2  ;;  %v3583_v35 = vld [vmem:[%s3822_s18 + $0x2c] ss:$0 sps:$4 sm:$0x33]  }
  0x68   : > { %3232 = vmatprep.mubr.msk.bf16.mxu0 %vm3734_vm0, %v5118_v1  ;;  %3268 = vmatprep.mubr.msk.bf16.mxu1 %vm3734_vm0, %v5118_v1  ;;  %v1086_v40 = vshrl.u32 %v3583_v35, 16  ;;  %v4260_v28 = vld [vmem:[%s3822_s18 + $0x28] sm:$0xff]  }
  0x69   : > { %3286 = vmatprep.subr.bf16.mxu0 %v5118_v1  ;;  %3321 = vmatpush3.bf16.msra.mxu1 %v3561_v37  ;;  %v3579_v37 = vld [vmem:[%s5112_s1 + $0x1e0] sm:$0xff]   ;;  %v1083_v38 = vor.u32 %v1082_v34, %v1079_v33  ;;  %v1660_v33 = vshll.u32 %v4260_v28, 16 }
  0x6a   : > { %3322 = vmatprep.subr.bf16.mxu1 %v5118_v1  ;;  %v1088_v47 = vrot.slane %v1086_v40, 1  ;;  %v1460_v40 = vrot.slane %v4260_v28, 2 }
  0x6b   : > { %3287 = vmatpush3.bf16.msra.mxu0 %v3562_v39  ;;  %v3580_v39 = vld [vmem:[%s5112_s1 + $0x1a8] sm:$0xff]  }
  0x6c   : > { %3288 = vmatprep.subr.bf16.mxu0 %v5118_v1 }
  0x6d   : > { %3323 = vmatpush3.bf16.msra.mxu1 %v3563_v41  ;;  %v1089_v41 = vshll.u32 %v3583_v35, 16 }
  0x6e   : > { %3233 = vmatmul.mubr.bf16.gmra.mrb[32].mxu0 %v679_v42  ;;  %3324 = vmatprep.subr.bf16.mxu1 %v5118_v1  ;;  %v1258_v42 = vrot.slane %v4054_v36, 2  ;;  %v3582_v36 = vld [vmem:[%s5112_s1 + $0x1b0] sm:$0xff]  }
  0x6f   : > { %3269 = vmatmul.mubr.bf16.gmra.mrb[32].mxu1 %v881_v44  ;;  %3236 = vmatprep.mubr.msk.bf16.mxu0 %vm3734_vm0, %v5118_v1  ;;  %v1398_v44 = vld [vmem:[%s3822_s18 + $0x8] sm:$0xc]  ;;  %v1091_v48 = vrot.slane %v1089_v41, 2 }
  0x70   : > { %3272 = vmatprep.mubr.msk.bf16.mxu1 %vm3734_vm0, %v5118_v1  ;;  %3289 = vmatpush3.bf16.msra.mxu0 %v3564_v45  ;;  %v4188_v45 = vld [vmem:[%s3822_s18 + $0xc] sm:$0xf]  ;;  %v1259_v49 = vsel %vm1250_vm4, %v1256_v29, %v1258_v42  ;;  %v1458_v29 = vrot.slane %v4239_v17, 2 }
  0x71   : > { %3325 = vmatpush3.bf16.msra.mxu1 %v3566_v46  ;;  %3290 = vmatprep.subr.bf16.mxu0 %v5118_v1  ;;  %v1084_v46 = vsel %vm1040_vm3, %v1074_v24, %v1083_v38  ;;  %v2960_v50 = vcombine.low %v1398_v44, %v4188_v45  ;;  %v3597_v41 = vld [vmem:[%s5112_s1 + $0x228] sm:$0xff]  }
  0x72   : > { %3326 = vmatprep.subr.bf16.mxu1 %v5118_v1 }
  0x73   : > { %v1625_v57 = vshll.u32 %v2960_v50, 16  ;;  %v1453_v5 = vrot.slane %v2960_v50, 2 }
  0x74   : > { %3291 = vmatpush3.bf16.msra.mxu0 %v3567_v53  ;;  %v1092_v53 = vor.u32 %v1091_v48, %v1088_v47  ;;  %v3599_v47 = vld [vmem:[%s3822_s18 + $0x30] ss:$0 sps:$4 sm:$0x33]  }
  0x75   : > { %3327 = vmatpush3.bf16.msra.mxu1 %v3568_v54  ;;  %3348 = vmatprep.subr.bf16.mxu0 %v5118_v1  ;;  %v1260_v54 = vrot.slane %v3583_v35, 2  ;;  %v1627_v0 = vrot.slane %v1625_v57, 3  ;;  %v3595_v35 = vld [vmem:[%s5112_s1 + $0x220] sm:$0xff]  }
  0x76   : > { %3237 = vmatmul.mubr.bf16.gmra.mrb[36].mxu0 %v681_v56  ;;  %3384 = vmatprep.subr.bf16.mxu1 %v5118_v1  ;;  %v1622_v56 = vshrl.u32 %v2960_v50, 16 }
  0x77   : > { %3273 = vmatmul.mubr.bf16.gmra.mrb[36].mxu1 %v883_v61  ;;  %3292 = vmatprep.mubr.msk.bf16.mxu0 %vm3734_vm0, %v5118_v1  ;;  %v1093_v61 = vsel %vm1040_vm3, %v1083_v38, %v1092_v53  ;;  %v1261_v62 = vsel %vm1250_vm4, %v1258_v42, %v1260_v54  ;;  %v1662_v38 = vrot.slane %v1660_v33, 3  ;;  %v3601_v54 = vld [vmem:[%s5112_s1 + $0x238] sm:$0xff]  }
  0x78   : > { %3328 = vmatprep.mubr.msk.bf16.mxu1 %vm3734_vm0, %v5118_v1  ;;  %v1624_v63 = vrot.slane %v1622_v56, 2 }
  0x7e   : > { %3293 = vmatmul.mubr.bf16.vlgmr.msra.gmra.mrb[40].mxu0 %v1057_v6  ;;  %v1454_v6 = vrot.slane %v4199_v51, 2 }
  0x7f   : > { %3329 = vmatmul.mubr.bf16.vlgmr.msra.gmra.mrb[40].mxu1 %v1253_v11  ;;  %3349 = vmatpush3.bf16.msra.mxu0 %v3570_v7  ;;  %v1628_v7 = vor.u32 %v1627_v0, %v1624_v63  ;;  %v1642_v11 = vshll.u32 %v4222_v4, 16  ;;  %v1834_v0 = vrot.slane %v4222_v4, 3 }
  0x80   : > { %3350 = vmatprep.subr.bf16.mxu0 %v5118_v1  ;;  %3296 = vmatprep.mubr.msk.bf16.mxu0 %vm3734_vm0, %v5118_v1 }
  0x81   : > { %3332 = vmatprep.mubr.msk.bf16.mxu1 %vm3734_vm0, %v5118_v1  ;;  %3385 = vmatpush3.bf16.msra.mxu1 %v3572_v12  ;;  %v1455_v12 = vsel %vm1250_vm4, %v1453_v5, %v1454_v6  ;;  %v1637_v13 = vsel %vm1620_vm5, %v1628_v7, %v1636_v8  ;;  %v1644_v16 = vrot.slane %v1642_v11, 3 }
  0x82   : > { %3386 = vmatprep.subr.bf16.mxu1 %v5118_v1 }
  0x83   : > { %3351 = vmatpush3.bf16.msra.mxu0 %v3571_v10  ;;  %v3589_v10 = vld [vmem:[%s5112_s1 + $0x200] sm:$0xff]  }
  0x84   : > { %3352 = vmatprep.subr.bf16.mxu0 %v5118_v1 }
  0x85   : > { %3387 = vmatpush3.bf16.msra.mxu1 %v3574_v18  ;;  %v3590_v18 = vld [vmem:[%s5112_s1 + $0x208] sm:$0xff]  }
  0x86   : > { %3297 = vmatmul.mubr.bf16.gmra.mrb[44].mxu0 %v1066_v15  ;;  %3388 = vmatprep.subr.bf16.mxu1 %v5118_v1  ;;  %v1456_v15 = vrot.slane %v4222_v4, 2 }
  0x87   : > { %3333 = vmatmul.mubr.bf16.gmra.mrb[44].mxu1 %v1255_v19  ;;  %3353 = vmatpush3.bf16.msra.mxu0 %v3573_v20  ;;  %v1645_v20 = vor.u32 %v1644_v16, %v1641_v14 }
  0x88   : > { %3300 = vmatprep.mubr.msk.bf16.mxu0 %vm3734_vm0, %v5118_v1  ;;  %3336 = vmatprep.mubr.msk.bf16.mxu1 %vm3734_vm0, %v5118_v1  ;;  %v1457_v19 = vsel %vm1250_vm4, %v1454_v6, %v1456_v15  ;;  %v1459_v34 = vsel %vm1250_vm4, %v1456_v15, %v1458_v29 }
  0x89   : > { %3354 = vmatprep.subr.bf16.mxu0 %v5118_v1  ;;  %3389 = vmatpush3.bf16.msra.mxu1 %v3576_v23  ;;  %v3592_v23 = vld [vmem:[%s5112_s1 + $0x210] sm:$0xff]   ;;  %v1646_v24 = vsel %vm1620_vm5, %v1636_v8, %v1645_v20 }
  0x8a   : > { %3390 = vmatprep.subr.bf16.mxu1 %v5118_v1 }
  0x8b   : > { %3355 = vmatpush3.bf16.msra.mxu0 %v3575_v25  ;;  %v1650_v25 = vrot.slane %v1648_v21, 2 }
  0x8c   : > { %3356 = vmatprep.subr.bf16.mxu0 %v5118_v1 }
  0x8d   : > { %3391 = vmatpush3.bf16.msra.mxu1 %v3578_v30  ;;  %v3594_v30 = vld [vmem:[%s5112_s1 + $0x218] sm:$0xff]  }
  0x8e   : > { %3301 = vmatmul.mubr.bf16.gmra.mrb[48].mxu0 %v1075_v31  ;;  %3392 = vmatprep.subr.bf16.mxu1 %v5118_v1  ;;  %v1654_v31 = vor.u32 %v1653_v26, %v1650_v25 }
  0x8f   : > { %3337 = vmatmul.mubr.bf16.gmra.mrb[48].mxu1 %v1257_v27  ;;  %3357 = vmatpush3.bf16.msra.mxu0 %v3577_v32  ;;  %v1657_v32 = vshrl.u32 %v4260_v28, 16 }
  0x90   : > { %3304 = vmatprep.mubr.msk.bf16.mxu0 %vm3734_vm0, %v5118_v1  ;;  %3340 = vmatprep.mubr.msk.bf16.mxu1 %vm3734_vm0, %v5118_v1  ;;  %v1655_v27 = vsel %vm1620_vm5, %v1645_v20, %v1654_v31 }
  0x91   : > { %3358 = vmatprep.subr.bf16.mxu0 %v5118_v1  ;;  %3393 = vmatpush3.bf16.msra.mxu1 %v3579_v37  ;;  %v1659_v37 = vrot.slane %v1657_v32, 2 }
  0x92   : > { %3394 = vmatprep.subr.bf16.mxu1 %v5118_v1 }
  0x93   : > { %3359 = vmatpush3.bf16.msra.mxu0 %v3580_v39  ;;  %v4282_v39 = vld [vmem:[%s3822_s18 + $0x30] ss:$0 sps:$4 sm:$0x77]   ;;  %v1663_v42 = vor.u32 %v1662_v38, %v1659_v37 }
  0x94   : > { %3360 = vmatprep.subr.bf16.mxu0 %v5118_v1  ;;  %v1669_v44 = vshll.u32 %v4282_v39, 16 }
  0x95   : > { %3395 = vmatpush3.bf16.msra.mxu1 %v3581_v43  ;;  %v1666_v43 = vshrl.u32 %v4282_v39, 16  ;;  %v1664_v48 = vsel %vm1620_vm5, %v1654_v31, %v1663_v42 }
  0x96   : > { %3305 = vmatmul.mubr.bf16.gmra.mrb[52].mxu0 %v1084_v46  ;;  %3396 = vmatprep.subr.bf16.mxu1 %v5118_v1  ;;  %v1461_v46 = vsel %vm1250_vm4, %v1458_v29, %v1460_v40  ;;  %v1671_v50 = vrot.slane %v1669_v44, 3 }
  0x97   : > { %3341 = vmatmul.mubr.bf16.gmra.mrb[52].mxu1 %v1259_v49  ;;  %3308 = vmatprep.mubr.msk.bf16.mxu0 %vm3734_vm0, %v5118_v1  ;;  %v3598_v49 = vld [vmem:[%s5112_s1 + $0x230] sm:$0xff]  }
  0x98   : > { %3344 = vmatprep.mubr.msk.bf16.mxu1 %vm3734_vm0, %v5118_v1  ;;  %3361 = vmatpush3.bf16.msra.mxu0 %v3582_v36  ;;  %v1668_v36 = vrot.slane %v1666_v43, 2 }
  0x99   : > { %3397 = vmatpush3.bf16.msra.mxu1 %v3584_v52  ;;  %3362 = vmatprep.subr.bf16.mxu0 %v5118_v1  ;;  %v1462_v52 = vrot.slane %v3599_v47, 2 }
  0x9a   : > { %3398 = vmatprep.subr.bf16.mxu1 %v5118_v1  ;;  %v1672_v53 = vor.u32 %v1671_v50, %v1668_v36 }
  0x9b   : > { %v1463_v56 = vsel %vm1250_vm4, %v1460_v40, %v1462_v52 }
  0x9c   : > { %3363 = vmatpush3.bf16.msra.mxu0 %v3585_v55  ;;  %v1810_v55 = vld [vmem:[%s3822_s18 + $0x8] sm:$0x8]  ;;  %v1673_v58 = vsel %vm1620_vm5, %v1663_v42, %v1672_v53 }
  0x9d   : > { %3399 = vmatpush3.bf16.msra.mxu1 %v3586_v60  ;;  %3420 = vmatprep.subr.bf16.mxu0 %v5118_v1  ;;  %v2983_v57 = vcombine.low %v1810_v55, %v4188_v45  ;;  %v1832_v60 = vrot.slane %v4199_v51, 3  ;;  %v1838_v45 = vrot.slane %v4260_v28, 3  ;;  %v1840_v51 = vrot.slane %v4282_v39, 3 }
  0x9e   : > { %3309 = vmatmul.mubr.bf16.gmra.mrb[56].mxu0 %v1093_v61  ;;  %3456 = vmatprep.subr.bf16.mxu1 %v5118_v1  ;;  %v1836_v61 = vrot.slane %v4239_v17, 3 }
  0x9f   : > { %3345 = vmatmul.mubr.bf16.gmra.mrb[56].mxu1 %v1261_v62  ;;  %3364 = vmatprep.mubr.msk.bf16.mxu0 %vm3734_vm0, %v5118_v1  ;;  %v1831_v59 = vrot.slane %v2983_v57, 3  ;;  %v1835_v2 = vsel %vm1830_vm6, %v1832_v60, %v1834_v0  ;;  %v1841_v3 = vsel %vm1830_vm6, %v1838_v45, %v1840_v51 }
  0xa0   : > { %3400 = vmatprep.mubr.msk.bf16.mxu1 %vm3734_vm0, %v5118_v1  ;;  %v1839_v63 = vsel %vm1830_vm6, %v1836_v61, %v1838_v45  ;;  %v1837_v5 = vsel %vm1830_vm6, %v1834_v0, %v1836_v61 }
  0xa1   : > { %v1833_v62 = vsel %vm1830_vm6, %v1831_v59, %v1832_v60 }
  0xa6   : > { %3365 = vmatmul.mubr.bf16.vlgmr.msra.gmra.mrb[60].mxu0 %v1455_v12 }
  0xa7   : > { %3401 = vmatmul.mubr.bf16.vlgmr.msra.gmra.mrb[60].mxu1 %v1637_v13  ;;  %3421 = vmatpush3.bf16.msra.mxu0 %v3589_v10 }
  0xa8   : > { %3422 = vmatprep.subr.bf16.mxu0 %v5118_v1  ;;  %3368 = vmatprep.mubr.msk.bf16.mxu0 %vm3734_vm0, %v5118_v1 }
  0xa9   : > { %3404 = vmatprep.mubr.msk.bf16.mxu1 %vm3734_vm0, %v5118_v1  ;;  %3464 = vmatpush3.bf16.msra.mxu1 %v3589_v10 }
  0xaa   : > { %3457 = vmatprep.subr.bf16.mxu1 %v5118_v1 }
  0xab   : > { %3423 = vmatpush3.bf16.msra.mxu0 %v3590_v18 }
  0xac   : > { %3424 = vmatprep.subr.bf16.mxu0 %v5118_v1 }
  0xad   : > { %3465 = vmatpush3.bf16.msra.mxu1 %v3590_v18 }
  0xae   : > { %3369 = vmatmul.mubr.bf16.gmra.mrb[64].mxu0 %v1457_v19  ;;  %3458 = vmatprep.subr.bf16.mxu1 %v5118_v1 }
  0xaf   : > { %3405 = vmatmul.mubr.bf16.gmra.mrb[64].mxu1 %v1646_v24  ;;  %3425 = vmatpush3.bf16.msra.mxu0 %v3592_v23 }
  0xb0   : > { %3372 = vmatprep.mubr.msk.bf16.mxu0 %vm3734_vm0, %v5118_v1  ;;  %3408 = vmatprep.mubr.msk.bf16.mxu1 %vm3734_vm0, %v5118_v1 }
  0xb1   : > { %3426 = vmatprep.subr.bf16.mxu0 %v5118_v1  ;;  %3466 = vmatpush3.bf16.msra.mxu1 %v3592_v23 }
  0xb2   : > { %3459 = vmatprep.subr.bf16.mxu1 %v5118_v1 }
  0xb3   : > { %3427 = vmatpush3.bf16.msra.mxu0 %v3594_v30 }
  0xb4   : > { %3428 = vmatprep.subr.bf16.mxu0 %v5118_v1 }
  0xb5   : > { %3467 = vmatpush3.bf16.msra.mxu1 %v3594_v30 }
  0xb6   : > { %3373 = vmatmul.mubr.bf16.gmra.mrb[68].mxu0 %v1459_v34  ;;  %3460 = vmatprep.subr.bf16.mxu1 %v5118_v1 }
  0xb7   : > { %3409 = vmatmul.mubr.bf16.gmra.mrb[68].mxu1 %v1655_v27  ;;  %3429 = vmatpush3.bf16.msra.mxu0 %v3595_v35 }
  0xb8   : > { %3376 = vmatprep.mubr.msk.bf16.mxu0 %vm3734_vm0, %v5118_v1  ;;  %3412 = vmatprep.mubr.msk.bf16.mxu1 %vm3734_vm0, %v5118_v1 }
  0xb9   : > { %3468 = vmatpush3.bf16.msra.mxu1 %v3595_v35  ;;  %3430 = vmatprep.subr.bf16.mxu0 %v5118_v1 }
  0xba   : > { %3461 = vmatprep.subr.bf16.mxu1 %v5118_v1 }
  0xbb   : > { %3431 = vmatpush3.bf16.msra.mxu0 %v3597_v41 }
  0xbc   : > { %3432 = vmatprep.subr.bf16.mxu0 %v5118_v1 }
  0xbd   : > { %3469 = vmatpush3.bf16.msra.mxu1 %v3597_v41 }
  0xbe   : > { %3377 = vmatmul.mubr.bf16.gmra.mrb[72].mxu0 %v1461_v46  ;;  %3462 = vmatprep.subr.bf16.mxu1 %v5118_v1 }
  0xbf   : > { %3413 = vmatmul.mubr.bf16.gmra.mrb[72].mxu1 %v1664_v48  ;;  %3380 = vmatprep.mubr.msk.bf16.mxu0 %vm3734_vm0, %v5118_v1 }
  0xc0   : > { %3416 = vmatprep.mubr.msk.bf16.mxu1 %vm3734_vm0, %v5118_v1  ;;  %3433 = vmatpush3.bf16.msra.mxu0 %v3598_v49 }
  0xc1   : > { %3470 = vmatpush3.bf16.msra.mxu1 %v3598_v49  ;;  %3434 = vmatprep.subr.bf16.mxu0 %v5118_v1 }
  0xc2   : > { %3463 = vmatprep.subr.bf16.mxu1 %v5118_v1 }
  0xc4   : > { %3435 = vmatpush3.bf16.msra.mxu0 %v3601_v54 }
  0xc5   : > { %3471 = vmatpush3.bf16.msra.mxu1 %v3601_v54 }
  0xc6   : > { %3381 = vmatmul.mubr.bf16.gmra.mrb[76].mxu0 %v1463_v56 }
  0xc7   : > { %3417 = vmatmul.mubr.bf16.gmra.mrb[76].mxu1 %v1673_v58  ;;  %3436 = vmatprep.mubr.msk.bf16.mxu0 %vm3734_vm0, %v5118_v1 }
  0xc8   : > { %3448 = vmatprep.mubr.msk.bf16.mxu1 %vm3734_vm0, %v5118_v1 }
  0xce   : > { %3437 = vmatmul.mubr.bf16.vlgmr.msra.gmra.mrb[80].mxu0 %v1833_v62 }
  0xcf   : > { %3449 = vmatmul.mubr.bf16.vlgmr.msra.gmra.mrb[80].mxu1 %v1839_v63  ;;  %3440 = vmatprep.mubr.msk.bf16.mxu0 %vm3734_vm0, %v5118_v1 }
  0xd0   : > { %3452 = vmatprep.mubr.msk.bf16.mxu1 %vm3734_vm0, %v5118_v1 }
  0xd6   : > { %3441 = vmatmul.mubr.bf16.gmra.mrb[84].mxu0 %v1835_v2 }
  0xd7   : > { %3453 = vmatmul.mubr.bf16.gmra.mrb[84].mxu1 %v1841_v3  ;;  %3444 = vmatprep.mubr.msk.bf16.mxu0 %vm3734_vm0, %v5118_v1 }
  0xde   : > { %3445 = vmatmul.mubr.bf16.gmra.mrb[88].mxu0 %v1837_v5 }
 0x101   : > { %v485_v6 = vpop.f32.mrb[0].mxu0 }
 0x102   : > { %v611_v7 = vpop.f32.mrb[0].mxu1  ;;  %v3150_v4 = vpop.f32.mrb[1].mxu0 }
 0x103   : > { %v612_v8 = vadd.f32 %v611_v7, %v485_v6  ;;  %v3186_v9 = vpop.f32.mrb[1].mxu1  ;;  %v488_v11 = vpop.f32.mrb[2].mxu0 }
 0x104   : > { %v614_v12 = vpop.f32.mrb[2].mxu1  ;;  %v3151_v10 = vpop.f32.mrb[3].mxu0 }
 0x105   : > { %v615_v13 = vadd.f32 %v614_v12, %v488_v11  ;;  %v3187_v14 = vpop.f32.mrb[3].mxu1 }
 0x109   : > { %v493_v16 = vpop.f32.mrb[4].mxu0 }
 0x10a   : > { %v619_v17 = vpop.f32.mrb[4].mxu1  ;;  %v3154_v18 = vpop.f32.mrb[5].mxu0 }
 0x10b   : > { %v620_v15 = vadd.f32 %v619_v17, %v493_v16  ;;  %v3190_v20 = vpop.f32.mrb[5].mxu1  ;;  %v496_v21 = vpop.f32.mrb[6].mxu0 }
 0x10c   : > { %v622_v22 = vpop.f32.mrb[6].mxu1  ;;  %v3155_v19 = vpop.f32.mrb[7].mxu0 }
 0x10d   : > { %v623_v23 = vadd.f32 %v622_v22, %v496_v21  ;;  %v3191_v24 = vpop.f32.mrb[7].mxu1 }
 0x111   : > { %v501_v25 = vpop.f32.mrb[8].mxu0 }
 0x112   : > { %v627_v26 = vpop.f32.mrb[8].mxu1  ;;  %v3158_v28 = vpop.f32.mrb[9].mxu0 }
 0x113   : > { %v628_v29 = vadd.f32 %v627_v26, %v501_v25  ;;  %v3194_v30 = vpop.f32.mrb[9].mxu1  ;;  %v504_v31 = vpop.f32.mrb[10].mxu0 }
 0x114   : > { %v630_v32 = vpop.f32.mrb[10].mxu1  ;;  %v3159_v33 = vpop.f32.mrb[11].mxu0 }
 0x115   : > { %v631_v34 = vadd.f32 %v630_v32, %v504_v31  ;;  %v3195_v35 = vpop.f32.mrb[11].mxu1 }
 0x119   : > { %v509_v27 = vpop.f32.mrb[12].mxu0 }
 0x11a   : > { %v635_v37 = vpop.f32.mrb[12].mxu1  ;;  %v3162_v38 = vpop.f32.mrb[13].mxu0 }
 0x11b   : > { %v636_v39 = vadd.f32 %v635_v37, %v509_v27  ;;  %v3198_v40 = vpop.f32.mrb[13].mxu1  ;;  %v512_v41 = vpop.f32.mrb[14].mxu0 }
 0x11c   : > { %v638_v42 = vpop.f32.mrb[14].mxu1  ;;  %v3163_v43 = vpop.f32.mrb[15].mxu0 }
 0x11d   : > { %v639_v44 = vadd.f32 %v638_v42, %v512_v41  ;;  %v3199_v46 = vpop.f32.mrb[15].mxu1 }
 0x121   : > { %v517_v47 = vpop.f32.mrb[16].mxu0 }
 0x122   : > { %v643_v48 = vpop.f32.mrb[16].mxu1  ;;  %v3166_v49 = vpop.f32.mrb[17].mxu0 }
 0x123   : > { %v644_v36 = vadd.f32 %v643_v48, %v517_v47  ;;  %v3202_v50 = vpop.f32.mrb[17].mxu1  ;;  %v520_v52 = vpop.f32.mrb[18].mxu0 }
 0x124   : > { %v646_v53 = vpop.f32.mrb[18].mxu1  ;;  %v3167_v54 = vpop.f32.mrb[19].mxu0 }
 0x125   : > { %v647_v55 = vadd.f32 %v646_v53, %v520_v52  ;;  %v3203_v56 = vpop.f32.mrb[19].mxu1 }
 0x129   : > { %v769_v57 = vpop.f32.mrb[20].mxu0 }
 0x12a   : > { %v808_v58 = vadd.f32 %v769_v57, %v612_v8  ;;  %v3222_v59 = vpop.f32.mrb[21].mxu0  ;;  %v971_v60 = vpop.f32.mrb[20].mxu1 }
 0x12b   : > { %v772_v61 = vpop.f32.mrb[22].mxu0  ;;  %v3258_v45 = vpop.f32.mrb[21].mxu1 }
 0x12c   : > { %v809_v62 = vadd.f32 %v772_v61, %v615_v13  ;;  %v1010_v63 = vadd.f32 %v971_v60, %v808_v58  ;;  %v3223_v0 = vpop.f32.mrb[23].mxu0  ;;  %v974_v51 = vpop.f32.mrb[22].mxu1 }
 0x12d   : > { %v3259_v2 = vpop.f32.mrb[23].mxu1 }
 0x12e   : > { %v1011_v3 = vadd.f32 %v974_v51, %v809_v62 }
 0x131   : > { %v777_v5 = vpop.f32.mrb[24].mxu0 }
 0x132   : > { %v810_v6 = vadd.f32 %v777_v5, %v620_v15  ;;  %v3226_v7 = vpop.f32.mrb[25].mxu0  ;;  %v979_v4 = vpop.f32.mrb[24].mxu1 }
 0x133   : > { %v780_v9 = vpop.f32.mrb[26].mxu0  ;;  %v3262_v11 = vpop.f32.mrb[25].mxu1 }
 0x134   : > { %v811_v12 = vadd.f32 %v780_v9, %v623_v23  ;;  %v1012_v10 = vadd.f32 %v979_v4, %v810_v6  ;;  %v3227_v14 = vpop.f32.mrb[27].mxu0  ;;  %v982_v8 = vpop.f32.mrb[26].mxu1 }
 0x135   : > { %v3263_v16 = vpop.f32.mrb[27].mxu1 }
 0x136   : > { %v1013_v17 = vadd.f32 %v982_v8, %v811_v12 }
 0x139   : > { %v785_v18 = vpop.f32.mrb[28].mxu0 }
 0x13a   : > { %v812_v20 = vadd.f32 %v785_v18, %v628_v29  ;;  %v3230_v13 = vpop.f32.mrb[29].mxu0  ;;  %v987_v21 = vpop.f32.mrb[28].mxu1 }
 0x13b   : > { %v788_v22 = vpop.f32.mrb[30].mxu0  ;;  %v3266_v19 = vpop.f32.mrb[29].mxu1 }
 0x13c   : > { %v813_v24 = vadd.f32 %v788_v22, %v631_v34  ;;  %v1014_v25 = vadd.f32 %v987_v21, %v812_v20  ;;  %v3231_v26 = vpop.f32.mrb[31].mxu0  ;;  %v990_v15 = vpop.f32.mrb[30].mxu1 }
 0x13d   : > { %v3267_v28 = vpop.f32.mrb[31].mxu1 }
 0x13e   : > { %v1015_v30 = vadd.f32 %v990_v15, %v813_v24 }
 0x141   : > { %v793_v31 = vpop.f32.mrb[32].mxu0 }
 0x142   : > { %v814_v32 = vadd.f32 %v793_v31, %v636_v39  ;;  %v3234_v23 = vpop.f32.mrb[33].mxu0  ;;  %v995_v33 = vpop.f32.mrb[32].mxu1 }
 0x143   : > { %v796_v35 = vpop.f32.mrb[34].mxu0  ;;  %v3270_v27 = vpop.f32.mrb[33].mxu1 }
 0x144   : > { %v815_v37 = vadd.f32 %v796_v35, %v639_v44  ;;  %v1016_v38 = vadd.f32 %v995_v33, %v814_v32  ;;  %v3235_v40 = vpop.f32.mrb[35].mxu0  ;;  %v998_v29 = vpop.f32.mrb[34].mxu1 }
 0x145   : > { %v3271_v41 = vpop.f32.mrb[35].mxu1 }
 0x146   : > { %v1017_v42 = vadd.f32 %v998_v29, %v815_v37 }
 0x149   : > { %v801_v43 = vpop.f32.mrb[36].mxu0 }
 0x14a   : > { %v816_v46 = vadd.f32 %v801_v43, %v644_v36  ;;  %v3238_v34 = vpop.f32.mrb[37].mxu0  ;;  %v1003_v47 = vpop.f32.mrb[36].mxu1 }
 0x14b   : > { %v804_v48 = vpop.f32.mrb[38].mxu0  ;;  %v3274_v49 = vpop.f32.mrb[37].mxu1 }
 0x14c   : > { %v817_v50 = vadd.f32 %v804_v48, %v647_v55  ;;  %v1018_v52 = vadd.f32 %v1003_v47, %v816_v46  ;;  %v3239_v53 = vpop.f32.mrb[39].mxu0  ;;  %v1006_v39 = vpop.f32.mrb[38].mxu1 }
 0x14d   : > { %v3275_v54 = vpop.f32.mrb[39].mxu1 }
 0x14e   : > { %v1019_v56 = vadd.f32 %v1006_v39, %v817_v50  ;;  %v1999_v54 = vlaneseq }
 0x151   : > { %v1181_v57 = vpop.f32.mrb[40].mxu0 }
 0x152   : > { %v1220_v58 = vadd.f32 %v1181_v57, %v1010_v63  ;;  %v3294_v44 = vpop.f32.mrb[41].mxu0  ;;  %v1349_v59 = vpop.f32.mrb[40].mxu1 }
 0x153   : > { %v1184_v60 = vpop.f32.mrb[42].mxu0  ;;  %v3330_v61 = vpop.f32.mrb[41].mxu1 }
 0x154   : > { %v1221_v45 = vadd.f32 %v1184_v60, %v1011_v3  ;;  %v1388_v62 = vadd.f32 %v1349_v59, %v1220_v58  ;;  %v3295_v0 = vpop.f32.mrb[43].mxu0  ;;  %v1352_v36 = vpop.f32.mrb[42].mxu1 }
 0x155   : > { %v3331_v51 = vpop.f32.mrb[43].mxu1 }
 0x156   : > { %v1389_v2 = vadd.f32 %v1352_v36, %v1221_v45 }
 0x159   : > { %v1189_v5 = vpop.f32.mrb[44].mxu0 }
 0x15a   : > { %v1222_v6 = vadd.f32 %v1189_v5, %v1012_v10  ;;  %v3298_v55 = vpop.f32.mrb[45].mxu0  ;;  %v1357_v7 = vpop.f32.mrb[44].mxu1 }
 0x15b   : > { %v1192_v4 = vpop.f32.mrb[46].mxu0  ;;  %v3334_v9 = vpop.f32.mrb[45].mxu1 }
 0x15c   : > { %v1223_v11 = vadd.f32 %v1192_v4, %v1013_v17  ;;  %v1390_v12 = vadd.f32 %v1357_v7, %v1222_v6  ;;  %v3299_v14 = vpop.f32.mrb[47].mxu0  ;;  %v1360_v63 = vpop.f32.mrb[46].mxu1 }
 0x15d   : > { %v3335_v8 = vpop.f32.mrb[47].mxu1 }
 0x15e   : > { %v4338_v16 = vadd.f32 %v1360_v63, %v1223_v11 }
 0x161   : > { %v1197_v18 = vpop.f32.mrb[48].mxu0 }
 0x162   : > { %v1224_v3 = vadd.f32 %v1197_v18, %v1014_v25  ;;  %v3302_v20 = vpop.f32.mrb[49].mxu0  ;;  %v1365_v13 = vpop.f32.mrb[48].mxu1 }
 0x163   : > { %v1200_v21 = vpop.f32.mrb[50].mxu0  ;;  %v3338_v22 = vpop.f32.mrb[49].mxu1 }
 0x164   : > { %v1225_v19 = vadd.f32 %v1200_v21, %v1015_v30  ;;  %v4340_v24 = vadd.f32 %v1365_v13, %v1224_v3  ;;  %v3303_v10 = vpop.f32.mrb[51].mxu0  ;;  %v1368_v26 = vpop.f32.mrb[50].mxu1 }
 0x165   : > { %v3339_v15 = vpop.f32.mrb[51].mxu1 }
 0x166   : > { %v4342_v28 = vadd.f32 %v1368_v26, %v1225_v19 }
 0x169   : > { %v1205_v17 = vpop.f32.mrb[52].mxu0 }
 0x16a   : > { %v1226_v31 = vadd.f32 %v1205_v17, %v1016_v38  ;;  %v3306_v32 = vpop.f32.mrb[53].mxu0  ;;  %v1373_v23 = vpop.f32.mrb[52].mxu1 }
 0x16b   : > { %v1208_v33 = vpop.f32.mrb[54].mxu0  ;;  %v3342_v35 = vpop.f32.mrb[53].mxu1 }
 0x16c   : > { %v1227_v27 = vadd.f32 %v1208_v33, %v1017_v42  ;;  %v4344_v25 = vadd.f32 %v1373_v23, %v1226_v31  ;;  %v3307_v37 = vpop.f32.mrb[55].mxu0  ;;  %v1376_v40 = vpop.f32.mrb[54].mxu1 }
 0x16d   : > { %v3343_v29 = vpop.f32.mrb[55].mxu1 }
 0x16e   : > { %v4346_v30 = vadd.f32 %v1376_v40, %v1227_v27 }
 0x171   : > { %v1213_v41 = vpop.f32.mrb[56].mxu0 }
 0x172   : > { %v1228_v43 = vadd.f32 %v1213_v41, %v1018_v52  ;;  %v3310_v46 = vpop.f32.mrb[57].mxu0  ;;  %v1381_v34 = vpop.f32.mrb[56].mxu1  ;;  %v4352_v52 = vshrl.u32 %v1999_v54, 7 }
 0x173   : > { %v1216_v47 = vpop.f32.mrb[58].mxu0  ;;  %v3346_v48 = vpop.f32.mrb[57].mxu1 }
 0x174   : > { %v1229_v49 = vadd.f32 %v1216_v47, %v1019_v56  ;;  %v4348_v38 = vadd.f32 %v1381_v34, %v1228_v43  ;;  %v3311_v50 = vpop.f32.mrb[59].mxu0  ;;  %v1384_v53 = vpop.f32.mrb[58].mxu1  ;;  %v2517_v5 = vadd.s32 8, %v4352_v52  ;;  %v2518_v55 = vadd.s32 16, %v4352_v52 }
 0x175   : > { %v3347_v39 = vpop.f32.mrb[59].mxu1  ;;  %v4377_v26 = vadd.s32 32, %v4352_v52  ;;  %v4386_v32 = vadd.s32 40, %v4352_v52 }
 0x176   : > { %v4350_v42 = vadd.f32 %v1384_v53, %v1229_v49  ;;  %v4364_v9 = vmul.u32.u64.low 3435973837, %v2517_v5  ;;  %v4365_v11 = vmul.u32.u64.high 3435973837, %v2517_v5, %v4364_v9 }
 0x177   : > { %v4370_v20 = vmul.u32.u64.low 3435973837, %v2518_v55  ;;  %v4371_v13 = vmul.u32.u64.high 3435973837, %v2518_v55, %v4370_v20  ;;  %v4396_v41 = vmul.u32.u64.low 3435973837, %v4386_v32  ;;  %v4397_v43 = vmul.u32.u64.high 3435973837, %v4386_v32, %v4396_v41 }
 0x178   : > { %v2543_v27 = vshrl.u32 %v4365_v11, 3 }
 0x179   : > { %v1551_v57 = vpop.f32.mrb[60].mxu0  ;;  %v2554_v47 = vshrl.u32 %v4371_v13, 3  ;;  %v2587_v9 = vshrl.u32 %v4397_v43, 3  ;;  %v2001_v43 = vsub.s32 0, %v4352_v52 }
 0x17a   : > { %v1590_v58 = vadd.f32 %v1551_v57, %v1388_v62  ;;  %v3366_v44 = vpop.f32.mrb[61].mxu0  ;;  %v1761_v59 = vpop.f32.mrb[60].mxu1  ;;  %v4361_v62 = vmul.u32.u64.low 3435973837, %v4352_v52  ;;  %v4362_v7 = vmul.u32.u64.high 3435973837, %v4352_v52, %v4361_v62  ;;  %v2544_v57 = vmul.u32 10, %v2543_v27 }
 0x17b   : > { %v1554_v60 = vpop.f32.mrb[62].mxu0  ;;  %v3402_v61 = vpop.f32.mrb[61].mxu1 }
 0x17c   : > { %v1591_v45 = vadd.f32 %v1554_v60, %v1389_v2  ;;  %v4354_v0 = vadd.f32 %v1761_v59, %v1590_v58  ;;  %v3367_v56 = vpop.f32.mrb[63].mxu0  ;;  %v1764_v36 = vpop.f32.mrb[62].mxu1  ;;  %v4368_v2 = vadd.s32 24, %v4352_v52  ;;  %v2532_v35 = vshrl.u32 %v4362_v7, 3 }
 0x17d   : > { %v3403_v51 = vpop.f32.mrb[63].mxu1  ;;  %v4410_v59 = vadd.s32 48, %v4352_v52  ;;  %v2555_v60 = vmul.u32 10, %v2554_v47 }
 0x17e   : > { %v4357_v6 = vadd.f32 %v1764_v36, %v1591_v45  ;;  %v2533_v54 = vmul.u32 10, %v2532_v35  ;;  %v4416_v36 = vsub.s32 %v2517_v5, %v2544_v57 }
 0x180   : > { %v4414_v56 = vsub.s32 %v4352_v52, %v2533_v54  ;;  %vm2637_vm9 = vcmp.ne.s32.totalorder %v4416_v36, 0  ;;  %vm2647_vm10 = vcmp.lt.s32.totalorder %v4416_v36, 0 }
 0x181   : > { %v1559_v4 = vpop.f32.mrb[64].mxu0  ;;  %vm4442_vm14 = vmand %vm2647_vm10, %vm2637_vm9 }
 0x182   : > { %v1592_v14 = vadd.f32 %v1559_v4, %v1390_v12  ;;  %v3370_v63 = vpop.f32.mrb[65].mxu0  ;;  %v1769_v8 = vpop.f32.mrb[64].mxu1  ;;  %v4380_v17 = vmul.u32.u64.low 3435973837, %v4368_v2  ;;  %v4381_v12 = vmul.u32.u64.high 3435973837, %v4368_v2, %v4380_v17  ;;  %vm2636_vm7 = vcmp.ne.s32.totalorder %v4414_v56, 0 }
 0x183   : > { %v1562_v18 = vpop.f32.mrb[66].mxu0  ;;  %v3406_v3 = vpop.f32.mrb[65].mxu1  ;;  %vm2646_vm8 = vcmp.lt.s32.totalorder %v4414_v56, 0 }
 0x184   : > { %v1593_v21 = vadd.f32 %v1562_v18, %v4338_v16  ;;  %v4374_v22 = vadd.f32 %v1769_v8, %v1592_v14  ;;  %v3371_v19 = vpop.f32.mrb[67].mxu0  ;;  %v1772_v10 = vpop.f32.mrb[66].mxu1  ;;  %v4389_v23 = vmul.u32.u64.low 3435973837, %v4377_v26  ;;  %v4390_v16 = vmul.u32.u64.high 3435973837, %v4377_v26, %v4389_v23  ;;  %vm4434_vm13 = vmand %vm2646_vm8, %vm2636_vm7 }
 0x185   : > { %v3407_v15 = vpop.f32.mrb[67].mxu1  ;;  %v2565_v58 = vshrl.u32 %v4381_v12, 3  ;;  %v4421_v11 = vmul.u32.u64.low 3435973837, %v4410_v59  ;;  %v4422_v14 = vmul.u32.u64.high 3435973837, %v4410_v59, %v4421_v11  ;;  %v2556_v18 = vsub.s32 %v2518_v55, %v2555_v60 }
 0x186   : > { %v4383_v31 = vadd.f32 %v1772_v10, %v1593_v21  ;;  %v2576_v61 = vshrl.u32 %v4390_v16, 3  ;;  %v2666_v15 = vadd.s32 10, %v4414_v56  ;;  %v2667_v23 = vadd.s32 10, %v4416_v36 }
 0x187   : > { %v2566_v51 = vmul.u32 10, %v2565_v58  ;;  %vm2638_vm11 = vcmp.ne.s32.totalorder %v2556_v18, 0  ;;  %vm2648_vm12 = vcmp.lt.s32.totalorder %v2556_v18, 0  ;;  %v2668_v16 = vadd.s32 10, %v2556_v18 }
 0x188   : > { %v2577_v21 = vmul.u32 10, %v2576_v61  ;;  %vm4448_vm1 = vmand %vm2648_vm12, %vm2638_vm11 }
 0x189   : > { %v1567_v33 = vpop.f32.mrb[68].mxu0  ;;  %v2567_v19 = vsub.s32 %v4368_v2, %v2566_v51 }
 0x18a   : > { %v1594_v37 = vadd.f32 %v1567_v33, %v4340_v24  ;;  %v3374_v40 = vpop.f32.mrb[69].mxu0  ;;  %v1777_v29 = vpop.f32.mrb[68].mxu1  ;;  %v1995_v24 = vld [vmem:[%s5114_s3] sm:$0x1]  ;;  %v4440_v17 = vsub.s32 %v4377_v26, %v2577_v21 }
 0x18b   : > { %v1570_v46 = vpop.f32.mrb[70].mxu0  ;;  %v3410_v34 = vpop.f32.mrb[69].mxu1  ;;  %vm2639_vm15 = vcmp.ne.s32.totalorder %v2567_v19, 0  ;;  %vm2649_vm0 = vcmp.lt.s32.totalorder %v2567_v19, 0  ;;  %v2598_v40 = vshrl.u32 %v4422_v14, 3 }
 0x18c   : > { %v1595_v48 = vadd.f32 %v1570_v46, %v4342_v28  ;;  %v4401_v49 = vadd.f32 %v1777_v29, %v1594_v37  ;;  %v3375_v50 = vpop.f32.mrb[71].mxu0  ;;  %v1780_v53 = vpop.f32.mrb[70].mxu1  ;;  %v1996_v28 = vmul.f32 1.442695, %v1995_v24  ;;  %v2669_v46 = vadd.s32 10, %v2567_v19  ;;  %vm4460_vm2 = vmand %vm2649_vm0, %vm2639_vm15 }
 0x18d   : > { %v3411_v39 = vpop.f32.mrb[71].mxu1  ;;  %vm2640_vm3 = vcmp.ne.s32.totalorder %v4440_v17, 0  ;;  %vm2650_vm4 = vcmp.lt.s32.totalorder %v4440_v17, 0  ;;  %v2670_v24 = vadd.s32 10, %v4440_v17  ;;  %v2599_v58 = vmul.u32 10, %v2598_v40 }
 0x18e   : > { %v4407_v44 = vadd.f32 %v1780_v53, %v1595_v48  ;;  %3603 = vpow2.f32 %v1996_v28  ;;  %v2676_v53 = vsel %vm4434_vm13, %v2666_v15, %v4414_v56  ;;  %v2678_v39 = vsel %vm4448_vm1, %v2668_v16, %v2556_v18  ;;  %vm4479_vm7 = vmand %vm2650_vm4, %vm2640_vm3 }
 0x18f   : > { %v2679_v60 = vsel %vm4460_vm2, %v2669_v46, %v2567_v19  ;;  %vm4483_vm8 = vcmp.lt.s32.totalorder %v2676_v53, 8  ;;  %vm4491_vm10 = vcmp.lt.s32.totalorder %v2678_v39, 8  ;;  %v4515_v18 = vsub.s32 %v4410_v59, %v2599_v58 }
 0x190   : > { %vm4507_vm12 = vcmp.lt.s32.totalorder %v2679_v60, 8  ;;  %v4538_v15 = vadd.s32 56, %v4352_v52 }
 0x191   : > { %v1575_v45 = vpop.f32.mrb[72].mxu0  ;;  %vm2652_vm15 = vcmp.lt.s32.totalorder %v4515_v18, 0 }
 0x192   : > { %v1596_v62 = vadd.f32 %v1575_v45, %v4344_v25  ;;  %v3378_v7 = vpop.f32.mrb[73].mxu0  ;;  %v1785_v4 = vpop.f32.mrb[72].mxu1 }
 0x193   : > { %v1578_v63 = vpop.f32.mrb[74].mxu0  ;;  %v3414_v8 = vpop.f32.mrb[73].mxu1 }
 0x194   : > { %v1597_v3 = vadd.f32 %v1578_v63, %v4346_v30  ;;  %v4425_v20 = vadd.f32 %v1785_v4, %v1596_v62  ;;  %v3379_v5 = vpop.f32.mrb[75].mxu0  ;;  %v1788_v13 = vpop.f32.mrb[74].mxu1  ;;  %v2588_v30 = vmul.u32 10, %v2587_v9  ;;  %v4498_v62 = vld [vmem:[%s5113_s2] ss:$0 sm:$0xff]  ;;  %v2680_v8 = vsel %vm4479_vm7, %v2670_v24, %v4440_v17 }
 0x195   : > { %v3415_v25 = vpop.f32.mrb[75].mxu1  ;;  %vm2690_vm13 = vcmp.lt.s32.totalorder %v2680_v8, 8 }
 0x196   : > { %v4430_v10 = vadd.f32 %v1788_v13, %v1597_v3  ;;  %v2589_v26 = vsub.s32 %v4386_v32, %v2588_v30  ;;  %v4531_v25 = vsel %vm4491_vm10, 1.0, %v5118_v1 }
 0x198   : > { %v3604_v54 = vpop.eup %3603  ;;  %vm2641_vm5 = vcmp.ne.s32.totalorder %v2589_v26, 0  ;;  %vm2651_vm6 = vcmp.lt.s32.totalorder %v2589_v26, 0 }
 0x199   : > { %v1583_v12 = vpop.f32.mrb[76].mxu0  ;;  %v4500_v7 = vrot.slane %v3604_v54, %v2001_v43  ;;  %vm4502_vm11 = vmand %vm2651_vm6, %vm2641_vm5 }
 0x19a   : > { %v1598_v33 = vadd.f32 %v1583_v12, %v4348_v38  ;;  %v3382_v35 = vpop.f32.mrb[77].mxu0  ;;  %v1793_v27 = vpop.f32.mrb[76].mxu1 }
 0x19b   : > { %v1586_v29 = vpop.f32.mrb[78].mxu0  ;;  %v3418_v41 = vpop.f32.mrb[77].mxu1 }
 0x19c   : > { %v1599_v34 = vadd.f32 %v1586_v29, %v4350_v42  ;;  %v4456_v47 = vadd.f32 %v1793_v27, %v1598_v33  ;;  %v3383_v38 = vpop.f32.mrb[79].mxu0  ;;  %v1796_v48 = vpop.f32.mrb[78].mxu1  ;;  %v2677_v42 = vsel %vm4442_vm14, %v2667_v23, %v4416_v36  ;;  %v2671_v36 = vadd.s32 10, %v2589_v26 }
 0x19d   : > { %v3419_v32 = vpop.f32.mrb[79].mxu1  ;;  %vm4487_vm9 = vcmp.lt.s32.totalorder %v2677_v42, 8  ;;  %v4545_v23 = vsel %vm4507_vm12, 1.0, %v5118_v1  ;;  %vm2642_vm14 = vcmp.ne.s32.totalorder %v4515_v18, 0  ;;  %v4562_v27 = vadd.s32 10, %v4515_v18 }
 0x19e   : > { %v4475_v57 = vadd.f32 %v1796_v48, %v1599_v34  ;;  %v4526_v21 = vsel %vm4487_vm9, 1.0, %v5118_v1  ;;  %v2681_v55 = vsel %vm4502_vm11, %v2671_v36, %v2589_v26  ;;  %v4581_v34 = vsel %vm2690_vm13, 1.0, %v5118_v1  ;;  %vm4583_vm1 = vmand %vm2652_vm15, %vm2642_vm14 }
 0x19f   : > { %vm4557_vm0 = vcmp.lt.s32.totalorder %v2681_v55, 8  ;;  %v4571_v40 = vmul.u32.u64.low 3435973837, %v4538_v15  ;;  %v4572_v29 = vmul.u32.u64.high 3435973837, %v4538_v15, %v4571_v40  ;;  %v4588_v48 = vadd.s32 64, %v4352_v52 }
 0x1a0   : > { %v4598_v24 = vsel %vm4557_vm0, 1.0, %v5118_v1  ;;  %v2682_v4 = vsel %vm4583_vm1, %v4562_v27, %v4515_v18 }
 0x1a1   : > { %v1929_v51 = vpop.f32.mrb[80].mxu0  ;;  %v2609_v38 = vshrl.u32 %v4572_v29, 3  ;;  %vm4658_vm2 = vcmp.lt.s32.totalorder %v2682_v4, 8 }
 0x1a2   : > { %v1968_v9 = vadd.f32 %v1929_v51, %v4354_v0  ;;  %v1953_v11 = vpop.f32.mrb[80].mxu1  ;;  %v3438_v14 = vpop.f32.mrb[81].mxu0  ;;  %v4521_v0 = vsel %vm4483_vm8, 1.0, %v5118_v1 }
 0x1a3   : > { %v1974_v3 = vadd.f32 %v1953_v11, %v4425_v20  ;;  %v3450_v5 = vpop.f32.mrb[81].mxu1  ;;  %v1932_v13 = vpop.f32.mrb[82].mxu0  ;;  %v4613_v14 = vmul.u32.u64.low 3435973837, %v4588_v48  ;;  %v4614_v63 = vmul.u32.u64.high 3435973837, %v4588_v48, %v4613_v14 }
 0x1a4   : > { %v1985_v59 = vadd.f32 %v4498_v62, %v1968_v9  ;;  %v1969_v20 = vadd.f32 %v1932_v13, %v4357_v6  ;;  %v1956_v19 = vpop.f32.mrb[82].mxu1  ;;  %v3439_v30 = vpop.f32.mrb[83].mxu0 }
 0x1a5   : > { %v1991_v17 = vadd.f32 %v4498_v62, %v1974_v3  ;;  %v1975_v12 = vadd.f32 %v1956_v19, %v4430_v10  ;;  %v3451_v2 = vpop.f32.mrb[83].mxu1 }
 0x1a6   : > { %v4548_v6 = vmul.f32 %v4500_v7, %v1985_v59  ;;  %v1986_v16 = vadd.f32 %v4498_v62, %v1969_v20 }
 0x1a7   : > { %v4554_v33 = vmul.f32 %v4500_v7, %v1991_v17  ;;  %v1992_v10 = vadd.f32 %v4498_v62, %v1975_v12 }
 0x1a8   : > { %5154 = vst [vmem:[#allocation2_spill] sm:$0xff] %v4548_v6  ;;  %v4565_v37 = vadd.f32 2.0, %v4548_v6  ;;  %v4568_v26 = vmul.f32 %v4500_v7, %v1986_v16 }
 0x1a9   : > { %5155 = vst [vmem:[#allocation3_spill] sm:$0xff] %v4554_v33  ;;  %v4575_v41 = vadd.f32 2.0, %v4554_v33  ;;  %v4578_v43 = vmul.f32 %v4500_v7, %v1992_v10  ;;  %v1937_v46 = vpop.f32.mrb[84].mxu0 }
 0x1aa   : > { %5158 = vst [vmem:[#allocation4_spill] sm:$0xff] %v4568_v26  ;;  %v2255_v50 = vsub.f32 0.0, %v4565_v37  ;;  %v4592_v32 = vadd.f32 2.0, %v4568_v26  ;;  %v1970_v53 = vadd.f32 %v1937_v46, %v4374_v22  ;;  %v1961_v42 = vpop.f32.mrb[84].mxu1  ;;  %v3442_v39 = vpop.f32.mrb[85].mxu0  ;;  %vm2245_vm6 = vcmp.gt.f32.partialorder %v4565_v37, 0.0 }
 0x1ab   : > { %5159 = vst [vmem:[#allocation5_spill] sm:$0xff] %v4578_v43  ;;  %v2385_v54 = vmul.f32 1.442695, %v4565_v37  ;;  %v2261_v58 = vsub.f32 0.0, %v4575_v41  ;;  %v4603_v60 = vadd.f32 2.0, %v4578_v43  ;;  %v1976_v28 = vadd.f32 %v1961_v42, %v4456_v47  ;;  %v3454_v61 = vpop.f32.mrb[85].mxu1 }
 0x1ac   : > { %v1940_v45 = vpop.f32.mrb[86].mxu0  ;;  %v2265_v56 = vmul.f32 1.442695, %v2255_v50  ;;  %v2397_v22 = vmul.f32 1.442695, %v4575_v41  ;;  %v2256_v36 = vsub.f32 0.0, %v4592_v32  ;;  %v1987_v3 = vadd.f32 %v4498_v62, %v1970_v53 }
 0x1ad   : > { %5162 = vst [vmem:[#allocation6_spill] sm:$0xff] %v4603_v60  ;;  %v1964_v51 = vpop.f32.mrb[86].mxu1  ;;  %v2277_v9 = vmul.f32 1.442695, %v2261_v58  ;;  %v3443_v11 = vpop.f32.mrb[87].mxu0  ;;  %v4617_v47 = vadd.s32 72, %v4352_v52  ;;  %v1993_v5 = vadd.f32 %v4498_v62, %v1976_v28  ;;  %v1971_v18 = vadd.f32 %v1940_v45, %v4383_v31 }
 0x1ae   : > { %3605 = vpow2.f32 %v2265_v56  ;;  %v2262_v8 = vsub.f32 0.0, %v4603_v60  ;;  %v3455_v13 = vpop.f32.mrb[87].mxu1  ;;  %v2267_v59 = vmul.f32 1.442695, %v2256_v36  ;;  %v1977_v20 = vadd.f32 %v1964_v51, %v4475_v57 }
 0x1af   : > { %3607 = vpow2.f32 %v2385_v54  ;;  %v2387_v19 = vmul.f32 1.442695, %v4592_v32  ;;  %v4626_v52 = vmul.f32 %v4500_v7, %v1987_v3  ;;  %v4629_v30 = vmul.f32 %v4500_v7, %v1993_v5 }
 0x1b0   : > { %3609 = vpow2.f32 %v2397_v22  ;;  %v1988_v55 = vadd.f32 %v4498_v62, %v1971_v18  ;;  %v4633_v12 = vmul.u32.u64.low 3435973837, %v4617_v47  ;;  %v4634_v2 = vmul.u32.u64.high 3435973837, %v4617_v47, %v4633_v12 }
 0x1b1   : > { %5163 = vst [vmem:[#allocation7_spill] sm:$0xff] %v4626_v52  ;;  %5164 = vst [vmem:[#allocation8_spill] sm:$0xff] %v4629_v30  ;;  %3611 = vpow2.f32 %v2277_v9  ;;  %v1945_v17 = vpop.f32.mrb[88].mxu0  ;;  %v2279_v31 = vmul.f32 1.442695, %v2262_v8  ;;  %v4637_v57 = vadd.f32 2.0, %v4626_v52  ;;  %v1994_v42 = vadd.f32 %v4498_v62, %v1977_v20 }
 0x1b2   : > { %v4640_v16 = vadd.f32 2.0, %v4629_v30  ;;  %v1972_v10 = vadd.f32 %v1945_v17, %v4401_v49  ;;  %v3446_v35 = vpop.f32.mrb[89].mxu0  ;;  %3613 = vpow2.f32 %v2267_v59  ;;  %v2399_v27 = vmul.f32 1.442695, %v4603_v60 }
 0x1b3   : > { %v4645_v40 = vmul.f32 %v4500_v7, %v1988_v55  ;;  %v1948_v46 = vpop.f32.mrb[90].mxu0  ;;  %3615 = vpow2.f32 %v2387_v19  ;;  %v2257_v50 = vsub.f32 0.0, %v4637_v57  ;;  %v2389_v53 = vmul.f32 1.442695, %v4637_v57 }
 0x1b4   : > { %5165 = vst [vmem:[#allocation9_spill] sm:$0xff] %v4640_v16  ;;  %v2263_v39 = vsub.f32 0.0, %v4640_v16  ;;  %v1989_v54 = vadd.f32 %v4498_v62, %v1972_v10  ;;  %v1973_v58 = vadd.f32 %v1948_v46, %v4407_v44  ;;  %v3447_v28 = vpop.f32.mrb[91].mxu0  ;;  %3617 = vpow2.f32 %v2279_v31 }
 0x1b5   : > { %5166 = vst [vmem:[#allocation10_spill] sm:$0xff] %v4645_v40  ;;  %v4653_v49 = vadd.f32 2.0, %v4645_v40  ;;  %v2269_v61 = vmul.f32 1.442695, %v2257_v50  ;;  %v2401_v29 = vmul.f32 1.442695, %v4640_v16  ;;  %3619 = vpow2.f32 %v2389_v53 }
 0x1b6   : > { %v2610_v22 = vmul.u32 10, %v2609_v38  ;;  %v2620_v36 = vshrl.u32 %v4614_v63, 3  ;;  %v4668_v9 = vmul.f32 %v4500_v7, %v1989_v54  ;;  %v1990_v11 = vadd.f32 %v4498_v62, %v1973_v58 }
 0x1b7   : > { %v2258_v56 = vsub.f32 0.0, %v4653_v49  ;;  %3621 = vpow2.f32 %v2269_v61  ;;  %v2391_v44 = vmul.f32 1.442695, %v4653_v49  ;;  %v2281_v14 = vmul.f32 1.442695, %v2263_v39 }
 0x1b8   : > { %v4664_v51 = vpop.eup %3605  ;;  %5169 = vst [vmem:[#allocation11_spill] sm:$0xff] %v4668_v9  ;;  %3623 = vpow2.f32 %v2399_v27  ;;  %v4674_v3 = vmul.f32 %v4500_v7, %v1994_v42  ;;  %v4679_v63 = vadd.f32 2.0, %v4668_v9  ;;  %v4682_v13 = vmul.f32 %v4500_v7, %v1990_v11 }
 0x1b9   : > { %v4671_v4 = vpop.eup %3607  ;;  %v2271_v8 = vmul.f32 1.442695, %v2258_v56  ;;  %3625 = vpow2.f32 %v2401_v29  ;;  %v4687_v62 = vsel %vm4658_vm2, 1.0, %v5118_v1  ;;  %v2285_v18 = vadd.f32 1.0, %v4664_v51 }
 0x1ba   : > { %5170 = vst [vmem:[#allocation12_spill] sm:$0xff] %v4674_v3  ;;  %v4676_v5 = vpop.eup %3609  ;;  %5171 = vst [vmem:[#allocation13_spill] sm:$0xff] %v4682_v13  ;;  %v4693_v20 = vsub.s32 %v4538_v15, %v2610_v22  ;;  %v2621_v19 = vmul.u32 10, %v2620_v36  ;;  %v2259_v55 = vsub.f32 0.0, %v4679_v63  ;;  %v2393_v7 = vmul.f32 1.442695, %v4679_v63 }
 0x1bb   : > { %5172 = vst [vmem:[#allocation14_spill] sm:$0xff] %v4687_v62  ;;  %v4689_v59 = vpop.eup %3611  ;;  %3627 = vpow2.f32 %v2271_v8  ;;  %v4698_v17 = vadd.f32 2.0, %v4682_v13  ;;  %v4703_v31 = vadd.f32 2.0, %v4674_v3  ;;  %v2288_v10 = vmul.f32 -0.5, %v4664_v51 }
 0x1bc   : > { %3629 = vpow2.f32 %v2391_v44  ;;  %v4700_v12 = vpop.eup %3613  ;;  %v2631_v15 = vshrl.u32 %v4634_v2, 3  ;;  %v2273_v27 = vmul.f32 1.442695, %v2259_v55  ;;  %v2405_v50 = vadd.f32 1.0, %v4671_v4 }
 0x1bd   : > { %3631 = vpow2.f32 %v2281_v14  ;;  %v4707_v35 = vpop.eup %3615  ;;  %v2260_v46 = vsub.f32 0.0, %v4698_v17  ;;  %v2395_v38 = vmul.f32 1.442695, %v4698_v17  ;;  %v2408_v53 = vmul.f32 -0.5, %v4671_v4 }
 0x1be   : > { %3633 = vpow2.f32 %v2393_v7  ;;  %v4714_v42 = vadd.s32 10, %v4693_v20  ;;  %v4716_v39 = vpop.eup %3617  ;;  %v2294_v54 = vadd.f32 1.0, %v4700_v12  ;;  %v4720_v58 = vsub.s32 %v4588_v48, %v2621_v19 }
 0x1bf   : > { %3635 = vlog2.f32 %v2285_v18  ;;  %v2275_v2 = vmul.f32 1.442695, %v2260_v46  ;;  %v4722_v28 = vpop.eup %3619  ;;  %v2291_v61 = vand.u32 2147483647, %v4664_v51  ;;  %v2414_v29 = vadd.f32 1.0, %v4707_v35 }
 0x1c0   : > { %3637 = vpow2.f32 %v2273_v27  ;;  %v4726_v45 = vmul.u32 10, %v2631_v15  ;;  %v2289_v36 = vadd.f32 1.0, %v2288_v10  ;;  %v2297_v44 = vmul.f32 -0.5, %v4700_v12 }
 0x1c1   : > { %3639 = vpow2.f32 %v2395_v38  ;;  %v3622_v56 = vpop.eup %3621  ;;  %v2409_v48 = vadd.f32 1.0, %v2408_v53  ;;  %v2411_v14 = vand.u32 2147483647, %v4671_v4  ;;  %v2300_v19 = vand.u32 2147483647, %v4700_v12 }
 0x1c2   : > { %3641 = vpow2.f32 %v2275_v2  ;;  %v4730_v11 = vpop.eup %3623  ;;  %v2303_v8 = vadd.f32 1.0, %v3622_v56  ;;  %v2417_v55 = vmul.f32 -0.5, %v4707_v35  ;;  %v2306_v7 = vmul.f32 -0.5, %v3622_v56 }
 0x1c3   : > { %3643 = vlog2.f32 %v2405_v50  ;;  %v4733_v18 = vpop.eup %3625  ;;  %v4740_v10 = vmul.f32 1.442695, %v4703_v31  ;;  %vm4742_vm3 = vcmp.lt.f32.partialorder %v2291_v61, 0.0004427343  ;;  %v2423_v46 = vadd.f32 1.0, %v4722_v28 }
 0x1c4   : > { %3645 = vlog2.f32 %v2294_v54  ;;  %v2290_v50 = vmul.f32 %v4664_v51, %v2289_v36  ;;  %v2298_v53 = vadd.f32 1.0, %v2297_v44  ;;  %v2426_v2 = vmul.f32 -0.5, %v4722_v28 }
 0x1c5   : > { %v4737_v15 = vpop.eup %3627  ;;  %3647 = vlog2.f32 %v2414_v29  ;;  %v2410_v1 = vmul.f32 %v4671_v4, %v2409_v48  ;;  %vm4754_vm4 = vcmp.lt.f32.partialorder %v2411_v14, 0.0004427343  ;;  %v2420_v29 = vand.u32 2147483647, %v4707_v35 }
 0x1c6   : > { %v4747_v38 = vpop.eup %3629  ;;  %3649 = vlog2.f32 %v2303_v8  ;;  %vm4761_vm5 = vcmp.lt.f32.partialorder %v2300_v19, 0.0004427343  ;;  %v2418_v51 = vadd.f32 1.0, %v2417_v55  ;;  %v2307_v36 = vadd.f32 1.0, %v2306_v7 }
 0x1c7   : > { %v4751_v54 = vpop.eup %3631  ;;  %3651 = vlog2.f32 %v2423_v46  ;;  %v2312_v44 = vadd.f32 1.0, %v4737_v15  ;;  %v2315_v8 = vmul.f32 -0.5, %v4737_v15  ;;  %v2309_v48 = vand.u32 2147483647, %v3622_v56 }
 0x1c8   : > { %v4759_v22 = vpop.eup %3633  ;;  %v2427_v14 = vadd.f32 1.0, %v2426_v2  ;;  %v2429_v30 = vand.u32 2147483647, %v4722_v28  ;;  %v2432_v33 = vadd.f32 1.0, %v4747_v38  ;;  %v2299_v9 = vmul.f32 %v4700_v12, %v2298_v53 }
 0x1c9   : > { %v3636_v4 = vpop.eup %3635  ;;  %3653 = vlog2.f32 %v2312_v44  ;;  %v2318_v55 = vand.u32 2147483647, %v4737_v15  ;;  %vm4776_vm7 = vcmp.lt.f32.partialorder %v2420_v29, 0.0004427343  ;;  %v2435_v2 = vmul.f32 -0.5, %v4747_v38 }
 0x1ca   : > { %v4769_v46 = vpop.eup %3637  ;;  %v2287_v19 = vmul.f32 0.6931472, %v3636_v4  ;;  %3655 = vlog2.f32 %v2432_v33  ;;  %v2438_v52 = vand.u32 2147483647, %v4747_v38  ;;  %vm2246_vm8 = vcmp.gt.f32.partialorder %v4592_v32, 0.0 }
 0x1cb   : > { %v4774_v7 = vpop.eup %3639  ;;  %v2419_v12 = vmul.f32 %v4707_v35, %v2418_v51  ;;  %v2316_v53 = vadd.f32 1.0, %v2315_v8  ;;  %v2321_v29 = vadd.f32 1.0, %v4769_v46  ;;  %v2308_v6 = vmul.f32 %v3622_v56, %v2307_v36 }
 0x1cc   : > { %v4782_v26 = vpop.eup %3641  ;;  %v2293_v4 = vsel %vm4742_vm3, %v2290_v50, %v2287_v19  ;;  %vm4789_vm9 = vcmp.lt.f32.partialorder %v2309_v48, 0.0004427343  ;;  %v2428_v43 = vmul.f32 %v4722_v28, %v2427_v14  ;;  %vm4794_vm10 = vcmp.lt.f32.partialorder %v2429_v30, 0.0004427343 }
 0x1cd   : > { %v3644_v44 = vpop.eup %3643  ;;  %vm2247_vm11 = vcmp.gt.f32.partialorder %v4637_v57, 0.0  ;;  %vm4799_vm12 = vcmp.lt.f32.partialorder %v2318_v55, 0.0004427343  ;;  %3657 = vlog2.f32 %v2321_v29  ;;  %v2324_v56 = vmul.f32 -0.5, %v4769_v46 }
 0x1ce   : > { %v3646_v27 = vpop.eup %3645  ;;  %v2407_v50 = vmul.f32 0.6931472, %v3644_v44  ;;  %v2441_v51 = vadd.f32 1.0, %v4759_v22  ;;  %v2375_v8 = vsub.f32 0.0, %v2293_v4  ;;  %v2436_v30 = vadd.f32 1.0, %v2435_v2 }
 0x1cf   : > { %v3648_v36 = vpop.eup %3647  ;;  %v2296_v28 = vmul.f32 0.6931472, %v3646_v27  ;;  %vm4805_vm13 = vcmp.lt.f32.partialorder %v2438_v52, 0.0004427343  ;;  %v2317_v44 = vmul.f32 %v4737_v15, %v2316_v53  ;;  %v2444_v52 = vmul.f32 -0.5, %v4759_v22 }
 0x1d0   : > { %v3650_v14 = vpop.eup %3649  ;;  %v2413_v19 = vsel %vm4754_vm4, %v2410_v1, %v2407_v50  ;;  %v2416_v55 = vmul.f32 0.6931472, %v3648_v36  ;;  %3659 = vlog2.f32 %v2441_v51  ;;  %v2325_v61 = vadd.f32 1.0, %v2324_v56 }
 0x1d1   : > { %v3652_v29 = vpop.eup %3651  ;;  %v2495_v16 = vsub.f32 %v4565_v37, %v2413_v19  ;;  %v2302_v4 = vsel %vm4761_vm5, %v2299_v9, %v2296_v28  ;;  %v2305_v27 = vmul.f32 0.6931472, %v3650_v14  ;;  %v2437_v3 = vmul.f32 %v4747_v38, %v2436_v30 }
 0x1d2   : > { %v2376_v2 = vsub.f32 0.0, %v2302_v4  ;;  %v2422_v60 = vsel %vm4776_vm7, %v2419_v12, %v2416_v55  ;;  %v2425_v62 = vmul.f32 0.6931472, %v3652_v29  ;;  %v2330_v12 = vadd.f32 1.0, %v4782_v26 }
 0x1d3   : > { %v2505_v1 = vsel %vm2245_vm6, %v2375_v8, %v2495_v16  ;;  %v2496_v15 = vsub.f32 %v4592_v32, %v2422_v60  ;;  %v2311_v53 = vsel %vm4789_vm9, %v2308_v6, %v2305_v27  ;;  %v3654_v9 = vpop.eup %3653  ;;  %vm2643_vm14 = vcmp.ne.s32.totalorder %v4693_v20, 0 }
 0x1d4   : > { %v2716_v50 = vmul.f32 %v4521_v0, %v2505_v1  ;;  %v2377_v51 = vsub.f32 0.0, %v2311_v53  ;;  %v2431_v40 = vsel %vm4794_vm10, %v2428_v43, %v2425_v62  ;;  %vm2653_vm15 = vcmp.lt.s32.totalorder %v4693_v20, 0  ;;  %v3656_v16 = vpop.eup %3655 }
 0x1d5   : > { %v2506_v60 = vsel %vm2246_vm8, %v2376_v2, %v2496_v15  ;;  %v2497_v6 = vsub.f32 %v4637_v57, %v2431_v40  ;;  %v2314_v38 = vmul.f32 0.6931472, %v3654_v9  ;;  %v2327_v33 = vand.u32 2147483647, %v4769_v46  ;;  %vm4873_vm6 = vmand %vm2653_vm15, %vm2643_vm14 }
 0x1d6   : > { %vm2644_vm0 = vcmp.ne.s32.totalorder %v4720_v58, 0  ;;  %vm2654_vm1 = vcmp.lt.s32.totalorder %v4720_v58, 0  ;;  %2736 = vrot.lane.b32.xlu0 %v2716_v50, %s3735_s26  ;;  %v2434_v0 = vmul.f32 0.6931472, %v3656_v16  ;;  %v2326_v43 = vmul.f32 %v4769_v46, %v2325_v61 }
 0x1d7   : > { %v2445_v13 = vadd.f32 1.0, %v2444_v52  ;;  %3661 = vlog2.f32 %v2330_v12  ;;  %v2507_v62 = vsel %vm2247_vm11, %v2377_v51, %v2497_v6  ;;  %v2320_v56 = vsel %vm4799_vm12, %v2317_v44, %v2314_v38  ;;  %v3658_v28 = vpop.eup %3657  ;;  %vm4886_vm7 = vmand %vm2654_vm1, %vm2644_vm0 }
 0x1d8   : > { %v2447_v36 = vand.u32 2147483647, %v4759_v22  ;;  %v2450_v8 = vadd.f32 1.0, %v4774_v7  ;;  %v2717_v30 = vmul.f32 %v4526_v21, %v2506_v60  ;;  %v2718_v14 = vmul.f32 %v4531_v25, %v2507_v62 }
 0x1d9   : > { %v2378_v19 = vsub.f32 0.0, %v2320_v56  ;;  %v2440_v46 = vsel %vm4805_vm13, %v2437_v3, %v2434_v0  ;;  %v2323_v29 = vmul.f32 0.6931472, %v3658_v28  ;;  %v2333_v4 = vmul.f32 -0.5, %v4782_v26 }
 0x1da   : > { %v2498_v55 = vsub.f32 %v4653_v49, %v2440_v46  ;;  %3663 = vlog2.f32 %v2450_v8  ;;  %v3660_v35 = vpop.eup %3659  ;;  %v5189_v44 = vsub.f32 0.0, %v4703_v31  ;;  %2738 = vrot.lane.b32.xlu0 %v2717_v30, %s3735_s26  ;;  %2740 = vrot.lane.b32.xlu1 %v2718_v14, %s3735_s26  ;;  %vm2248_vm2 = vcmp.gt.f32.partialorder %v4653_v49, 0.0 }
 0x1db   : > { %vm2328_vm3 = vcmp.lt.f32.partialorder %v2327_v33, 0.0004427343  ;;  %v2339_v21 = vadd.f32 1.0, %v4689_v59  ;;  %v2443_v52 = vmul.f32 0.6931472, %v3660_v35  ;;  %v2446_v2 = vmul.f32 %v4759_v22, %v2445_v13 }
 0x1dc   : > { %v2283_v27 = vmul.f32 1.442695, %v5189_v44  ;;  %v2508_v25 = vsel %vm2248_vm2, %v2378_v19, %v2498_v55  ;;  %v2329_v48 = vsel %vm2328_vm3, %v2326_v43, %v2323_v29  ;;  %vm2448_vm4 = vcmp.lt.f32.partialorder %v2447_v36, 0.0004427343 }
 0x1dd   : > { %v2719_v61 = vmul.f32 %v4545_v23, %v2508_v25  ;;  %v2379_v1 = vsub.f32 0.0, %v2329_v48  ;;  %v2453_v15 = vmul.f32 -0.5, %v4774_v7  ;;  %v2449_v53 = vsel %vm2448_vm4, %v2446_v2, %v2443_v52 }
 0x1de   : > { %v2334_v3 = vadd.f32 1.0, %v2333_v4  ;;  %3665 = vlog2.f32 %v2339_v21  ;;  %v4860_v9 = vadd.s32 10, %v4720_v58  ;;  %v2499_v50 = vsub.f32 %v4679_v63, %v2449_v53 }
 0x1df   : > { %3667 = vpow2.f32 %v2283_v27  ;;  %2742 = vrot.lane.b32.xlu1 %v2719_v61, %s3735_s26  ;;  %v2336_v51 = vand.u32 2147483647, %v4782_v26  ;;  %v2459_v22 = vadd.f32 1.0, %v4676_v5  ;;  %vm2249_vm5 = vcmp.gt.f32.partialorder %v4679_v63, 0.0 }
 0x1e0   : > { %3669 = vpow2.f32 %v4740_v10  ;;  %v2342_v23 = vmul.f32 -0.5, %v4689_v59  ;;  %v4879_v12 = vsub.s32 %v4617_v47, %v4726_v45  ;;  %v2509_v60 = vsel %vm2249_vm5, %v2379_v1, %v2499_v50 }
 0x1e1   : > { %v3662_v16 = vpop.eup %3661  ;;  %v2454_v6 = vadd.f32 1.0, %v2453_v15  ;;  %3671 = vlog2.f32 %v2459_v22  ;;  %v2348_v10 = vadd.f32 1.0, %v4716_v39  ;;  %v2720_v33 = vmul.f32 %v4581_v34, %v2509_v60 }
 0x1e2   : > { %v2332_v0 = vmul.f32 0.6931472, %v3662_v16  ;;  %v2335_v47 = vmul.f32 %v4782_v26, %v2334_v3  ;;  %v2456_v45 = vand.u32 2147483647, %v4774_v7  ;;  %vm2337_vm8 = vcmp.lt.f32.partialorder %v2336_v51, 0.0004427343 }
 0x1e3   : > { %3673 = vlog2.f32 %v2348_v10  ;;  %v2468_v43 = vadd.f32 1.0, %v4730_v11  ;;  %v2683_v13 = vsel %vm4873_vm6, %v4714_v42, %v4693_v20  ;;  %2744 = vrot.lane.b32.xlu0 %v2720_v33, %s3735_s26  ;;  %v2343_v36 = vadd.f32 1.0, %v2342_v23 }
 0x1e4   : > { %v3664_v62 = vpop.eup %3663  ;;  %v2338_v56 = vsel %vm2337_vm8, %v2335_v47, %v2332_v0  ;;  %v2462_v34 = vmul.f32 -0.5, %v4676_v5  ;;  %v2684_v26 = vsel %vm4886_vm7, %v4860_v9, %v4720_v58  ;;  %v2455_v28 = vmul.f32 %v4774_v7, %v2454_v6 }
 0x1e5   : > { %v2452_v8 = vmul.f32 0.6931472, %v3664_v62  ;;  %v2345_v30 = vand.u32 2147483647, %v4689_v59  ;;  %3675 = vlog2.f32 %v2468_v43  ;;  %v2380_v14 = vsub.f32 0.0, %v2338_v56 }
 0x1e6   : > { %vm2457_vm9 = vcmp.lt.f32.partialorder %v2456_v45, 0.0004427343  ;;  %v2351_v20 = vmul.f32 -0.5, %v4716_v39  ;;  %vm2645_vm10 = vcmp.ne.s32.totalorder %v4879_v12, 0  ;;  %vm2655_vm11 = vcmp.lt.s32.totalorder %v4879_v12, 0 }
 0x1e7   : > { %v4910_v42 = vadd.s32 10, %v4879_v12  ;;  %vm2250_vm12 = vcmp.gt.f32.partialorder %v4698_v17, 0.0  ;;  %v2458_v19 = vsel %vm2457_vm9, %v2455_v28, %v2452_v8  ;;  %v2471_v46 = vmul.f32 -0.5, %v4730_v11  ;;  %vm4959_vm3 = vmand %vm2655_vm11, %vm2645_vm10 }
 0x1e8   : > { %v2357_v7 = vadd.f32 1.0, %v4751_v54  ;;  %v3666_v55 = vpop.eup %3665  ;;  %v2500_v29 = vsub.f32 %v4698_v17, %v2458_v19  ;;  %vm2251_vm13 = vcmp.gt.f32.partialorder %v4575_v41, 0.0  ;;  %v2463_v4 = vadd.f32 1.0, %v2462_v34 }
 0x1e9   : > { %v2465_v35 = vand.u32 2147483647, %v4676_v5  ;;  %vm4918_vm14 = vcmp.lt.s32.totalorder %v2683_v13, 8  ;;  %v2477_v27 = vadd.f32 1.0, %v4733_v18  ;;  %v4923_v21 = vpop.eup %3667  ;;  %v2341_v25 = vmul.f32 0.6931472, %v3666_v55 }
 0x1ea   : > { %v2344_v48 = vmul.f32 %v4689_v59, %v2343_v36  ;;  %vm4926_vm15 = vcmp.lt.f32.partialorder %v2345_v30, 0.0004427343  ;;  %3677 = vlog2.f32 %v2357_v7  ;;  %v4930_v2 = vpop.eup %3669  ;;  %v2510_v61 = vsel %vm2250_vm12, %v2380_v14, %v2500_v29  ;;  %v5202_v30 = vld [vmem:[#allocation14_spill] sm:$0xff]  ;;  %v5208_v13 = vld [vmem:[#allocation13_spill] sm:$0xff] }
 0x1eb   : > { %v2352_v1 = vadd.f32 1.0, %v2351_v20  ;;  %v2354_v15 = vand.u32 2147483647, %v4716_v39  ;;  %3679 = vlog2.f32 %v2477_v27  ;;  %v3672_v53 = vpop.eup %3671  ;;  %v2721_v3 = vmul.f32 %v4598_v24, %v2510_v61  ;;  %v5203_v55 = vld [vmem:[#allocation6_spill] sm:$0xff] }
 0x1ec   : > { %v2347_v59 = vsel %vm4926_vm15, %v2344_v48, %v2341_v25  ;;  %v2472_v50 = vadd.f32 1.0, %v2471_v46  ;;  %v2474_v51 = vand.u32 2147483647, %v4730_v11  ;;  %v2461_v22 = vmul.f32 0.6931472, %v3672_v53 }
 0x1ed   : > { %v2464_v23 = vmul.f32 %v4676_v5, %v2463_v4  ;;  %vm2466_vm0 = vcmp.lt.f32.partialorder %v2465_v35, 0.0004427343  ;;  %v2360_v40 = vmul.f32 -0.5, %v4751_v54  ;;  %v3674_v16 = vpop.eup %3673  ;;  %2746 = vrot.lane.b32.xlu1 %v2721_v3, %s3735_s26  ;;  %v2381_v60 = vsub.f32 0.0, %v2347_v59 }
 0x1ee   : > { %v2480_v6 = vmul.f32 -0.5, %v4733_v18  ;;  %v2366_v24 = vadd.f32 1.0, %v4923_v21  ;;  %v2486_v10 = vadd.f32 1.0, %v4930_v2  ;;  %v2350_v0 = vmul.f32 0.6931472, %v3674_v16 }
 0x1ef   : > { %v2467_v33 = vsel %vm2466_vm0, %v2464_v23, %v2461_v22  ;;  %v2353_v47 = vmul.f32 %v4716_v39, %v2352_v1  ;;  %vm2355_vm1 = vcmp.lt.f32.partialorder %v2354_v15, 0.0004427343  ;;  %v3676_v45 = vpop.eup %3675  ;;  %v2473_v43 = vmul.f32 %v4730_v11, %v2472_v50  ;;  %v2091_v11 = vld [vmem:[%s5006_s30 + $0x38] sm:$0xff] }
 0x1f0   : > { %v2501_v5 = vsub.f32 %v4575_v41, %v2467_v33  ;;  %vm4948_vm2 = vcmp.lt.f32.partialorder %v2474_v51, 0.0004427343  ;;  %3681 = vlog2.f32 %v2366_v24  ;;  %v2470_v56 = vmul.f32 0.6931472, %v3676_v45 }
 0x1f1   : > { %v2356_v62 = vsel %vm2355_vm1, %v2353_v47, %v2350_v0  ;;  %v2361_v36 = vadd.f32 1.0, %v2360_v40  ;;  %3683 = vlog2.f32 %v2486_v10  ;;  %v2363_v39 = vand.u32 2147483647, %v4751_v54  ;;  %v2092_v47 = vld [vmem:[%s5006_s30 + $0x40] sm:$0xff] }
 0x1f2   : > { %v2511_v34 = vsel %vm2251_vm13, %v2381_v60, %v2501_v5  ;;  %v2382_v8 = vsub.f32 0.0, %v2356_v62  ;;  %v2481_v28 = vadd.f32 1.0, %v2480_v6  ;;  %v2476_v20 = vsel %vm4948_vm2, %v2473_v43, %v2470_v56  ;;  %v2084_v43 = vld [vmem:[%s5006_s30] sm:$0xff]  ;;  %v2085_v62 = vld [vmem:[%s5006_s30 + $0x8] sm:$0xff]  ;;  %v5209_v56 = vld [vmem:[#allocation5_spill] sm:$0xff] }
 0x1f3   : > { %v2722_v14 = vmul.f32 %v5202_v30, %v2511_v34  ;;  %v2483_v19 = vand.u32 2147483647, %v4733_v18  ;;  %v2369_v46 = vmul.f32 -0.5, %v4923_v21  ;;  %v2502_v29 = vsub.f32 %v5203_v55, %v2476_v20  ;;  %v2087_v34 = vld [vmem:[%s5006_s30 + $0x18] sm:$0xff]  ;;  %v2093_v30 = vld [vmem:[%s5006_s30 + $0x48] sm:$0xff]  ;;  %v5211_v20 = vld [vmem:[#allocation4_spill] sm:$0xff] }
 0x1f4   : > { %v3678_v7 = vpop.eup %3677  ;;  %v5204_v4 = vmov 0.0   ;;  %vm4977_vm4 = vcmp.lt.s32.totalorder %v2684_v26, 8  ;;  %v2489_v25 = vmul.f32 -0.5, %v4930_v2  ;;  %vm2252_vm5 = vcmp.gt.f32.partialorder %v5203_v55, 0.0 }
 0x1f5   : > { %v3010_v35 = vsel %vm4918_vm14, 1.0, %v5204_v4  ;;  %v3680_v48 = vpop.eup %3679  ;;  %2748 = vrot.lane.b32.xlu0 %v2722_v14, %s3735_s26  ;;  %v2359_v52 = vmul.f32 0.6931472, %v3678_v7  ;;  %v2362_v44 = vmul.f32 %v4751_v54, %v2361_v36  ;;  %v2685_v58 = vsel %vm4959_vm3, %v4910_v42, %v4879_v12  ;;  %v5207_v54 = vld [vmem:[#allocation9_spill] sm:$0xff]  ;;  %v2086_v36 = vld [vmem:[%s5006_s30 + $0x10] sm:$0xff]  ;;  %v5210_v14 = vld [vmem:[#allocation2_spill] sm:$0xff] }
 0x1f6   : > { %v2512_v9 = vsel %vm2252_vm5, %v2382_v8, %v2502_v29  ;;  %vm2364_vm6 = vcmp.lt.f32.partialorder %v2363_v39, 0.0004427343  ;;  %v2479_v38 = vmul.f32 0.6931472, %v3680_v48  ;;  %v2482_v26 = vmul.f32 %v4733_v18, %v2481_v28  ;;  %v2088_v8 = vld [vmem:[%s5006_s30 + $0x20] sm:$0xff]  ;;  %v2089_v39 = vld [vmem:[%s5006_s30 + $0x28] sm:$0xff] }
 0x1f7   : > { %v2723_v61 = vmul.f32 %v3010_v35, %v2512_v9  ;;  %v2365_v1 = vsel %vm2364_vm6, %v2362_v44, %v2359_v52  ;;  %vm2484_vm7 = vcmp.lt.f32.partialorder %v2483_v19, 0.0004427343  ;;  %v2370_v15 = vadd.f32 1.0, %v2369_v46  ;;  %v2090_v28 = vld [vmem:[%s5006_s30 + $0x30] sm:$0xff]  ;;  %v5212_v19 = vld [vmem:[#allocation7_spill] sm:$0xff]  ;;  %v5213_v46 = vld [vmem:[#allocation10_spill] sm:$0xff] }
 0x1f8   : > { %v2383_v53 = vsub.f32 0.0, %v2365_v1  ;;  %v2485_v3 = vsel %vm2484_vm7, %v2482_v26, %v2479_v38  ;;  %v2372_v59 = vand.u32 2147483647, %v4923_v21  ;;  %v2490_v50 = vadd.f32 1.0, %v2489_v25  ;;  %v5214_v7 = vld [vmem:[#allocation11_spill] sm:$0xff] }
 0x1f9   : > { %2750 = vrot.lane.b32.xlu1 %v2723_v61, %s3735_s26  ;;  %v2503_v12 = vsub.f32 %v5207_v54, %v2485_v3  ;;  %v3011_v42 = vsel %vm4977_vm4, 1.0, %v5204_v4  ;;  %v2492_v18 = vand.u32 2147483647, %v4930_v2  ;;  %vm2253_vm8 = vcmp.gt.f32.partialorder %v5207_v54, 0.0  ;;  %v5215_v29 = vld [vmem:[#allocation3_spill] sm:$0xff] }
 0x1fa   : > { %v3682_v51 = vpop.eup %3681  ;;  %v2371_v16 = vmul.f32 %v4923_v21, %v2370_v15  ;;  %vm2695_vm9 = vcmp.lt.s32.totalorder %v2685_v58, 8  ;;  %vm2373_vm10 = vcmp.lt.f32.partialorder %v2372_v59, 0.0004427343  ;;  %v2491_v24 = vmul.f32 %v4930_v2, %v2490_v50 }
 0x1fb   : > { %v3684_v22 = vpop.eup %3683  ;;  %v2513_v23 = vsel %vm2253_vm8, %v2383_v53, %v2503_v12  ;;  %v2368_v40 = vmul.f32 0.6931472, %v3682_v51  ;;  %vm2493_vm11 = vcmp.lt.f32.partialorder %v2492_v18, 0.0004427343  ;;  %v3012_v2 = vsel %vm2695_vm9, 1.0, %v5204_v4  ;;  %v5216_v4 = vld [vmem:[#allocation8_spill] sm:$0xff] }
 0x1fc   : > { %v2724_v60 = vmul.f32 %v3011_v42, %v2513_v23  ;;  %v2488_v6 = vmul.f32 0.6931472, %v3684_v22  ;;  %vm2254_vm12 = vcmp.gt.f32.partialorder %v4703_v31, 0.0  ;;  %vm2234_vm13 = vcmask 64512  }
 0x1fd   : > { %v2374_v10 = vsel %vm2373_vm10, %v2371_v16, %v2368_v40  ;;  %vm2795_vm14 = vcmask 0  }
 0x1fe   : > { %2752 = vrot.lane.b32.xlu0 %v2724_v60, %s3735_s26  ;;  %v2384_v21 = vsub.f32 0.0, %v2374_v10  ;;  %v2494_v33 = vsel %vm2493_vm11, %v2491_v24, %v2488_v6 }
 0x1ff   : > { %v2504_v0 = vsub.f32 %v4703_v31, %v2494_v33  ;;  %v2993_v33 = vmul.f32 -1.442695, %v4565_v37  ;;  %v2997_v37 = vmul.f32 -1.442695, %v4679_v63 }
 0x201   : > { %v2514_v45 = vsel %vm2254_vm12, %v2384_v21, %v2504_v0  ;;  %3685 = vpow2.f32 %v2993_v33 }
 0x202   : > { %v2725_v5 = vmul.f32 %v3012_v2, %v2514_v45  ;;  %2120 = vrot.lane.b32.xlu0 %v2092_v47, %s3736_s7  ;;  %v2994_v2 = vmul.f32 -1.442695, %v4592_v32  ;;  %v2995_v45 = vmul.f32 -1.442695, %v4637_v57  ;;  %v3000_v32 = vmul.f32 -1.442695, %v5203_v55 }
 0x203   : > { %v5217_v57 = vld [vmem:[#allocation12_spill] sm:$0xff] }
 0x204   : > { %2754 = vrot.lane.b32.xlu1 %v2725_v5, %s3735_s26  ;;  %3687 = vpow2.f32 %v2994_v2 }
 0x205   : > { %3689 = vpow2.f32 %v2995_v45 }
 0x206   : > { %2164 = vrot.lane.b32.xlu0 %v5208_v13, %s3736_s7 }
 0x208   : > { %2104 = vrot.lane.b32.xlu1 %v2084_v43, %s3736_s7  ;;  %v2996_v43 = vmul.f32 -1.442695, %v4653_v49  ;;  %v2999_v49 = vmul.f32 -1.442695, %v4575_v41 }
 0x20a   : > { %2168 = vrot.lane.b32.xlu0 %v5209_v56, %s3736_s7  ;;  %v2998_v56 = vmul.f32 -1.442695, %v4698_v17  ;;  %3691 = vpow2.f32 %v2996_v43  ;;  %v3001_v17 = vmul.f32 -1.442695, %v5207_v54 }
 0x20c   : > { %2106 = vrot.lane.b32.xlu1 %v2085_v62, %s3736_s7  ;;  %v3686_v62 = vpop.eup %3685  ;;  %3693 = vpow2.f32 %v2998_v56 }
 0x20d   : > { %3695 = vpow2.f32 %v2997_v37  ;;  %v3002_v37 = vmul.f32 -1.442695, %v4703_v31 }
 0x210   : > { %2108 = vrot.lane.b32.xlu1 %v2086_v36, %s3736_s7  ;;  %v2054_v36 = vadd.f32 1.0, %v3686_v62 }
 0x212   : > { %3697 = vrcp.f32 %v2054_v36 }
 0x213   : > { %3699 = vpow2.f32 %v3000_v32 }
 0x214   : > { %2110 = vrot.lane.b32.xlu1 %v2087_v34, %s3736_s7  ;;  %3701 = vpow2.f32 %v2999_v49 }
 0x218   : > { %2112 = vrot.lane.b32.xlu1 %v2088_v8, %s3736_s7  ;;  %v3688_v8 = vpop.eup %3687 }
 0x21c   : > { %2114 = vrot.lane.b32.xlu1 %v2089_v39, %s3736_s7  ;;  %v2055_v39 = vadd.f32 1.0, %v3688_v8 }
 0x21e   : > { %3703 = vrcp.f32 %v2055_v39 }
 0x21f   : > { %3705 = vpow2.f32 %v3001_v17 }
 0x220   : > { %2116 = vrot.lane.b32.xlu1 %v2090_v28, %s3736_s7 }
 0x224   : > { %2118 = vrot.lane.b32.xlu1 %v2091_v11, %s3736_s7  ;;  %v3690_v11 = vpop.eup %3689 }
 0x225   : > { %v2056_v63 = vadd.f32 1.0, %v3690_v11 }
 0x227   : > { %3707 = vrcp.f32 %v2056_v63 }
 0x228   : > { %2122 = vrot.lane.b32.xlu1 %v2093_v30, %s3736_s7 }
 0x22c   : > { %2154 = vrot.lane.b32.xlu1 %v5210_v14, %s3736_s7  ;;  %v3692_v14 = vpop.eup %3691 }
 0x22d   : > { %v2057_v55 = vadd.f32 1.0, %v3692_v14 }
 0x22f   : > { %3709 = vrcp.f32 %v2057_v55 }
 0x230   : > { %2156 = vrot.lane.b32.xlu1 %v5211_v20, %s3736_s7  ;;  %v3694_v20 = vpop.eup %3693 }
 0x234   : > { %2158 = vrot.lane.b32.xlu1 %v5212_v19, %s3736_s7 }
 0x238   : > { %2160 = vrot.lane.b32.xlu1 %v5213_v46, %s3736_s7  ;;  %v3696_v46 = vpop.eup %3695 }
 0x239   : > { %v3698_v41 = vpop.eup %3697 }
 0x23c   : > { %2162 = vrot.lane.b32.xlu1 %v5214_v7, %s3736_s7  ;;  %v2059_v7 = vadd.f32 1.0, %v3694_v20 }
 0x23e   : > { %3711 = vrcp.f32 %v2059_v7 }
 0x240   : > { %2166 = vrot.lane.b32.xlu1 %v5215_v29, %s3736_s7  ;;  %v3700_v29 = vpop.eup %3699 }
 0x241   : > { %v3702_v54 = vpop.eup %3701 }
 0x244   : > { %2170 = vrot.lane.b32.xlu1 %v5216_v4, %s3736_s7 }
 0x248   : > { %v2737_v35 = vpop.permute.xlu0 %2736 }
 0x249   : > { %v2766_v44 = vsel %vm2234_vm13, %v2737_v35, 0.0  ;;  %v2058_v35 = vadd.f32 1.0, %v3696_v46 }
 0x24b   : > { %3713 = vrcp.f32 %v2058_v35 }
 0x24c   : > { %v2741_v27 = vpop.permute.xlu1 %2740  ;;  %v2739_v25 = vpop.permute.xlu0 %2738 }
 0x24d   : > { %v2767_v48 = vsel %vm2234_vm13, %v2739_v25, 0.0  ;;  %v2769_v58 = vsel %vm2234_vm13, %v2741_v27, 0.0 }
 0x24e   : > { %v2768_v9 = vadd.f32 %v2767_v48, %v2766_v44  ;;  %v3704_v48 = vpop.eup %3703 }
 0x250   : > { %v2770_v61 = vadd.f32 %v2769_v58, %v2768_v9  ;;  %v2060_v58 = vadd.f32 1.0, %v3702_v54 }
 0x251   : > { %v2743_v52 = vpop.permute.xlu1 %2742 }
 0x252   : > { %v2771_v26 = vsel %vm2234_vm13, %v2743_v52, 0.0  ;;  %v2061_v52 = vadd.f32 1.0, %v3700_v29 }
 0x253   : > { %v2772_v15 = vadd.f32 %v2771_v26, %v2770_v61 }
 0x254   : > { %3715 = vrcp.f32 %v2061_v52 }
 0x255   : > { %v2745_v38 = vpop.permute.xlu0 %2744  ;;  %3717 = vrcp.f32 %v2060_v58 }
 0x256   : > { %v2773_v1 = vsel %vm2234_vm13, %v2745_v38, 0.0  ;;  %v3706_v38 = vpop.eup %3705 }
 0x257   : > { %v2774_v3 = vadd.f32 %v2773_v1, %v2772_v15  ;;  %v3708_v61 = vpop.eup %3707  ;;  %v2062_v15 = vadd.f32 1.0, %v3706_v38 }
 0x259   : > { %3719 = vrcp.f32 %v2062_v15 }
 0x25a   : > { %3721 = vpow2.f32 %v3002_v37 }
 0x25f   : > { %v2747_v53 = vpop.permute.xlu1 %2746 }
 0x260   : > { %v2775_v59 = vsel %vm2234_vm13, %v2747_v53, 0.0 }
 0x261   : > { %v2776_v12 = vadd.f32 %v2775_v59, %v2774_v3 }
 0x267   : > { %v2749_v50 = vpop.permute.xlu0 %2748 }
 0x268   : > { %v2777_v42 = vsel %vm2234_vm13, %v2749_v50, 0.0  ;;  %v3710_v50 = vpop.eup %3709 }
 0x269   : > { %v2778_v51 = vadd.f32 %v2777_v42, %v2776_v12  ;;  %v3712_v42 = vpop.eup %3711 }
 0x26b   : > { %v2751_v18 = vpop.permute.xlu1 %2750 }
 0x26c   : > { %v2779_v22 = vsel %vm2234_vm13, %v2751_v18, 0.0 }
 0x26d   : > { %v2780_v23 = vadd.f32 %v2779_v22, %v2778_v51 }
 0x270   : > { %v2753_v40 = vpop.permute.xlu0 %2752 }
 0x271   : > { %v2781_v16 = vsel %vm2234_vm13, %v2753_v40, 0.0 }
 0x272   : > { %v2782_v60 = vadd.f32 %v2781_v16, %v2780_v23  ;;  %v3714_v23 = vpop.eup %3713 }
 0x274   : > { %v2121_v53 = vpop.permute.xlu0 %2120 }
 0x276   : > { %v2755_v6 = vpop.permute.xlu1 %2754 }
 0x277   : > { %v2783_v24 = vsel %vm2234_vm13, %v2755_v6, 0.0 }
 0x278   : > { %v2784_v10 = vadd.f32 %v2783_v24, %v2782_v60  ;;  %v2165_v40 = vpop.permute.xlu0 %2164  ;;  %v3716_v60 = vpop.eup %3715 }
 0x279   : > { %v3718_v33 = vpop.eup %3717 }
 0x27a   : > { %2785 = vadd.xlane.f32.xlu0 %v2784_v10  ;;  %v2105_v21 = vpop.permute.xlu1 %2104  ;;  %v3720_v43 = vpop.eup %3719 }
 0x27b   : > { %v2134_v4 = vmul.f32 %v3698_v41, %v2105_v21  ;;  %v2142_v62 = vmul.f32 %v3720_v43, %v2121_v53  ;;  %v3722_v36 = vpop.eup %3721 }
 0x27c   : > { %v2169_v2 = vpop.permute.xlu0 %2168 }
 0x27e   : > { %v2107_v0 = vpop.permute.xlu1 %2106 }
 0x27f   : > { %v2135_v44 = vmul.f32 %v3704_v48, %v2107_v0 }
 0x282   : > { %v2109_v47 = vpop.permute.xlu1 %2108 }
 0x283   : > { %v2136_v1 = vmul.f32 %v3708_v61, %v2109_v47 }
 0x286   : > { %v2111_v5 = vpop.permute.xlu1 %2110 }
 0x287   : > { %v2137_v12 = vmul.f32 %v3710_v50, %v2111_v5 }
 0x28a   : > { %v5065_v13 = vpop.permute.xlu1 %2112 }
 0x28b   : > { %v2138_v16 = vmul.f32 %v3714_v23, %v5065_v13 }
 0x28e   : > { %v2115_v34 = vpop.permute.xlu1 %2114 }
 0x28f   : > { %v2139_v51 = vmul.f32 %v3712_v42, %v2115_v34  ;;  %v2063_v34 = vadd.f32 1.0, %v3722_v36 }
 0x290   : > { %2172 = vrot.lane.b32.xlu0 %v5217_v57, %s3736_s7 }
 0x291   : > { %v2189_v24 = vadd.f32 %v2165_v40, %v2139_v51  ;;  %3723 = vrcp.f32 %v2063_v34 }
 0x292   : > { %v2117_v28 = vpop.permute.xlu1 %2116 }
 0x293   : > { %v2140_v0 = vmul.f32 %v3718_v33, %v2117_v28 }
 0x296   : > { %v2119_v30 = vpop.permute.xlu1 %2118 }
 0x297   : > { %v2141_v10 = vmul.f32 %v3716_v60, %v2119_v30 }
 0x299   : > { %v2191_v45 = vadd.f32 %v2169_v2, %v2141_v10 }
 0x29a   : > { %v5074_v19 = vpop.permute.xlu1 %2122 }
 0x29b   : > { %v3724_v57 = vpop.eup %3723 }
 0x29c   : > { %v2143_v49 = vmul.f32 %v3724_v57, %v5074_v19 }
 0x29e   : > { %v2155_v27 = vpop.permute.xlu1 %2154 }
 0x29f   : > { %v2184_v25 = vadd.f32 %v2155_v27, %v2134_v4 }
 0x2a1   : > { %2204 = vrot.lane.b32.xlu1 %v2184_v25, %s3735_s26 }
 0x2a2   : > { %v2157_v9 = vpop.permute.xlu1 %2156 }
 0x2a3   : > { %v2185_v26 = vadd.f32 %v2157_v9, %v2135_v44 }
 0x2a5   : > { %2206 = vrot.lane.b32.xlu0 %v2185_v26, %s3735_s26 }
 0x2a6   : > { %v2159_v3 = vpop.permute.xlu1 %2158 }
 0x2a7   : > { %v2186_v59 = vadd.f32 %v2159_v3, %v2136_v1 }
 0x2a9   : > { %2208 = vrot.lane.b32.xlu1 %v2186_v59, %s3735_s26 }
 0x2aa   : > { %v2161_v18 = vpop.permute.xlu1 %2160 }
 0x2ab   : > { %v2187_v22 = vadd.f32 %v2161_v18, %v2137_v12 }
 0x2ad   : > { %2210 = vrot.lane.b32.xlu0 %v2187_v22, %s3735_s26 }
 0x2ae   : > { %v2163_v6 = vpop.permute.xlu1 %2162 }
 0x2af   : > { %v2188_v21 = vadd.f32 %v2163_v6, %v2138_v16 }
 0x2b1   : > { %2212 = vrot.lane.b32.xlu1 %v2188_v21, %s3735_s26  ;;  %2214 = vrot.lane.b32.xlu0 %v2189_v24, %s3735_s26 }
 0x2b2   : > { %v2167_v47 = vpop.permute.xlu1 %2166 }
 0x2b3   : > { %v2190_v5 = vadd.f32 %v2167_v47, %v2140_v0 }
 0x2b5   : > { %2216 = vrot.lane.b32.xlu1 %v2190_v5, %s3735_s26  ;;  %2218 = vrot.lane.b32.xlu0 %v2191_v45, %s3735_s26 }
 0x2b6   : > { %v2171_v13 = vpop.permute.xlu1 %2170 }
 0x2b7   : > { %v2192_v56 = vadd.f32 %v2171_v13, %v2142_v62 }
 0x2b9   : > { %2220 = vrot.lane.b32.xlu1 %v2192_v56, %s3735_s26 }
 0x307   : > { %v2786_v8 = vpop.xlane.xlu0 %2785 }
 0x308   : > { %v2787_v32 = vrot.slane %v2786_v8, 4 }
 0x30a   : > { %v2788_v39 = vadd.f32 %v2787_v32, %v2786_v8 }
 0x30b   : > { %v2173_v28 = vpop.permute.xlu0 %2172 }
 0x30c   : > { %v2789_v11 = vrot.slane %v2788_v39, 2  ;;  %v2193_v17 = vadd.f32 %v2173_v28, %v2143_v49 }
 0x30e   : > { %2222 = vrot.lane.b32.xlu0 %v2193_v17, %s3735_s26  ;;  %v2790_v63 = vadd.f32 %v2789_v11, %v2788_v39 }
 0x310   : > { %v2791_v30 = vrot.slane %v2790_v63, 1 }
 0x312   : > { %v2792_v31 = vadd.f32 %v2791_v30, %v2790_v63 }
 0x313   : > { %v2205_v14 = vpop.permute.xlu1 %2204 }
 0x314   : > { %2235 = vst.msk [vmem:[%s277_s10] sm:$0xff] %vm2234_vm13, %v2205_v14 }
 0x315   : > { %3494 = vpush %v2792_v31 }
 0x317   : > { %v2207_v20 = vpop.permute.xlu0 %2206 }
 0x318   : > { %2236 = vst.msk [vmem:[%s277_s10 + $0x8] sm:$0xff] %vm2234_vm13, %v2207_v20 }
 0x31b   : > { %v2209_v55 = vpop.permute.xlu1 %2208 }
 0x31c   : > { %2237 = vst.msk [vmem:[%s277_s10 + $0x10] sm:$0xff] %vm2234_vm13, %v2209_v55 }
 0x31f   : > { %v2211_v19 = vpop.permute.xlu0 %2210 }
 0x320   : > { %2238 = vst.msk [vmem:[%s277_s10 + $0x18] sm:$0xff] %vm2234_vm13, %v2211_v19 }
 0x323   : > { %v2213_v46 = vpop.permute.xlu1 %2212  ;;  %v2215_v41 = vpop.permute.xlu0 %2214 }
 0x324   : > { %2239 = vst.msk [vmem:[%s277_s10 + $0x20] sm:$0xff] %vm2234_vm13, %v2213_v46  ;;  %2240 = vst.msk [vmem:[%s277_s10 + $0x28] sm:$0xff] %vm2234_vm13, %v2215_v41 }
 0x327   : > { %v2217_v7 = vpop.permute.xlu1 %2216  ;;  %v2219_v29 = vpop.permute.xlu0 %2218 }
 0x328   : > { %2241 = vst.msk [vmem:[%s277_s10 + $0x30] sm:$0xff] %vm2234_vm13, %v2217_v7  ;;  %2242 = vst.msk [vmem:[%s277_s10 + $0x38] sm:$0xff] %vm2234_vm13, %v2219_v29 }
 0x32b   : > { %v2221_v4 = vpop.permute.xlu1 %2220 }
 0x32c   : > { %2243 = vst.msk [vmem:[%s277_s10 + $0x40] sm:$0xff] %vm2234_vm13, %v2221_v4 }
 0x346   : > { %s3495_s14 = spop %3494 }
 0x347   : > { %v2794_v35 = vstv %s3495_s14 }
 0x348   : > { %2796 = vst.msk [vmem:[%s280_s13] sm:$0x1] %vm2795_vm14, %v2794_v35 }
 0x380   : > { %v2223_v27 = vpop.permute.xlu0 %2222 }
 0x381   : > { %2244 = vst.msk [vmem:[%s277_s10 + $0x48] sm:$0xff] %vm2234_vm13, %v2223_v27 }
 0x382 PF: > { %s17_s21 = sadd.s32 1, %s3731_s21  }
 0x383   : > { %p14_p4 = scmp.ge.s32.totalorder %s17_s21, 4  }
 0x385   :  { %16 = sbr.rel (!%p14_p4) target bundleno = 1 (0x1), region = 85 }

// kernel: glow_forward.26
= control target key start
LH: loop header
LB: loop body
LE: loop exit
PB: predicated region body
PF: predicated region fallthrough
CT: control target
= control target key end

     0   :  { %s1156_s12 = smov 0   ;;  %s1281_s0 = inlined_call_operand.vmem [shape: bf16[2,44,16], index: 0, kind: input, shape index: {}]   ;;  %s1282_s1 = inlined_call_operand.vmem [shape: bf16[144,128], index: 1, kind: input, shape index: {}]   ;;  %s1283_s2 = inlined_call_operand.vmem [shape: f32[1,128], index: 2, kind: input, shape index: {}]   ;;  %s1284_s3 = inlined_call_operand.vmem [shape: bf16[2,24,128], index: 3, kind: output, shape index: {}]  }
   0x1 LB: > { %s954_s13 = sadd.s32 4294967295, %s1134_s12   ;;  %p958_p0 = scmp.ge.s32.totalorder %s1134_s12, 1  ;;  %s1134_s12 = sphi %s1156_s12, %s13_s12  }
   0x2   : > { %p137_p1 = scmp.lt.s32.totalorder %s1134_s12, 3 }
   0x4   : > { %p138_p2 = pnand %p958_p0, %p137_p1 }
   0x5   : > { %v1106_v0 = vld [vmem:[%s1282_s1 + $0x8] sm:$0xff] (!%p138_p2)   ;;  %p161_p3 = scmp.lt.s32.totalorder (!%p138_p2), %s954_s13, 1  ;;  %v1107_v1 = vld [vmem:[%s1282_s1] sm:$0xff] (!%p138_p2)   ;;  %v1175_v2 = vld [vmem:[%s1282_s1 + $0x10] sm:$0xff] (!%p138_p2)   ;;  %vm212_vm0 = vcmask (!%p138_p2), 130048   ;;  %vm333_vm2 = vcmask (!%p138_p2), 1046528  }
   0x6   : > { %141 = sbr.rel (%p138_p2) target bundleno = 282 (0x11a), region = 32  ;;  %1042 = vmatprep.subr.bf16.mxu0 (!%p138_p2), %v1106_v0  ;;  %1048 = vmatprep.subr.bf16.mxu1 (!%p138_p2), %v1107_v1  ;;  %v1112_v3 = vld [vmem:[%s1282_s1 + $0x18] sm:$0xff] (!%p138_p2)   ;;  %vm190_vm1 = vsmask.f32 (!%p138_p2), 7424  ;;  %vm410_vm3 = vcmask (!%p138_p2), 1044480   ;;  %v1197_v7 = vld [vmem:[%s1282_s1 + $0x28] sm:$0xff] (!%p138_p2)  }
   0x7   : > { %1043 = vmatpush3.bf16.msra.mxu0 (!%p138_p2), %v1106_v0  ;;  %1049 = vmatpush3.bf16.msra.mxu1 (!%p138_p2), %v1107_v1  ;;  %v1114_v45 = vld [vmem:[%s1282_s1 + $0x20] sm:$0xff] (!%p138_p2)   ;;  %v1122_v51 = vld [vmem:[%s1282_s1 + $0x38] sm:$0xff] (!%p138_p2)   ;;  %vm483_vm4 = vsmask.f32 (!%p138_p2), 4352  ;;  %vm720_vm5 = vsmask.f32 (!%p138_p2), 5376 }
   0x8   : > { %1054 = vmatprep.subr.bf16.mxu0 (!%p138_p2), %v1175_v2  ;;  %1060 = vmatprep.subr.bf16.mxu1 (!%p138_p2), %v1112_v3  ;;  %vm647_vm6 = vcmask (!%p138_p2), 1045504  }
   0xd   : > { %s1286_s13 = smov (!%p161_p3, %s954_s13), 1 }
   0xe   : > { %s1096_s20 = smul.u32 24, %s1286_s13 }
   0xf   : > { %s1097_s9 = smul.u32 12, %s1286_s13 }
  0x10   : > { %s1185_s25 = scalar_lea.vmem %s1281_s0, %s1096_s20 }
  0x11   : > { %v172_v4 = vld [vmem:[%s1185_s25] sm:$0xf]  ;;  %v1189_v5 = vld [vmem:[%s1185_s25 + $0x4] sm:$0xf]  ;;  %v1192_v6 = vld [vmem:[%s1185_s25 + $0x8] sm:$0xf]  ;;  %s170_s16 = scalar_lea.vmem %s1284_s3, %s1097_s9 }
  0x12   : > { %v177_v8 = vld [vmem:[%s1185_s25 + $0xc] sm:$0x1]  ;;  %v961_v9 = vcombine.low %v172_v4, %v1189_v5  ;;  %v966_v10 = vcombine.low %v1192_v6, %v1192_v6  ;;  %v327_v11 = vld [vmem:[%s1185_s25] sm:$0xe]  ;;  %v631_v30 = vld [vmem:[%s1185_s25 + $0x4] sm:$0xc]  ;;  %v983_v49 = vcombine.low %v1189_v5, %v1192_v6 }
  0x13   : > { %v400_v12 = vld [vmem:[%s1185_s25] sm:$0x8]  ;;  %v1206_v13 = vcombine.low %v1192_v6, %v177_v8  ;;  %v970_v14 = vcombine.low %v327_v11, %v1189_v5  ;;  %v401_v15 = vld [vmem:[%s1185_s25 + $0xc] sm:$0x7]  ;;  %v1225_v34 = vld [vmem:[%s1185_s25 + $0x8] sm:$0xf] }
  0x14   : > { %v974_v16 = vcombine.low %v400_v12, %v1189_v5  ;;  %v1212_v17 = vld [vmem:[%s1185_s25 + $0xc] sm:$0xf]  ;;  %v192_v18 = vshrl.u32 %v961_v9, 16  ;;  %v194_v19 = vshll.u32 %v961_v9, 16  ;;  %1050 = vmatprep.mubr.msk.bf16.mxu1 %vm212_vm0, %v961_v9  ;;  %v975_v20 = vcombine.low %v1192_v6, %v401_v15  ;;  %v714_v43 = vld [vmem:[%s1185_s25 + $0x10] sm:$0x7] }
  0x15   : > { %v979_v21 = vcombine.low %v1192_v6, %v1212_v17  ;;  %v199_v22 = vshll.u32 %v1206_v13, 16  ;;  %v203_v23 = vshrl.u32 %v1206_v13, 16  ;;  %1051 = vmatmul.mubr.msk.bf16.vlgmr.msra.gmra.mrb[0].mxu1 %vm212_vm0, %v966_v10  ;;  %v334_v24 = vrot.slane %v970_v14, 1  ;;  %v633_v38 = vld [vmem:[%s1185_s25 + $0xc] sm:$0xf]  ;;  %v1126_v10 = vld [vmem:[%s1282_s1 + $0x40] sm:$0xff]  }
  0x16   : > { %v335_v25 = vrot.slane %v1206_v13, 1  ;;  %v196_v26 = vrot.slane %v194_v19, 1  ;;  %1061 = vmatpush3.bf16.msra.mxu1 %v1112_v3  ;;  %v411_v27 = vrot.slane %v974_v16, 3  ;;  %v412_v28 = vrot.slane %v975_v20, 3  ;;  %v634_v59 = vld [vmem:[%s1185_s25 + $0x10] sm:$0x3] }
  0x17   : > { %v485_v29 = vshrl.u32 %v974_v16, 16  ;;  %v201_v31 = vrot.slane %v199_v22, 1  ;;  %1072 = vmatprep.subr.bf16.mxu1 %v1197_v7  ;;  %v488_v32 = vshll.u32 %v974_v16, 16  ;;  %v493_v33 = vshrl.u32 %v979_v21, 16  ;;  %v801_v8 = vld [vmem:[%s1185_s25 + $0x4] sm:$0x8] }
  0x18   : > { %v197_v35 = vor.u32 %v196_v26, %v192_v18  ;;  %v413_v36 = vsel %vm410_vm3, %v411_v27, %v412_v28  ;;  %v496_v37 = vshll.u32 %v979_v21, 16  ;;  %v336_v40 = vsel %vm333_vm2, %v334_v24, %v335_v25 }
  0x19   : > { %v205_v39 = vor.u32 %v203_v23, %v201_v31  ;;  %1062 = vmatprep.mubr.msk.bf16.mxu1 %vm212_vm0, %v413_v36  ;;  %v487_v41 = vrot.slane %v485_v29, 3  ;;  %v490_v42 = vrot.slane %v488_v32, 4  ;;  %v495_v46 = vrot.slane %v493_v33, 3 }
  0x1a   : > { %v202_v44 = vsel %vm190_vm1, %v197_v35, %v201_v31  ;;  %v498_v47 = vrot.slane %v496_v37, 4  ;;  %v988_v48 = vcombine.low %v631_v30, %v1225_v34  ;;  %v993_v50 = vcombine.low %v633_v38, %v714_v43 }
  0x1b   : > { %1044 = vmatprep.mubr.msk.bf16.mxu0 %vm212_vm0, %v202_v44  ;;  %v491_v56 = vor.u32 %v490_v42, %v487_v41  ;;  %v984_v3 = vcombine.low %v1212_v17, %v1212_v17  ;;  %v989_v4 = vcombine.low %v633_v38, %v634_v59  ;;  %v997_v11 = vcombine.low %v801_v8, %v1225_v34 }
  0x1c   : > { %1045 = vmatmul.mubr.msk.bf16.vlgmr.msra.gmra.mrb[0].mxu0 %vm212_vm0, %v205_v39  ;;  %v722_v52 = vshrl.u32 %v988_v48, 16  ;;  %v725_v53 = vshll.u32 %v988_v48, 16  ;;  %v730_v54 = vshrl.u32 %v993_v50, 16  ;;  %v733_v55 = vshll.u32 %v993_v50, 16 }
  0x1d   : > { %1055 = vmatpush3.bf16.msra.mxu0 %v1175_v2  ;;  %1056 = vmatprep.mubr.msk.bf16.mxu0 %vm212_vm0, %v336_v40  ;;  %v499_v57 = vor.u32 %v498_v47, %v495_v46  ;;  %v1119_v2 = vld [vmem:[%s1282_s1 + $0x30] sm:$0xff]   ;;  %v648_v6 = vrot.slane %v988_v48, 2  ;;  %v807_v12 = vrot.slane %v997_v11, 3  ;;  %v808_v13 = vrot.slane %v993_v50, 3 }
  0x1e   : > { %1066 = vmatprep.subr.bf16.mxu0 %v1114_v45  ;;  %1063 = vmatmul.mubr.msk.bf16.vlgmr.msra.gmra.mrb[4].mxu1 %vm212_vm0, %v412_v28  ;;  %v724_v58 = vrot.slane %v722_v52, 2  ;;  %v727_v60 = vrot.slane %v725_v53, 3  ;;  %v732_v61 = vrot.slane %v730_v54, 2  ;;  %v735_v62 = vrot.slane %v733_v55, 3 }
  0x1f   : > { %1073 = vmatpush3.bf16.msra.mxu1 %v1197_v7  ;;  %1074 = vmatprep.mubr.msk.bf16.mxu1 %vm212_vm0, %v983_v49  ;;  %v500_v1 = vsel %vm483_vm4, %v491_v56, %v499_v57  ;;  %v649_v7 = vrot.slane %v989_v4, 2  ;;  %v809_v14 = vsel %vm410_vm3, %v807_v12, %v808_v13 }
  0x20   : > { %1084 = vmatprep.subr.bf16.mxu1 %v1122_v51  ;;  %v728_v63 = vor.u32 %v727_v60, %v724_v58  ;;  %v736_v0 = vor.u32 %v735_v62, %v732_v61 }
  0x21   : > { %v650_v9 = vsel %vm647_vm6, %v648_v6, %v649_v7 }
  0x22   : > { %v737_v5 = vsel %vm720_vm5, %v728_v63, %v736_v0 }
  0x24   : > { %1057 = vmatmul.mubr.msk.bf16.vlgmr.msra.gmra.mrb[4].mxu0 %vm212_vm0, %v335_v25 }
  0x25   : > { %1067 = vmatpush3.bf16.msra.mxu0 %v1114_v45  ;;  %1068 = vmatprep.mubr.msk.bf16.mxu0 %vm212_vm0, %v500_v1 }
  0x26   : > { %1078 = vmatprep.subr.bf16.mxu0 %v1119_v2  ;;  %1075 = vmatmul.mubr.msk.bf16.vlgmr.msra.gmra.mrb[8].mxu1 %vm212_vm0, %v984_v3 }
  0x27   : > { %1085 = vmatpush3.bf16.msra.mxu1 %v1122_v51  ;;  %1086 = vmatprep.mubr.msk.bf16.mxu1 %vm212_vm0, %v737_v5  ;;  %v1001_v5 = vld [vmem:[%s1283_s2] ss:$0 sm:$0xff] }
  0x2c   : > { %1069 = vmatmul.mubr.msk.bf16.vlgmr.msra.gmra.mrb[8].mxu0 %vm212_vm0, %v499_v57 }
  0x2d   : > { %1079 = vmatpush3.bf16.msra.mxu0 %v1119_v2  ;;  %1080 = vmatprep.mubr.msk.bf16.mxu0 %vm212_vm0, %v650_v9 }
  0x2e   : > { %1090 = vmatprep.subr.bf16.mxu0 %v1126_v10  ;;  %1087 = vmatmul.mubr.msk.bf16.vlgmr.msra.gmra.mrb[12].mxu1 %vm212_vm0, %v736_v0 }
  0x34   : > { %1081 = vmatmul.mubr.msk.bf16.vlgmr.msra.gmra.mrb[12].mxu0 %vm212_vm0, %v649_v7 }
  0x35   : > { %1091 = vmatpush3.bf16.msra.mxu0 %v1126_v10  ;;  %1092 = vmatprep.mubr.msk.bf16.mxu0 %vm212_vm0, %v809_v14 }
  0x3c   : > { %1093 = vmatmul.mubr.msk.bf16.vlgmr.msra.gmra.mrb[16].mxu0 %vm212_vm0, %v808_v13 }
  0xe8   : > { %v1052_v15 = vpop.f32.mrb[0].mxu1 }
  0xe9   : > { %v313_v16 = vpop.f32.mrb[1].mxu1 }
  0xea   : > { %v1053_v17 = vpop.f32.mrb[2].mxu1 }
  0xeb   : > { %v316_v18 = vpop.f32.mrb[3].mxu1 }
  0xef   : > { %v1046_v19 = vpop.f32.mrb[0].mxu0 }
  0xf0   : > { %v322_v20 = vadd.f32 %v1052_v15, %v1046_v19  ;;  %v253_v21 = vpop.f32.mrb[1].mxu0 }
  0xf1   : > { %v314_v22 = vadd.f32 %v313_v16, %v253_v21  ;;  %v1047_v23 = vpop.f32.mrb[2].mxu0  ;;  %v1064_v24 = vpop.f32.mrb[4].mxu1 }
  0xf2   : > { %v256_v25 = vpop.f32.mrb[3].mxu0  ;;  %v460_v26 = vpop.f32.mrb[5].mxu1 }
  0xf3   : > { %v317_v27 = vadd.f32 %v316_v18, %v256_v25  ;;  %v1065_v28 = vpop.f32.mrb[6].mxu1 }
  0xf4   : > { %v463_v29 = vpop.f32.mrb[7].mxu1 }
  0xf7   : > { %v1058_v30 = vpop.f32.mrb[4].mxu0 }
  0xf8   : > { %v399_v31 = vadd.f32 %v1058_v30, %v322_v20  ;;  %v383_v32 = vpop.f32.mrb[5].mxu0 }
  0xf9   : > { %v397_v33 = vadd.f32 %v383_v32, %v314_v22  ;;  %v1059_v34 = vpop.f32.mrb[6].mxu0  ;;  %v1076_v35 = vpop.f32.mrb[8].mxu1 }
  0xfa   : > { %v476_v36 = vadd.f32 %v1064_v24, %v399_v31  ;;  %v386_v37 = vpop.f32.mrb[7].mxu0  ;;  %v614_v38 = vpop.f32.mrb[9].mxu1 }
  0xfb   : > { %v398_v39 = vadd.f32 %v386_v37, %v317_v27  ;;  %v474_v40 = vadd.f32 %v460_v26, %v397_v33  ;;  %v1077_v41 = vpop.f32.mrb[10].mxu1 }
  0xfc   : > { %v617_v42 = vpop.f32.mrb[11].mxu1 }
  0xfd   : > { %v475_v43 = vadd.f32 %v463_v29, %v398_v39 }
  0xff   : > { %v1070_v44 = vpop.f32.mrb[8].mxu0 }
 0x100   : > { %v563_v45 = vadd.f32 %v1070_v44, %v476_v36  ;;  %v547_v46 = vpop.f32.mrb[9].mxu0 }
 0x101   : > { %v561_v47 = vadd.f32 %v547_v46, %v474_v40  ;;  %v1071_v48 = vpop.f32.mrb[10].mxu0  ;;  %v1088_v49 = vpop.f32.mrb[12].mxu1 }
 0x102   : > { %v630_v50 = vadd.f32 %v1076_v35, %v563_v45  ;;  %v550_v51 = vpop.f32.mrb[11].mxu0  ;;  %v784_v52 = vpop.f32.mrb[13].mxu1 }
 0x103   : > { %v562_v53 = vadd.f32 %v550_v51, %v475_v43  ;;  %v628_v54 = vadd.f32 %v614_v38, %v561_v47  ;;  %v1089_v55 = vpop.f32.mrb[14].mxu1 }
 0x104   : > { %v787_v56 = vpop.f32.mrb[15].mxu1 }
 0x105   : > { %v629_v57 = vadd.f32 %v617_v42, %v562_v53 }
 0x107   : > { %v1082_v58 = vpop.f32.mrb[12].mxu0 }
 0x108   : > { %v713_v59 = vadd.f32 %v1082_v58, %v630_v50  ;;  %v697_v60 = vpop.f32.mrb[13].mxu0 }
 0x109   : > { %v711_v61 = vadd.f32 %v697_v60, %v628_v54  ;;  %v1083_v62 = vpop.f32.mrb[14].mxu0 }
 0x10a   : > { %v800_v63 = vadd.f32 %v1088_v49, %v713_v59  ;;  %v700_v0 = vpop.f32.mrb[15].mxu0 }
 0x10b   : > { %v712_v1 = vadd.f32 %v700_v0, %v629_v57  ;;  %v798_v2 = vadd.f32 %v784_v52, %v711_v61 }
 0x10d   : > { %v799_v3 = vadd.f32 %v787_v56, %v712_v1 }
 0x10f   : > { %v1094_v4 = vpop.f32.mrb[16].mxu0 }
 0x110   : > { %v872_v6 = vadd.f32 %v1094_v4, %v800_v63  ;;  %v856_v7 = vpop.f32.mrb[17].mxu0 }
 0x111   : > { %v870_v8 = vadd.f32 %v856_v7, %v798_v2  ;;  %v1095_v9 = vpop.f32.mrb[18].mxu0 }
 0x112   : > { %v882_v10 = vadd.f32 %v1001_v5, %v872_v6  ;;  %v859_v11 = vpop.f32.mrb[19].mxu0 }
 0x113   : > { %v871_v12 = vadd.f32 %v859_v11, %v799_v3  ;;  %v880_v14 = vadd.f32 %v1001_v5, %v870_v8 }
 0x114   : > { %v1009_v13 = vpack.c.bf16 %v882_v10, %v882_v10 }
 0x115   : > { %v881_v15 = vadd.f32 %v1001_v5, %v871_v12 }
 0x116   : > { %898 = vst [vmem:[%s170_s16 + $0x8] sm:$0xf] %v1009_v13 }
 0x117   : > { %v1013_v16 = vpack.c.bf16 %v881_v15, %v880_v14 }
 0x119   : > { %1014 = vst [vmem:[%s170_s16] sm:$0xff] %v1013_v16  }
 0x11a PF: > { %s13_s12 = sadd.s32 1, %s1134_s12  }
 0x11b   : > { %p10_p4 = scmp.ge.s32.totalorder %s13_s12, 4  }
 0x11d   :  { %12 = sbr.rel (!%p10_p4) target bundleno = 1 (0x1), region = 62 }

// kernel: glow_forward.27
= control target key start
LH: loop header
LB: loop body
LE: loop exit
PB: predicated region body
PF: predicated region fallthrough
CT: control target
= control target key end

     0   :  { %s142_s0 = inlined_call_operand.vmem [shape: bf16[32,128], index: 0, kind: input, shape index: {}]   ;;  %s143_s1 = inlined_call_operand.vmem [shape: bf16[32,128], index: 1, kind: output, shape index: {}]  }
   0x1   :  { %v97_v0 = vld [vmem:[%s142_s0] sm:$0xff]   ;;  %v114_v1 = vld [vmem:[%s142_s0 + $0x8] sm:$0xff]  }
   0x2   :  { %v98_v2 = vunpack.c.l.bf16 %v97_v0  ;;  %v99_v3 = vunpack.c.h.bf16 %v97_v0  ;;  %v102_v4 = vunpack.c.l.bf16 %v114_v1  ;;  %v103_v5 = vunpack.c.h.bf16 %v114_v1 }
   0x4   :  { %v16_v6 = vadd.f32 %v99_v3, %v98_v2  ;;  %v26_v7 = vmul.f32 %v98_v2, %v98_v2  ;;  %v27_v8 = vmul.f32 %v99_v3, %v99_v3  ;;  %v28_v9 = vmul.f32 %v102_v4, %v102_v4 }
   0x5   :  { %v29_v11 = vmul.f32 %v103_v5, %v103_v5 }
   0x6   :  { %v17_v10 = vadd.f32 %v102_v4, %v16_v6  ;;  %v30_v12 = vadd.f32 %v27_v8, %v26_v7 }
   0x8   :  { %v18_v13 = vadd.f32 %v103_v5, %v17_v10  ;;  %v31_v14 = vadd.f32 %v30_v12, %v28_v9 }
   0xa   :  { %v19_v15 = vrot.slane %v18_v13, 4  ;;  %v32_v16 = vadd.f32 %v31_v14, %v29_v11 }
   0xc   :  { %v20_v17 = vadd.f32 %v19_v15, %v18_v13  ;;  %v33_v18 = vrot.slane %v32_v16, 4 }
   0xe   :  { %v21_v19 = vrot.slane %v20_v17, 2  ;;  %v34_v20 = vadd.f32 %v33_v18, %v32_v16 }
  0x10   :  { %v22_v21 = vadd.f32 %v21_v19, %v20_v17  ;;  %v35_v22 = vrot.slane %v34_v20, 2 }
  0x12   :  { %v23_v23 = vrot.slane %v22_v21, 1  ;;  %v36_v24 = vadd.f32 %v35_v22, %v34_v20 }
  0x14   :  { %v24_v25 = vadd.f32 %v23_v23, %v22_v21  ;;  %v37_v26 = vrot.slane %v36_v24, 1 }
  0x16   :  { %v25_v27 = vmul.f32 0.03125, %v24_v25  ;;  %v38_v28 = vadd.f32 %v37_v26, %v36_v24 }
  0x18   :  { %v39_v29 = vmul.f32 0.03125, %v38_v28  ;;  %v40_v30 = vmul.f32 %v25_v27, %v25_v27  ;;  %v51_v39 = vsub.f32 %v98_v2, %v25_v27  ;;  %v52_v40 = vsub.f32 %v99_v3, %v25_v27 }
  0x19   :  { %v53_v41 = vsub.f32 %v102_v4, %v25_v27  ;;  %v54_v42 = vsub.f32 %v103_v5, %v25_v27 }
  0x1a   :  { %v41_v31 = vsub.f32 %v39_v29, %v40_v30 }
  0x1c   :  { %v42_v32 = vmax.f32 %v41_v31, 0.0 }
  0x1e   :  { %116 = vrsqrt.f32 %v42_v32  ;;  %vm45_vm0 = vcmp.eq.f32.partialorder %v42_v32, inf  ;;  %v48_v34 = vand.u32 2147483648, %v42_v32  ;;  %vm47_vm1 = vcmp.eq.f32.partialorder %v42_v32, 0.0 }
  0x28   :  { %v117_v33 = vpop.eup %116 }
  0x29   :  { %v44_v35 = vmul.f32 %v117_v33, %v42_v32 }
  0x2b   :  { %v46_v36 = vsel %vm45_vm0, %v42_v32, %v44_v35 }
  0x2c   :  { %v49_v37 = vsel %vm47_vm1, %v48_v34, %v46_v36 }
  0x2d   :  { %v50_v38 = vadd.f32 1e-06, %v49_v37 }
  0x2f   :  { %118 = vrcp.f32 %v50_v38 }
  0x39   :  { %v119_v43 = vpop.eup %118 }
  0x3a   :  { %v56_v44 = vmul.f32 %v119_v43, %v51_v39  ;;  %v57_v45 = vmul.f32 %v119_v43, %v52_v40  ;;  %v58_v46 = vmul.f32 %v119_v43, %v53_v41  ;;  %v59_v47 = vmul.f32 %v119_v43, %v54_v42 }
  0x3c   :  { %v60_v48 = vmax.f32 %v56_v44, 0.0  ;;  %v61_v49 = vmax.f32 %v57_v45, 0.0  ;;  %v62_v50 = vmax.f32 %v58_v46, 0.0  ;;  %v63_v51 = vmax.f32 %v59_v47, 0.0 }
  0x3e   :  { %v107_v52 = vpack.c.bf16 %v61_v49, %v60_v48  ;;  %v112_v53 = vpack.c.bf16 %v63_v51, %v62_v50 }
  0x40   :  { %108 = vst [vmem:[%s143_s1] sm:$0xff] %v107_v52   ;;  %115 = vst [vmem:[%s143_s1 + $0x8] sm:$0xff] %v112_v53  }

// kernel: glow_forward.28
= control target key start
LH: loop header
LB: loop body
LE: loop exit
PB: predicated region body
PF: predicated region fallthrough
CT: control target
= control target key end

     0   :  { %s335_s1 = inlined_call_operand.vmem [shape: bf16[128,128], index: 1, kind: input, shape index: {}]   ;;  %s336_s0 = inlined_call_operand.vmem [shape: bf16[32,128], index: 0, kind: input, shape index: {}]   ;;  %s337_s2 = inlined_call_operand.vmem [shape: f32[1,128], index: 2, kind: input, shape index: {}]   ;;  %s338_s3 = inlined_call_operand.vmem [shape: bf16[32,128], index: 3, kind: output, shape index: {}]  }
   0x1   :  { %v266_v0 = vld [vmem:[%s335_s1] sm:$0xff]   ;;  %v267_v1 = vld [vmem:[%s335_s1 + $0x8] sm:$0xff]   ;;  %v268_v2 = vld [vmem:[%s335_s1 + $0x10] sm:$0xff]  }
   0x2   :  { %246 = vmatprep.subr.bf16.mxu0 %v266_v0  ;;  %v269_v3 = vld [vmem:[%s335_s1 + $0x18] sm:$0xff]   ;;  %v274_v4 = vld [vmem:[%s336_s0] sm:$0xff]   ;;  %v271_v6 = vld [vmem:[%s335_s1 + $0x28] sm:$0xff]  }
   0x3   :  { %247 = vmatpush3.bf16.msra.mxu0 %v266_v0  ;;  %262 = vmatprep.mubr.bf16.mxu0 %v274_v4  ;;  %v270_v5 = vld [vmem:[%s335_s1 + $0x20] sm:$0xff]   ;;  %v272_v7 = vld [vmem:[%s335_s1 + $0x30] sm:$0xff]   ;;  %v273_v8 = vld [vmem:[%s335_s1 + $0x38] sm:$0xff]  }
   0x4   :  { %248 = vmatprep.subr.bf16.mxu0 %v267_v1  ;;  %v275_v9 = vld [vmem:[%s336_s0 + $0x8] sm:$0xff]   ;;  %v216_v11 = vld [vmem:[%s337_s2] ss:$0 sm:$0xff] }
   0x7   :  { %249 = vmatpush3.bf16.msra.mxu0 %v267_v1 }
   0x8   :  { %250 = vmatprep.subr.bf16.mxu0 %v268_v2 }
   0xb   :  { %251 = vmatpush3.bf16.msra.mxu0 %v268_v2 }
   0xc   :  { %252 = vmatprep.subr.bf16.mxu0 %v269_v3 }
   0xf   :  { %253 = vmatpush3.bf16.msra.mxu0 %v269_v3 }
  0x10   :  { %254 = vmatprep.subr.bf16.mxu0 %v270_v5 }
  0x13   :  { %255 = vmatpush3.bf16.msra.mxu0 %v270_v5 }
  0x14   :  { %256 = vmatprep.subr.bf16.mxu0 %v271_v6 }
  0x17   :  { %257 = vmatpush3.bf16.msra.mxu0 %v271_v6 }
  0x18   :  { %258 = vmatprep.subr.bf16.mxu0 %v272_v7 }
  0x1b   :  { %259 = vmatpush3.bf16.msra.mxu0 %v272_v7 }
  0x1c   :  { %260 = vmatprep.subr.bf16.mxu0 %v273_v8 }
  0x1f   :  { %261 = vmatpush3.bf16.msra.mxu0 %v273_v8 }
  0x22   :  { %263 = vmatmul.mubr.bf16.vlgmr.msra.gmra.mrb[0].mxu0 %v275_v9 }
  0xf5   :  { %v264_v10 = vpop.f32.mrb[0].mxu0 }
  0xf6   :  { %v141_v12 = vpop.f32.mrb[1].mxu0  ;;  %v180_v14 = vadd.f32 %v264_v10, %v216_v11 }
  0xf7   :  { %v265_v13 = vpop.f32.mrb[2].mxu0  ;;  %v178_v17 = vadd.f32 %v216_v11, %v141_v12 }
  0xf8   :  { %v181_v15 = vadd.f32 %v265_v13, %v216_v11  ;;  %v144_v16 = vpop.f32.mrb[3].mxu0 }
  0xf9   :  { %v179_v18 = vadd.f32 %v216_v11, %v144_v16 }
  0xfa   :  { %v233_v19 = vpack.c.bf16 %v181_v15, %v180_v14 }
  0xfb   :  { %v228_v20 = vpack.c.bf16 %v179_v18, %v178_v17 }
  0xfc   :  { %235 = vst [vmem:[%s338_s3 + $0x8] sm:$0xff] %v233_v19  }
  0xfd   :  { %229 = vst [vmem:[%s338_s3] sm:$0xff] %v228_v20  }

// kernel: glow_forward.29
= control target key start
LH: loop header
LB: loop body
LE: loop exit
PB: predicated region body
PF: predicated region fallthrough
CT: control target
= control target key end

     0   :  { %s306_s0 = inlined_call_operand.vmem [shape: bf16[72,128], index: 0, kind: input, shape index: {}]   ;;  %s307_s1 = inlined_call_operand.vmem [shape: bf16[72,128], index: 1, kind: output, shape index: {}]  }
   0x1   :  { %v173_v0 = vld [vmem:[%s306_s0] sm:$0xff]   ;;  %v208_v1 = vld [vmem:[%s306_s0 + $0x8] sm:$0xff]   ;;  %v209_v5 = vld [vmem:[%s306_s0 + $0x10] sm:$0xff]  }
   0x2   :  { %v234_v2 = vunpack.c.l.bf16 %v173_v0  ;;  %v236_v3 = vunpack.c.h.bf16 %v173_v0  ;;  %v238_v4 = vunpack.c.l.bf16 %v208_v1  ;;  %v243_v6 = vunpack.c.h.bf16 %v208_v1  ;;  %v210_v12 = vld [vmem:[%s306_s0 + $0x18] sm:$0xff]   ;;  %v16_v21 = vld [vmem:[%s306_s0 + $0x20] sm:$0xf] }
   0x3   :  { %v251_v10 = vunpack.c.l.bf16 %v209_v5  ;;  %v259_v14 = vunpack.c.h.bf16 %v209_v5  ;;  %v264_v18 = vunpack.c.l.bf16 %v210_v12  ;;  %v187_v23 = vunpack.c.h.bf16 %v210_v12 }
   0x4   :  { %v26_v7 = vadd.f32 %v236_v3, %v234_v2  ;;  %v41_v8 = vmul.f32 %v234_v2, %v234_v2  ;;  %v42_v9 = vmul.f32 %v236_v3, %v236_v3  ;;  %v43_v11 = vmul.f32 %v238_v4, %v238_v4 }
   0x5   :  { %v44_v15 = vmul.f32 %v243_v6, %v243_v6  ;;  %v45_v19 = vmul.f32 %v251_v10, %v251_v10  ;;  %v46_v24 = vmul.f32 %v259_v14, %v259_v14  ;;  %v275_v27 = vunpack.c.l.bf16 %v16_v21 }
   0x6   :  { %v27_v13 = vadd.f32 %v238_v4, %v26_v7  ;;  %v50_v16 = vadd.f32 %v42_v9, %v41_v8  ;;  %v47_v28 = vmul.f32 %v264_v18, %v264_v18  ;;  %v48_v31 = vmul.f32 %v187_v23, %v187_v23 }
   0x7   :  { %v49_v34 = vmul.f32 %v275_v27, %v275_v27 }
   0x8   :  { %v28_v17 = vadd.f32 %v243_v6, %v27_v13  ;;  %v51_v20 = vadd.f32 %v50_v16, %v43_v11 }
   0xa   :  { %v29_v22 = vadd.f32 %v251_v10, %v28_v17  ;;  %v52_v25 = vadd.f32 %v51_v20, %v44_v15 }
   0xc   :  { %v30_v26 = vadd.f32 %v259_v14, %v29_v22  ;;  %v53_v29 = vadd.f32 %v52_v25, %v45_v19 }
   0xe   :  { %v31_v30 = vadd.f32 %v264_v18, %v30_v26  ;;  %v54_v32 = vadd.f32 %v53_v29, %v46_v24 }
  0x10   :  { %v32_v33 = vadd.f32 %v187_v23, %v31_v30  ;;  %v55_v35 = vadd.f32 %v54_v32, %v47_v28 }
  0x12   :  { %v33_v36 = vadd.f32 %v32_v33, %v275_v27  ;;  %v56_v37 = vadd.f32 %v55_v35, %v48_v31 }
  0x14   :  { %v34_v38 = vrot.slane %v33_v36, 4  ;;  %v57_v39 = vadd.f32 %v56_v37, %v49_v34 }
  0x16   :  { %v35_v40 = vadd.f32 %v34_v38, %v33_v36  ;;  %v58_v41 = vrot.slane %v57_v39, 4 }
  0x18   :  { %v36_v42 = vrot.slane %v35_v40, 2  ;;  %v59_v43 = vadd.f32 %v58_v41, %v57_v39 }
  0x1a   :  { %v37_v44 = vadd.f32 %v36_v42, %v35_v40  ;;  %v60_v45 = vrot.slane %v59_v43, 2 }
  0x1c   :  { %v38_v46 = vrot.slane %v37_v44, 1  ;;  %v61_v47 = vadd.f32 %v60_v45, %v59_v43 }
  0x1e   :  { %v39_v48 = vadd.f32 %v38_v46, %v37_v44  ;;  %v62_v49 = vrot.slane %v61_v47, 1 }
  0x20   :  { %v40_v50 = vmul.f32 0.013888889, %v39_v48  ;;  %v63_v51 = vadd.f32 %v62_v49, %v61_v47 }
  0x22   :  { %v65_v52 = vmul.f32 %v40_v50, %v40_v50  ;;  %v64_v53 = vmul.f32 0.013888889, %v63_v51  ;;  %v76_v62 = vsub.f32 %v234_v2, %v40_v50  ;;  %v77_v63 = vsub.f32 %v236_v3, %v40_v50 }
  0x23   :  { %v78_v0 = vsub.f32 %v238_v4, %v40_v50  ;;  %v79_v1 = vsub.f32 %v243_v6, %v40_v50  ;;  %v80_v5 = vsub.f32 %v251_v10, %v40_v50  ;;  %v81_v7 = vsub.f32 %v259_v14, %v40_v50 }
  0x24   :  { %v66_v54 = vsub.f32 %v64_v53, %v65_v52  ;;  %v82_v8 = vsub.f32 %v264_v18, %v40_v50  ;;  %v83_v9 = vsub.f32 %v187_v23, %v40_v50  ;;  %v84_v12 = vsub.f32 %v275_v27, %v40_v50 }
  0x26   :  { %v67_v55 = vmax.f32 %v66_v54, 0.0 }
  0x28   :  { %214 = vrsqrt.f32 %v67_v55  ;;  %vm70_vm0 = vcmp.eq.f32.partialorder %v67_v55, inf  ;;  %v73_v57 = vand.u32 2147483648, %v67_v55  ;;  %vm72_vm1 = vcmp.eq.f32.partialorder %v67_v55, 0.0 }
  0x32   :  { %v215_v56 = vpop.eup %214 }
  0x33   :  { %v69_v58 = vmul.f32 %v215_v56, %v67_v55 }
  0x35   :  { %v71_v59 = vsel %vm70_vm0, %v67_v55, %v69_v58 }
  0x36   :  { %v74_v60 = vsel %vm72_vm1, %v73_v57, %v71_v59 }
  0x37   :  { %v75_v61 = vadd.f32 1e-06, %v74_v60 }
  0x39   :  { %216 = vrcp.f32 %v75_v61 }
  0x43   :  { %v217_v11 = vpop.eup %216 }
  0x44   :  { %v86_v13 = vmul.f32 %v217_v11, %v76_v62  ;;  %v87_v15 = vmul.f32 %v217_v11, %v77_v63  ;;  %v88_v16 = vmul.f32 %v217_v11, %v78_v0  ;;  %v89_v2 = vmul.f32 %v217_v11, %v79_v1 }
  0x45   :  { %v90_v17 = vmul.f32 %v217_v11, %v80_v5  ;;  %v91_v3 = vmul.f32 %v217_v11, %v81_v7  ;;  %v92_v19 = vmul.f32 %v217_v11, %v82_v8  ;;  %v93_v4 = vmul.f32 %v217_v11, %v83_v9 }
  0x46   :  { %v95_v20 = vmax.f32 %v86_v13, 0.0  ;;  %v96_v6 = vmax.f32 %v87_v15, 0.0  ;;  %v97_v21 = vmax.f32 %v88_v16, 0.0  ;;  %v98_v10 = vmax.f32 %v89_v2, 0.0 }
  0x47   :  { %v99_v22 = vmax.f32 %v90_v17, 0.0  ;;  %v100_v14 = vmax.f32 %v91_v3, 0.0  ;;  %v101_v24 = vmax.f32 %v92_v19, 0.0  ;;  %v102_v18 = vmax.f32 %v93_v4, 0.0 }
  0x48   :  { %v191_v23 = vpack.c.bf16 %v96_v6, %v95_v20  ;;  %v196_v25 = vpack.c.bf16 %v98_v10, %v97_v21  ;;  %v94_v26 = vmul.f32 %v217_v11, %v84_v12 }
  0x49   :  { %v201_v27 = vpack.c.bf16 %v100_v14, %v99_v22  ;;  %v206_v28 = vpack.c.bf16 %v102_v18, %v101_v24 }
  0x4a   :  { %192 = vst [vmem:[%s307_s1] sm:$0xff] %v191_v23   ;;  %211 = vst [vmem:[%s307_s1 + $0x8] sm:$0xff] %v196_v25   ;;  %v103_v29 = vmax.f32 %v94_v26, 0.0 }
  0x4b   :  { %212 = vst [vmem:[%s307_s1 + $0x10] sm:$0xff] %v201_v27   ;;  %213 = vst [vmem:[%s307_s1 + $0x18] sm:$0xff] %v206_v28  }
  0x4c   :  { %v171_v30 = vpack.c.bf16 %v103_v29, %v103_v29 }
  0x4e   :  { %149 = vst [vmem:[%s307_s1 + $0x20] sm:$0xf] %v171_v30 }

// kernel: glow_forward.30
= control target key start
LH: loop header
LB: loop body
LE: loop exit
PB: predicated region body
PF: predicated region fallthrough
CT: control target
= control target key end

     0   :  { %s2370_s21 = smov 0   ;;  %s2827_s0 = inlined_call_operand.vmem [shape: bf16[2,44,128], index: 0, kind: input, shape index: {}]   ;;  %s2828_s1 = inlined_call_operand.vmem [shape: bf16[1152,32], index: 1, kind: input, shape index: {}]   ;;  %s2829_s2 = inlined_call_operand.vmem [shape: f32[1,32], index: 2, kind: input, shape index: {}]   ;;  %s2830_s3 = inlined_call_operand.vmem [shape: f32[1,32], index: 3, kind: input, shape index: {}]   ;;  %s2831_s4 = inlined_call_operand.vmem [shape: f32[2,24,16], index: 4, kind: input, shape index: {}]   ;;  %s2832_s5 = inlined_call_operand.vmem [shape: f32[2,24,16], index: 5, kind: output, shape index: {0}]   ;;  %s2833_s6 = inlined_call_operand.vmem [shape: f32[2,1,1], index: 6, kind: output, shape index: {1}]  }
   0x1 LB: > { %s1809_s22 = sadd.s32 4294967295, %s2330_s21   ;;  %p1813_p0 = scmp.ge.s32.totalorder %s2330_s21, 1  ;;  %s2330_s21 = sphi %s2370_s21, %s17_s21  }
   0x2   : > { %p225_p1 = scmp.lt.s32.totalorder %s2330_s21, 3 }
   0x4   : > { %p226_p2 = pnand %p1813_p0, %p225_p1 }
   0x5   : > { %v2201_v0 = vld [vmem:[%s2828_s1 + $0x40] sm:$0xff] (!%p226_p2)   ;;  %p263_p3 = scmp.lt.s32.totalorder (!%p226_p2), %s1809_s22, 1  ;;  %v2203_v2 = vld [vmem:[%s2828_s1 + $0x48] sm:$0xff] (!%p226_p2)   ;;  %v2205_v4 = vld [vmem:[%s2828_s1 + $0x50] sm:$0xff] (!%p226_p2)   ;;  %vm328_vm0 = vsmask.f32 (!%p226_p2), 7424 }
   0x6   : > { %229 = sbr.rel (%p226_p2) target bundleno = 754 (0x2f2), region = 40  ;;  %v2202_v1 = vld [vmem:[%s2828_s1] sm:$0xff] (!%p226_p2)   ;;  %2001 = vmatprep.subr.bf16.mxu0 (!%p226_p2), %v2201_v0  ;;  %v2204_v3 = vld [vmem:[%s2828_s1 + $0x8] sm:$0xff] (!%p226_p2)   ;;  %v2206_v5 = vld [vmem:[%s2828_s1 + $0x10] sm:$0xff] (!%p226_p2)   ;;  %vm561_vm1 = vcmask (!%p226_p2), 1046528   ;;  %vm690_vm2 = vcmask (!%p226_p2), 1044480  }
   0x7   : > { %2021 = vmatprep.subr.bf16.mxu1 (!%p226_p2), %v2202_v1  ;;  %2002 = vmatpush3.bf16.msra.mxu0 (!%p226_p2), %v2201_v0  ;;  %v2207_v6 = vld [vmem:[%s2828_s1 + $0x58] sm:$0xff] (!%p226_p2)   ;;  %v2209_v8 = vld [vmem:[%s2828_s1 + $0x60] sm:$0xff] (!%p226_p2)   ;;  %v2211_v10 = vld [vmem:[%s2828_s1 + $0x68] sm:$0xff] (!%p226_p2)   ;;  %vm815_vm3 = vsmask.f32 (!%p226_p2), 4352  ;;  %vm1083_vm4 = vcmask (!%p226_p2), 1045504  }
   0x8   : > { %2022 = vmatpush3.bf16.msra.mxu1 (!%p226_p2), %v2202_v1  ;;  %2003 = vmatprep.subr.bf16.mxu0 (!%p226_p2), %v2203_v2  ;;  %v2208_v7 = vld [vmem:[%s2828_s1 + $0x18] sm:$0xff] (!%p226_p2)   ;;  %v2210_v9 = vld [vmem:[%s2828_s1 + $0x20] sm:$0xff] (!%p226_p2)   ;;  %v2212_v14 = vld [vmem:[%s2828_s1 + $0x28] sm:$0xff] (!%p226_p2)   ;;  %vm1208_vm5 = vsmask.f32 (!%p226_p2), 5376  ;;  %s2333_s30 = smov (!%p226_p2), 112  }
   0x9   : > { %2023 = vmatprep.subr.bf16.mxu1 (!%p226_p2), %v2204_v3  ;;  %v2213_v20 = vld [vmem:[%s2828_s1 + $0x70] sm:$0xff] (!%p226_p2)   ;;  %v2215_v26 = vld [vmem:[%s2828_s1 + $0x78] sm:$0xff] (!%p226_p2)   ;;  %v2220_v30 = vld [vmem:[%s2828_s1 + $0x80] sm:$0xff] (!%p226_p2)   ;;  %s2334_s10 = smov (!%p226_p2), 16  }
   0xa   : > { %v2214_v22 = vld [vmem:[%s2828_s1 + $0x30] sm:$0xff] (!%p226_p2)   ;;  %v2216_v27 = vld [vmem:[%s2828_s1 + $0x38] sm:$0xff] (!%p226_p2)   ;;  %v2221_v31 = vld [vmem:[%s2828_s1 + $0xc0] sm:$0xff] (!%p226_p2)  }
   0xb   : > { %2004 = vmatpush3.bf16.msra.mxu0 (!%p226_p2), %v2203_v2  ;;  %v2222_v34 = vld [vmem:[%s2828_s1 + $0x88] sm:$0xff] (!%p226_p2)   ;;  %v2224_v41 = vld [vmem:[%s2828_s1 + $0x90] sm:$0xff] (!%p226_p2)   ;;  %v2226_v49 = vld [vmem:[%s2828_s1 + $0x98] sm:$0xff] (!%p226_p2)  }
   0xc   : > { %2024 = vmatpush3.bf16.msra.mxu1 (!%p226_p2), %v2204_v3  ;;  %2005 = vmatprep.subr.bf16.mxu0 (!%p226_p2), %v2205_v4  ;;  %v2223_v35 = vld [vmem:[%s2828_s1 + $0xc8] sm:$0xff] (!%p226_p2)   ;;  %v2225_v44 = vld [vmem:[%s2828_s1 + $0xd0] sm:$0xff] (!%p226_p2)   ;;  %v2227_v51 = vld [vmem:[%s2828_s1 + $0xd8] sm:$0xff] (!%p226_p2)  }
   0xd   : > { %s2855_s22 = smov (!%p263_p3, %s1809_s22), 1  ;;  %2025 = vmatprep.subr.bf16.mxu1 %v2206_v5  ;;  %v2228_v52 = vld [vmem:[%s2828_s1 + $0xa0] sm:$0xff]   ;;  %v2230_v54 = vld [vmem:[%s2828_s1 + $0xa8] sm:$0xff]   ;;  %v2232_v56 = vld [vmem:[%s2828_s1 + $0xb0] sm:$0xff]  }
   0xe   : > { %s2405_s15 = smul.u32 24, %s2855_s22  ;;  %v2229_v53 = vld [vmem:[%s2828_s1 + $0xe0] sm:$0xff]   ;;  %v2231_v55 = vld [vmem:[%s2828_s1 + $0xe8] sm:$0xff]   ;;  %v2233_v61 = vld [vmem:[%s2828_s1 + $0xf0] sm:$0xff]  }
   0xf   : > { %2006 = vmatpush3.bf16.msra.mxu0 %v2205_v4  ;;  %v2234_v0 = vld [vmem:[%s2828_s1 + $0xb8] sm:$0xff]  }
  0x10   : > { %2026 = vmatpush3.bf16.msra.mxu1 %v2206_v5  ;;  %2007 = vmatprep.subr.bf16.mxu0 %v2207_v6  ;;  %s2417_s24 = scalar_lea.vmem %s2827_s0, %s2405_s15  ;;  %v2235_v1 = vld [vmem:[%s2828_s1 + $0xf8] sm:$0xff]   ;;  %s272_s9 = scalar_lea.vmem %s2831_s4, %s2405_s15 }
  0x11   : > { %2027 = vmatprep.subr.bf16.mxu1 %v2208_v7  ;;  %v282_v11 = vld [vmem:[%s2417_s24] sm:$0xf]  ;;  %v2424_v12 = vld [vmem:[%s2417_s24 + $0x4] sm:$0xf]  ;;  %v2427_v13 = vld [vmem:[%s2417_s24 + $0x8] sm:$0xf]  ;;  %s277_s13 = scalar_lea.vmem %s2832_s5, %s2405_s15  ;;  %s280_s15 = scalar_lea.vmem %s2833_s6, %s2855_s22 }
  0x12   : > { %v301_v15 = vld [vmem:[%s2417_s24 + $0xc] sm:$0x1]  ;;  %v1817_v16 = vcombine.low %v282_v11, %v2424_v12  ;;  %v1827_v33 = vcombine.low %v2427_v13, %v2427_v13  ;;  %v541_v36 = vld [vmem:[%s2417_s24] sm:$0xe] }
  0x13   : > { %2008 = vmatpush3.bf16.msra.mxu0 %v2207_v6  ;;  %v2435_v17 = vcombine.low %v2427_v13, %v301_v15  ;;  %v1836_v37 = vcombine.low %v541_v36, %v2424_v12  ;;  %v666_v39 = vld [vmem:[%s2417_s24] sm:$0x8]  ;;  %v667_v40 = vld [vmem:[%s2417_s24 + $0xc] sm:$0x7]  ;;  %v1864_v15 = vcombine.low %v2424_v12, %v2427_v13 }
  0x14   : > { %2028 = vmatpush3.bf16.msra.mxu1 %v2208_v7  ;;  %2009 = vmatprep.subr.bf16.mxu0 %v2209_v8  ;;  %v330_v18 = vshrl.u32 %v1817_v16, 16  ;;  %v332_v19 = vshll.u32 %v1817_v16, 16  ;;  %v1845_v42 = vcombine.low %v666_v39, %v2424_v12  ;;  %v1846_v43 = vcombine.low %v2427_v13, %v667_v40  ;;  %v2508_v57 = vld [vmem:[%s2417_s24 + $0xc] sm:$0xf]  ;;  %v2237_v6 = vld [vmem:[%s2828_s1 + $0x100] sm:$0xff]   ;;  %v2245_v12 = vld [vmem:[%s2828_s1 + $0x118] sm:$0xff]  }
  0x15   : > { %2029 = vmatprep.subr.bf16.mxu1 %v2210_v9  ;;  %2037 = vmatprep.mubr.bf16.mxu1 %v1817_v16  ;;  %v337_v21 = vshll.u32 %v2435_v17, 16  ;;  %v341_v29 = vshrl.u32 %v2435_v17, 16  ;;  %v563_v38 = vrot.slane %v2435_v17, 1  ;;  %v562_v45 = vrot.slane %v1836_v37, 1  ;;  %v2240_v7 = vld [vmem:[%s2828_s1 + $0x140] sm:$0xff]   ;;  %v2242_v11 = vld [vmem:[%s2828_s1 + $0x148] sm:$0xff]  }
  0x16   : > { %v334_v23 = vrot.slane %v332_v19, 1  ;;  %v691_v46 = vrot.slane %v1845_v42, 3  ;;  %v2479_v47 = vrot.slane %v1846_v43, 3  ;;  %v817_v58 = vshrl.u32 %v1845_v42, 16  ;;  %v2243_v16 = vld [vmem:[%s2828_s1 + $0x110] sm:$0xff]   ;;  %v2253_v40 = vld [vmem:[%s2828_s1 + $0x138] sm:$0xff]  }
  0x17   : > { %2010 = vmatpush3.bf16.msra.mxu0 %v2209_v8  ;;  %v339_v24 = vrot.slane %v337_v21, 1  ;;  %v564_v48 = vsel %vm561_vm1, %v562_v45, %v563_v38  ;;  %v820_v59 = vshll.u32 %v1845_v42, 16  ;;  %v1855_v60 = vcombine.low %v2427_v13, %v2508_v57  ;;  %v2244_v17 = vld [vmem:[%s2828_s1 + $0x150] sm:$0xff]   ;;  %v2246_v13 = vld [vmem:[%s2828_s1 + $0x158] sm:$0xff]   ;;  %v2248_v21 = vld [vmem:[%s2828_s1 + $0x160] sm:$0xff]  }
  0x18   : > { %2030 = vmatpush3.bf16.msra.mxu1 %v2210_v9  ;;  %2011 = vmatprep.subr.bf16.mxu0 %v2211_v10  ;;  %v335_v25 = vor.u32 %v334_v23, %v330_v18  ;;  %v693_v50 = vsel %vm690_vm2, %v691_v46, %v2479_v47  ;;  %v819_v2 = vrot.slane %v817_v58, 3  ;;  %v1055_v18 = vld [vmem:[%s2417_s24 + $0xc] sm:$0xf]  ;;  %v1188_v19 = vld [vmem:[%s2417_s24 + $0x10] sm:$0x7] }
  0x19   : > { %2031 = vmatprep.subr.bf16.mxu1 %v2212_v14  ;;  %v343_v32 = vor.u32 %v341_v29, %v339_v24  ;;  %v825_v62 = vshrl.u32 %v1855_v60, 16  ;;  %v828_v63 = vshll.u32 %v1855_v60, 16  ;;  %v822_v3 = vrot.slane %v820_v59, 4  ;;  %v1054_v23 = vld [vmem:[%s2417_s24 + $0x8] sm:$0xf]  ;;  %v2262_v58 = vld [vmem:[%s2828_s1 + $0x190] sm:$0xff]  }
  0x1a   : > { %v340_v28 = vsel %vm328_vm0, %v335_v25, %v339_v24  ;;  %v1327_v24 = vld [vmem:[%s2417_s24 + $0x4] sm:$0x8]  ;;  %v2250_v29 = vld [vmem:[%s2828_s1 + $0x168] sm:$0xff]   ;;  %v2263_v59 = vld [vmem:[%s2828_s1 + $0x1d0] sm:$0xff]  }
  0x1b   : > { %2012 = vmatpush3.bf16.msra.mxu0 %v2211_v10  ;;  %2017 = vmatprep.mubr.bf16.mxu0 %v340_v28  ;;  %v827_v4 = vrot.slane %v825_v62, 3  ;;  %v830_v5 = vrot.slane %v828_v63, 4  ;;  %v823_v8 = vor.u32 %v822_v3, %v819_v2  ;;  %v2241_v10 = vld [vmem:[%s2828_s1 + $0x108] sm:$0xff]   ;;  %v1893_v25 = vcombine.low %v1327_v24, %v1054_v23  ;;  %v1053_v28 = vld [vmem:[%s2417_s24 + $0x4] sm:$0xc]  ;;  %v2264_v60 = vld [vmem:[%s2828_s1 + $0x198] sm:$0xff]  }
  0x1c   : > { %2032 = vmatpush3.bf16.msra.mxu1 %v2212_v14  ;;  %2013 = vmatprep.subr.bf16.mxu0 %v2213_v20  ;;  %v2266_v62 = vld [vmem:[%s2828_s1 + $0x1a0] sm:$0xff]   ;;  %v2270_v2 = vld [vmem:[%s2828_s1 + $0x1b0] sm:$0xff]  }
  0x1d   : > { %2033 = vmatprep.subr.bf16.mxu1 %v2214_v22  ;;  %v2527_v9 = vor.u32 %v830_v5, %v827_v4  ;;  %v2267_v63 = vld [vmem:[%s2828_s1 + $0x1e0] sm:$0xff]   ;;  %v2271_v3 = vld [vmem:[%s2828_s1 + $0x1f0] sm:$0xff]   ;;  %v2272_v4 = vld [vmem:[%s2828_s1 + $0x1b8] sm:$0xff]  }
  0x1e   : > { %v2273_v5 = vld [vmem:[%s2828_s1 + $0x1f8] sm:$0xff]  }
  0x1f   : > { %2014 = vmatpush3.bf16.msra.mxu0 %v2213_v20  ;;  %v832_v14 = vsel %vm815_vm3, %v823_v8, %v2527_v9  ;;  %v2247_v20 = vld [vmem:[%s2828_s1 + $0x120] sm:$0xff]   ;;  %v2279_v8 = vld [vmem:[%s2828_s1 + $0x210] sm:$0xff]  }
  0x20   : > { %2034 = vmatpush3.bf16.msra.mxu1 %v2214_v22  ;;  %2015 = vmatprep.subr.bf16.mxu0 %v2215_v26  ;;  %v2561_v22 = vcombine.low %v1055_v18, %v1188_v19 }
  0x21   : > { %2035 = vmatprep.subr.bf16.mxu1 %v2216_v27 }
  0x22   : > { %v1221_v39 = vshll.u32 %v2561_v22, 16 }
  0x23   : > { %2016 = vmatpush3.bf16.msra.mxu0 %v2215_v26  ;;  %v1348_v26 = vrot.slane %v2561_v22, 3 }
  0x24   : > { %2036 = vmatpush3.bf16.msra.mxu1 %v2216_v27  ;;  %2041 = vmatprep.subr.bf16.mxu0 %v2220_v30  ;;  %v2249_v27 = vld [vmem:[%s2828_s1 + $0x128] sm:$0xff]   ;;  %v1223_v46 = vrot.slane %v1221_v39, 3 }
  0x25   : > { %2061 = vmatprep.subr.bf16.mxu1 %v2221_v31 }
  0x26   : > { %2018 = vmatmul.mubr.bf16.vlgmr.msra.gmra.mrb[0].mxu0 %v343_v32 }
  0x27   : > { %2038 = vmatmul.mubr.bf16.vlgmr.msra.gmra.mrb[0].mxu1 %v1827_v33  ;;  %2042 = vmatpush3.bf16.msra.mxu0 %v2220_v30  ;;  %v1347_v30 = vrot.slane %v1893_v25, 3  ;;  %v2251_v33 = vld [vmem:[%s2828_s1 + $0x130] sm:$0xff]  }
  0x28   : > { %2062 = vmatpush3.bf16.msra.mxu1 %v2221_v31  ;;  %2043 = vmatprep.subr.bf16.mxu0 %v2222_v34  ;;  %v1874_v31 = vcombine.low %v1053_v28, %v1054_v23 }
  0x29   : > { %2063 = vmatprep.subr.bf16.mxu1 %v2223_v35  ;;  %2057 = vmatprep.mubr.bf16.mxu0 %v564_v48  ;;  %v2576_v32 = vsel %vm690_vm2, %v1347_v30, %v1348_v26  ;;  %v2259_v48 = vld [vmem:[%s2828_s1 + $0x1c0] sm:$0xff]  }
  0x2a   : > { %2077 = vmatprep.mubr.bf16.mxu1 %v693_v50  ;;  %v1210_v36 = vshrl.u32 %v1874_v31, 16  ;;  %v1213_v37 = vshll.u32 %v1874_v31, 16 }
  0x2b   : > { %2044 = vmatpush3.bf16.msra.mxu0 %v2222_v34  ;;  %v2252_v34 = vld [vmem:[%s2828_s1 + $0x170] sm:$0xff]  }
  0x2c   : > { %2064 = vmatpush3.bf16.msra.mxu1 %v2223_v35  ;;  %2045 = vmatprep.subr.bf16.mxu0 %v2224_v41  ;;  %v1056_v35 = vld [vmem:[%s2417_s24 + $0x10] sm:$0x3]  ;;  %v1212_v43 = vrot.slane %v1210_v36, 2 }
  0x2d   : > { %2065 = vmatprep.subr.bf16.mxu1 %v2225_v44  ;;  %v1875_v42 = vcombine.low %v1055_v18, %v1056_v35 }
  0x2f   : > { %2046 = vmatpush3.bf16.msra.mxu0 %v2224_v41  ;;  %v2254_v41 = vld [vmem:[%s2828_s1 + $0x178] sm:$0xff]   ;;  %v1085_v50 = vrot.slane %v1875_v42, 2 }
  0x30   : > { %2066 = vmatpush3.bf16.msra.mxu1 %v2225_v44  ;;  %2047 = vmatprep.subr.bf16.mxu0 %v2226_v49  ;;  %v1215_v44 = vrot.slane %v1213_v37, 3 }
  0x31   : > { %2067 = vmatprep.subr.bf16.mxu1 %v2227_v51 }
  0x33   : > { %2048 = vmatpush3.bf16.msra.mxu0 %v2226_v49  ;;  %v1084_v49 = vrot.slane %v1874_v31, 2 }
  0x34   : > { %2068 = vmatpush3.bf16.msra.mxu1 %v2227_v51  ;;  %2049 = vmatprep.subr.bf16.mxu0 %v2228_v52  ;;  %v1865_v51 = vcombine.low %v2508_v57, %v2508_v57 }
  0x35   : > { %2069 = vmatprep.subr.bf16.mxu1 %v2229_v53 }
  0x37   : > { %2050 = vmatpush3.bf16.msra.mxu0 %v2228_v52  ;;  %v1216_v52 = vor.u32 %v1215_v44, %v1212_v43 }
  0x38   : > { %2070 = vmatpush3.bf16.msra.mxu1 %v2229_v53  ;;  %2051 = vmatprep.subr.bf16.mxu0 %v2230_v54 }
  0x39   : > { %2071 = vmatprep.subr.bf16.mxu1 %v2231_v55 }
  0x3b   : > { %2052 = vmatpush3.bf16.msra.mxu0 %v2230_v54  ;;  %v2260_v54 = vld [vmem:[%s2828_s1 + $0x188] sm:$0xff]  }
  0x3c   : > { %2072 = vmatpush3.bf16.msra.mxu1 %v2231_v55  ;;  %2053 = vmatprep.subr.bf16.mxu0 %v2232_v56  ;;  %v2261_v55 = vld [vmem:[%s2828_s1 + $0x1c8] sm:$0xff]  }
  0x3d   : > { %2073 = vmatprep.subr.bf16.mxu1 %v2233_v61 }
  0x3f   : > { %2054 = vmatpush3.bf16.msra.mxu0 %v2232_v56  ;;  %v1086_v56 = vsel %vm1083_vm4, %v1084_v49, %v1085_v50 }
  0x40   : > { %2074 = vmatpush3.bf16.msra.mxu1 %v2233_v61  ;;  %2055 = vmatprep.subr.bf16.mxu0 %v2234_v0  ;;  %v2265_v61 = vld [vmem:[%s2828_s1 + $0x1d8] sm:$0xff]  }
  0x41   : > { %2075 = vmatprep.subr.bf16.mxu1 %v2235_v1 }
  0x43   : > { %2056 = vmatpush3.bf16.msra.mxu0 %v2234_v0  ;;  %v2268_v0 = vld [vmem:[%s2828_s1 + $0x1a8] sm:$0xff]  }
  0x44   : > { %2076 = vmatpush3.bf16.msra.mxu1 %v2235_v1  ;;  %2081 = vmatprep.subr.bf16.mxu0 %v2237_v6  ;;  %v2269_v1 = vld [vmem:[%s2828_s1 + $0x1e8] sm:$0xff]  }
  0x45   : > { %2101 = vmatprep.subr.bf16.mxu1 %v2240_v7 }
  0x46   : > { %2058 = vmatmul.mubr.bf16.vlgmr.msra.gmra.mrb[4].mxu0 %v563_v38  ;;  %v1218_v38 = vshrl.u32 %v2561_v22, 16 }
  0x47   : > { %2082 = vmatpush3.bf16.msra.mxu0 %v2237_v6  ;;  %2078 = vmatmul.mubr.bf16.vlgmr.msra.gmra.mrb[4].mxu1 %v2479_v47  ;;  %v2256_v47 = vld [vmem:[%s2828_s1 + $0x180] sm:$0xff]  }
  0x48   : > { %2102 = vmatpush3.bf16.msra.mxu1 %v2240_v7  ;;  %2083 = vmatprep.subr.bf16.mxu0 %v2241_v10  ;;  %v1220_v45 = vrot.slane %v1218_v38, 2  ;;  %v2277_v6 = vld [vmem:[%s2828_s1 + $0x200] sm:$0xff]   ;;  %v2278_v7 = vld [vmem:[%s2828_s1 + $0x208] sm:$0xff]  }
  0x49   : > { %2103 = vmatprep.subr.bf16.mxu1 %v2242_v11  ;;  %2097 = vmatprep.mubr.bf16.mxu0 %v832_v14  ;;  %v2283_v14 = vld [vmem:[%s2828_s1 + $0x230] sm:$0xff]  }
  0x4a   : > { %2117 = vmatprep.mubr.bf16.mxu1 %v1864_v15  ;;  %v1224_v53 = vor.u32 %v1223_v46, %v1220_v45  ;;  %v2284_v15 = vld [vmem:[%s2828_s1 + $0x238] sm:$0xff]  }
  0x4b   : > { %2084 = vmatpush3.bf16.msra.mxu0 %v2241_v10  ;;  %v2281_v10 = vld [vmem:[%s2828_s1 + $0x220] sm:$0xff]  }
  0x4c   : > { %2104 = vmatpush3.bf16.msra.mxu1 %v2242_v11  ;;  %2085 = vmatprep.subr.bf16.mxu0 %v2243_v16  ;;  %v1225_v57 = vsel %vm1208_vm5, %v1216_v52, %v1224_v53  ;;  %v2282_v11 = vld [vmem:[%s2828_s1 + $0x228] sm:$0xff]  }
  0x4d   : > { %2105 = vmatprep.subr.bf16.mxu1 %v2244_v17 }
  0x4f   : > { %2086 = vmatpush3.bf16.msra.mxu0 %v2243_v16 }
  0x50   : > { %2106 = vmatpush3.bf16.msra.mxu1 %v2244_v17  ;;  %2087 = vmatprep.subr.bf16.mxu0 %v2245_v12 }
  0x51   : > { %2107 = vmatprep.subr.bf16.mxu1 %v2246_v13 }
  0x53   : > { %2088 = vmatpush3.bf16.msra.mxu0 %v2245_v12 }
  0x54   : > { %2108 = vmatpush3.bf16.msra.mxu1 %v2246_v13  ;;  %2089 = vmatprep.subr.bf16.mxu0 %v2247_v20 }
  0x55   : > { %2109 = vmatprep.subr.bf16.mxu1 %v2248_v21 }
  0x57   : > { %2090 = vmatpush3.bf16.msra.mxu0 %v2247_v20 }
  0x58   : > { %2110 = vmatpush3.bf16.msra.mxu1 %v2248_v21  ;;  %2091 = vmatprep.subr.bf16.mxu0 %v2249_v27 }
  0x59   : > { %2111 = vmatprep.subr.bf16.mxu1 %v2250_v29 }
  0x5b   : > { %2092 = vmatpush3.bf16.msra.mxu0 %v2249_v27 }
  0x5c   : > { %2112 = vmatpush3.bf16.msra.mxu1 %v2250_v29  ;;  %2093 = vmatprep.subr.bf16.mxu0 %v2251_v33 }
  0x5d   : > { %2113 = vmatprep.subr.bf16.mxu1 %v2252_v34 }
  0x5f   : > { %2094 = vmatpush3.bf16.msra.mxu0 %v2251_v33 }
  0x60   : > { %2114 = vmatpush3.bf16.msra.mxu1 %v2252_v34  ;;  %2095 = vmatprep.subr.bf16.mxu0 %v2253_v40 }
  0x61   : > { %2115 = vmatprep.subr.bf16.mxu1 %v2254_v41 }
  0x63   : > { %2096 = vmatpush3.bf16.msra.mxu0 %v2253_v40 }
  0x64   : > { %2116 = vmatpush3.bf16.msra.mxu1 %v2254_v41  ;;  %2121 = vmatprep.subr.bf16.mxu0 %v2256_v47 }
  0x65   : > { %2141 = vmatprep.subr.bf16.mxu1 %v2259_v48 }
  0x66   : > { %2098 = vmatmul.mubr.bf16.vlgmr.msra.gmra.mrb[8].mxu0 %v2527_v9  ;;  %v2280_v9 = vld [vmem:[%s2828_s1 + $0x218] sm:$0xff]  }
  0x67   : > { %2122 = vmatpush3.bf16.msra.mxu0 %v2256_v47  ;;  %2118 = vmatmul.mubr.bf16.vlgmr.msra.gmra.mrb[8].mxu1 %v1865_v51 }
  0x68   : > { %2142 = vmatpush3.bf16.msra.mxu1 %v2259_v48  ;;  %2123 = vmatprep.subr.bf16.mxu0 %v2260_v54 }
  0x69   : > { %2143 = vmatprep.subr.bf16.mxu1 %v2261_v55  ;;  %2137 = vmatprep.mubr.bf16.mxu0 %v1086_v56 }
  0x6a   : > { %2157 = vmatprep.mubr.bf16.mxu1 %v1225_v57 }
  0x6b   : > { %2124 = vmatpush3.bf16.msra.mxu0 %v2260_v54 }
  0x6c   : > { %2144 = vmatpush3.bf16.msra.mxu1 %v2261_v55  ;;  %2125 = vmatprep.subr.bf16.mxu0 %v2262_v58 }
  0x6d   : > { %2145 = vmatprep.subr.bf16.mxu1 %v2263_v59 }
  0x6f   : > { %2126 = vmatpush3.bf16.msra.mxu0 %v2262_v58 }
  0x70   : > { %2146 = vmatpush3.bf16.msra.mxu1 %v2263_v59  ;;  %2127 = vmatprep.subr.bf16.mxu0 %v2264_v60 }
  0x71   : > { %2147 = vmatprep.subr.bf16.mxu1 %v2265_v61 }
  0x73   : > { %2128 = vmatpush3.bf16.msra.mxu0 %v2264_v60 }
  0x74   : > { %2148 = vmatpush3.bf16.msra.mxu1 %v2265_v61  ;;  %2129 = vmatprep.subr.bf16.mxu0 %v2266_v62 }
  0x75   : > { %2149 = vmatprep.subr.bf16.mxu1 %v2267_v63 }
  0x77   : > { %2130 = vmatpush3.bf16.msra.mxu0 %v2266_v62 }
  0x78   : > { %2150 = vmatpush3.bf16.msra.mxu1 %v2267_v63  ;;  %2131 = vmatprep.subr.bf16.mxu0 %v2268_v0 }
  0x79   : > { %2151 = vmatprep.subr.bf16.mxu1 %v2269_v1 }
  0x7b   : > { %2132 = vmatpush3.bf16.msra.mxu0 %v2268_v0 }
  0x7c   : > { %2152 = vmatpush3.bf16.msra.mxu1 %v2269_v1  ;;  %2133 = vmatprep.subr.bf16.mxu0 %v2270_v2 }
  0x7d   : > { %2153 = vmatprep.subr.bf16.mxu1 %v2271_v3 }
  0x7f   : > { %2134 = vmatpush3.bf16.msra.mxu0 %v2270_v2 }
  0x80   : > { %2154 = vmatpush3.bf16.msra.mxu1 %v2271_v3  ;;  %2135 = vmatprep.subr.bf16.mxu0 %v2272_v4  ;;  %v1461_v3 = vld [vmem:[%s2830_s3] sm:$0x1] }
  0x81   : > { %2155 = vmatprep.subr.bf16.mxu1 %v2273_v5 }
  0x83   : > { %2136 = vmatpush3.bf16.msra.mxu0 %v2272_v4  ;;  %v1462_v4 = vmul.f32 1.442695, %v1461_v3 }
  0x84   : > { %2156 = vmatpush3.bf16.msra.mxu1 %v2273_v5  ;;  %2161 = vmatprep.subr.bf16.mxu0 %v2277_v6  ;;  %v1465_v5 = vlaneseq }
  0x85   : > { %2286 = vpow2.f32 %v1462_v4 }
  0x86   : > { %2138 = vmatmul.mubr.bf16.vlgmr.msra.gmra.mrb[12].mxu0 %v1085_v50 }
  0x87   : > { %2162 = vmatpush3.bf16.msra.mxu0 %v2277_v6  ;;  %2158 = vmatmul.mubr.bf16.vlgmr.msra.gmra.mrb[12].mxu1 %v1224_v53  ;;  %v1466_v6 = vshrl.u32 %v1465_v5, 7 }
  0x88   : > { %2163 = vmatprep.subr.bf16.mxu0 %v2278_v7  ;;  %2177 = vmatprep.mubr.bf16.mxu0 %v2576_v32 }
  0x8b   : > { %2164 = vmatpush3.bf16.msra.mxu0 %v2278_v7  ;;  %v1627_v7 = vadd.s32 16, %v1466_v6 }
  0x8c   : > { %2165 = vmatprep.subr.bf16.mxu0 %v2279_v8 }
  0x8f   : > { %2166 = vmatpush3.bf16.msra.mxu0 %v2279_v8  ;;  %v1467_v8 = vsub.s32 0, %v1466_v6 }
  0x90   : > { %2167 = vmatprep.subr.bf16.mxu0 %v2280_v9 }
  0x93   : > { %2168 = vmatpush3.bf16.msra.mxu0 %v2280_v9  ;;  %v2287_v9 = vpop.eup %2286 }
  0x94   : > { %2169 = vmatprep.subr.bf16.mxu0 %v2281_v10 }
  0x97   : > { %2170 = vmatpush3.bf16.msra.mxu0 %v2281_v10 }
  0x98   : > { %2171 = vmatprep.subr.bf16.mxu0 %v2282_v11 }
  0x9b   : > { %2172 = vmatpush3.bf16.msra.mxu0 %v2282_v11  ;;  %v1902_v11 = vld [vmem:[%s2829_s2] ss:$0 sm:$0xff] }
  0x9c   : > { %2173 = vmatprep.subr.bf16.mxu0 %v2283_v14 }
  0x9f   : > { %2174 = vmatpush3.bf16.msra.mxu0 %v2283_v14 }
  0xa0   : > { %2175 = vmatprep.subr.bf16.mxu0 %v2284_v15 }
  0xa3   : > { %2176 = vmatpush3.bf16.msra.mxu0 %v2284_v15  ;;  %v2677_v14 = vmul.u32.u64.low 2863311531, %v1627_v7  ;;  %v2678_v15 = vmul.u32.u64.high 2863311531, %v1627_v7, %v2677_v14 }
  0xa6   : > { %2178 = vmatmul.mubr.bf16.vlgmr.msra.gmra.mrb[16].mxu0 %v1348_v26 }
  0xf9   : > { %v2019_v16 = vpop.f32.mrb[0].mxu0 }
  0xfa   : > { %v2039_v17 = vpop.f32.mrb[0].mxu1  ;;  %v428_v12 = vpop.f32.mrb[1].mxu0 }
  0xfb   : > { %v536_v13 = vadd.f32 %v2039_v17, %v2019_v16  ;;  %v527_v18 = vpop.f32.mrb[1].mxu1  ;;  %v2020_v19 = vpop.f32.mrb[2].mxu0  ;;  %v1468_v17 = vrot.slane %v2287_v9, %v1467_v8 }
  0xfc   : > { %v528_v20 = vadd.f32 %v527_v18, %v428_v12  ;;  %v2040_v21 = vpop.f32.mrb[2].mxu1  ;;  %v431_v23 = vpop.f32.mrb[3].mxu0 }
  0xfd   : > { %v530_v24 = vpop.f32.mrb[3].mxu1 }
  0xfe   : > { %v531_v25 = vadd.f32 %v530_v24, %v431_v23  ;;  %v1626_v24 = vadd.s32 8, %v1466_v6 }
 0x119   : > { %v2059_v27 = vpop.f32.mrb[4].mxu0 }
 0x11a   : > { %v665_v28 = vadd.f32 %v2059_v27, %v536_v13  ;;  %v649_v29 = vpop.f32.mrb[5].mxu0  ;;  %v2079_v30 = vpop.f32.mrb[4].mxu1 }
 0x11b   : > { %v663_v31 = vadd.f32 %v649_v29, %v528_v20  ;;  %v2060_v32 = vpop.f32.mrb[6].mxu0  ;;  %v778_v33 = vpop.f32.mrb[5].mxu1  ;;  %v2680_v19 = vmul.u32.u64.low 2863311531, %v1466_v6  ;;  %v2681_v20 = vmul.u32.u64.high 2863311531, %v1466_v6, %v2680_v19 }
 0x11c   : > { %v794_v22 = vadd.f32 %v2079_v30, %v665_v28  ;;  %v652_v26 = vpop.f32.mrb[7].mxu0  ;;  %v2080_v34 = vpop.f32.mrb[6].mxu1 }
 0x11d   : > { %v664_v35 = vadd.f32 %v652_v26, %v531_v25  ;;  %v792_v36 = vadd.f32 %v778_v33, %v663_v31  ;;  %v781_v37 = vpop.f32.mrb[7].mxu1  ;;  %v2690_v32 = vmul.u32.u64.low 2863311531, %v1626_v24  ;;  %v2691_v33 = vmul.u32.u64.high 2863311531, %v1626_v24, %v2690_v32 }
 0x11e   : > { %v1656_v34 = vshrl.u32 %v2678_v15, 2 }
 0x11f   : > { %v793_v38 = vadd.f32 %v781_v37, %v664_v35 }
 0x139   : > { %v2099_v39 = vpop.f32.mrb[8].mxu0 }
 0x13a   : > { %v933_v40 = vadd.f32 %v2099_v39, %v794_v22  ;;  %v917_v41 = vpop.f32.mrb[9].mxu0  ;;  %v2119_v42 = vpop.f32.mrb[8].mxu1 }
 0x13b   : > { %v931_v43 = vadd.f32 %v917_v41, %v792_v36  ;;  %v2100_v44 = vpop.f32.mrb[10].mxu0  ;;  %v1036_v45 = vpop.f32.mrb[9].mxu1 }
 0x13c   : > { %v1052_v46 = vadd.f32 %v2119_v42, %v933_v40  ;;  %v920_v47 = vpop.f32.mrb[11].mxu0  ;;  %v2120_v48 = vpop.f32.mrb[10].mxu1  ;;  %v1634_v40 = vshrl.u32 %v2681_v20, 2  ;;  %v1657_v44 = vmul.u32 6, %v1656_v34 }
 0x13d   : > { %v932_v49 = vadd.f32 %v920_v47, %v793_v38  ;;  %v1050_v50 = vadd.f32 %v1036_v45, %v931_v43  ;;  %v1039_v51 = vpop.f32.mrb[11].mxu1  ;;  %v1645_v48 = vshrl.u32 %v2691_v33, 2 }
 0x13e   : > { %v1635_v47 = vmul.u32 6, %v1634_v40 }
 0x13f   : > { %v1051_v52 = vadd.f32 %v1039_v51, %v932_v49  ;;  %v1658_v49 = vsub.s32 %v1627_v7, %v1657_v44  ;;  %v1646_v51 = vmul.u32 6, %v1645_v48 }
 0x141   : > { %vm1663_vm6 = vcmp.ne.s32.totalorder %v1658_v49, 0  ;;  %vm1666_vm7 = vcmp.lt.s32.totalorder %v1658_v49, 0 }
 0x142   : > { %vm2712_vm10 = vmand %vm1666_vm7, %vm1663_vm6 }
 0x159   : > { %v2139_v53 = vpop.f32.mrb[12].mxu0 }
 0x15a   : > { %v1187_v54 = vadd.f32 %v2139_v53, %v1052_v46  ;;  %v1171_v55 = vpop.f32.mrb[13].mxu0  ;;  %v2159_v56 = vpop.f32.mrb[12].mxu1 }
 0x15b   : > { %v1185_v57 = vadd.f32 %v1171_v55, %v1050_v50  ;;  %v2140_v58 = vpop.f32.mrb[14].mxu0  ;;  %v1310_v59 = vpop.f32.mrb[13].mxu1  ;;  %v1636_v50 = vsub.s32 %v1466_v6, %v1635_v47  ;;  %v1672_v55 = vadd.s32 6, %v1658_v49 }
 0x15c   : > { %v1326_v60 = vadd.f32 %v2159_v56, %v1187_v54  ;;  %v1174_v61 = vpop.f32.mrb[15].mxu0  ;;  %v2160_v62 = vpop.f32.mrb[14].mxu1  ;;  %v1647_v58 = vsub.s32 %v1626_v24, %v1646_v51  ;;  %v2332_v24 = vmov 0.0  }
 0x15d   : > { %v1186_v63 = vadd.f32 %v1174_v61, %v1051_v52  ;;  %v1324_v0 = vadd.f32 %v1310_v59, %v1185_v57  ;;  %v1313_v1 = vpop.f32.mrb[15].mxu1  ;;  %vm1661_vm8 = vcmp.ne.s32.totalorder %v1636_v50, 0  ;;  %vm1664_vm9 = vcmp.lt.s32.totalorder %v1636_v50, 0 }
 0x15e   : > { %v1670_v62 = vadd.s32 6, %v1636_v50  ;;  %vm2717_vm11 = vmand %vm1664_vm9, %vm1661_vm8  ;;  %vm1662_vm12 = vcmp.ne.s32.totalorder %v1647_v58, 0  ;;  %vm1665_vm13 = vcmp.lt.s32.totalorder %v1647_v58, 0  ;;  %v1671_v8 = vadd.s32 6, %v1647_v58 }
 0x15f   : > { %v1325_v2 = vadd.f32 %v1313_v1, %v1186_v63  ;;  %vm2736_vm15 = vmand %vm1665_vm13, %vm1662_vm12  ;;  %vm1715_vm12 = vcmask 0  }
 0x160   : > { %v1673_v6 = vsel %vm2717_vm11, %v1670_v62, %v1636_v50  ;;  %vm1539_vm11 = vcmask 130048  }
 0x161   : > { %vm2740_vm0 = vcmp.lt.s32.totalorder %v1673_v6, 4 }
 0x179   : > { %v2179_v10 = vpop.f32.mrb[16].mxu0 }
 0x17a   : > { %v1450_v16 = vadd.f32 %v2179_v10, %v1326_v60  ;;  %v1434_v12 = vpop.f32.mrb[17].mxu0 }
 0x17b   : > { %v1448_v13 = vadd.f32 %v1434_v12, %v1324_v0  ;;  %v2180_v18 = vpop.f32.mrb[18].mxu0 }
 0x17c   : > { %v1460_v21 = vadd.f32 %v1902_v11, %v1450_v16  ;;  %v1437_v23 = vpop.f32.mrb[19].mxu0 }
 0x17d   : > { %v1458_v25 = vadd.f32 %v1902_v11, %v1448_v13  ;;  %v1449_v27 = vadd.f32 %v1437_v23, %v1325_v2  ;;  %v1675_v2 = vsel %vm2712_vm10, %v1672_v55, %v1658_v49 }
 0x17e   : > { %v2683_v28 = vmul.f32 %v1468_v17, %v1460_v21  ;;  %vm2730_vm14 = vcmp.lt.s32.totalorder %v1675_v2, 4  ;;  %v1674_v21 = vsel %vm2736_vm15, %v1671_v8, %v1647_v58 }
 0x17f   : > { %v2685_v29 = vmul.f32 %v1468_v17, %v1458_v25  ;;  %v1459_v30 = vadd.f32 %v1902_v11, %v1449_v27  ;;  %v1908_v25 = vsel %vm2730_vm14, 1.0, %v2332_v24  ;;  %vm2761_vm3 = vcmp.lt.s32.totalorder %v1674_v21, 4 }
 0x180   : > { %v2688_v31 = vadd.f32 2.0, %v2683_v28 }
 0x181   : > { %v2694_v22 = vadd.f32 2.0, %v2685_v29  ;;  %v2696_v26 = vmul.f32 %v1468_v17, %v1459_v30 }
 0x182   : > { %v1548_v35 = vsub.f32 0.0, %v2688_v31  ;;  %v1589_v36 = vmul.f32 1.442695, %v2688_v31  ;;  %vm1545_vm6 = vcmp.gt.f32.partialorder %v2688_v31, 0.0 }
 0x183   : > { %v1546_v37 = vsub.f32 0.0, %v2694_v22  ;;  %v1585_v38 = vmul.f32 1.442695, %v2694_v22  ;;  %v2704_v39 = vadd.f32 2.0, %v2696_v26  ;;  %vm1543_vm7 = vcmp.gt.f32.partialorder %v2694_v22, 0.0 }
 0x184   : > { %v1553_v41 = vmul.f32 1.442695, %v1548_v35  ;;  %2288 = vpow2.f32 %v1589_v36  ;;  %v1906_v35 = vsel %vm2740_vm0, 1.0, %v2332_v24 }
 0x185   : > { %v1549_v42 = vmul.f32 1.442695, %v1546_v37  ;;  %2290 = vpow2.f32 %v1585_v38  ;;  %v1547_v43 = vsub.f32 0.0, %v2704_v39  ;;  %v1587_v45 = vmul.f32 1.442695, %v2704_v39 }
 0x186   : > { %2292 = vpow2.f32 %v1553_v41  ;;  %vm1544_vm10 = vcmp.gt.f32.partialorder %v2704_v39, 0.0  ;;  %v1904_v21 = vmul.f32 -1.442695, %v2704_v39 }
 0x187   : > { %2294 = vpow2.f32 %v1549_v42  ;;  %v1551_v46 = vmul.f32 1.442695, %v1547_v43 }
 0x189   : > { %2296 = vpow2.f32 %v1551_v46 }
 0x18a   : > { %2298 = vpow2.f32 %v1587_v45 }
 0x18e   : > { %v2289_v52 = vpop.eup %2288 }
 0x18f   : > { %v2710_v53 = vpop.eup %2290  ;;  %v1609_v54 = vadd.f32 1.0, %v2289_v52  ;;  %v1612_v4 = vmul.f32 -0.5, %v2289_v52  ;;  %v1615_v18 = vand.u32 2147483647, %v2289_v52 }
 0x190   : > { %v2293_v56 = vpop.eup %2292  ;;  %v1591_v61 = vadd.f32 1.0, %v2710_v53  ;;  %v1594_v11 = vmul.f32 -0.5, %v2710_v53  ;;  %v1597_v20 = vand.u32 2147483647, %v2710_v53 }
 0x191   : > { %v2295_v59 = vpop.eup %2294  ;;  %v1573_v60 = vadd.f32 1.0, %v2293_v56  ;;  %2300 = vlog2.f32 %v1609_v54  ;;  %v1576_v5 = vmul.f32 -0.5, %v2293_v56  ;;  %v1613_v16 = vadd.f32 1.0, %v1612_v4 }
 0x192   : > { %v1555_v63 = vadd.f32 1.0, %v2295_v59  ;;  %v1558_v10 = vmul.f32 -0.5, %v2295_v59  ;;  %v1579_v13 = vand.u32 2147483647, %v2293_v56  ;;  %v1561_v19 = vand.u32 2147483647, %v2295_v59 }
 0x193   : > { %v2721_v1 = vpop.eup %2296  ;;  %2302 = vlog2.f32 %v1573_v60  ;;  %v1577_v12 = vadd.f32 1.0, %v1576_v5  ;;  %v1595_v30 = vadd.f32 1.0, %v1594_v11  ;;  %v1614_v34 = vmul.f32 %v2289_v52, %v1613_v16 }
 0x194   : > { %v2725_v3 = vpop.eup %2298  ;;  %2304 = vlog2.f32 %v1555_v63  ;;  %v1564_v7 = vadd.f32 1.0, %v2721_v1  ;;  %v1559_v27 = vadd.f32 1.0, %v1558_v10  ;;  %v1567_v32 = vmul.f32 -0.5, %v2721_v1 }
 0x195   : > { %2306 = vlog2.f32 %v1591_v61  ;;  %v1600_v14 = vadd.f32 1.0, %v2725_v3  ;;  %v1603_v36 = vmul.f32 -0.5, %v2725_v3  ;;  %v1578_v38 = vmul.f32 %v2293_v56, %v1577_v12 }
 0x196   : > { %2308 = vlog2.f32 %v1564_v7  ;;  %vm2753_vm1 = vcmp.lt.f32.partialorder %v1579_v13, 0.0004427343  ;;  %vm2757_vm2 = vcmp.lt.f32.partialorder %v1615_v18, 0.0004427343  ;;  %vm2767_vm4 = vcmp.lt.f32.partialorder %v1561_v19, 0.0004427343 }
 0x197   : > { %2310 = vlog2.f32 %v1600_v14  ;;  %vm2771_vm5 = vcmp.lt.f32.partialorder %v1597_v20, 0.0004427343  ;;  %v1560_v50 = vmul.f32 %v2295_v59, %v1559_v27  ;;  %v1596_v51 = vmul.f32 %v2710_v53, %v1595_v30  ;;  %v1494_v13 = vld [vmem:[%s272_s9] sm:$0xff]  ;;  %v1495_v18 = vld [vmem:[%s272_s9 + $0x8] sm:$0xff]  ;;  %v1496_v19 = vld [vmem:[%s272_s9 + $0x10] sm:$0xff] }
 0x198   : > { %v1568_v52 = vadd.f32 1.0, %v1567_v32  ;;  %v1570_v56 = vand.u32 2147483647, %v2721_v1  ;;  %v1604_v57 = vadd.f32 1.0, %v1603_v36  ;;  %v1606_v62 = vand.u32 2147483647, %v2725_v3 }
 0x199   : > { %v1903_v20 = vmul.f32 -1.442695, %v2694_v22 }
 0x19a   : > { %v1569_v6 = vmul.f32 %v2721_v1, %v1568_v52  ;;  %vm1571_vm8 = vcmp.lt.f32.partialorder %v1570_v56, 0.0004427343  ;;  %v1605_v9 = vmul.f32 %v2725_v3, %v1604_v57  ;;  %vm1607_vm9 = vcmp.lt.f32.partialorder %v1606_v62, 0.0004427343 }
 0x19b   : > { %v2301_v23 = vpop.eup %2300  ;;  %v1907_v1 = vsel %vm2761_vm3, 1.0, %v2332_v24  ;;  %2312 = vpow2.f32 %v1903_v20 }
 0x19c   : > { %v1611_v33 = vmul.f32 0.6931472, %v2301_v23  ;;  %2314 = vpow2.f32 %v1904_v21  ;;  %v1905_v23 = vmul.f32 -1.442695, %v2688_v31 }
 0x19d   : > { %v2303_v37 = vpop.eup %2302 }
 0x19e   : > { %v2305_v43 = vpop.eup %2304  ;;  %v1575_v44 = vmul.f32 0.6931472, %v2303_v37  ;;  %v1617_v45 = vsel %vm2757_vm2, %v1614_v34, %v1611_v33  ;;  %2316 = vpow2.f32 %v1905_v23 }
 0x19f   : > { %v2307_v48 = vpop.eup %2306  ;;  %v1557_v49 = vmul.f32 0.6931472, %v2305_v43  ;;  %v1620_v60 = vsub.f32 %v2688_v31, %v1617_v45 }
 0x1a0   : > { %v1581_v54 = vsel %vm2753_vm1, %v1578_v38, %v1575_v44  ;;  %v1593_v55 = vmul.f32 0.6931472, %v2307_v48  ;;  %v2309_v63 = vpop.eup %2308 }
 0x1a1   : > { %v1584_v58 = vsub.f32 0.0, %v1581_v54  ;;  %v1563_v61 = vsel %vm2767_vm4, %v1560_v50, %v1557_v49  ;;  %v2311_v0 = vpop.eup %2310  ;;  %v1566_v5 = vmul.f32 0.6931472, %v2309_v63 }
 0x1a2   : > { %v1582_v53 = vsub.f32 0.0, %v1563_v61  ;;  %v1599_v59 = vsel %vm2771_vm5, %v1596_v51, %v1593_v55  ;;  %v1602_v8 = vmul.f32 0.6931472, %v2311_v0 }
 0x1a3   : > { %v1623_v2 = vsel %vm1545_vm6, %v1584_v58, %v1620_v60  ;;  %v1618_v4 = vsub.f32 %v2694_v22, %v1599_v59  ;;  %v1572_v11 = vsel %vm1571_vm8, %v1569_v6, %v1566_v5 }
 0x1a4   : > { %v1687_v7 = vmul.f32 %v1908_v25, %v1623_v2  ;;  %v1583_v15 = vsub.f32 0.0, %v1572_v11  ;;  %v1608_v16 = vsel %vm1607_vm9, %v1605_v9, %v1602_v8 }
 0x1a5   : > { %v1621_v10 = vsel %vm1543_vm7, %v1582_v53, %v1618_v4  ;;  %v1619_v17 = vsub.f32 %v2704_v39, %v1608_v16  ;;  %v2313_v25 = vpop.eup %2312 }
 0x1a6   : > { %1695 = vrot.lane.b32.xlu1 %v1687_v7, %s2333_s30  ;;  %v1685_v14 = vmul.f32 %v1906_v35, %v1621_v10  ;;  %v1485_v32 = vadd.f32 1.0, %v2313_v25 }
 0x1a7   : > { %v1622_v12 = vsel %vm1544_vm10, %v1583_v15, %v1619_v17 }
 0x1a8   : > { %1691 = vrot.lane.b32.xlu0 %v1685_v14, %s2333_s30  ;;  %v1686_v3 = vmul.f32 %v1907_v1, %v1622_v12  ;;  %2318 = vrcp.f32 %v1485_v32 }
 0x1ac   : > { %1693 = vrot.lane.b32.xlu0 %v1686_v3, %s2333_s30 }
 0x1b0   : > { %1500 = vrot.lane.b32.xlu0 %v1494_v13, %s2334_s10 }
 0x1b4   : > { %1502 = vrot.lane.b32.xlu0 %v1495_v18, %s2334_s10 }
 0x1b8   : > { %1504 = vrot.lane.b32.xlu0 %v1496_v19, %s2334_s10 }
 0x1bc   : > { %1515 = vrot.lane.b32.xlu0 %v2685_v29, %s2334_s10  ;;  %v2315_v29 = vpop.eup %2314 }
 0x1bd   : > { %v1486_v35 = vadd.f32 1.0, %v2315_v29  ;;  %v2317_v31 = vpop.eup %2316 }
 0x1be   : > { %v1487_v37 = vadd.f32 1.0, %v2317_v31  ;;  %v2319_v40 = vpop.eup %2318 }
 0x1bf   : > { %2320 = vrcp.f32 %v1486_v35 }
 0x1c0   : > { %1517 = vrot.lane.b32.xlu0 %v2696_v26, %s2334_s10  ;;  %2322 = vrcp.f32 %v1487_v37 }
 0x1c4   : > { %1519 = vrot.lane.b32.xlu0 %v2683_v28, %s2334_s10 }
 0x1c9   : > { %v2321_v44 = vpop.eup %2320 }
 0x1ca   : > { %v2323_v48 = vpop.eup %2322 }
 0x218   : > { %v1696_v27 = vpop.permute.xlu1 %1695 }
 0x219   : > { %v1703_v22 = vsel %vm1539_vm11, %v1696_v27, 0.0 }
 0x21a   : > { %v1692_v24 = vpop.permute.xlu0 %1691 }
 0x21b   : > { %v1700_v26 = vsel %vm1539_vm11, %v1692_v24, 0.0 }
 0x21e   : > { %v1694_v30 = vpop.permute.xlu0 %1693 }
 0x21f   : > { %v1701_v28 = vsel %vm1539_vm11, %v1694_v30, 0.0 }
 0x220   : > { %v1702_v33 = vadd.f32 %v1701_v28, %v1700_v26 }
 0x222   : > { %v1501_v39 = vpop.permute.xlu0 %1500  ;;  %v1704_v34 = vadd.f32 %v1703_v22, %v1702_v33 }
 0x223   : > { %v1509_v41 = vmul.f32 %v2319_v40, %v1501_v39 }
 0x224   : > { %1705 = vadd.xlane.f32.xlu1 %v1704_v34 }
 0x226   : > { %v1503_v36 = vpop.permute.xlu0 %1502 }
 0x227   : > { %v1510_v45 = vmul.f32 %v2321_v44, %v1503_v36 }
 0x22a   : > { %v1505_v38 = vpop.permute.xlu0 %1504 }
 0x22b   : > { %v1511_v49 = vmul.f32 %v2323_v48, %v1505_v38 }
 0x22e   : > { %v1516_v42 = vpop.permute.xlu0 %1515 }
 0x22f   : > { %v1524_v43 = vadd.f32 %v1516_v42, %v1509_v41 }
 0x231   : > { %1530 = vrot.lane.b32.xlu0 %v1524_v43, %s2333_s30 }
 0x232   : > { %v1518_v46 = vpop.permute.xlu0 %1517 }
 0x233   : > { %v1525_v47 = vadd.f32 %v1518_v46, %v1510_v45 }
 0x235   : > { %1532 = vrot.lane.b32.xlu0 %v1525_v47, %s2333_s30 }
 0x236   : > { %v1520_v50 = vpop.permute.xlu0 %1519 }
 0x237   : > { %v1526_v51 = vadd.f32 %v1520_v50, %v1511_v49 }
 0x239   : > { %1534 = vrot.lane.b32.xlu0 %v1526_v51, %s2333_s30 }
 0x2a3   : > { %v1531_v52 = vpop.permute.xlu0 %1530 }
 0x2a4   : > { %1540 = vst.msk [vmem:[%s277_s13] sm:$0xff] %vm1539_vm11, %v1531_v52 }
 0x2a7   : > { %v1533_v54 = vpop.permute.xlu0 %1532 }
 0x2a8   : > { %1541 = vst.msk [vmem:[%s277_s13 + $0x8] sm:$0xff] %vm1539_vm11, %v1533_v54 }
 0x2ab   : > { %v1535_v55 = vpop.permute.xlu0 %1534 }
 0x2ac   : > { %1542 = vst.msk [vmem:[%s277_s13 + $0x10] sm:$0xff] %vm1539_vm11, %v1535_v55 }
 0x2b1   : > { %v1706_v56 = vpop.xlane.xlu1 %1705 }
 0x2b2   : > { %v1707_v57 = vrot.slane %v1706_v56, 4 }
 0x2b4   : > { %v1708_v58 = vadd.f32 %v1707_v57, %v1706_v56 }
 0x2b6   : > { %v1709_v60 = vrot.slane %v1708_v58, 2 }
 0x2b8   : > { %v1710_v61 = vadd.f32 %v1709_v60, %v1708_v58 }
 0x2ba   : > { %v1711_v62 = vrot.slane %v1710_v61, 1 }
 0x2bc   : > { %v1712_v63 = vadd.f32 %v1711_v62, %v1710_v61 }
 0x2be   : > { %2188 = vpush %v1712_v63 }
 0x2ef   : > { %s2189_s17 = spop %2188 }
 0x2f0   : > { %v1714_v53 = vstv %s2189_s17 }
 0x2f1   : > { %1716 = vst.msk [vmem:[%s280_s15] sm:$0x1] %vm1715_vm12, %v1714_v53 }
 0x2f2 PF: > { %s17_s21 = sadd.s32 1, %s2330_s21  }
 0x2f3   : > { %p14_p4 = scmp.ge.s32.totalorder %s17_s21, 4  }
 0x2f5   :  { %16 = sbr.rel (!%p14_p4) target bundleno = 1 (0x1), region = 85 }

// kernel: glow_forward.31
= control target key start
LH: loop header
LB: loop body
LE: loop exit
PB: predicated region body
PF: predicated region fallthrough
CT: control target
= control target key end

     0   :  { %s1570_s21 = smov 0   ;;  %s1767_s0 = inlined_call_operand.vmem [shape: bf16[2,44,32], index: 0, kind: input, shape index: {}]   ;;  %s1768_s1 = inlined_call_operand.vmem [shape: bf16[288,64], index: 1, kind: input, shape index: {}]   ;;  %s1769_s2 = inlined_call_operand.vmem [shape: f32[1,64], index: 2, kind: input, shape index: {}]   ;;  %s1770_s3 = inlined_call_operand.vmem [shape: f32[1,64], index: 3, kind: input, shape index: {}]   ;;  %s1771_s4 = inlined_call_operand.vmem [shape: f32[2,24,32], index: 4, kind: input, shape index: {}]   ;;  %s1772_s5 = inlined_call_operand.vmem [shape: f32[2,24,32], index: 5, kind: output, shape index: {0}]   ;;  %s1773_s6 = inlined_call_operand.vmem [shape: f32[2,1,1], index: 6, kind: output, shape index: {1}]  }
   0x1 LB: > { %s1296_s22 = sadd.s32 4294967295, %s1531_s21   ;;  %p1300_p0 = scmp.ge.s32.totalorder %s1531_s21, 1  ;;  %s1531_s21 = sphi %s1570_s21, %s17_s21  }
   0x2   : > { %p225_p1 = scmp.lt.s32.totalorder %s1531_s21, 3 }
   0x4   : > { %p226_p2 = pnand %p1300_p0, %p225_p1 }
   0x5   : > { %v1486_v0 = vld [vmem:[%s1768_s1 + $0x10] sm:$0xff] (!%p226_p2)   ;;  %p263_p3 = scmp.lt.s32.totalorder (!%p226_p2), %s1296_s22, 1  ;;  %v1487_v1 = vld [vmem:[%s1768_s1] sm:$0xff] (!%p226_p2)   ;;  %v1488_v2 = vld [vmem:[%s1768_s1 + $0x18] sm:$0xff] (!%p226_p2)   ;;  %vm332_vm0 = vcmask (!%p226_p2), 261120   ;;  %vm461_vm2 = vcmask (!%p226_p2), 1046528  }
   0x6   : > { %229 = sbr.rel (%p226_p2) target bundleno = 613 (0x265), region = 40  ;;  %1395 = vmatprep.subr.bf16.mxu0 (!%p226_p2), %v1486_v0  ;;  %1403 = vmatprep.subr.bf16.mxu1 (!%p226_p2), %v1487_v1  ;;  %v1489_v3 = vld [vmem:[%s1768_s1 + $0x8] sm:$0xff] (!%p226_p2)   ;;  %v1492_v4 = vld [vmem:[%s1768_s1 + $0x20] sm:$0xff] (!%p226_p2)   ;;  %v1494_v5 = vld [vmem:[%s1768_s1 + $0x30] sm:$0xff] (!%p226_p2)   ;;  %vm304_vm1 = vsmask.f32 (!%p226_p2), 7424 }
   0x7   : > { %1396 = vmatpush3.bf16.msra.mxu0 (!%p226_p2), %v1486_v0  ;;  %1404 = vmatpush3.bf16.msra.mxu1 (!%p226_p2), %v1487_v1  ;;  %v1496_v13 = vld [vmem:[%s1768_s1 + $0x38] sm:$0xff] (!%p226_p2)   ;;  %v1501_v28 = vld [vmem:[%s1768_s1 + $0x50] sm:$0xff] (!%p226_p2)   ;;  %vm546_vm3 = vcmask (!%p226_p2), 1044480   ;;  %v1495_v36 = vld [vmem:[%s1768_s1 + $0x28] sm:$0xff] (!%p226_p2)   ;;  %vm627_vm4 = vsmask.f32 (!%p226_p2), 4352 }
   0x8   : > { %1397 = vmatprep.subr.bf16.mxu0 (!%p226_p2), %v1488_v2  ;;  %1405 = vmatprep.subr.bf16.mxu1 (!%p226_p2), %v1489_v3  ;;  %v1503_v42 = vld [vmem:[%s1768_s1 + $0x58] sm:$0xff] (!%p226_p2)   ;;  %v1498_v46 = vld [vmem:[%s1768_s1 + $0x40] sm:$0xff] (!%p226_p2)   ;;  %v1508_v50 = vld [vmem:[%s1768_s1 + $0x70] sm:$0xff] (!%p226_p2)   ;;  %vm888_vm5 = vsmask.f32 (!%p226_p2), 5376  ;;  %vm807_vm6 = vcmask (!%p226_p2), 1045504  }
   0x9   : > { %v1502_v61 = vld [vmem:[%s1768_s1 + $0x48] sm:$0xff] (!%p226_p2)   ;;  %s1534_s24 = smov (!%p226_p2), 96  }
   0xb   : > { %1398 = vmatpush3.bf16.msra.mxu0 (!%p226_p2), %v1488_v2  ;;  %1406 = vmatpush3.bf16.msra.mxu1 (!%p226_p2), %v1489_v3 }
   0xc   : > { %1411 = vmatprep.subr.bf16.mxu0 (!%p226_p2), %v1492_v4  ;;  %1419 = vmatprep.subr.bf16.mxu1 (!%p226_p2), %v1494_v5 }
   0xd   : > { %s1781_s22 = smov (!%p263_p3, %s1296_s22), 1 }
   0xe   : > { %s1593_s7 = smul.u32 24, %s1781_s22  ;;  %s280_s10 = scalar_lea.vmem %s1773_s6, %s1781_s22 }
  0x10   : > { %s1602_s12 = scalar_lea.vmem %s1767_s0, %s1593_s7  ;;  %s272_s27 = scalar_lea.vmem %s1771_s4, %s1593_s7 }
  0x11   : > { %v282_v6 = vld [vmem:[%s1602_s12] sm:$0xf]  ;;  %v1609_v7 = vld [vmem:[%s1602_s12 + $0x4] sm:$0xf]  ;;  %v1612_v8 = vld [vmem:[%s1602_s12 + $0x8] sm:$0xf]  ;;  %s277_s30 = scalar_lea.vmem %s1772_s5, %s1593_s7 }
  0x12   : > { %v289_v9 = vld [vmem:[%s1602_s12 + $0xc] sm:$0x1]  ;;  %v1304_v10 = vcombine.low %v282_v6, %v1609_v7  ;;  %v1310_v11 = vcombine.low %v1612_v8, %v1612_v8  ;;  %v453_v14 = vld [vmem:[%s1602_s12] sm:$0xe]  ;;  %v1331_v41 = vcombine.low %v1609_v7, %v1612_v8  ;;  %v789_v52 = vld [vmem:[%s1602_s12 + $0x4] sm:$0xc] }
  0x13   : > { %v1619_v12 = vcombine.low %v1612_v8, %v289_v9  ;;  %v1315_v17 = vcombine.low %v453_v14, %v1609_v7  ;;  %v534_v21 = vld [vmem:[%s1602_s12] sm:$0x8]  ;;  %v535_v24 = vld [vmem:[%s1602_s12 + $0xc] sm:$0x7]  ;;  %v790_v53 = vld [vmem:[%s1602_s12 + $0x8] sm:$0xf] }
  0x14   : > { %v306_v15 = vshrl.u32 %v1304_v10, 16  ;;  %v308_v16 = vshll.u32 %v1304_v10, 16  ;;  %1407 = vmatprep.mubr.msk.bf16.mxu1 %vm332_vm0, %v1304_v10  ;;  %v1320_v25 = vcombine.low %v534_v21, %v1609_v7  ;;  %v1321_v27 = vcombine.low %v1612_v8, %v535_v24  ;;  %v619_v34 = vld [vmem:[%s1602_s12 + $0xc] sm:$0xf]  ;;  %v792_v56 = vld [vmem:[%s1602_s12 + $0x10] sm:$0x3] }
  0x15   : > { %v313_v18 = vshll.u32 %v1619_v12, 16  ;;  %v317_v19 = vshrl.u32 %v1619_v12, 16  ;;  %1408 = vmatmul.mubr.msk.bf16.vlgmr.msra.gmra.mrb[0].mxu1 %vm332_vm0, %v1310_v11  ;;  %v463_v20 = vrot.slane %v1619_v12, 1  ;;  %v462_v23 = vrot.slane %v1315_v17, 1  ;;  %v791_v54 = vld [vmem:[%s1602_s12 + $0xc] sm:$0xf] }
  0x16   : > { %v310_v22 = vrot.slane %v308_v16, 1  ;;  %1420 = vmatpush3.bf16.msra.mxu1 %v1494_v5  ;;  %v547_v30 = vrot.slane %v1320_v25, 3  ;;  %v548_v33 = vrot.slane %v1321_v27, 3  ;;  %v1326_v37 = vcombine.low %v1612_v8, %v619_v34  ;;  %v880_v58 = vld [vmem:[%s1602_s12 + $0x10] sm:$0x7]  ;;  %v1505_v9 = vld [vmem:[%s1768_s1 + $0x60] sm:$0xff]  }
  0x17   : > { %v315_v26 = vrot.slane %v313_v18, 1  ;;  %1421 = vmatprep.subr.bf16.mxu1 %v1496_v13  ;;  %v464_v32 = vsel %vm461_vm2, %v462_v23, %v463_v20  ;;  %v629_v38 = vshrl.u32 %v1320_v25, 16  ;;  %v632_v40 = vshll.u32 %v1320_v25, 16  ;;  %v975_v14 = vld [vmem:[%s1602_s12 + $0x4] sm:$0x8]  ;;  %v1509_v16 = vld [vmem:[%s1768_s1 + $0x68] sm:$0xff]  }
  0x18   : > { %v311_v29 = vor.u32 %v310_v22, %v306_v15  ;;  %v549_v39 = vsel %vm546_vm3, %v547_v30, %v548_v33  ;;  %v637_v44 = vshrl.u32 %v1326_v37, 16  ;;  %v640_v45 = vshll.u32 %v1326_v37, 16  ;;  %v1515_v22 = vld [vmem:[%s1768_s1 + $0x88] sm:$0xff]  }
  0x19   : > { %v319_v31 = vor.u32 %v317_v19, %v315_v26  ;;  %1423 = vmatprep.mubr.msk.bf16.mxu1 %vm332_vm0, %v549_v39  ;;  %v631_v43 = vrot.slane %v629_v38, 3  ;;  %v634_v47 = vrot.slane %v632_v40, 4  ;;  %v1337_v57 = vcombine.low %v789_v52, %v790_v53  ;;  %v1514_v19 = vld [vmem:[%s1768_s1 + $0x80] sm:$0xff]  }
  0x1a   : > { %v316_v35 = vsel %vm304_vm1, %v311_v29, %v315_v26  ;;  %1422 = vmatpush3.bf16.msra.mxu1 %v1496_v13  ;;  %v639_v48 = vrot.slane %v637_v44, 3  ;;  %v642_v49 = vrot.slane %v640_v45, 4  ;;  %v1332_v59 = vcombine.low %v619_v34, %v619_v34 }
  0x1b   : > { %1399 = vmatprep.mubr.msk.bf16.mxu0 %vm332_vm0, %v316_v35  ;;  %1435 = vmatprep.subr.bf16.mxu1 %v1501_v28  ;;  %v635_v51 = vor.u32 %v634_v47, %v631_v43  ;;  %v1343_v60 = vcombine.low %v791_v54, %v880_v58  ;;  %v1338_v63 = vcombine.low %v791_v54, %v792_v56  ;;  %v890_v0 = vshrl.u32 %v1337_v57, 16 }
  0x1c   : > { %1400 = vmatmul.mubr.msk.bf16.vlgmr.msra.gmra.mrb[0].mxu0 %vm332_vm0, %v319_v31  ;;  %v643_v55 = vor.u32 %v642_v49, %v639_v48  ;;  %v893_v1 = vshll.u32 %v1337_v57, 16  ;;  %v808_v10 = vrot.slane %v1337_v57, 2  ;;  %v1348_v18 = vcombine.low %v975_v14, %v790_v53 }
  0x1d   : > { %1412 = vmatpush3.bf16.msra.mxu0 %v1492_v4  ;;  %1415 = vmatprep.mubr.msk.bf16.mxu0 %vm332_vm0, %v464_v32  ;;  %v898_v2 = vshrl.u32 %v1343_v60, 16  ;;  %v901_v3 = vshll.u32 %v1343_v60, 16  ;;  %v1510_v4 = vld [vmem:[%s1768_s1 + $0x78] sm:$0xff]   ;;  %v892_v5 = vrot.slane %v890_v0, 2  ;;  %v809_v11 = vrot.slane %v1338_v63, 2 }
  0x1e   : > { %1413 = vmatprep.subr.bf16.mxu0 %v1495_v36  ;;  %1424 = vmatmul.mubr.msk.bf16.vlgmr.msra.gmra.mrb[4].mxu1 %vm332_vm0, %v548_v33  ;;  %v644_v62 = vsel %vm627_vm4, %v635_v51, %v643_v55  ;;  %v895_v6 = vrot.slane %v893_v1, 3  ;;  %v984_v21 = vrot.slane %v1343_v60, 3  ;;  %v1069_v24 = vlaneseq  ;;  %v1065_v63 = vld [vmem:[%s1770_s3] sm:$0x1] }
  0x1f   : > { %1436 = vmatpush3.bf16.msra.mxu1 %v1501_v28  ;;  %1439 = vmatprep.mubr.msk.bf16.mxu1 %vm332_vm0, %v1331_v41  ;;  %v900_v7 = vrot.slane %v898_v2, 2  ;;  %v903_v8 = vrot.slane %v901_v3, 3  ;;  %v810_v17 = vsel %vm807_vm6, %v808_v10, %v809_v11  ;;  %v1066_v3 = vmul.f32 1.442695, %v1065_v63 }
  0x20   : > { %1437 = vmatprep.subr.bf16.mxu1 %v1503_v42  ;;  %v896_v12 = vor.u32 %v895_v6, %v892_v5  ;;  %v1703_v29 = vshrl.u32 %v1069_v24, 7  ;;  %vm1202_vm4 = vcmask 0  }
  0x21   : > { %1414 = vmatpush3.bf16.msra.mxu0 %v1495_v36  ;;  %v904_v13 = vor.u32 %v903_v8, %v900_v7  ;;  %1517 = vpow2.f32 %v1066_v3 }
  0x22   : > { %1427 = vmatprep.subr.bf16.mxu0 %v1498_v46  ;;  %v1113_v31 = vadd.s32 16, %v1703_v29  ;;  %v1710_v44 = vmul.u32.u64.low 2863311531, %v1703_v29  ;;  %v1711_v45 = vmul.u32.u64.high 2863311531, %v1703_v29, %v1710_v44 }
  0x23   : > { %1438 = vmatpush3.bf16.msra.mxu1 %v1503_v42  ;;  %v905_v15 = vsel %vm888_vm5, %v896_v12, %v904_v13 }
  0x24   : > { %1416 = vmatmul.mubr.msk.bf16.vlgmr.msra.gmra.mrb[4].mxu0 %vm332_vm0, %v463_v20  ;;  %1451 = vmatprep.subr.bf16.mxu1 %v1508_v50  ;;  %v983_v20 = vrot.slane %v1348_v18, 3  ;;  %v1706_v41 = vmul.u32.u64.low 2863311531, %v1113_v31  ;;  %v1707_v42 = vmul.u32.u64.high 2863311531, %v1113_v31, %v1706_v41  ;;  %v1120_v0 = vshrl.u32 %v1711_v45, 2  ;;  %v1353_v45 = vld [vmem:[%s1769_s2] ss:$0 sm:$0xff] }
  0x25   : > { %1428 = vmatpush3.bf16.msra.mxu0 %v1498_v46  ;;  %1431 = vmatprep.mubr.msk.bf16.mxu0 %vm332_vm0, %v644_v62  ;;  %v1112_v46 = vadd.s32 8, %v1703_v29 }
  0x26   : > { %1429 = vmatprep.subr.bf16.mxu0 %v1502_v61  ;;  %1440 = vmatmul.mubr.msk.bf16.vlgmr.msra.gmra.mrb[8].mxu1 %vm332_vm0, %v1332_v59  ;;  %v985_v23 = vsel %vm546_vm3, %v983_v20, %v984_v21  ;;  %v1121_v7 = vmul.u32 6, %v1120_v0 }
  0x27   : > { %1452 = vmatpush3.bf16.msra.mxu1 %v1508_v50  ;;  %1455 = vmatprep.mubr.msk.bf16.mxu1 %vm332_vm0, %v905_v15  ;;  %v1714_v50 = vmul.u32.u64.low 2863311531, %v1112_v46  ;;  %v1715_v51 = vmul.u32.u64.high 2863311531, %v1112_v46, %v1714_v50 }
  0x28   : > { %1453 = vmatprep.subr.bf16.mxu1 %v1510_v4  ;;  %v1122_v20 = vsub.s32 %v1703_v29, %v1121_v7 }
  0x29   : > { %1430 = vmatpush3.bf16.msra.mxu0 %v1502_v61  ;;  %v1142_v61 = vshrl.u32 %v1707_v42, 2  ;;  %v1131_v8 = vshrl.u32 %v1715_v51, 2 }
  0x2a   : > { %1443 = vmatprep.subr.bf16.mxu0 %v1505_v9  ;;  %vm1147_vm9 = vcmp.ne.s32.totalorder %v1122_v20, 0  ;;  %vm1150_vm10 = vcmp.lt.s32.totalorder %v1122_v20, 0 }
  0x2b   : > { %1454 = vmatpush3.bf16.msra.mxu1 %v1510_v4  ;;  %v1143_v4 = vmul.u32 6, %v1142_v61  ;;  %vm1728_vm12 = vmand %vm1150_vm10, %vm1147_vm9 }
  0x2c   : > { %1432 = vmatmul.mubr.msk.bf16.vlgmr.msra.gmra.mrb[8].mxu0 %vm332_vm0, %v643_v55 }
  0x2d   : > { %1444 = vmatpush3.bf16.msra.mxu0 %v1505_v9  ;;  %1447 = vmatprep.mubr.msk.bf16.mxu0 %vm332_vm0, %v810_v17  ;;  %v1144_v18 = vsub.s32 %v1113_v31, %v1143_v4 }
  0x2e   : > { %1445 = vmatprep.subr.bf16.mxu0 %v1509_v16  ;;  %1456 = vmatmul.mubr.msk.bf16.vlgmr.msra.gmra.mrb[12].mxu1 %vm332_vm0, %v904_v13 }
  0x2f   : > { %vm1149_vm7 = vcmp.ne.s32.totalorder %v1144_v18, 0  ;;  %vm1152_vm8 = vcmp.lt.s32.totalorder %v1144_v18, 0 }
  0x30   : > { %vm1724_vm11 = vmand %vm1152_vm8, %vm1149_vm7 }
  0x31   : > { %1446 = vmatpush3.bf16.msra.mxu0 %v1509_v16 }
  0x32   : > { %1459 = vmatprep.subr.bf16.mxu0 %v1514_v19 }
  0x34   : > { %1448 = vmatmul.mubr.msk.bf16.vlgmr.msra.gmra.mrb[12].mxu0 %vm332_vm0, %v809_v11 }
  0x35   : > { %1460 = vmatpush3.bf16.msra.mxu0 %v1514_v19  ;;  %1463 = vmatprep.mubr.msk.bf16.mxu0 %vm332_vm0, %v985_v23 }
  0x36   : > { %1461 = vmatprep.subr.bf16.mxu0 %v1515_v22 }
  0x39   : > { %1462 = vmatpush3.bf16.msra.mxu0 %v1515_v22 }
  0x3c   : > { %1464 = vmatmul.mubr.msk.bf16.vlgmr.msra.gmra.mrb[16].mxu0 %vm332_vm0, %v984_v21  ;;  %v1132_v21 = vmul.u32 6, %v1131_v8 }
  0xe8   : > { %v1409_v25 = vpop.f32.mrb[0].mxu1 }
  0xe9   : > { %v439_v26 = vpop.f32.mrb[1].mxu1 }
  0xea   : > { %v1410_v27 = vpop.f32.mrb[2].mxu1 }
  0xeb   : > { %v442_v28 = vpop.f32.mrb[3].mxu1 }
  0xef   : > { %v1401_v30 = vpop.f32.mrb[0].mxu0 }
  0xf0   : > { %v448_v32 = vadd.f32 %v1409_v25, %v1401_v30  ;;  %v373_v33 = vpop.f32.mrb[1].mxu0  ;;  %v1158_v30 = vadd.s32 6, %v1144_v18 }
  0xf1   : > { %v440_v34 = vadd.f32 %v439_v26, %v373_v33  ;;  %v1402_v35 = vpop.f32.mrb[2].mxu0  ;;  %v1425_v36 = vpop.f32.mrb[4].mxu1  ;;  %v1133_v26 = vsub.s32 %v1112_v46, %v1132_v21 }
  0xf2   : > { %v376_v37 = vpop.f32.mrb[3].mxu0  ;;  %v602_v38 = vpop.f32.mrb[5].mxu1  ;;  %v1161_v41 = vsel %vm1724_vm11, %v1158_v30, %v1144_v18 }
  0xf3   : > { %v443_v39 = vadd.f32 %v442_v28, %v376_v37  ;;  %v1426_v40 = vpop.f32.mrb[6].mxu1  ;;  %vm1148_vm13 = vcmp.ne.s32.totalorder %v1133_v26, 0  ;;  %vm1151_vm14 = vcmp.lt.s32.totalorder %v1133_v26, 0  ;;  %vm1164_vm1 = vcmp.lt.s32.totalorder %v1161_v41, 4 }
  0xf4   : > { %v605_v43 = vpop.f32.mrb[7].mxu1  ;;  %vm1740_vm15 = vmand %vm1151_vm14, %vm1148_vm13 }
  0xf7   : > { %v1417_v47 = vpop.f32.mrb[4].mxu0 }
  0xf8   : > { %v533_v48 = vadd.f32 %v1417_v47, %v448_v32  ;;  %v517_v49 = vpop.f32.mrb[5].mxu0 }
  0xf9   : > { %v531_v52 = vadd.f32 %v517_v49, %v440_v34  ;;  %v1418_v53 = vpop.f32.mrb[6].mxu0  ;;  %v1441_v54 = vpop.f32.mrb[8].mxu1  ;;  %v1156_v34 = vadd.s32 6, %v1122_v20 }
  0xfa   : > { %v618_v55 = vadd.f32 %v1425_v36, %v533_v48  ;;  %v520_v56 = vpop.f32.mrb[7].mxu0  ;;  %v772_v57 = vpop.f32.mrb[9].mxu1 }
  0xfb   : > { %v532_v58 = vadd.f32 %v520_v56, %v443_v39  ;;  %v616_v59 = vadd.f32 %v602_v38, %v531_v52  ;;  %v1442_v60 = vpop.f32.mrb[10].mxu1  ;;  %v1071_v38 = vsub.s32 0, %v1703_v29  ;;  %v1518_v39 = vpop.eup %1517  ;;  %v1159_v42 = vsel %vm1728_vm12, %v1156_v34, %v1122_v20  ;;  %v1077_v20 = vld [vmem:[%s272_s27] sm:$0xff] }
  0xfc   : > { %v775_v62 = vpop.f32.mrb[11].mxu1  ;;  %vm1162_vm2 = vcmp.lt.s32.totalorder %v1159_v42, 4  ;;  %v1533_v56 = vmov 0.0  }
  0xfd   : > { %v617_v1 = vadd.f32 %v605_v43, %v532_v58  ;;  %v1157_v43 = vadd.s32 6, %v1133_v26  ;;  %v1072_v47 = vrot.slane %v1518_v39, %v1071_v38 }
  0xff   : > { %v1433_v2 = vpop.f32.mrb[8].mxu0  ;;  %v1160_v53 = vsel %vm1740_vm15, %v1157_v43, %v1133_v26 }
 0x100   : > { %v713_v5 = vadd.f32 %v1433_v2, %v618_v55  ;;  %v697_v6 = vpop.f32.mrb[9].mxu0  ;;  %vm1163_vm3 = vcmp.lt.s32.totalorder %v1160_v53, 4 }
 0x101   : > { %v711_v9 = vadd.f32 %v697_v6, %v616_v59  ;;  %v1434_v10 = vpop.f32.mrb[10].mxu0  ;;  %v1457_v11 = vpop.f32.mrb[12].mxu1  ;;  %v1354_v59 = vsel %vm1162_vm2, 1.0, %v1533_v56  ;;  %v1355_v2 = vsel %vm1163_vm3, 1.0, %v1533_v56 }
 0x102   : > { %v788_v12 = vadd.f32 %v1441_v54, %v713_v5  ;;  %v700_v13 = vpop.f32.mrb[11].mxu0  ;;  %v958_v14 = vpop.f32.mrb[13].mxu1 }
 0x103   : > { %v712_v15 = vadd.f32 %v700_v13, %v617_v1  ;;  %v786_v16 = vadd.f32 %v772_v57, %v711_v9  ;;  %v1458_v17 = vpop.f32.mrb[14].mxu1  ;;  %v1356_v57 = vsel %vm1164_vm1, 1.0, %v1533_v56 }
 0x104   : > { %v961_v19 = vpop.f32.mrb[15].mxu1 }
 0x105   : > { %v787_v22 = vadd.f32 %v775_v62, %v712_v15 }
 0x107   : > { %v1449_v23 = vpop.f32.mrb[12].mxu0 }
 0x108   : > { %v879_v24 = vadd.f32 %v1449_v23, %v788_v12  ;;  %v863_v25 = vpop.f32.mrb[13].mxu0  ;;  %v1078_v23 = vld [vmem:[%s272_s27 + $0x8] sm:$0xff] }
 0x109   : > { %v877_v27 = vadd.f32 %v863_v25, %v786_v16  ;;  %v1450_v28 = vpop.f32.mrb[14].mxu0 }
 0x10a   : > { %v974_v32 = vadd.f32 %v1457_v11, %v879_v24  ;;  %v866_v33 = vpop.f32.mrb[15].mxu0 }
 0x10b   : > { %v878_v35 = vadd.f32 %v866_v33, %v787_v22  ;;  %v972_v36 = vadd.f32 %v958_v14, %v877_v27  ;;  %v1079_v27 = vld [vmem:[%s272_s27 + $0x10] sm:$0xff] }
 0x10d   : > { %v973_v40 = vadd.f32 %v961_v19, %v878_v35 }
 0x10f   : > { %v1465_v44 = vpop.f32.mrb[16].mxu0 }
 0x110   : > { %v1054_v29 = vadd.f32 %v1465_v44, %v974_v32  ;;  %v1038_v48 = vpop.f32.mrb[17].mxu0 }
 0x111   : > { %v1052_v49 = vadd.f32 %v1038_v48, %v972_v36  ;;  %v1466_v50 = vpop.f32.mrb[18].mxu0 }
 0x112   : > { %v1064_v51 = vadd.f32 %v1353_v45, %v1054_v29  ;;  %v1041_v52 = vpop.f32.mrb[19].mxu0 }
 0x113   : > { %v1062_v54 = vadd.f32 %v1353_v45, %v1052_v49  ;;  %v1053_v55 = vadd.f32 %v1041_v52, %v973_v40 }
 0x114   : > { %v1076_v58 = vmul.f32 %v1072_v47, %v1064_v51 }
 0x115   : > { %v1074_v60 = vmul.f32 %v1072_v47, %v1062_v54  ;;  %v1063_v61 = vadd.f32 %v1353_v45, %v1053_v55 }
 0x116   : > { %v1173_v62 = vmul.f32 %v1356_v57, %v1076_v58  ;;  %v1085_v5 = vsub.f32 0.0, %v1076_v58  ;;  %v1082_v30 = vsub.f32 %v1079_v27, %v1076_v58 }
 0x117   : > { %v1083_v63 = vsub.f32 0.0, %v1074_v60  ;;  %v1075_v0 = vmul.f32 %v1072_v47, %v1063_v61  ;;  %v1171_v1 = vmul.f32 %v1354_v59, %v1074_v60  ;;  %v1080_v21 = vsub.f32 %v1077_v20, %v1074_v60 }
 0x118   : > { %1181 = vrot.lane.b32.xlu1 %v1173_v62, %s1534_s24  ;;  %v1090_v8 = vmul.f32 1.442695, %v1085_v5 }
 0x119   : > { %v1086_v3 = vmul.f32 1.442695, %v1083_v63  ;;  %v1084_v4 = vsub.f32 0.0, %v1075_v0  ;;  %1177 = vrot.lane.b32.xlu0 %v1171_v1, %s1534_s24  ;;  %v1172_v7 = vmul.f32 %v1355_v2, %v1075_v0  ;;  %v1081_v25 = vsub.f32 %v1078_v23, %v1075_v0 }
 0x11b   : > { %1519 = vpow2.f32 %v1086_v3  ;;  %v1088_v6 = vmul.f32 1.442695, %v1084_v4 }
 0x11d   : > { %1179 = vrot.lane.b32.xlu0 %v1172_v7, %s1534_s24  ;;  %1521 = vpow2.f32 %v1088_v6 }
 0x11e   : > { %1523 = vpow2.f32 %v1090_v8 }
 0x125   : > { %v1520_v9 = vpop.eup %1519 }
 0x126   : > { %1095 = vrot.lane.b32.xlu0 %v1520_v9, %s1534_s24 }
 0x127   : > { %v1522_v10 = vpop.eup %1521 }
 0x128   : > { %v1524_v11 = vpop.eup %1523 }
 0x12a   : > { %1097 = vrot.lane.b32.xlu0 %v1522_v10, %s1534_s24 }
 0x12e   : > { %1099 = vrot.lane.b32.xlu0 %v1524_v11, %s1534_s24 }
 0x18a   : > { %v1182_v13 = vpop.permute.xlu1 %1181 }
 0x18b   : > { %v1178_v12 = vpop.permute.xlu0 %1177  ;;  %v1189_v18 = vsel %vm332_vm0, %v1182_v13, 0.0 }
 0x18c   : > { %v1186_v15 = vsel %vm332_vm0, %v1178_v12, 0.0 }
 0x18f   : > { %v1180_v14 = vpop.permute.xlu0 %1179 }
 0x190   : > { %v1187_v16 = vsel %vm332_vm0, %v1180_v14, 0.0 }
 0x191   : > { %v1188_v17 = vadd.f32 %v1187_v16, %v1186_v15 }
 0x193   : > { %v1190_v19 = vadd.f32 %v1189_v18, %v1188_v17 }
 0x195   : > { %1191 = vadd.xlane.f32.xlu1 %v1190_v19 }
 0x198   : > { %v1096_v22 = vpop.permute.xlu0 %1095 }
 0x199   : > { %v1104_v24 = vmul.f32 %v1096_v22, %v1080_v21 }
 0x19b   : > { %1107 = vst.msk [vmem:[%s277_s30] sm:$0xff] %vm332_vm0, %v1104_v24 }
 0x19c   : > { %v1098_v26 = vpop.permute.xlu0 %1097 }
 0x19d   : > { %v1105_v28 = vmul.f32 %v1098_v26, %v1081_v25 }
 0x19f   : > { %1108 = vst.msk [vmem:[%s277_s30 + $0x8] sm:$0xff] %vm332_vm0, %v1105_v28 }
 0x1a0   : > { %v1100_v32 = vpop.permute.xlu0 %1099 }
 0x1a1   : > { %v1106_v33 = vmul.f32 %v1100_v32, %v1082_v30 }
 0x1a3   : > { %1109 = vst.msk [vmem:[%s277_s30 + $0x10] sm:$0xff] %vm332_vm0, %v1106_v33 }
 0x222   : > { %v1192_v31 = vpop.xlane.xlu1 %1191 }
 0x223   : > { %v1193_v34 = vrot.slane %v1192_v31, 4 }
 0x225   : > { %v1194_v35 = vadd.f32 %v1193_v34, %v1192_v31 }
 0x227   : > { %v1195_v36 = vrot.slane %v1194_v35, 2 }
 0x229   : > { %v1196_v37 = vadd.f32 %v1195_v36, %v1194_v35 }
 0x22b   : > { %v1197_v38 = vrot.slane %v1196_v37, 1 }
 0x22d   : > { %v1198_v39 = vadd.f32 %v1197_v38, %v1196_v37 }
 0x22f   : > { %1474 = vpush %v1198_v39 }
 0x260   : > { %s1475_s7 = spop %1474 }
 0x261   : > { %s1200_s11 = ssub.f32 0.0, %s1475_s7 }
 0x263   : > { %v1201_v40 = vstv %s1200_s11 }
 0x264   : > { %1203 = vst.msk [vmem:[%s280_s10] sm:$0x1] %vm1202_vm4, %v1201_v40 }
 0x265 PF: > { %s17_s21 = sadd.s32 1, %s1531_s21  }
 0x266   : > { %p14_p4 = scmp.ge.s32.totalorder %s17_s21, 4  }
 0x268   :  { %16 = sbr.rel (!%p14_p4) target bundleno = 1 (0x1), region = 85 }

// kernel: glow_forward.23
= control target key start
LH: loop header
LB: loop body
LE: loop exit
PB: predicated region body
PF: predicated region fallthrough
CT: control target
= control target key end

     0   :  { %s2515_s21 = smov 0   ;;  %s3343_s0 = inlined_call_operand.vmem [shape: bf16[2,108,8], index: 0, kind: input, shape index: {}]   ;;  %s3344_s1 = inlined_call_operand.vmem [shape: bf16[72,16], index: 1, kind: input, shape index: {}]   ;;  %s3345_s2 = inlined_call_operand.vmem [shape: f32[1,16], index: 2, kind: input, shape index: {}]   ;;  %s3346_s3 = inlined_call_operand.vmem [shape: f32[1,16], index: 3, kind: input, shape index: {}]   ;;  %s3347_s4 = inlined_call_operand.vmem [shape: f32[2,80,8], index: 4, kind: input, shape index: {}]   ;;  %s3348_s5 = inlined_call_operand.vmem [shape: f32[2,80,8], index: 5, kind: output, shape index: {0}]   ;;  %s3349_s6 = inlined_call_operand.vmem [shape: f32[2,1,1], index: 6, kind: output, shape index: {1}]  }
   0x1 LB: > { %s2046_s22 = sadd.s32 4294967295, %s2475_s21   ;;  %p2050_p0 = scmp.ge.s32.totalorder %s2475_s21, 1  ;;  %s2475_s21 = sphi %s2515_s21, %s17_s21  }
   0x2   : > { %p225_p1 = scmp.lt.s32.totalorder %s2475_s21, 3 }
   0x4   : > { %p226_p2 = pnand %p2050_p0, %p225_p1 }
   0x5   : > { %v294_v0 = vld [vmem:[%s3344_s1 + $0x4] sm:$0xf] (!%p226_p2)  ;;  %vm384_vm0 = vcmask (!%p226_p2), 1043456   ;;  %p263_p3 = scmp.lt.s32.totalorder (!%p226_p2), %s2046_s22, 1  ;;  %v2477_v1 = vmov (!%p226_p2), 0.0   ;;  %vm2478_vm1 = vmmov (!%p226_p2), 0  }
   0x6   : > { %229 = sbr.rel (%p226_p2) target bundleno = 751 (0x2ef), region = 40  ;;  %2189 = vmatprep.subr.bf16.mxu0 (!%p226_p2), %v2477_v1  ;;  %2387 = vmatprep.subr.bf16.mxu1 (!%p226_p2), %v2477_v1  ;;  %v386_v2 = vsel (!%p226_p2), %vm384_vm0, %v294_v0, 0  ;;  %vm323_vm2 = vsmask.f32 (!%p226_p2), 7424  ;;  %v548_v13 = vld [vmem:[%s3344_s1 + $0x8] sm:$0xf] (!%p226_p2) }
   0x7   : > { %2190 = vmatpush3.bf16.msra.mxu0 (!%p226_p2), %v386_v2  ;;  %2388 = vmatpush3.bf16.msra.mxu1 (!%p226_p2), %v386_v2  ;;  %vm368_vm3 = vcmask (!%p226_p2), 64512   ;;  %v292_v22 = vld [vmem:[%s3344_s1] sm:$0xf] (!%p226_p2)  ;;  %v580_v26 = vsel (!%p226_p2), %vm384_vm0, %v548_v13, 0  ;;  %vm552_vm4 = vcmask (!%p226_p2), 1046528   ;;  %vm982_vm6 = vcmask (!%p226_p2), 1045504  }
   0x8   : > { %2191 = vmatprep.mubr.msk.bf16.mxu0 (!%p226_p2), %vm2478_vm1, %v2477_v1  ;;  %2203 = vmatprep.mubr.msk.bf16.mxu1 (!%p226_p2), %vm2478_vm1, %v2477_v1  ;;  %v472_v31 = vsel (!%p226_p2), %vm384_vm0, %v292_v22, 0  ;;  %v676_v48 = vld [vmem:[%s3344_s1 + $0xc] sm:$0xf] (!%p226_p2)  ;;  %v818_v53 = vld [vmem:[%s3344_s1 + $0x10] sm:$0xf] (!%p226_p2)  ;;  %vm1412_vm8 = vcmask (!%p226_p2), 1044480  }
   0x9   : > { %2233 = vmatprep.subr.bf16.mxu0 (!%p226_p2), %v2477_v1  ;;  %2211 = vmatprep.subr.bf16.mxu1 (!%p226_p2), %v2477_v1  ;;  %v732_v50 = vsel (!%p226_p2), %vm384_vm0, %v676_v48, 0  ;;  %v892_v55 = vsel (!%p226_p2), %vm384_vm0, %v818_v53, 0  ;;  %vm822_vm5 = vsmask.f32 (!%p226_p2), 6400  ;;  %vm1252_vm7 = vsmask.f32 (!%p226_p2), 5376 }
   0xa   : > { %s2479_s27 = smov (!%p226_p2), 120  }
   0xd   : > { %s3383_s22 = smov (!%p263_p3, %s2046_s22), 1 }
   0xe   : > { %s2389_s25 = smul.u32 56, %s3383_s22  ;;  %s280_s14 = scalar_lea.vmem %s3349_s6, %s3383_s22 }
  0x10   : > { %s2541_s28 = scalar_lea.vmem %s3343_s0, %s2389_s25 }
  0x11   : > { %v282_v3 = vld [vmem:[%s2541_s28] sm:$0xf]  ;;  %v2545_v4 = vld [vmem:[%s2541_s28 + $0x4] sm:$0xf]  ;;  %v2551_v6 = vld [vmem:[%s2541_s28 + $0x8] sm:$0xff]  }
  0x12   : > { %v2548_v5 = vcombine.low %v282_v3, %v2545_v4  ;;  %v332_v9 = vshll.u32 %v2551_v6, 16  ;;  %v2557_v10 = vld [vmem:[%s2541_s28 + $0x18] sm:$0xff]   ;;  %v2560_v11 = vld [vmem:[%s2541_s28 + $0x20] sm:$0xff]   ;;  %v2563_v12 = vld [vmem:[%s2541_s28 + $0x10] sm:$0xff]   ;;  %v336_v23 = vshrl.u32 %v2551_v6, 16  ;;  %v554_v52 = vrot.slane %v2551_v6, 1 }
  0x13   : > { %v348_v16 = vshll.u32 %v2557_v10, 16  ;;  %v352_v17 = vshrl.u32 %v2557_v10, 16  ;;  %v356_v18 = vshll.u32 %v2560_v11, 16  ;;  %v2572_v19 = vld [vmem:[%s2541_s28 + $0x28] ss:$0 sps:$4 sm:$0x11]  }
  0x14   : > { %v325_v7 = vshrl.u32 %v2548_v5, 16  ;;  %v327_v8 = vshll.u32 %v2548_v5, 16  ;;  %v334_v15 = vrot.slane %v332_v9, 1  ;;  %v340_v24 = vshll.u32 %v2563_v12, 16  ;;  %v2596_v39 = vld [vmem:[%s2541_s28 + $0x24] sm:$0xff]   ;;  %v2667_v2 = vld [vmem:[%s2541_s28 + $0xc] sm:$0xff]  }
  0x15   : > { %v350_v21 = vrot.slane %v348_v16, 1  ;;  %v358_v25 = vrot.slane %v356_v18, 1  ;;  %v360_v29 = vshrl.u32 %v2560_v11, 16  ;;  %v364_v30 = vshll.u32 %v2572_v19, 16  ;;  %v547_v43 = vld [vmem:[%s2541_s28] sm:$0xe] }
  0x16   : > { %v329_v14 = vrot.slane %v327_v8, 1  ;;  %v338_v33 = vor.u32 %v336_v23, %v334_v15  ;;  %v342_v34 = vrot.slane %v340_v24, 1  ;;  %v344_v38 = vshrl.u32 %v2563_v12, 16  ;;  %v2436_v40 = vld [vmem:[%s2541_s28 + $0x2c] ss:$0 sps:$4 sm:$0x11]  }
  0x17   : > { %v354_v28 = vor.u32 %v352_v17, %v350_v21  ;;  %v362_v35 = vor.u32 %v360_v29, %v358_v25  ;;  %v366_v36 = vrot.slane %v364_v30, 1  ;;  %v712_v44 = vrot.slane %v2596_v39, 1  ;;  %v665_v61 = vld [vmem:[%s2541_s28 + $0x4] sm:$0xe]  ;;  %v2662_v62 = vld [vmem:[%s2541_s28 + $0x8] sm:$0xf] }
  0x18   : > { %v330_v20 = vor.u32 %v329_v14, %v325_v7  ;;  %v343_v37 = vsel %vm323_vm2, %v338_v33, %v342_v34  ;;  %v346_v42 = vor.u32 %v344_v38, %v342_v34  ;;  %v714_v45 = vrot.slane %v2436_v40, 1  ;;  %v2686_v18 = vld [vmem:[%s2541_s28 + $0x14] sm:$0xff]   ;;  %v2706_v30 = vld [vmem:[%s2541_s28 + $0x1c] sm:$0xff]   ;;  %v2730_v48 = vld [vmem:[%s2541_s28 + $0x2c] ss:$0 sps:$4 sm:$0x33]  }
  0x19   : > { %v359_v32 = vsel %vm323_vm2, %v354_v28, %v358_v25  ;;  %v367_v41 = vsel %vm323_vm2, %v362_v35, %v366_v36  ;;  %v2070_v49 = vcombine.low %v547_v43, %v2545_v4  ;;  %v556_v56 = vrot.slane %v2563_v12, 1  ;;  %v1106_v24 = vld [vmem:[%s3344_s1 + $0x18] sm:$0xf]  ;;  %v977_v53 = vld [vmem:[%s2541_s28 + $0x4] sm:$0xc] }
  0x1a   : > { %v335_v27 = vsel %vm323_vm2, %v330_v20, %v334_v15  ;;  %2204 = vmatmul.mubr.msk.bf16.vlgmr.msra.gmra.mrb[0].mxu1 %vm368_vm3, %v359_v32  ;;  %v2611_v46 = vsel %vm552_vm4, %v712_v44, %v714_v45  ;;  %v351_v47 = vsel %vm323_vm2, %v346_v42, %v350_v21  ;;  %v558_v58 = vrot.slane %v2557_v10, 1 }
  0x1b   : > { %2192 = vmatmul.mubr.msk.bf16.vlgmr.msra.gmra.mrb[0].mxu0 %vm368_vm3, %v335_v27  ;;  %2212 = vmatpush3.bf16.msra.mxu1 %v472_v31  ;;  %v553_v51 = vrot.slane %v2070_v49, 1  ;;  %v557_v57 = vsel %vm552_vm4, %v554_v52, %v556_v56  ;;  %v560_v60 = vrot.slane %v2560_v11, 1  ;;  %v2076_v0 = vcombine.low %v665_v61, %v2662_v62 }
  0x1c   : > { %2234 = vmatpush3.bf16.msra.mxu0 %v580_v26  ;;  %2195 = vmatprep.mubr.msk.bf16.mxu0 %vm2478_vm1, %v2477_v1  ;;  %v559_v59 = vsel %vm552_vm4, %v556_v56, %v558_v58  ;;  %v562_v3 = vrot.slane %v2572_v19, 1  ;;  %v835_v7 = vshll.u32 %v2667_v2, 16  ;;  %v706_v9 = vrot.slane %v2667_v2, 1 }
  0x1d   : > { %2277 = vmatprep.subr.bf16.mxu0 %v2477_v1  ;;  %2207 = vmatprep.mubr.msk.bf16.mxu1 %vm2478_vm1, %v2477_v1  ;;  %v555_v54 = vsel %vm552_vm4, %v553_v51, %v554_v52  ;;  %v561_v63 = vsel %vm552_vm4, %v558_v58, %v560_v60  ;;  %v824_v4 = vshrl.u32 %v2076_v0, 16  ;;  %v705_v8 = vrot.slane %v2076_v0, 1  ;;  %v1095_v58 = vld [vmem:[%s2541_s28 + $0x8] sm:$0xc] }
  0x1e   : > { %2255 = vmatprep.subr.bf16.mxu1 %v2477_v1  ;;  %v837_v16 = vrot.slane %v835_v7, 2  ;;  %v841_v21 = vshrl.u32 %v2686_v18, 16  ;;  %v844_v22 = vshll.u32 %v2686_v18, 16  ;;  %v708_v23 = vrot.slane %v2686_v18, 1  ;;  %v1408_v7 = vld [vmem:[%s3344_s1 + $0x20] sm:$0xf] }
  0x1f   : > { %v826_v13 = vrot.slane %v824_v4, 1  ;;  %v707_v17 = vsel %vm552_vm4, %v705_v8, %v706_v9  ;;  %v1162_v28 = vsel %vm384_vm0, %v1106_v24, 0  ;;  %v850_v32 = vshrl.u32 %v2706_v30, 16 }
  0x20   : > { %v843_v26 = vrot.slane %v841_v21, 1  ;;  %v846_v27 = vrot.slane %v844_v22, 2  ;;  %v709_v29 = vsel %vm552_vm4, %v706_v9, %v708_v23  ;;  %v853_v33 = vshll.u32 %v2706_v30, 16  ;;  %v2781_v9 = vld [vmem:[%s2541_s28 + $0x18] sm:$0xff]  }
  0x21   : > { %v710_v34 = vrot.slane %v2706_v30, 1  ;;  %v852_v36 = vrot.slane %v850_v32, 1  ;;  %v862_v42 = vshll.u32 %v2596_v39, 16  ;;  %v868_v51 = vshrl.u32 %v2730_v48, 16 }
  0x22   : > { %2208 = vmatmul.mubr.msk.bf16.gmra.mrb[4].mxu1 %vm368_vm3, %v367_v41  ;;  %v847_v31 = vor.u32 %v846_v27, %v843_v26  ;;  %v859_v41 = vshrl.u32 %v2596_v39, 16  ;;  %v871_v52 = vshll.u32 %v2730_v48, 16  ;;  %v2093_v56 = vcombine.low %v977_v53, %v2662_v62 }
  0x23   : > { %2196 = vmatmul.mubr.msk.bf16.gmra.mrb[4].mxu0 %vm368_vm3, %v343_v37  ;;  %2213 = vmatprep.mubr.msk.bf16.mxu1 %vm2478_vm1, %v2477_v1  ;;  %v855_v37 = vrot.slane %v853_v33, 2  ;;  %v711_v38 = vsel %vm552_vm4, %v708_v23, %v710_v34  ;;  %v713_v49 = vsel %vm552_vm4, %v710_v34, %v712_v44  ;;  %v984_v61 = vrot.slane %v2667_v2, 2 }
  0x24   : > { %2199 = vmatprep.mubr.msk.bf16.mxu0 %vm2478_vm1, %v2477_v1  ;;  %v861_v45 = vrot.slane %v859_v41, 1  ;;  %v992_v23 = vrot.slane %v2730_v48, 2 }
  0x25   : > { %v856_v40 = vor.u32 %v855_v37, %v852_v36 }
  0x27   : > { %v857_v43 = vsel %vm822_vm5, %v847_v31, %v856_v40 }
  0x2a   : > { %2214 = vmatmul.mubr.msk.bf16.vlgmr.msra.gmra.mrb[8].mxu1 %vm368_vm3, %v2548_v5  ;;  %v827_v5 = vshll.u32 %v2076_v0, 16 }
  0x2b   : > { %2200 = vmatmul.mubr.msk.bf16.gmra.mrb[8].mxu0 %vm368_vm3, %v351_v47  ;;  %2256 = vmatpush3.bf16.msra.mxu1 %v732_v50  ;;  %v864_v47 = vrot.slane %v862_v42, 2 }
  0x2c   : > { %2235 = vmatprep.mubr.msk.bf16.mxu0 %vm2478_vm1, %v2477_v1  ;;  %2217 = vmatprep.mubr.msk.bf16.mxu1 %vm2478_vm1, %v2477_v1  ;;  %v829_v14 = vrot.slane %v827_v5, 2 }
  0x2d   : > { %2299 = vmatprep.subr.bf16.mxu1 %v2477_v1  ;;  %v865_v50 = vor.u32 %v864_v47, %v861_v45 }
  0x2e   : > { %v830_v19 = vor.u32 %v829_v14, %v826_v13  ;;  %v1138_v13 = vrot.slane %v2781_v9, 2  ;;  %v988_v14 = vrot.slane %v2706_v30, 2 }
  0x2f   : > { %v866_v44 = vsel %vm822_vm5, %v856_v40, %v865_v50  ;;  %v1274_v40 = vshll.u32 %v2781_v9, 16 }
  0x31   : > { %v1276_v47 = vrot.slane %v1274_v40, 3 }
  0x32   : > { %2218 = vmatmul.mubr.msk.bf16.gmra.mrb[12].mxu1 %vm368_vm3, %v2551_v6  ;;  %v832_v6 = vshrl.u32 %v2667_v2, 16 }
  0x33   : > { %2236 = vmatmul.mubr.msk.bf16.vlgmr.msra.gmra.mrb[12].mxu0 %vm368_vm3, %v555_v54  ;;  %2221 = vmatprep.mubr.msk.bf16.mxu1 %vm2478_vm1, %v2477_v1  ;;  %v870_v54 = vrot.slane %v868_v51, 1 }
  0x34   : > { %2278 = vmatpush3.bf16.msra.mxu0 %v892_v55  ;;  %2239 = vmatprep.mubr.msk.bf16.mxu0 %vm2478_vm1, %v2477_v1  ;;  %v834_v15 = vrot.slane %v832_v6, 1  ;;  %v873_v55 = vrot.slane %v871_v52, 2  ;;  %v986_v6 = vrot.slane %v2686_v18, 2 }
  0x35   : > { %2321 = vmatprep.subr.bf16.mxu0 %v2477_v1 }
  0x36   : > { %v838_v20 = vor.u32 %v837_v16, %v834_v15  ;;  %v2795_v16 = vld [vmem:[%s2541_s28 + $0x20] sm:$0xff]  }
  0x37   : > { %v1140_v18 = vrot.slane %v2795_v16, 2  ;;  %v1280_v51 = vshrl.u32 %v2795_v16, 16  ;;  %v1283_v52 = vshll.u32 %v2795_v16, 16 }
  0x38   : > { %v839_v25 = vsel %vm822_vm5, %v830_v19, %v838_v20  ;;  %v848_v35 = vsel %vm822_vm5, %v838_v20, %v847_v31  ;;  %v2808_v20 = vld [vmem:[%s2541_s28 + $0x28] sm:$0xff]  }
  0x39   : > { %v1141_v19 = vsel %vm982_vm6, %v1138_v13, %v1140_v18  ;;  %v1142_v22 = vrot.slane %v2808_v20, 2 }
  0x3a   : > { %2222 = vmatmul.mubr.msk.bf16.gmra.mrb[16].mxu1 %vm368_vm3, %v2563_v12  ;;  %v978_v12 = vld [vmem:[%s3344_s1 + $0x14] sm:$0xf] }
  0x3b   : > { %2240 = vmatmul.mubr.msk.bf16.gmra.mrb[16].mxu0 %vm368_vm3, %v557_v57  ;;  %2225 = vmatprep.mubr.msk.bf16.mxu1 %vm2478_vm1, %v2477_v1  ;;  %v874_v57 = vor.u32 %v873_v55, %v870_v54  ;;  %v1143_v27 = vsel %vm982_vm6, %v1140_v18, %v1142_v22  ;;  %v1282_v54 = vrot.slane %v1280_v51, 2  ;;  %v1285_v55 = vrot.slane %v1283_v52, 3 }
  0x3c   : > { %2243 = vmatprep.mubr.msk.bf16.mxu0 %vm2478_vm1, %v2477_v1 }
  0x3d   : > { %v875_v62 = vsel %vm822_vm5, %v865_v50, %v874_v57  ;;  %v1286_v57 = vor.u32 %v1285_v55, %v1282_v54 }
  0x42   : > { %2226 = vmatmul.mubr.msk.bf16.gmra.mrb[20].mxu1 %vm368_vm3, %v2557_v10  ;;  %v563_v10 = vsel %vm552_vm4, %v560_v60, %v562_v3  ;;  %v983_v60 = vrot.slane %v2093_v56, 2  ;;  %v1416_v56 = vrot.slane %v2781_v9, 3 }
  0x43   : > { %2244 = vmatmul.mubr.msk.bf16.gmra.mrb[20].mxu0 %vm368_vm3, %v559_v59  ;;  %2229 = vmatprep.mubr.msk.bf16.mxu1 %vm2478_vm1, %v2477_v1  ;;  %v2753_v59 = vld [vmem:[%s2541_s28 + $0xc] sm:$0xf] }
  0x44   : > { %2247 = vmatprep.mubr.msk.bf16.mxu0 %vm2478_vm1, %v2477_v1  ;;  %v2099_v0 = vcombine.low %v1095_v58, %v2753_v59  ;;  %v985_v3 = vsel %vm982_vm6, %v983_v60, %v984_v61  ;;  %v1289_v58 = vshrl.u32 %v2808_v20, 16 }
  0x46   : > { %v1135_v2 = vrot.slane %v2099_v0, 2  ;;  %v1257_v24 = vshll.u32 %v2099_v0, 16 }
  0x48   : > { %v1259_v31 = vrot.slane %v1257_v24, 3 }
  0x4a   : > { %2230 = vmatmul.mubr.msk.bf16.gmra.mrb[24].mxu1 %vm368_vm3, %v2560_v11  ;;  %v1010_v11 = vsel %vm384_vm0, %v978_v12, 0  ;;  %v987_v12 = vsel %vm982_vm6, %v984_v61, %v986_v6 }
  0x4b   : > { %2248 = vmatmul.mubr.msk.bf16.gmra.mrb[24].mxu0 %vm368_vm3, %v561_v63  ;;  %2257 = vmatprep.mubr.msk.bf16.mxu1 %vm2478_vm1, %v2477_v1  ;;  %v1248_v63 = vld [vmem:[%s3344_s1 + $0x1c] sm:$0xf] }
  0x4c   : > { %2251 = vmatprep.mubr.msk.bf16.mxu0 %vm2478_vm1, %v2477_v1  ;;  %v1322_v4 = vsel %vm384_vm0, %v1248_v63, 0 }
  0x52   : > { %2258 = vmatmul.mubr.msk.bf16.vlgmr.msra.gmra.mrb[28].mxu1 %vm368_vm3, %v707_v17  ;;  %v989_v17 = vsel %vm982_vm6, %v986_v6, %v988_v14 }
  0x53   : > { %2252 = vmatmul.mubr.msk.bf16.gmra.mrb[28].mxu0 %vm368_vm3, %v563_v10  ;;  %2300 = vmatpush3.bf16.msra.mxu1 %v1010_v11  ;;  %v1440_v10 = vsel %vm384_vm0, %v1408_v7, 0  ;;  %v990_v11 = vrot.slane %v2596_v39, 2  ;;  %v1254_v39 = vshrl.u32 %v2099_v0, 16  ;;  %v2446_v0 = vld [vmem:[%s2541_s28 + $0x30] ss:$0 sps:$4 sm:$0x77]  }
  0x54   : > { %2279 = vmatprep.mubr.msk.bf16.mxu0 %vm2478_vm1, %v2477_v1  ;;  %2261 = vmatprep.mubr.msk.bf16.mxu1 %vm2478_vm1, %v2477_v1 }
  0x55   : > { %2343 = vmatprep.subr.bf16.mxu1 %v2477_v1  ;;  %v991_v21 = vsel %vm982_vm6, %v988_v14, %v990_v11  ;;  %v1256_v30 = vrot.slane %v1254_v39, 2  ;;  %v1422_v14 = vrot.slane %v2446_v0, 3 }
  0x57   : > { %v1260_v36 = vor.u32 %v1259_v31, %v1256_v30 }
  0x5a   : > { %2262 = vmatmul.mubr.msk.bf16.gmra.mrb[32].mxu1 %vm368_vm3, %v709_v29  ;;  %v993_v29 = vsel %vm982_vm6, %v990_v11, %v992_v23 }
  0x5b   : > { %2280 = vmatmul.mubr.msk.bf16.vlgmr.msra.gmra.mrb[32].mxu0 %vm368_vm3, %v839_v25  ;;  %2265 = vmatprep.mubr.msk.bf16.mxu1 %vm2478_vm1, %v2477_v1 }
  0x5c   : > { %2322 = vmatpush3.bf16.msra.mxu0 %v1162_v28  ;;  %2283 = vmatprep.mubr.msk.bf16.mxu0 %vm2478_vm1, %v2477_v1  ;;  %v2444_v28 = vld [vmem:[%s2541_s28 + $0x30] ss:$0 sps:$4 sm:$0x33]  }
  0x5d   : > { %2365 = vmatprep.subr.bf16.mxu0 %v2477_v1  ;;  %v1144_v34 = vrot.slane %v2444_v28, 2 }
  0x5f   : > { %v1145_v41 = vsel %vm982_vm6, %v1142_v22, %v1144_v34 }
  0x62   : > { %2266 = vmatmul.mubr.msk.bf16.gmra.mrb[36].mxu1 %vm368_vm3, %v711_v38  ;;  %v1271_v38 = vshrl.u32 %v2781_v9, 16  ;;  %v1420_v9 = vrot.slane %v2808_v20, 3 }
  0x63   : > { %2284 = vmatmul.mubr.msk.bf16.gmra.mrb[36].mxu0 %vm368_vm3, %v848_v35  ;;  %2269 = vmatprep.mubr.msk.bf16.mxu1 %vm2478_vm1, %v2477_v1  ;;  %v1407_v35 = vld [vmem:[%s2541_s28 + $0x8] sm:$0x8] }
  0x64   : > { %2287 = vmatprep.mubr.msk.bf16.mxu0 %vm2478_vm1, %v2477_v1  ;;  %v2116_v42 = vcombine.low %v1407_v35, %v2753_v59  ;;  %v1273_v45 = vrot.slane %v1271_v38, 2  ;;  %v1292_v59 = vshll.u32 %v2808_v20, 16 }
  0x66   : > { %v1413_v48 = vrot.slane %v2116_v42, 3  ;;  %v1277_v50 = vor.u32 %v1276_v47, %v1273_v45  ;;  %v1294_v63 = vrot.slane %v1292_v59, 3 }
  0x68   : > { %v1287_v61 = vsel %vm1252_vm7, %v1277_v50, %v1286_v57 }
  0x6a   : > { %2270 = vmatmul.mubr.msk.bf16.gmra.mrb[40].mxu1 %vm368_vm3, %v713_v49 }
  0x6b   : > { %2288 = vmatmul.mubr.msk.bf16.gmra.mrb[40].mxu0 %vm368_vm3, %v857_v43  ;;  %2273 = vmatprep.mubr.msk.bf16.mxu1 %vm2478_vm1, %v2477_v1 }
  0x6c   : > { %2291 = vmatprep.mubr.msk.bf16.mxu0 %vm2478_vm1, %v2477_v1 }
  0x72   : > { %2274 = vmatmul.mubr.msk.bf16.gmra.mrb[44].mxu1 %vm368_vm3, %v2611_v46  ;;  %v2764_v46 = vld [vmem:[%s2541_s28 + $0x10] sm:$0xff]   ;;  %s2390_s28 = smul.u32 80, %s3383_s22 }
  0x73   : > { %2292 = vmatmul.mubr.msk.bf16.gmra.mrb[44].mxu0 %vm368_vm3, %v866_v44  ;;  %2301 = vmatprep.mubr.msk.bf16.mxu1 %vm2478_vm1, %v2477_v1  ;;  %v1136_v5 = vrot.slane %v2764_v46, 2  ;;  %v1262_v25 = vshrl.u32 %v2764_v46, 16  ;;  %v1265_v26 = vshll.u32 %v2764_v46, 16  ;;  %v1414_v49 = vrot.slane %v2764_v46, 3 }
  0x74   : > { %2295 = vmatprep.mubr.msk.bf16.mxu0 %vm2478_vm1, %v2477_v1  ;;  %v1418_v46 = vrot.slane %v2795_v16, 3  ;;  %s3239_s7 = scalar_lea.vmem %s3347_s4, %s2390_s28  ;;  %s3293_s10 = scalar_lea.vmem %s3348_s5, %s2390_s28 }
  0x75   : > { %v1137_v8 = vsel %vm982_vm6, %v1135_v2, %v1136_v5  ;;  %v1139_v15 = vsel %vm982_vm6, %v1136_v5, %v1138_v13  ;;  %v1264_v32 = vrot.slane %v1262_v25, 2  ;;  %v1267_v33 = vrot.slane %v1265_v26, 3 }
  0x76   : > { %v1415_v53 = vsel %vm1412_vm8, %v1413_v48, %v1414_v49  ;;  %v1417_v60 = vsel %vm1412_vm8, %v1414_v49, %v1416_v56  ;;  %v1301_v2 = vshll.u32 %v2446_v0, 16  ;;  %v1419_v5 = vsel %vm1412_vm8, %v1416_v56, %v1418_v46 }
  0x77   : > { %v1268_v37 = vor.u32 %v1267_v33, %v1264_v32 }
  0x79   : > { %v1269_v43 = vsel %vm1252_vm7, %v1260_v36, %v1268_v37  ;;  %v1278_v44 = vsel %vm1252_vm7, %v1268_v37, %v1277_v50 }
  0x7a   : > { %2302 = vmatmul.mubr.msk.bf16.vlgmr.msra.gmra.mrb[48].mxu1 %vm368_vm3, %v985_v3 }
  0x7b   : > { %2296 = vmatmul.mubr.msk.bf16.gmra.mrb[48].mxu0 %vm368_vm3, %v875_v62  ;;  %2344 = vmatpush3.bf16.msra.mxu1 %v1322_v4  ;;  %v1291_v62 = vrot.slane %v1289_v58, 2  ;;  %v1298_v4 = vshrl.u32 %v2446_v0, 16 }
  0x7c   : > { %2323 = vmatprep.mubr.msk.bf16.mxu0 %vm2478_vm1, %v2477_v1  ;;  %2305 = vmatprep.mubr.msk.bf16.mxu1 %vm2478_vm1, %v2477_v1 }
  0x7d   : > { %v1295_v3 = vor.u32 %v1294_v63, %v1291_v62  ;;  %v1300_v7 = vrot.slane %v1298_v4, 2 }
  0x7f   : > { %v1296_v6 = vsel %vm1252_vm7, %v1286_v57, %v1295_v3 }
  0x82   : > { %2306 = vmatmul.mubr.msk.bf16.gmra.mrb[52].mxu1 %vm368_vm3, %v987_v12  ;;  %v1421_v12 = vsel %vm1412_vm8, %v1418_v46, %v1420_v9 }
  0x83   : > { %2324 = vmatmul.mubr.msk.bf16.vlgmr.msra.gmra.mrb[52].mxu0 %vm368_vm3, %v1137_v8  ;;  %2309 = vmatprep.mubr.msk.bf16.mxu1 %vm2478_vm1, %v2477_v1  ;;  %v1303_v8 = vrot.slane %v1301_v2, 3 }
  0x84   : > { %2366 = vmatpush3.bf16.msra.mxu0 %v1440_v10  ;;  %2327 = vmatprep.mubr.msk.bf16.mxu0 %vm2478_vm1, %v2477_v1 }
  0x85   : > { %v1304_v10 = vor.u32 %v1303_v8, %v1300_v7 }
  0x87   : > { %v1305_v13 = vsel %vm1252_vm7, %v1295_v3, %v1304_v10 }
  0x8a   : > { %2310 = vmatmul.mubr.msk.bf16.gmra.mrb[56].mxu1 %vm368_vm3, %v989_v17 }
  0x8b   : > { %2328 = vmatmul.mubr.msk.bf16.gmra.mrb[56].mxu0 %vm368_vm3, %v1139_v15  ;;  %2313 = vmatprep.mubr.msk.bf16.mxu1 %vm2478_vm1, %v2477_v1  ;;  %v1423_v15 = vsel %vm1412_vm8, %v1420_v9, %v1422_v14 }
  0x8c   : > { %2331 = vmatprep.mubr.msk.bf16.mxu0 %vm2478_vm1, %v2477_v1 }
  0x92   : > { %2314 = vmatmul.mubr.msk.bf16.gmra.mrb[60].mxu1 %vm368_vm3, %v991_v21 }
  0x93   : > { %2332 = vmatmul.mubr.msk.bf16.gmra.mrb[60].mxu0 %vm368_vm3, %v1141_v19  ;;  %2317 = vmatprep.mubr.msk.bf16.mxu1 %vm2478_vm1, %v2477_v1 }
  0x94   : > { %2335 = vmatprep.mubr.msk.bf16.mxu0 %vm2478_vm1, %v2477_v1 }
  0x9a   : > { %2318 = vmatmul.mubr.msk.bf16.gmra.mrb[64].mxu1 %vm368_vm3, %v993_v29 }
  0x9b   : > { %2336 = vmatmul.mubr.msk.bf16.gmra.mrb[64].mxu0 %vm368_vm3, %v1143_v27  ;;  %2345 = vmatprep.mubr.msk.bf16.mxu1 %vm2478_vm1, %v2477_v1 }
  0x9c   : > { %2339 = vmatprep.mubr.msk.bf16.mxu0 %vm2478_vm1, %v2477_v1 }
  0xa2   : > { %2346 = vmatmul.mubr.msk.bf16.vlgmr.msra.gmra.mrb[68].mxu1 %vm368_vm3, %v1269_v43 }
  0xa3   : > { %2340 = vmatmul.mubr.msk.bf16.gmra.mrb[68].mxu0 %vm368_vm3, %v1145_v41  ;;  %2349 = vmatprep.mubr.msk.bf16.mxu1 %vm2478_vm1, %v2477_v1 }
  0xa4   : > { %2367 = vmatprep.mubr.msk.bf16.mxu0 %vm2478_vm1, %v2477_v1 }
  0xaa   : > { %2350 = vmatmul.mubr.msk.bf16.gmra.mrb[72].mxu1 %vm368_vm3, %v1278_v44 }
  0xab   : > { %2368 = vmatmul.mubr.msk.bf16.vlgmr.msra.gmra.mrb[72].mxu0 %vm368_vm3, %v1415_v53  ;;  %2353 = vmatprep.mubr.msk.bf16.mxu1 %vm2478_vm1, %v2477_v1 }
  0xac   : > { %2371 = vmatprep.mubr.msk.bf16.mxu0 %vm2478_vm1, %v2477_v1 }
  0xb2   : > { %2354 = vmatmul.mubr.msk.bf16.gmra.mrb[76].mxu1 %vm368_vm3, %v1287_v61 }
  0xb3   : > { %2372 = vmatmul.mubr.msk.bf16.gmra.mrb[76].mxu0 %vm368_vm3, %v1417_v60  ;;  %2357 = vmatprep.mubr.msk.bf16.mxu1 %vm2478_vm1, %v2477_v1 }
  0xb4   : > { %2375 = vmatprep.mubr.msk.bf16.mxu0 %vm2478_vm1, %v2477_v1 }
  0xba   : > { %2358 = vmatmul.mubr.msk.bf16.gmra.mrb[80].mxu1 %vm368_vm3, %v1296_v6 }
  0xbb   : > { %2376 = vmatmul.mubr.msk.bf16.gmra.mrb[80].mxu0 %vm368_vm3, %v1419_v5  ;;  %2361 = vmatprep.mubr.msk.bf16.mxu1 %vm2478_vm1, %v2477_v1 }
  0xbc   : > { %2379 = vmatprep.mubr.msk.bf16.mxu0 %vm2478_vm1, %v2477_v1 }
  0xc2   : > { %2362 = vmatmul.mubr.msk.bf16.gmra.mrb[84].mxu1 %vm368_vm3, %v1305_v13 }
  0xc3   : > { %2380 = vmatmul.mubr.msk.bf16.gmra.mrb[84].mxu0 %vm368_vm3, %v1421_v12 }
  0xc4   : > { %2383 = vmatprep.mubr.msk.bf16.mxu0 %vm2478_vm1, %v2477_v1 }
  0xcb   : > { %2384 = vmatmul.mubr.msk.bf16.gmra.mrb[88].mxu0 %vm368_vm3, %v1423_v15 }
  0xed   : > { %v446_v11 = vpop.f32.mrb[0].mxu1 }
  0xee   : > { %v422_v16 = vpop.f32.mrb[0].mxu0  ;;  %v2205_v20 = vpop.f32.mrb[1].mxu1 }
  0xef   : > { %v2193_v17 = vpop.f32.mrb[1].mxu0  ;;  %v449_v21 = vpop.f32.mrb[2].mxu1 }
  0xf0   : > { %v425_v18 = vpop.f32.mrb[2].mxu0  ;;  %v2206_v22 = vpop.f32.mrb[3].mxu1 }
  0xf1   : > { %v2194_v19 = vpop.f32.mrb[3].mxu0 }
  0xf5   : > { %v454_v25 = vpop.f32.mrb[4].mxu1 }
  0xf6   : > { %v430_v23 = vpop.f32.mrb[4].mxu0  ;;  %v2209_v27 = vpop.f32.mrb[5].mxu1 }
  0xf7   : > { %v2197_v39 = vpop.f32.mrb[5].mxu0  ;;  %v457_v28 = vpop.f32.mrb[6].mxu1 }
  0xf8   : > { %v433_v24 = vpop.f32.mrb[6].mxu0  ;;  %v2210_v29 = vpop.f32.mrb[7].mxu1 }
  0xf9   : > { %v2198_v26 = vpop.f32.mrb[7].mxu0 }
  0xfd   : > { %v508_v32 = vpop.f32.mrb[8].mxu1 }
  0xfe   : > { %v438_v30 = vpop.f32.mrb[8].mxu0  ;;  %v509_v34 = vadd.f32 %v508_v32, %v422_v16  ;;  %v2215_v35 = vpop.f32.mrb[9].mxu1 }
  0xff   : > { %v2201_v31 = vpop.f32.mrb[9].mxu0  ;;  %v511_v37 = vpop.f32.mrb[10].mxu1 }
 0x100   : > { %v441_v33 = vpop.f32.mrb[10].mxu0  ;;  %v512_v38 = vadd.f32 %v511_v37, %v425_v18  ;;  %v2216_v40 = vpop.f32.mrb[11].mxu1 }
 0x101   : > { %v2202_v36 = vpop.f32.mrb[11].mxu0 }
 0x105   : > { %v516_v45 = vpop.f32.mrb[12].mxu1 }
 0x106   : > { %v616_v41 = vpop.f32.mrb[12].mxu0  ;;  %v517_v48 = vadd.f32 %v516_v45, %v430_v23  ;;  %v2219_v49 = vpop.f32.mrb[13].mxu1 }
 0x107   : > { %v655_v42 = vadd.f32 %v616_v41, %v509_v34  ;;  %v2237_v43 = vpop.f32.mrb[13].mxu0  ;;  %v519_v52 = vpop.f32.mrb[14].mxu1 }
 0x108   : > { %v619_v47 = vpop.f32.mrb[14].mxu0  ;;  %v520_v53 = vadd.f32 %v519_v52, %v433_v24  ;;  %v2220_v44 = vpop.f32.mrb[15].mxu1 }
 0x109   : > { %v656_v50 = vadd.f32 %v619_v47, %v512_v38  ;;  %v2238_v51 = vpop.f32.mrb[15].mxu0 }
 0x10d   : > { %v524_v57 = vpop.f32.mrb[16].mxu1 }
 0x10e   : > { %v624_v54 = vpop.f32.mrb[16].mxu0  ;;  %v525_v59 = vadd.f32 %v524_v57, %v438_v30  ;;  %v2223_v60 = vpop.f32.mrb[17].mxu1 }
 0x10f   : > { %v657_v55 = vadd.f32 %v624_v54, %v517_v48  ;;  %v2241_v56 = vpop.f32.mrb[17].mxu0  ;;  %v527_v63 = vpop.f32.mrb[18].mxu1 }
 0x110   : > { %v627_v58 = vpop.f32.mrb[18].mxu0  ;;  %v528_v0 = vadd.f32 %v527_v63, %v441_v33  ;;  %v2224_v46 = vpop.f32.mrb[19].mxu1 }
 0x111   : > { %v658_v61 = vadd.f32 %v627_v58, %v520_v53  ;;  %v2242_v62 = vpop.f32.mrb[19].mxu0 }
 0x115   : > { %v532_v5 = vpop.f32.mrb[20].mxu1 }
 0x116   : > { %v632_v3 = vpop.f32.mrb[20].mxu0  ;;  %v533_v7 = vadd.f32 %v532_v5, %v446_v11  ;;  %v2227_v8 = vpop.f32.mrb[21].mxu1 }
 0x117   : > { %v659_v4 = vadd.f32 %v632_v3, %v525_v59  ;;  %v2245_v2 = vpop.f32.mrb[21].mxu0  ;;  %v535_v12 = vpop.f32.mrb[22].mxu1 }
 0x118   : > { %v635_v6 = vpop.f32.mrb[22].mxu0  ;;  %v536_v13 = vadd.f32 %v535_v12, %v449_v21  ;;  %v2228_v14 = vpop.f32.mrb[23].mxu1 }
 0x119   : > { %v660_v9 = vadd.f32 %v635_v6, %v528_v0  ;;  %v2246_v10 = vpop.f32.mrb[23].mxu0 }
 0x11d   : > { %v540_v18 = vpop.f32.mrb[24].mxu1 }
 0x11e   : > { %v640_v15 = vpop.f32.mrb[24].mxu0  ;;  %v541_v20 = vadd.f32 %v540_v18, %v454_v25  ;;  %v2231_v22 = vpop.f32.mrb[25].mxu1 }
 0x11f   : > { %v661_v16 = vadd.f32 %v640_v15, %v533_v7  ;;  %v2249_v17 = vpop.f32.mrb[25].mxu0  ;;  %v543_v24 = vpop.f32.mrb[26].mxu1 }
 0x120   : > { %v643_v19 = vpop.f32.mrb[26].mxu0  ;;  %v544_v26 = vadd.f32 %v543_v24, %v457_v28  ;;  %v2232_v27 = vpop.f32.mrb[27].mxu1 }
 0x121   : > { %v662_v23 = vadd.f32 %v643_v19, %v536_v13  ;;  %v2250_v39 = vpop.f32.mrb[27].mxu0 }
 0x125   : > { %v768_v31 = vpop.f32.mrb[28].mxu1 }
 0x126   : > { %v648_v29 = vpop.f32.mrb[28].mxu0  ;;  %v807_v33 = vadd.f32 %v768_v31, %v655_v42  ;;  %v2259_v21 = vpop.f32.mrb[29].mxu1 }
 0x127   : > { %v663_v11 = vadd.f32 %v648_v29, %v541_v20  ;;  %v2253_v30 = vpop.f32.mrb[29].mxu0  ;;  %v771_v36 = vpop.f32.mrb[30].mxu1 }
 0x128   : > { %v651_v32 = vpop.f32.mrb[30].mxu0  ;;  %v808_v37 = vadd.f32 %v771_v36, %v656_v50  ;;  %v2260_v38 = vpop.f32.mrb[31].mxu1 }
 0x129   : > { %v664_v34 = vadd.f32 %v651_v32, %v544_v26  ;;  %v2254_v35 = vpop.f32.mrb[31].mxu0 }
 0x12d   : > { %v776_v43 = vpop.f32.mrb[32].mxu1 }
 0x12e   : > { %v928_v40 = vpop.f32.mrb[32].mxu0  ;;  %v809_v47 = vadd.f32 %v776_v43, %v657_v55  ;;  %v2263_v28 = vpop.f32.mrb[33].mxu1 }
 0x12f   : > { %v967_v25 = vadd.f32 %v928_v40, %v807_v33  ;;  %v2281_v41 = vpop.f32.mrb[33].mxu0  ;;  %v779_v51 = vpop.f32.mrb[34].mxu1 }
 0x130   : > { %v931_v45 = vpop.f32.mrb[34].mxu0  ;;  %v810_v52 = vadd.f32 %v779_v51, %v658_v61  ;;  %v2264_v53 = vpop.f32.mrb[35].mxu1 }
 0x131   : > { %v968_v48 = vadd.f32 %v931_v45, %v808_v37  ;;  %v2282_v49 = vpop.f32.mrb[35].mxu0  ;;  %v1546_v37 = vlaneseq }
 0x133   : > { %v2893_v45 = vshrl.u32 %v1546_v37, 7 }
 0x135   : > { %v784_v56 = vpop.f32.mrb[36].mxu1 }
 0x136   : > { %v936_v44 = vpop.f32.mrb[36].mxu0  ;;  %v811_v58 = vadd.f32 %v784_v56, %v659_v4  ;;  %v2267_v50 = vpop.f32.mrb[37].mxu1 }
 0x137   : > { %v969_v42 = vadd.f32 %v936_v44, %v809_v47  ;;  %v2285_v54 = vpop.f32.mrb[37].mxu0  ;;  %v787_v62 = vpop.f32.mrb[38].mxu1 }
 0x138   : > { %v939_v57 = vpop.f32.mrb[38].mxu0  ;;  %v812_v63 = vadd.f32 %v787_v62, %v660_v9  ;;  %v2268_v0 = vpop.f32.mrb[39].mxu1  ;;  %v2899_v54 = vmul.u32.u64.low 3435973837, %v2893_v45  ;;  %v2900_v56 = vmul.u32.u64.high 3435973837, %v2893_v45, %v2899_v54 }
 0x139   : > { %v970_v59 = vadd.f32 %v939_v57, %v810_v52  ;;  %v2286_v60 = vpop.f32.mrb[39].mxu0 }
 0x13d   : > { %v792_v2 = vpop.f32.mrb[40].mxu1 }
 0x13e   : > { %v944_v46 = vpop.f32.mrb[40].mxu0  ;;  %v813_v6 = vadd.f32 %v792_v2, %v661_v16  ;;  %v2271_v61 = vpop.f32.mrb[41].mxu1 }
 0x13f   : > { %v971_v55 = vadd.f32 %v944_v46, %v811_v58  ;;  %v2289_v3 = vpop.f32.mrb[41].mxu0  ;;  %v795_v10 = vpop.f32.mrb[42].mxu1 }
 0x140   : > { %v947_v5 = vpop.f32.mrb[42].mxu0  ;;  %v814_v12 = vadd.f32 %v795_v10, %v662_v23  ;;  %v2272_v13 = vpop.f32.mrb[43].mxu1 }
 0x141   : > { %v972_v7 = vadd.f32 %v947_v5, %v812_v63  ;;  %v2290_v8 = vpop.f32.mrb[43].mxu0  ;;  %v2916_v13 = vadd.s32 24, %v2893_v45 }
 0x142   : > { %v1688_v8 = vshrl.u32 %v2900_v56, 3 }
 0x145   : > { %v800_v17 = vpop.f32.mrb[44].mxu1 }
 0x146   : > { %v952_v14 = vpop.f32.mrb[44].mxu0  ;;  %v815_v9 = vadd.f32 %v800_v17, %v663_v11  ;;  %v2275_v19 = vpop.f32.mrb[45].mxu1 }
 0x147   : > { %v2883_v4 = vadd.f32 %v952_v14, %v813_v6  ;;  %v2293_v15 = vpop.f32.mrb[45].mxu0  ;;  %v803_v39 = vpop.f32.mrb[46].mxu1  ;;  %v2910_v6 = vadd.s32 16, %v2893_v45 }
 0x148   : > { %v955_v18 = vpop.f32.mrb[46].mxu0  ;;  %v816_v24 = vadd.f32 %v803_v39, %v664_v34  ;;  %v2276_v16 = vpop.f32.mrb[47].mxu1  ;;  %v1542_v39 = vld [vmem:[%s3346_s3] sm:$0x1] }
 0x149   : > { %v2885_v20 = vadd.f32 %v955_v18, %v814_v12  ;;  %v2294_v22 = vpop.f32.mrb[47].mxu0  ;;  %v1689_v16 = vmul.u32 10, %v1688_v8 }
 0x14d   : > { %v1046_v23 = vpop.f32.mrb[48].mxu1 }
 0x14e   : > { %v960_v26 = vpop.f32.mrb[48].mxu0  ;;  %v1085_v31 = vadd.f32 %v1046_v23, %v967_v25  ;;  %v2303_v32 = vpop.f32.mrb[49].mxu1 }
 0x14f   : > { %v2887_v27 = vadd.f32 %v960_v26, %v815_v9  ;;  %v2297_v29 = vpop.f32.mrb[49].mxu0  ;;  %v1049_v35 = vpop.f32.mrb[50].mxu1 }
 0x150   : > { %v963_v30 = vpop.f32.mrb[50].mxu0  ;;  %v1086_v11 = vadd.f32 %v1049_v35, %v968_v48  ;;  %v2304_v36 = vpop.f32.mrb[51].mxu1  ;;  %v1673_v48 = vadd.s32 8, %v2893_v45  ;;  %v1690_v35 = vsub.s32 %v2893_v45, %v1689_v16 }
 0x151   : > { %v2889_v33 = vadd.f32 %v963_v30, %v816_v24  ;;  %v2298_v21 = vpop.f32.mrb[51].mxu0  ;;  %v2931_v23 = vmul.u32.u64.low 3435973837, %v2916_v13  ;;  %v2932_v30 = vmul.u32.u64.high 3435973837, %v2916_v13, %v2931_v23 }
 0x152   : > { %vm1792_vm9 = vcmp.ne.s32.totalorder %v1690_v35, 0  ;;  %vm1802_vm10 = vcmp.lt.s32.totalorder %v1690_v35, 0 }
 0x153   : > { %vm2960_vm11 = vmand %vm1802_vm10, %vm1792_vm9 }
 0x155   : > { %v1054_v41 = vpop.f32.mrb[52].mxu1 }
 0x156   : > { %v1198_v38 = vpop.f32.mrb[52].mxu0  ;;  %v1087_v47 = vadd.f32 %v1054_v41, %v969_v42  ;;  %v2307_v28 = vpop.f32.mrb[53].mxu1  ;;  %v2904_v42 = vmul.u32.u64.low 3435973837, %v1673_v48  ;;  %v2905_v62 = vmul.u32.u64.high 3435973837, %v1673_v48, %v2904_v42 }
 0x157   : > { %v2891_v40 = vadd.f32 %v1198_v38, %v1085_v31  ;;  %v2325_v34 = vpop.f32.mrb[53].mxu0  ;;  %v1057_v51 = vpop.f32.mrb[54].mxu1  ;;  %v1543_v31 = vmul.f32 1.442695, %v1542_v39 }
 0x158   : > { %v1201_v43 = vpop.f32.mrb[54].mxu0  ;;  %v1088_v52 = vadd.f32 %v1057_v51, %v970_v59  ;;  %v2308_v53 = vpop.f32.mrb[55].mxu1  ;;  %v1699_v15 = vshrl.u32 %v2905_v62, 3 }
 0x159   : > { %v2895_v49 = vadd.f32 %v1201_v43, %v1086_v11  ;;  %v2326_v25 = vpop.f32.mrb[55].mxu0  ;;  %v2939_v11 = vadd.s32 40, %v2893_v45  ;;  %2447 = vpow2.f32 %v1543_v31 }
 0x15a   : > { %v1700_v32 = vmul.u32 10, %v1699_v15 }
 0x15c   : > { %v1701_v34 = vsub.s32 %v1673_v48, %v1700_v32 }
 0x15d   : > { %v1062_v50 = vpop.f32.mrb[56].mxu1 }
 0x15e   : > { %v1206_v44 = vpop.f32.mrb[56].mxu0  ;;  %v1089_v63 = vadd.f32 %v1062_v50, %v971_v55  ;;  %v2311_v0 = vpop.f32.mrb[57].mxu1  ;;  %v1822_v50 = vadd.s32 10, %v1690_v35  ;;  %vm1793_vm12 = vcmp.ne.s32.totalorder %v1701_v34, 0  ;;  %vm1803_vm13 = vcmp.lt.s32.totalorder %v1701_v34, 0 }
 0x15f   : > { %v2902_v57 = vadd.f32 %v1206_v44, %v1087_v47  ;;  %v2329_v58 = vpop.f32.mrb[57].mxu0  ;;  %v1065_v3 = vpop.f32.mrb[58].mxu1  ;;  %v2952_v44 = vmul.u32.u64.low 3435973837, %v2939_v11  ;;  %v2953_v54 = vmul.u32.u64.high 3435973837, %v2939_v11, %v2952_v44  ;;  %vm2972_vm14 = vmand %vm1803_vm13, %vm1793_vm12 }
 0x160   : > { %v1209_v60 = vpop.f32.mrb[58].mxu0  ;;  %v1090_v2 = vadd.f32 %v1065_v3, %v972_v7  ;;  %v2312_v5 = vpop.f32.mrb[59].mxu1  ;;  %v2920_v17 = vmul.u32.u64.low 3435973837, %v2910_v6  ;;  %v2921_v7 = vmul.u32.u64.high 3435973837, %v2910_v6, %v2920_v17  ;;  %v2958_v58 = vadd.s32 48, %v2893_v45 }
 0x161   : > { %v2907_v46 = vadd.f32 %v1209_v60, %v1088_v52  ;;  %v2330_v59 = vpop.f32.mrb[59].mxu0  ;;  %v1832_v8 = vsel %vm2960_vm11, %v1822_v50, %v1690_v35  ;;  %v1743_v16 = vshrl.u32 %v2953_v54, 3  ;;  %v3031_v44 = vadd.s32 72, %v2893_v45 }
 0x162   : > { %v1710_v41 = vshrl.u32 %v2921_v7, 3  ;;  %vm2989_vm15 = vcmp.lt.s32.totalorder %v1832_v8, 8 }
 0x164   : > { %v1711_v60 = vmul.u32 10, %v1710_v41  ;;  %v2123_v41 = vsel %vm2989_vm15, 1.0, %v2477_v1 }
 0x165   : > { %v1070_v55 = vpop.f32.mrb[60].mxu1 }
 0x166   : > { %v1214_v61 = vpop.f32.mrb[60].mxu0  ;;  %v1091_v18 = vadd.f32 %v1070_v55, %v2883_v4  ;;  %v2315_v9 = vpop.f32.mrb[61].mxu1  ;;  %v2935_v4 = vadd.s32 32, %v2893_v45  ;;  %v2977_v55 = vsub.s32 %v2910_v6, %v1711_v60 }
 0x167   : > { %v2913_v10 = vadd.f32 %v1214_v61, %v1089_v63  ;;  %v2333_v12 = vpop.f32.mrb[61].mxu0  ;;  %v1073_v24 = vpop.f32.mrb[62].mxu1  ;;  %v1823_v63 = vadd.s32 10, %v1701_v34 }
 0x168   : > { %v1217_v14 = vpop.f32.mrb[62].mxu0  ;;  %v1092_v26 = vadd.f32 %v1073_v24, %v2885_v20  ;;  %v2316_v29 = vpop.f32.mrb[63].mxu1  ;;  %v2948_v51 = vmul.u32.u64.low 3435973837, %v2935_v4  ;;  %v2949_v52 = vmul.u32.u64.high 3435973837, %v2935_v4, %v2948_v51  ;;  %v1548_v24 = vsub.s32 0, %v2893_v45 }
 0x169   : > { %v2924_v19 = vadd.f32 %v1217_v14, %v1090_v2  ;;  %v2334_v22 = vpop.f32.mrb[63].mxu0  ;;  %v2967_v3 = vmul.u32.u64.low 3435973837, %v2958_v58  ;;  %v2968_v2 = vmul.u32.u64.high 3435973837, %v2958_v58, %v2967_v3  ;;  %v2980_v14 = vadd.s32 56, %v2893_v45 }
 0x16a   : > { %v1732_v9 = vshrl.u32 %v2949_v52, 3  ;;  %v2448_v22 = vpop.eup %2447  ;;  %vm1794_vm0 = vcmp.ne.s32.totalorder %v2977_v55, 0  ;;  %vm1804_vm1 = vcmp.lt.s32.totalorder %v2977_v55, 0 }
 0x16b   : > { %v3009_v35 = vrot.slane %v2448_v22, %v1548_v24  ;;  %vm3022_vm4 = vmand %vm1804_vm1, %vm1794_vm0 }
 0x16d   : > { %v1078_v20 = vpop.f32.mrb[64].mxu1 }
 0x16e   : > { %v1222_v21 = vpop.f32.mrb[64].mxu0  ;;  %v1093_v43 = vadd.f32 %v1078_v20, %v2887_v27  ;;  %v2319_v47 = vpop.f32.mrb[65].mxu1  ;;  %v1721_v27 = vshrl.u32 %v2932_v30, 3  ;;  %v3001_v30 = vmul.u32.u64.low 3435973837, %v2980_v14  ;;  %v3002_v31 = vmul.u32.u64.high 3435973837, %v2980_v14, %v3001_v30 }
 0x16f   : > { %v2941_v36 = vadd.f32 %v1222_v21, %v1091_v18  ;;  %v2337_v37 = vpop.f32.mrb[65].mxu0  ;;  %v1081_v53 = vpop.f32.mrb[66].mxu1  ;;  %v3007_v21 = vld [vmem:[%s3345_s2] ss:$0 sm:$0xff]  ;;  %v3013_v20 = vadd.s32 64, %v2893_v45 }
 0x170   : > { %v1225_v38 = vpop.f32.mrb[66].mxu0  ;;  %v1094_v48 = vadd.f32 %v1081_v53, %v2889_v33  ;;  %v2320_v56 = vpop.f32.mrb[67].mxu1  ;;  %v1722_v33 = vmul.u32 10, %v1721_v27  ;;  %v1744_v37 = vmul.u32 10, %v1743_v16 }
 0x171   : > { %v2945_v28 = vadd.f32 %v1225_v38, %v1092_v26  ;;  %v2338_v25 = vpop.f32.mrb[67].mxu0 }
 0x172   : > { %v2996_v23 = vsub.s32 %v2916_v13, %v1722_v33  ;;  %v1824_v13 = vadd.s32 10, %v2977_v55  ;;  %v1754_v25 = vshrl.u32 %v2968_v2, 3 }
 0x174   : > { %vm1795_vm5 = vcmp.ne.s32.totalorder %v2996_v23, 0  ;;  %vm1805_vm6 = vcmp.lt.s32.totalorder %v2996_v23, 0  ;;  %v1825_v53 = vadd.s32 10, %v2996_v23 }
 0x175   : > { %v1358_v5 = vpop.f32.mrb[68].mxu1  ;;  %vm3057_vm7 = vmand %vm1805_vm6, %vm1795_vm5 }
 0x176   : > { %v1230_v62 = vpop.f32.mrb[68].mxu0  ;;  %v1397_v15 = vadd.f32 %v1358_v5, %v2891_v40  ;;  %v2347_v17 = vpop.f32.mrb[69].mxu1  ;;  %v1833_v40 = vsel %vm2972_vm14, %v1823_v63, %v1701_v34  ;;  %v3042_v63 = vsub.s32 %v2939_v11, %v1744_v37  ;;  %v1755_v11 = vmul.u32 10, %v1754_v25 }
 0x177   : > { %v2964_v0 = vadd.f32 %v1230_v62, %v1093_v43  ;;  %v2341_v59 = vpop.f32.mrb[69].mxu0  ;;  %v1361_v39 = vpop.f32.mrb[70].mxu1  ;;  %vm3018_vm2 = vcmp.lt.s32.totalorder %v1833_v40, 8  ;;  %v1834_v62 = vsel %vm3022_vm4, %v1824_v13, %v2977_v55  ;;  %v1765_v5 = vshrl.u32 %v3002_v31, 3 }
 0x178   : > { %v1233_v61 = vpop.f32.mrb[70].mxu0  ;;  %v1398_v6 = vadd.f32 %v1361_v39, %v2895_v49  ;;  %v2348_v26 = vpop.f32.mrb[71].mxu1  ;;  %v1733_v49 = vmul.u32 10, %v1732_v9  ;;  %v3045_v45 = vmul.u32.u64.low 3435973837, %v3013_v20  ;;  %v3046_v59 = vmul.u32.u64.high 3435973837, %v3013_v20, %v3045_v45 }
 0x179   : > { %v2983_v7 = vadd.f32 %v1233_v61, %v1094_v48  ;;  %v2342_v18 = vpop.f32.mrb[71].mxu0  ;;  %v3063_v61 = vmul.u32.u64.low 3435973837, %v3031_v44  ;;  %v3064_v8 = vmul.u32.u64.high 3435973837, %v3031_v44, %v3063_v61  ;;  %vm3075_vm10 = vcmp.lt.s32.totalorder %v1834_v62, 8 }
 0x17a   : > { %v3036_v60 = vsub.s32 %v2935_v4, %v1733_v49  ;;  %v1835_v18 = vsel %vm3057_vm7, %v1825_v53, %v2996_v23  ;;  %vm1797_vm11 = vcmp.ne.s32.totalorder %v3042_v63, 0  ;;  %vm1807_vm12 = vcmp.lt.s32.totalorder %v3042_v63, 0 }
 0x17b   : > { %v3087_v24 = vsub.s32 %v2958_v58, %v1755_v11  ;;  %v1766_v29 = vmul.u32 10, %v1765_v5  ;;  %v1827_v49 = vadd.s32 10, %v3042_v63  ;;  %v2125_v37 = vsel %vm3075_vm10, 1.0, %v2477_v1  ;;  %vm3112_vm15 = vmand %vm1807_vm12, %vm1797_vm11 }
 0x17c   : > { %vm1796_vm8 = vcmp.ne.s32.totalorder %v3036_v60, 0  ;;  %vm1806_vm9 = vcmp.lt.s32.totalorder %v3036_v60, 0  ;;  %v1826_v9 = vadd.s32 10, %v3036_v60  ;;  %vm3104_vm14 = vcmp.lt.s32.totalorder %v1835_v18, 8 }
 0x17d   : > { %v1366_v51 = vpop.f32.mrb[72].mxu1  ;;  %vm3093_vm13 = vmand %vm1806_vm9, %vm1796_vm8  ;;  %vm1798_vm0 = vcmp.ne.s32.totalorder %v3087_v24, 0  ;;  %vm1808_vm1 = vcmp.lt.s32.totalorder %v3087_v24, 0  ;;  %v1787_v53 = vshrl.u32 %v3064_v8, 3 }
 0x17e   : > { %v1476_v32 = vpop.f32.mrb[72].mxu0  ;;  %v1399_v54 = vadd.f32 %v1366_v51, %v2902_v57  ;;  %v2351_v56 = vpop.f32.mrb[73].mxu1  ;;  %v1836_v25 = vsel %vm3093_vm13, %v1826_v9, %v3036_v60  ;;  %vm3146_vm4 = vmand %vm1808_vm1, %vm1798_vm0 }
 0x17f   : > { %v1515_v38 = vadd.f32 %v1476_v32, %v1397_v15  ;;  %v2369_v34 = vpop.f32.mrb[73].mxu0  ;;  %v1369_v42 = vpop.f32.mrb[74].mxu1  ;;  %v2124_v15 = vsel %vm3018_vm2, 1.0, %v2477_v1  ;;  %vm1846_vm2 = vcmp.lt.s32.totalorder %v1836_v25, 8 }
 0x180   : > { %v1479_v52 = vpop.f32.mrb[74].mxu0  ;;  %v1400_v33 = vadd.f32 %v1369_v42, %v2907_v46  ;;  %v2352_v3 = vpop.f32.mrb[75].mxu1  ;;  %v1776_v34 = vshrl.u32 %v3046_v59, 3 }
 0x181   : > { %v1532_v48 = vadd.f32 %v3007_v21, %v1515_v38  ;;  %v1516_v27 = vadd.f32 %v1479_v52, %v1398_v6  ;;  %v2370_v50 = vpop.f32.mrb[75].mxu0  ;;  %v3129_v52 = vsub.s32 %v2980_v14, %v1766_v29 }
 0x182   : > { %v1828_v50 = vadd.s32 10, %v3087_v24  ;;  %v1777_v14 = vmul.u32 10, %v1776_v34 }
 0x183   : > { %v3049_v57 = vmul.f32 %v3009_v35, %v1532_v48  ;;  %v1533_v4 = vadd.f32 %v3007_v21, %v1516_v27  ;;  %v2126_v27 = vsel %vm3104_vm14, 1.0, %v2477_v1  ;;  %vm1799_vm6 = vcmp.ne.s32.totalorder %v3129_v52, 0 }
 0x184   : > { %vm1809_vm7 = vcmp.lt.s32.totalorder %v3129_v52, 0 }
 0x185   : > { %v3067_v46 = vmul.f32 %v3009_v35, %v1533_v4  ;;  %v1872_v12 = vmul.f32 %v2123_v41, %v3049_v57  ;;  %v1374_v16 = vpop.f32.mrb[76].mxu1  ;;  %vm3178_vm8 = vmand %vm1809_vm7, %vm1799_vm6  ;;  %v1581_v34 = vsub.f32 0.0, %v3049_v57 }
 0x186   : > { %v1484_v55 = vpop.f32.mrb[76].mxu0  ;;  %v1401_v40 = vadd.f32 %v1374_v16, %v2913_v10  ;;  %v2355_v30 = vpop.f32.mrb[77].mxu1 }
 0x187   : > { %v1517_v22 = vadd.f32 %v1484_v55, %v1399_v54  ;;  %1892 = vrot.lane.b32.xlu0 %v1872_v12, %s2479_s27  ;;  %v2373_v39 = vpop.f32.mrb[77].mxu0  ;;  %v1873_v58 = vmul.f32 %v2124_v15, %v3067_v46  ;;  %v1377_v32 = vpop.f32.mrb[78].mxu1  ;;  %v1837_v54 = vsel %vm3112_vm15, %v1827_v49, %v3042_v63  ;;  %v2127_v12 = vsel %vm1846_vm2, 1.0, %v2477_v1 }
 0x188   : > { %v1487_v6 = vpop.f32.mrb[78].mxu0  ;;  %v1402_v43 = vadd.f32 %v1377_v32, %v2924_v19  ;;  %v2356_v47 = vpop.f32.mrb[79].mxu1  ;;  %vm3150_vm5 = vcmp.lt.s32.totalorder %v1837_v54, 8  ;;  %v1838_v55 = vsel %vm3146_vm4, %v1828_v50, %v3087_v24  ;;  %v1778_v15 = vsub.s32 %v3013_v20, %v1777_v14 }
 0x189   : > { %v1534_v23 = vadd.f32 %v3007_v21, %v1517_v22  ;;  %v2374_v31 = vpop.f32.mrb[79].mxu0  ;;  %v1518_v13 = vadd.f32 %v1487_v6, %v1400_v33  ;;  %v1788_v33 = vmul.u32 10, %v1787_v53  ;;  %v1829_v22 = vadd.s32 10, %v3129_v52 }
 0x18a   : > { %v2128_v39 = vsel %vm3150_vm5, 1.0, %v2477_v1  ;;  %vm3187_vm9 = vcmp.lt.s32.totalorder %v1838_v55, 8  ;;  %vm1800_vm10 = vcmp.ne.s32.totalorder %v1778_v15, 0  ;;  %vm1810_vm11 = vcmp.lt.s32.totalorder %v1778_v15, 0 }
 0x18b   : > { %v3118_v41 = vmul.f32 %v3009_v35, %v1534_v23  ;;  %1894 = vrot.lane.b32.xlu0 %v1873_v58, %s2479_s27  ;;  %v1535_v51 = vadd.f32 %v3007_v21, %v1518_v13  ;;  %v1830_v58 = vadd.s32 10, %v1778_v15  ;;  %v2129_v38 = vsel %vm3187_vm9, 1.0, %v2477_v1  ;;  %vm3204_vm14 = vmand %vm1810_vm11, %vm1800_vm10 }
 0x18c   : > { %v1591_v50 = vmul.f32 1.442695, %v1581_v34  ;;  %vm1952_vm4 = vcmask 0  }
 0x18d   : > { %v1874_v19 = vmul.f32 %v2125_v37, %v3118_v41  ;;  %v3137_v48 = vmul.f32 %v3009_v35, %v1535_v51  ;;  %v1382_v63 = vpop.f32.mrb[80].mxu1  ;;  %v1840_v54 = vsel %vm3204_vm14, %v1830_v58, %v1778_v15 }
 0x18e   : > { %v1492_v56 = vpop.f32.mrb[80].mxu0  ;;  %v1403_v4 = vadd.f32 %v1382_v63, %v2941_v36  ;;  %v2359_v2 = vpop.f32.mrb[81].mxu1  ;;  %vm1850_vm1 = vcmp.lt.s32.totalorder %v1840_v54, 8  ;;  %2449 = vpow2.f32 %v1591_v50 }
 0x18f   : > { %v1519_v60 = vadd.f32 %v1492_v56, %v1401_v40  ;;  %1896 = vrot.lane.b32.xlu1 %v1874_v19, %s2479_s27  ;;  %v2377_v42 = vpop.f32.mrb[81].mxu0  ;;  %v1875_v61 = vmul.f32 %v2126_v27, %v3137_v48  ;;  %v1385_v8 = vpop.f32.mrb[82].mxu1 }
 0x190   : > { %v1495_v45 = vpop.f32.mrb[82].mxu0  ;;  %v1404_v36 = vadd.f32 %v1385_v8, %v2945_v28  ;;  %v2360_v9 = vpop.f32.mrb[83].mxu1  ;;  %v1789_v28 = vsub.s32 %v3031_v44, %v1788_v33  ;;  %v1839_v44 = vsel %vm3178_vm8, %v1829_v22, %v3129_v52  ;;  %v1584_v22 = vsub.f32 0.0, %v3137_v48 }
 0x191   : > { %v1536_v3 = vadd.f32 %v3007_v21, %v1519_v60  ;;  %v1520_v11 = vadd.f32 %v1495_v45, %v1402_v43  ;;  %v2378_v5 = vpop.f32.mrb[83].mxu0  ;;  %vm1849_vm15 = vcmp.lt.s32.totalorder %v1839_v44, 8 }
 0x192   : > { %vm1801_vm12 = vcmp.ne.s32.totalorder %v1789_v28, 0  ;;  %vm1811_vm13 = vcmp.lt.s32.totalorder %v1789_v28, 0  ;;  %v1831_v47 = vadd.s32 10, %v1789_v28  ;;  %v2130_v27 = vsel %vm1849_vm15, 1.0, %v2477_v1 }
 0x193   : > { %v3165_v17 = vmul.f32 %v3009_v35, %v1536_v3  ;;  %v1537_v18 = vadd.f32 %v3007_v21, %v1520_v11  ;;  %1898 = vrot.lane.b32.xlu1 %v1875_v61, %s2479_s27  ;;  %vm3215_vm0 = vmand %vm1811_vm13, %vm1801_vm12  ;;  %v1583_v11 = vsub.f32 0.0, %v3118_v41  ;;  %v2131_v5 = vsel %vm1850_vm1, 1.0, %v2477_v1  ;;  %v3245_v61 = vld [vmem:[%s3239_s7 + $0x40] sm:$0xff] }
 0x194   : > { %v1841_v42 = vsel %vm3215_vm0, %v1831_v47, %v1789_v28 }
 0x195   : > { %v3184_v24 = vmul.f32 %v3009_v35, %v1537_v18  ;;  %v1876_v16 = vmul.f32 %v2127_v12, %v3165_v17  ;;  %v1390_v30 = vpop.f32.mrb[84].mxu1  ;;  %vm1851_vm2 = vcmp.lt.s32.totalorder %v1841_v42, 8  ;;  %v1595_v9 = vmul.f32 1.442695, %v1583_v11 }
 0x196   : > { %v1500_v6 = vpop.f32.mrb[84].mxu0  ;;  %v1405_v49 = vadd.f32 %v1390_v30, %v2964_v0  ;;  %v2363_v13 = vpop.f32.mrb[85].mxu1  ;;  %v2132_v55 = vsel %vm1851_vm2, 1.0, %v2477_v1  ;;  %v1597_v1 = vmul.f32 1.442695, %v1584_v22 }
 0x197   : > { %v1521_v29 = vadd.f32 %v1500_v6, %v1403_v4  ;;  %1900 = vrot.lane.b32.xlu0 %v1876_v16, %s2479_s27  ;;  %v2381_v40 = vpop.f32.mrb[85].mxu0  ;;  %v1877_v23 = vmul.f32 %v2128_v39, %v3184_v24  ;;  %v1393_v0 = vpop.f32.mrb[86].mxu1  ;;  %v1586_v28 = vsub.f32 0.0, %v3184_v24 }
 0x198   : > { %v1503_v31 = vpop.f32.mrb[86].mxu0  ;;  %v1406_v51 = vadd.f32 %v1393_v0, %v2983_v7  ;;  %v2364_v52 = vpop.f32.mrb[87].mxu1  ;;  %v1582_v7 = vsub.f32 0.0, %v3067_v46 }
 0x199   : > { %v1538_v32 = vadd.f32 %v3007_v21, %v1521_v29  ;;  %1902 = vrot.lane.b32.xlu1 %v1877_v23, %s2479_s27  ;;  %v2382_v37 = vpop.f32.mrb[87].mxu0  ;;  %v1522_v43 = vadd.f32 %v1503_v31, %v1404_v36  ;;  %v1601_v6 = vmul.f32 1.442695, %v1586_v28  ;;  %v1563_v28 = vld [vmem:[%s3239_s7 + $0x10] sm:$0xff] }
 0x19a   : > { %v1593_v2 = vmul.f32 1.442695, %v1582_v7 }
 0x19b   : > { %v3210_v25 = vmul.f32 %v3009_v35, %v1538_v32  ;;  %v1539_v19 = vadd.f32 %v3007_v21, %v1522_v43 }
 0x19c   : > { %2451 = vpow2.f32 %v1593_v2 }
 0x19d   : > { %v1878_v56 = vmul.f32 %v2129_v38, %v3210_v25  ;;  %v3227_v14 = vmul.f32 %v3009_v35, %v1539_v19  ;;  %2453 = vpow2.f32 %v1595_v9  ;;  %v1587_v26 = vsub.f32 0.0, %v3210_v25 }
 0x19e   : > { %v1508_v60 = vpop.f32.mrb[88].mxu0  ;;  %2455 = vpow2.f32 %v1597_v1  ;;  %v1562_v1 = vld [vmem:[%s3239_s7 + $0x8] sm:$0xff] }
 0x19f   : > { %v1523_v62 = vadd.f32 %v1508_v60, %v1405_v49  ;;  %1904 = vrot.lane.b32.xlu0 %v1878_v56, %s2479_s27  ;;  %v2385_v63 = vpop.f32.mrb[89].mxu0  ;;  %v1879_v59 = vmul.f32 %v2130_v27, %v3227_v14  ;;  %v1603_v40 = vmul.f32 1.442695, %v1587_v26  ;;  %v1588_v23 = vsub.f32 0.0, %v3227_v14 }
 0x1a0   : > { %v1511_v45 = vpop.f32.mrb[90].mxu0  ;;  %v1573_v26 = vsub.f32 %v1563_v28, %v3118_v41 }
 0x1a1   : > { %v1540_v33 = vadd.f32 %v3007_v21, %v1523_v62  ;;  %v1524_v4 = vadd.f32 %v1511_v45, %v1406_v51  ;;  %v2386_v3 = vpop.f32.mrb[91].mxu0  ;;  %1906 = vrot.lane.b32.xlu1 %v1879_v59, %s2479_s27  ;;  %v1605_v30 = vmul.f32 1.442695, %v1588_v23 }
 0x1a3   : > { %v3248_v8 = vmul.f32 %v3009_v35, %v1540_v33  ;;  %v1541_v12 = vadd.f32 %v3007_v21, %v1524_v4  ;;  %v1585_v21 = vsub.f32 0.0, %v3165_v17 }
 0x1a5   : > { %v3253_v15 = vmul.f32 %v3009_v35, %v1541_v12  ;;  %v1880_v36 = vmul.f32 %v2131_v5, %v3248_v8  ;;  %v1579_v18 = vsub.f32 %v3245_v61, %v3248_v8  ;;  %v2450_v35 = vpop.eup %2449  ;;  %v1599_v20 = vmul.f32 1.442695, %v1585_v21 }
 0x1a6   : > { %v2452_v16 = vpop.eup %2451 }
 0x1a7   : > { %1908 = vrot.lane.b32.xlu0 %v1880_v36, %s2479_s27  ;;  %v1881_v39 = vmul.f32 %v2132_v55, %v3253_v15  ;;  %2457 = vpow2.f32 %v1599_v20  ;;  %v2454_v29 = vpop.eup %2453  ;;  %v1590_v31 = vsub.f32 0.0, %v3253_v15  ;;  %v1561_v55 = vld [vmem:[%s3239_s7] sm:$0xff] }
 0x1a8   : > { %2459 = vpow2.f32 %v1601_v6  ;;  %v2456_v44 = vpop.eup %2455  ;;  %v1571_v22 = vsub.f32 %v1561_v55, %v3049_v57  ;;  %v1572_v57 = vsub.f32 %v1562_v1, %v3067_v46 }
 0x1a9   : > { %1910 = vrot.lane.b32.xlu1 %v1881_v39, %s2479_s27  ;;  %2461 = vpow2.f32 %v1603_v40  ;;  %v1609_v49 = vmul.f32 1.442695, %v1590_v31  ;;  %v1564_v40 = vld [vmem:[%s3239_s7 + $0x18] sm:$0xff] }
 0x1aa   : > { %2463 = vpow2.f32 %v1605_v30  ;;  %v1574_v46 = vsub.f32 %v1564_v40, %v3137_v48  ;;  %v1565_v30 = vld [vmem:[%s3239_s7 + $0x20] sm:$0xff] }
 0x1ab   : > { %2465 = vpow2.f32 %v1609_v49  ;;  %v1566_v49 = vld [vmem:[%s3239_s7 + $0x28] sm:$0xff] }
 0x1ad   : > { %1621 = vrot.lane.b32.xlu1 %v2450_v35, %s2479_s27  ;;  %v1589_v35 = vsub.f32 0.0, %v3248_v8 }
 0x1af   : > { %v1607_v6 = vmul.f32 1.442695, %v1589_v35 }
 0x1b1   : > { %1623 = vrot.lane.b32.xlu1 %v2452_v16, %s2479_s27  ;;  %v2458_v58 = vpop.eup %2457  ;;  %2467 = vpow2.f32 %v1607_v6 }
 0x1b2   : > { %v2460_v32 = vpop.eup %2459 }
 0x1b3   : > { %v2462_v13 = vpop.eup %2461 }
 0x1b4   : > { %v2464_v37 = vpop.eup %2463 }
 0x1b5   : > { %1625 = vrot.lane.b32.xlu1 %v2454_v29, %s2479_s27  ;;  %v2466_v38 = vpop.eup %2465 }
 0x1b9   : > { %1627 = vrot.lane.b32.xlu1 %v2456_v44, %s2479_s27 }
 0x1bd   : > { %1629 = vrot.lane.b32.xlu1 %v2458_v58, %s2479_s27  ;;  %v1575_v58 = vsub.f32 %v1565_v30, %v3165_v17 }
 0x1c1   : > { %1631 = vrot.lane.b32.xlu1 %v2460_v32, %s2479_s27 }
 0x1c5   : > { %1633 = vrot.lane.b32.xlu1 %v2462_v13, %s2479_s27  ;;  %v1576_v13 = vsub.f32 %v1566_v49, %v3184_v24 }
 0x1c9   : > { %1635 = vrot.lane.b32.xlu1 %v2464_v37, %s2479_s27  ;;  %v1567_v37 = vld [vmem:[%s3239_s7 + $0x30] sm:$0xff] }
 0x1ca   : > { %v1577_v17 = vsub.f32 %v1567_v37, %v3210_v25 }
 0x1cd   : > { %1639 = vrot.lane.b32.xlu1 %v2466_v38, %s2479_s27  ;;  %v2468_v38 = vpop.eup %2467 }
 0x1f9   : > { %v1893_v10 = vpop.permute.xlu0 %1892 }
 0x1fa   : > { %v1922_v51 = vsel %vm368_vm3, %v1893_v10, 0.0 }
 0x1fd   : > { %v1895_v0 = vpop.permute.xlu0 %1894 }
 0x1fe   : > { %v1923_v43 = vsel %vm368_vm3, %v1895_v0, 0.0  ;;  %v1568_v0 = vld [vmem:[%s3239_s7 + $0x38] sm:$0xff] }
 0x1ff   : > { %v1924_v53 = vadd.f32 %v1923_v43, %v1922_v51  ;;  %v1578_v24 = vsub.f32 %v1568_v0, %v3227_v14  ;;  %v1570_v51 = vld [vmem:[%s3239_s7 + $0x48] sm:$0xff] }
 0x201   : > { %v1897_v34 = vpop.permute.xlu1 %1896 }
 0x202   : > { %v1925_v52 = vsel %vm368_vm3, %v1897_v34, 0.0 }
 0x203   : > { %v1926_v56 = vadd.f32 %v1925_v52, %v1924_v53  ;;  %v1580_v53 = vsub.f32 %v1570_v51, %v3253_v15 }
 0x205   : > { %v1899_v47 = vpop.permute.xlu1 %1898 }
 0x206   : > { %v1927_v54 = vsel %vm368_vm3, %v1899_v47, 0.0 }
 0x207   : > { %v1928_v50 = vadd.f32 %v1927_v54, %v1926_v56 }
 0x209   : > { %v1901_v19 = vpop.permute.xlu0 %1900 }
 0x20a   : > { %v1929_v27 = vsel %vm368_vm3, %v1901_v19, 0.0 }
 0x20b   : > { %v1903_v7 = vpop.permute.xlu1 %1902  ;;  %v1930_v60 = vadd.f32 %v1929_v27, %v1928_v50 }
 0x20c   : > { %v1931_v42 = vsel %vm368_vm3, %v1903_v7, 0.0 }
 0x20d   : > { %v1932_v45 = vadd.f32 %v1931_v42, %v1930_v60 }
 0x211   : > { %v1905_v62 = vpop.permute.xlu0 %1904 }
 0x212   : > { %v1933_v63 = vsel %vm368_vm3, %v1905_v62, 0.0 }
 0x213   : > { %v1907_v59 = vpop.permute.xlu1 %1906  ;;  %v1934_v33 = vadd.f32 %v1933_v63, %v1932_v45 }
 0x214   : > { %v1935_v4 = vsel %vm368_vm3, %v1907_v59, 0.0 }
 0x215   : > { %v1936_v3 = vadd.f32 %v1935_v4, %v1934_v33 }
 0x219   : > { %v1909_v2 = vpop.permute.xlu0 %1908 }
 0x21a   : > { %v1937_v11 = vsel %vm368_vm3, %v1909_v2, 0.0 }
 0x21b   : > { %v1938_v5 = vadd.f32 %v1937_v11, %v1936_v3  ;;  %v1911_v12 = vpop.permute.xlu1 %1910 }
 0x21c   : > { %v1939_v36 = vsel %vm368_vm3, %v1911_v12, 0.0 }
 0x21d   : > { %v1940_v9 = vadd.f32 %v1939_v36, %v1938_v5 }
 0x21f   : > { %1941 = vadd.xlane.f32.xlu0 %v1940_v9  ;;  %v1622_v39 = vpop.permute.xlu1 %1621 }
 0x220   : > { %v1651_v21 = vmul.f32 %v1622_v39, %v1571_v22 }
 0x222   : > { %1661 = vst.msk [vmem:[%s3293_s10] sm:$0xff] %vm368_vm3, %v1651_v21 }
 0x223   : > { %v1624_v20 = vpop.permute.xlu1 %1623 }
 0x224   : > { %v1652_v16 = vmul.f32 %v1624_v20, %v1572_v57 }
 0x226   : > { %1662 = vst.msk [vmem:[%s3293_s10 + $0x8] sm:$0xff] %vm368_vm3, %v1652_v16 }
 0x227   : > { %v1626_v29 = vpop.permute.xlu1 %1625 }
 0x228   : > { %v1653_v23 = vmul.f32 %v1626_v29, %v1573_v26 }
 0x22a   : > { %1663 = vst.msk [vmem:[%s3293_s10 + $0x10] sm:$0xff] %vm368_vm3, %v1653_v23 }
 0x22b   : > { %v1628_v44 = vpop.permute.xlu1 %1627 }
 0x22c   : > { %v1654_v31 = vmul.f32 %v1628_v44, %v1574_v46 }
 0x22e   : > { %1664 = vst.msk [vmem:[%s3293_s10 + $0x18] sm:$0xff] %vm368_vm3, %v1654_v31 }
 0x22f   : > { %v1630_v41 = vpop.permute.xlu1 %1629 }
 0x230   : > { %v1655_v32 = vmul.f32 %v1630_v41, %v1575_v58 }
 0x232   : > { %1665 = vst.msk [vmem:[%s3293_s10 + $0x20] sm:$0xff] %vm368_vm3, %v1655_v32 }
 0x233   : > { %v1632_v48 = vpop.permute.xlu1 %1631 }
 0x234   : > { %v1656_v10 = vmul.f32 %v1632_v48, %v1576_v13 }
 0x235   : > { %1637 = vrot.lane.b32.xlu0 %v2468_v38, %s2479_s27 }
 0x236   : > { %1666 = vst.msk [vmem:[%s3293_s10 + $0x28] sm:$0xff] %vm368_vm3, %v1656_v10 }
 0x237   : > { %v1634_v34 = vpop.permute.xlu1 %1633 }
 0x238   : > { %v1657_v43 = vmul.f32 %v1634_v34, %v1577_v17 }
 0x23a   : > { %1667 = vst.msk [vmem:[%s3293_s10 + $0x30] sm:$0xff] %vm368_vm3, %v1657_v43 }
 0x23b   : > { %v1636_v47 = vpop.permute.xlu1 %1635 }
 0x23c   : > { %v1658_v52 = vmul.f32 %v1636_v47, %v1578_v24 }
 0x23e   : > { %1668 = vst.msk [vmem:[%s3293_s10 + $0x38] sm:$0xff] %vm368_vm3, %v1658_v52 }
 0x23f   : > { %v1640_v19 = vpop.permute.xlu1 %1639 }
 0x240   : > { %v1660_v54 = vmul.f32 %v1640_v19, %v1580_v53 }
 0x242   : > { %1670 = vst.msk [vmem:[%s3293_s10 + $0x48] sm:$0xff] %vm368_vm3, %v1660_v54 }
 0x2ac   : > { %v1942_v25 = vpop.xlane.xlu0 %1941 }
 0x2ad   : > { %v1943_v56 = vrot.slane %v1942_v25, 4 }
 0x2af   : > { %v1944_v27 = vadd.f32 %v1943_v56, %v1942_v25 }
 0x2b0   : > { %v1638_v50 = vpop.permute.xlu0 %1637 }
 0x2b1   : > { %v1945_v7 = vrot.slane %v1944_v27, 2  ;;  %v1659_v14 = vmul.f32 %v1638_v50, %v1579_v18 }
 0x2b3   : > { %1669 = vst.msk [vmem:[%s3293_s10 + $0x40] sm:$0xff] %vm368_vm3, %v1659_v14  ;;  %v1946_v60 = vadd.f32 %v1945_v7, %v1944_v27 }
 0x2b5   : > { %v1947_v42 = vrot.slane %v1946_v60, 1 }
 0x2b7   : > { %v1948_v62 = vadd.f32 %v1947_v42, %v1946_v60 }
 0x2b9   : > { %2411 = vpush %v1948_v62 }
 0x2ea   : > { %s2412_s11 = spop %2411 }
 0x2eb   : > { %s1950_s15 = ssub.f32 0.0, %s2412_s11 }
 0x2ed   : > { %v1951_v15 = vstv %s1950_s15 }
 0x2ee   : > { %1953 = vst.msk [vmem:[%s280_s14] sm:$0x1] %vm1952_vm4, %v1951_v15 }
 0x2ef PF: > { %s17_s21 = sadd.s32 1, %s2475_s21  }
 0x2f0   : > { %p14_p4 = scmp.ge.s32.totalorder %s17_s21, 4  }
 0x2f2   :  { %16 = sbr.rel (!%p14_p4) target bundleno = 1 (0x1), region = 85 }

</bundles_post_ra>
